<compile_context>
chip_gen: v5e
topology: v5e:2x2
jax: 0.10.0
libtpu: 0.0.40
codegen_flags: <defaults>
</compile_context>

<pallas_src>
import functools

import jax
import jax.numpy as jnp
from jax.experimental import pallas as pl
from jax.experimental.pallas import tpu as pltpu


# ------------------------------ Linear (l1) -------------------------------- #
def _linear_kernel(z_ref, w_ref, b_ref, o_ref):
    o_ref[...] = (jnp.dot(z_ref[...].astype(jnp.bfloat16), w_ref[...],
                          preferred_element_type=jnp.float32)
                  + b_ref[...]).astype(o_ref.dtype)


def linear(z, w_bf16, b_f32):
    B, L = z.shape
    D = w_bf16.shape[1]
    td = min(D, 8192)                    # few large steps (whole D when small)
    while D % td:
        td //= 2
    return pl.pallas_call(
        _linear_kernel,
        out_shape=jax.ShapeDtypeStruct((B, D), jnp.float32),
        grid=(D // td,),
        in_specs=[pl.BlockSpec((B, L), lambda i: (0, 0)),
                  pl.BlockSpec((L, td), lambda i: (0, i)),
                  pl.BlockSpec((1, td), lambda i: (0, i))],
        out_specs=pl.BlockSpec((B, td), lambda i: (0, i)),
        compiler_params=pltpu.CompilerParams(
            dimension_semantics=("parallel",)),
    )(z, w_bf16, b_f32)


# ------ fused: BN-apply [+LeakyReLU] -> (2x upsample folded into) 3x3 conv -- #
def _fused_block_kernel(x_ref, top_ref, bot_ref, scale_ref, shift_ref,
                        w_ref, b2_ref, *out_refs,
                        slope, apply_act, apply_tanh, emit_stats):
    o_ref = out_refs[0]
    th_in, w_in, cin = x_ref.shape[1], x_ref.shape[2], x_ref.shape[3]
    cout2 = w_ref.shape[2]               # 2 * cout (even/odd output columns)
    m_in = th_in * w_in

    t = pl.program_id(1)
    n_t = pl.num_programs(1)

    scale = scale_ref[...]               # (1, cin) folded BatchNorm scale
    shift = shift_ref[...]               # (1, cin) folded BatchNorm shift

    def bn_act(v):                       # per-channel affine [+ LeakyReLU], f32
        y = v.astype(jnp.float32) * scale + shift
        if apply_act:
            y = jnp.where(y >= 0.0, y, slope * y)
        return y

    x_n = bn_act(x_ref[0])                                    # (th_in, w_in, cin)
    # conv zero-padding lives in the post-BN/act domain, so the halo rows are
    # masked to zero at the image borders (index_map clamps the HBM read).
    top_n = jnp.where(t > 0, bn_act(top_ref[0, 0]), 0.0)       # (w_in, cin)
    bot_n = jnp.where(t < n_t - 1, bn_act(bot_ref[0, 0]), 0.0)

    # extended rows [x[r0-1], x[r0..r0+th_in-1], x[r0+th_in]], bf16 operands
    ext = jnp.concatenate([top_n[None], x_n, bot_n[None]],
                          axis=0).astype(jnp.bfloat16)         # (th_in+2, w_in, cin)

    # column taps (c-1 | c | c+1) of the UN-upsampled rows; built once, then
    # the 3 row-shifted LHS views are static sublane slices (no per-dy concat).
    zero_col = jnp.zeros((th_in + 2, 1, cin), jnp.bfloat16)
    taps = jnp.concatenate(
        [jnp.concatenate([zero_col, ext[:, :-1, :]], axis=1),   # value at c-1
         ext,                                                   # value at c
         jnp.concatenate([ext[:, 1:, :], zero_col], axis=1)],   # value at c+1
        axis=2).reshape((th_in + 2) * w_in, 3 * cin)

    t_rm1 = taps[0:m_in]                    # taps of x[r-1]  for r in tile
    t_r = taps[w_in:w_in + m_in]            # taps of x[r]
    t_rp1 = taps[2 * w_in:2 * w_in + m_in]  # taps of x[r+1]

    b2 = b2_ref[...]                        # (1, 2*cout)
    # sub-pixel decomposition: the 2x upsample is folded into 4 precombined
    # weight slabs; N = 2*cout packs the even/odd output columns, so the
    # matmul result is already the width-interleaved output row.
    oe = (jnp.dot(t_rm1, w_ref[0], preferred_element_type=jnp.float32)
          + jnp.dot(t_r, w_ref[1], preferred_element_type=jnp.float32) + b2)
    oo = (jnp.dot(t_r, w_ref[2], preferred_element_type=jnp.float32)
          + jnp.dot(t_rp1, w_ref[3], preferred_element_type=jnp.float32) + b2)
    if apply_tanh:
        oe = jnp.tanh(oe)
        oo = jnp.tanh(oo)

    # single contiguous store; (B, h_in, 2, w_in, 2*cout) == NHWC after a free
    # dim-merge reshape outside the kernel.
    oe_r = oe.reshape(th_in, 1, w_in, cout2).astype(o_ref.dtype)
    oo_r = oo.reshape(th_in, 1, w_in, cout2).astype(o_ref.dtype)
    o_ref[0] = jnp.concatenate([oe_r, oo_r], axis=1)

    if emit_stats:                          # partial sums for the following BN
        ssum_ref, ssq_ref = out_refs[1], out_refs[2]
        cout = cout2 // 2
        s2 = (jnp.sum(oe, axis=0, keepdims=True)
              + jnp.sum(oo, axis=0, keepdims=True))
        q2 = (jnp.sum(oe * oe, axis=0, keepdims=True)
              + jnp.sum(oo * oo, axis=0, keepdims=True))
        ssum_ref[0, 0] = s2[:, :cout] + s2[:, cout:]
        ssq_ref[0, 0] = q2[:, :cout] + q2[:, cout:]


def fused_block(x, scale, shift, w_pack, bias2, *, slope, apply_act,
                apply_tanh, emit_stats, out_dtype, max_tile_rows=16):
    B, h_in, w_in, cin = x.shape
    cout2 = w_pack.shape[-1]
    cout = cout2 // 2

    th_in = max(1, min(h_in, max_tile_rows))   # input rows per grid step
    while h_in % th_in:
        th_in //= 2
    n_t = h_in // th_in

    kernel = functools.partial(_fused_block_kernel, slope=slope,
                               apply_act=apply_act, apply_tanh=apply_tanh,
                               emit_stats=emit_stats)

    in_specs = [
        pl.BlockSpec((1, th_in, w_in, cin), lambda bi, ti: (bi, ti, 0, 0)),
        pl.BlockSpec((1, 1, w_in, cin),
                     lambda bi, ti: (bi, jnp.maximum(ti * th_in - 1, 0), 0, 0)),
        pl.BlockSpec((1, 1, w_in, cin),
                     lambda bi, ti: (bi, jnp.minimum((ti + 1) * th_in, h_in - 1),
                                     0, 0)),
        pl.BlockSpec((1, cin), lambda bi, ti: (0, 0)),
        pl.BlockSpec((1, cin), lambda bi, ti: (0, 0)),
        pl.BlockSpec((4, 3 * cin, cout2), lambda bi, ti: (0, 0, 0)),
        pl.BlockSpec((1, cout2), lambda bi, ti: (0, 0)),
    ]
    out_main_shape = jax.ShapeDtypeStruct((B, h_in, 2, w_in, cout2), out_dtype)
    out_main_spec = pl.BlockSpec((1, th_in, 2, w_in, cout2),
                                 lambda bi, ti: (bi, ti, 0, 0, 0))
    if emit_stats:
        out_shape = (out_main_shape,
                     jax.ShapeDtypeStruct((B, n_t, 1, cout), jnp.float32),
                     jax.ShapeDtypeStruct((B, n_t, 1, cout), jnp.float32))
        out_specs = (out_main_spec,
                     pl.BlockSpec((1, 1, 1, cout), lambda bi, ti: (bi, ti, 0, 0)),
                     pl.BlockSpec((1, 1, 1, cout), lambda bi, ti: (bi, ti, 0, 0)))
    else:
        out_shape = out_main_shape
        out_specs = out_main_spec

    res = pl.pallas_call(
        kernel,
        out_shape=out_shape,
        grid=(B, n_t),
        in_specs=in_specs,
        out_specs=out_specs,
        compiler_params=pltpu.CompilerParams(
            dimension_semantics=("parallel", "parallel"),
            vmem_limit_bytes=32 * 1024 * 1024),
    )(x, x, x, scale, shift, w_pack, bias2)

    if emit_stats:
        y5, ssum, ssq = res
    else:
        y5, ssum, ssq = res, None, None
    # free dim-merge reshape: (B, h_in, 2, w_in, 2*cout) -> (B, 2h, 2w, cout)
    y = y5.reshape(B, 2 * h_in, 2 * w_in, cout)
    return y, ssum, ssq


# ------------------------- BatchNorm folding (glue) ------------------------ #
def _bn_affine(mean, var, gamma, beta, eps):
    scale = gamma * jax.lax.rsqrt(var + eps)
    shift = beta - mean * scale
    return scale.reshape(1, -1).astype(jnp.float32), \
        shift.reshape(1, -1).astype(jnp.float32)


def _stats_to_affine(ssum, ssq, count, gamma, beta, eps):
    # TODO(synk): E[x^2]-E[x]^2 in f32 can cancel for very large B*H*W;
    # acceptable for GAN batch sizes, switch to a centered two-pass if needed.
    s = jnp.sum(ssum[:, :, 0, :], axis=(0, 1))
    q = jnp.sum(ssq[:, :, 0, :], axis=(0, 1))
    mean = s / count
    var = jnp.maximum(q / count - mean * mean, 0.0)   # biased (training) var
    return _bn_affine(mean, var, gamma, beta, eps)


# --------------------------- Generator forward ----------------------------- #
def generator_forward(z, params, *, init_size):
    B = z.shape[0]
    out = linear(z, params["l1_w"], params["l1_b"])              # (B, D) f32
    x0 = out.reshape(B, init_size, init_size, 128)               # NHWC already

    # BatchNorm2d(128), default eps, batch statistics, no activation
    mean0 = jnp.mean(x0, axis=(0, 1, 2))
    var0 = jnp.var(x0, axis=(0, 1, 2))
    sc0, sh0 = _bn_affine(mean0, var0, params["bn0_g"], params["bn0_b"], 1e-5)

    # block 1: BN0 -> Upsample -> Conv(128,128)   (stats feed BN1)
    y1, s1, q1 = fused_block(x0, sc0, sh0, params["c1_wp"], params["c1_b2"],
                             slope=0.0, apply_act=False, apply_tanh=False,
                             emit_stats=True, out_dtype=jnp.bfloat16)
    sc1, sh1 = _stats_to_affine(s1, q1, B * y1.shape[1] * y1.shape[2],
                                params["bn1_g"], params["bn1_b"], 0.8)

    # block 2: BN1 + LeakyReLU -> Upsample -> Conv(128,64)
    y2, s2, q2 = fused_block(y1, sc1, sh1, params["c2_wp"], params["c2_b2"],
                             slope=0.2, apply_act=True, apply_tanh=False,
                             emit_stats=True, out_dtype=jnp.bfloat16)
    sc2, sh2 = _stats_to_affine(s2, q2, B * y2.shape[1] * y2.shape[2],
                                params["bn2_g"], params["bn2_b"], 0.8)

    # block 3: BN2 + LeakyReLU -> Upsample -> Conv(64,64)
    y3, s3, q3 = fused_block(y2, sc2, sh2, params["c3_wp"], params["c3_b2"],
                             slope=0.2, apply_act=True, apply_tanh=False,
                             emit_stats=True, out_dtype=jnp.bfloat16)
    sc3, sh3 = _stats_to_affine(s3, q3, B * y3.shape[1] * y3.shape[2],
                                params["bn3_g"], params["bn3_b"], 0.8)

    # final: BN3 + LeakyReLU -> Upsample -> Conv(64, img_channels) -> Tanh
    img, _, _ = fused_block(y3, sc3, sh3, params["c4_wp"], params["c4_b2"],
                            slope=0.2, apply_act=True, apply_tanh=True,
                            emit_stats=False, out_dtype=jnp.float32)
    # TODO(synk): final store is lane-sparse (2*cout = 6 lanes); the NCHW
    # permute of the small 3-channel image is left to XLA.
    return img.transpose(0, 3, 1, 2)


# ------------------------ deterministic parameters ------------------------- #
def init_params(key, latent_dim, init_size, img_channels):
    keys = jax.random.split(key, 8)
    d = 128 * init_size * init_size
    p = {}
    p["l1_w"] = 0.05 * jax.random.normal(keys[0], (latent_dim, d), jnp.float32)
    p["l1_b"] = jnp.zeros((d,), jnp.float32)

    def conv_w(k, cin, cout):
        return 0.05 * jax.random.normal(k, (3, 3, cin, cout), jnp.float32)

    p["c1_w"] = conv_w(keys[1], 128, 128)
    p["c1_b"] = 0.01 * jax.random.normal(keys[5], (128,), jnp.float32)
    p["c2_w"] = conv_w(keys[2], 128, 64)
    p["c2_b"] = 0.01 * jax.random.normal(keys[6], (64,), jnp.float32)
    p["c3_w"] = conv_w(keys[3], 64, 64)
    p["c3_b"] = 0.01 * jax.random.normal(keys[7], (64,), jnp.float32)
    p["c4_w"] = conv_w(keys[4], 64, img_channels)
    p["c4_b"] = jnp.zeros((img_channels,), jnp.float32)

    for name, c in (("bn0", 128), ("bn1", 128), ("bn2", 64), ("bn3", 64)):
        p[name + "_g"] = jnp.ones((c,), jnp.float32)     # PyTorch BN default
        p[name + "_b"] = jnp.zeros((c,), jnp.float32)
    return p


def _pack_conv(w):
    """(3,3,cin,cout) HWIO -> (4, 3*cin, 2*cout) sub-pixel weight slabs."""
    cin, cout = w.shape[2], w.shape[3]
    zeros = jnp.zeros((cin, cout), w.dtype)

    def col_pack(wr):                    # wr[kx]: (3, cin, cout) row-combined
        even = jnp.concatenate([wr[0], wr[1] + wr[2], zeros], axis=0)
        odd = jnp.concatenate([zeros, wr[0] + wr[1], wr[2]], axis=0)
        return jnp.concatenate([even, odd], axis=1)      # (3*cin, 2*cout)

    packed = jnp.stack([col_pack(w[0]),            # even out rows, tap x[r-1]
                        col_pack(w[1] + w[2]),     # even out rows, tap x[r]
                        col_pack(w[0] + w[1]),     # odd  out rows, tap x[r]
                        col_pack(w[2])],           # odd  out rows, tap x[r+1]
                       axis=0)
    return packed.astype(jnp.bfloat16)


def prepare_params(raw, init_size):
    """Repack torch-layout parameters into the kernel-friendly layout."""
    p = {}
    c0 = 128
    d = c0 * init_size * init_size
    # permute l1 columns so the linear kernel's output is NHWC-flat
    w = raw["l1_w"].reshape(-1, c0, init_size, init_size)
    w = w.transpose(0, 2, 3, 1).reshape(-1, d)
    b = raw["l1_b"].reshape(c0, init_size, init_size).transpose(1, 2, 0).reshape(d)
    p["l1_w"] = w.astype(jnp.bfloat16)
    p["l1_b"] = b.reshape(1, d).astype(jnp.float32)

    for name in ("c1", "c2", "c3", "c4"):
        p[name + "_wp"] = _pack_conv(raw[name + "_w"])
        bb = raw[name + "_b"].astype(jnp.float32)
        p[name + "_b2"] = jnp.concatenate([bb, bb]).reshape(1, -1)

    for name in ("bn0", "bn1", "bn2", "bn3"):
        p[name + "_g"] = raw[name + "_g"]
        p[name + "_b"] = raw[name + "_b"]
    return p


# ------------------------- pure-JAX reference (check) ---------------------- #
def _reference_forward(z, raw, *, init_size):
    B = z.shape[0]
    x = (z @ raw["l1_w"] + raw["l1_b"]).reshape(B, 128, init_size, init_size)

    def bn(v, g, b, eps):
        m = v.mean(axis=(0, 2, 3), keepdims=True)
        s = v.var(axis=(0, 2, 3), keepdims=True)
        return (v - m) * jax.lax.rsqrt(s + eps) * g.reshape(1, -1, 1, 1) \
            + b.reshape(1, -1, 1, 1)

    def up(v):
        return jnp.repeat(jnp.repeat(v, 2, axis=2), 2, axis=3)

    def conv(v, w, b):
        return jax.lax.conv_general_dilated(
            v, w, (1, 1), ((1, 1), (1, 1)),
            dimension_numbers=("NCHW", "HWIO", "NCHW")) + b.reshape(1, -1, 1, 1)

    def lrelu(v):
        return jnp.where(v >= 0, v, 0.2 * v)

    x = bn(x, raw["bn0_g"], raw["bn0_b"], 1e-5)
    x = conv(up(x), raw["c1_w"], raw["c1_b"])
    x = lrelu(bn(x, raw["bn1_g"], raw["bn1_b"], 0.8))
    x = conv(up(x), raw["c2_w"], raw["c2_b"])
    x = lrelu(bn(x, raw["bn2_g"], raw["bn2_b"], 0.8))
    x = conv(up(x), raw["c3_w"], raw["c3_b"])
    x = lrelu(bn(x, raw["bn3_g"], raw["bn3_b"], 0.8))
    return jnp.tanh(conv(up(x), raw["c4_w"], raw["c4_b"]))


if __name__ == "__main__":
    # Small shapes consistent with the module (original: 256 / 100 / 3).
    img_channels = 3
    img_size = 32                  # must be divisible by 16
    latent_dim = 32
    init_size = img_size // 16     # == 2
    batch = 2

    key = jax.random.PRNGKey(0)
    zkey, pkey = jax.random.split(key)
    z = jax.random.normal(zkey, (batch, latent_dim), jnp.float32)
    raw = init_params(pkey, latent_dim, init_size, img_channels)
    params = prepare_params(raw, init_size)

    fwd = jax.jit(functools.partial(generator_forward, init_size=init_size))
    img = jax.block_until_ready(fwd(z, params))

    assert img.shape == (batch, img_channels, img_size, img_size), img.shape
    assert bool(jnp.all(jnp.isfinite(img)))

    # loose check vs. an XLA reference (bf16 matmul operands / bf16 activations)
    ref = jax.jit(functools.partial(_reference_forward, init_size=init_size))(z, raw)
    ref = jax.block_until_ready(ref)
    max_err = float(jnp.max(jnp.abs(img - ref)))
    assert max_err < 0.15, f"max abs error vs reference: {max_err}"

    print("KERNEL_OK")
</pallas_src>

<mosaic_0001>
module attributes {stable_mosaic.version = 11 : i64} {
  func.func @_linear_kernel(%arg0: i32, %arg1: memref<2x32xf32, #tpu.memory_space<vmem>>, %arg2: memref<32x512xbf16, #tpu.memory_space<vmem>>, %arg3: memref<1x512xf32, #tpu.memory_space<vmem>>, %arg4: memref<2x512xf32, #tpu.memory_space<vmem>>) attributes {dimension_semantics = [#tpu.dimension_semantics<parallel>], iteration_bounds = array<i64: 1>, scalar_prefetch = 0 : i64, scratch_operands = 0 : i64, tpu.core_type = #tpu.core_type<tc>, window_params = [{pipeline_mode = #tpu.pipeline_mode<synchronous>, transform_indices = @transform_0, window_bounds = array<i64: 2, 32>}, {transform_indices = @transform_1, window_bounds = array<i64: 32, 512>}, {transform_indices = @transform_2, window_bounds = array<i64: 1, 512>}, {transform_indices = @transform_3, window_bounds = array<i64: 2, 512>}]} {
    %c0 = arith.constant 0 : index
    %c0_0 = arith.constant 0 : index
    %0 = vector.load %arg1[%c0, %c0_0] : memref<2x32xf32, #tpu.memory_space<vmem>>, vector<2x32xf32>
    %1 = arith.truncf %0 : vector<2x32xf32> to vector<2x32xbf16>
    %c0_1 = arith.constant 0 : index
    %c0_2 = arith.constant 0 : index
    %2 = vector.load %arg2[%c0_1, %c0_2] : memref<32x512xbf16, #tpu.memory_space<vmem>>, vector<32x512xbf16>
    %cst = arith.constant dense<0.000000e+00> : vector<2x512xf32>
    %3 = tpu.matmul %1, %2, %cst {dimension_numbers = #tpu.dot_dimension_numbers<[1], [0], [0], [1], [0, 0, 1, 1], [], []>} : vector<2x32xbf16>, vector<32x512xbf16>, vector<2x512xf32> -> vector<2x512xf32>
    %c0_3 = arith.constant 0 : index
    %c0_4 = arith.constant 0 : index
    %4 = vector.load %arg3[%c0_3, %c0_4] : memref<1x512xf32, #tpu.memory_space<vmem>>, vector<1x512xf32>
    %5 = vector.broadcast %4 : vector<1x512xf32> to vector<2x512xf32>
    %6 = arith.addf %3, %5 : vector<2x512xf32>
    %c0_5 = arith.constant 0 : index
    %c0_6 = arith.constant 0 : index
    %7 = vector.load %arg4[%c0_5, %c0_6] : memref<2x512xf32, #tpu.memory_space<vmem>>, vector<2x512xf32>
    tpu.vector_store %arg4[%c0_5, %c0_6], %6 {strides = array<i32>} : memref<2x512xf32, #tpu.memory_space<vmem>>, vector<2x512xf32>,
    return
  }
  func.func @transform_0(%arg0: i32) -> (i32, i32) {
    %c0_i32 = arith.constant 0 : i32
    %c0_i32_0 = arith.constant 0 : i32
    %c0_i32_1 = arith.constant 0 : i32
    return %c0_i32, %c0_i32_0 : i32, i32
  }
  func.func @transform_1(%arg0: i32) -> (i32, i32) {
    %c0_i32 = arith.constant 0 : i32
    %c0_i32_0 = arith.constant 0 : i32
    return %c0_i32, %arg0 : i32, i32
  }
  func.func @transform_2(%arg0: i32) -> (i32, i32) {
    %c0_i32 = arith.constant 0 : i32
    %c0_i32_0 = arith.constant 0 : i32
    return %c0_i32, %arg0 : i32, i32
  }
  func.func @transform_3(%arg0: i32) -> (i32, i32) {
    %c0_i32 = arith.constant 0 : i32
    %c0_i32_0 = arith.constant 0 : i32
    return %c0_i32, %arg0 : i32, i32
  }
}

module attributes {stable_mosaic.version = 11 : i64} {
  func.func @_fused_block_kernel(%arg0: i32, %arg1: i32, %arg2: memref<1x2x2x128xf32, #tpu.memory_space<vmem>>, %arg3: memref<1x1x2x128xf32, #tpu.memory_space<vmem>>, %arg4: memref<1x1x2x128xf32, #tpu.memory_space<vmem>>, %arg5: memref<1x128xf32, #tpu.memory_space<vmem>>, %arg6: memref<1x128xf32, #tpu.memory_space<vmem>>, %arg7: memref<4x384x256xbf16, #tpu.memory_space<vmem>>, %arg8: memref<1x256xf32, #tpu.memory_space<vmem>>, %arg9: memref<1x2x2x2x256xbf16, #tpu.memory_space<vmem>>, %arg10: memref<1x1x1x128xf32, #tpu.memory_space<vmem>>, %arg11: memref<1x1x1x128xf32, #tpu.memory_space<vmem>>) attributes {dimension_semantics = [#tpu.dimension_semantics<parallel>, #tpu.dimension_semantics<parallel>], iteration_bounds = array<i64: 2, 1>, scalar_prefetch = 0 : i64, scratch_operands = 0 : i64, tpu.core_type = #tpu.core_type<tc>, window_params = [{transform_indices = @transform_0, window_bounds = array<i64: 1, 2, 2, 128>}, {transform_indices = @transform_1, window_bounds = array<i64: 1, 1, 2, 128>}, {transform_indices = @transform_2, window_bounds = array<i64: 1, 1, 2, 128>}, {pipeline_mode = #tpu.pipeline_mode<synchronous>, transform_indices = @transform_3, window_bounds = array<i64: 1, 128>}, {pipeline_mode = #tpu.pipeline_mode<synchronous>, transform_indices = @transform_4, window_bounds = array<i64: 1, 128>}, {pipeline_mode = #tpu.pipeline_mode<synchronous>, transform_indices = @transform_5, window_bounds = array<i64: 4, 384, 256>}, {pipeline_mode = #tpu.pipeline_mode<synchronous>, transform_indices = @transform_6, window_bounds = array<i64: 1, 256>}, {transform_indices = @transform_7, window_bounds = array<i64: 1, 2, 2, 2, 256>}, {transform_indices = @transform_8, window_bounds = array<i64: 1, 1, 1, 128>}, {transform_indices = @transform_9, window_bounds = array<i64: 1, 1, 1, 128>}]} {
    %c0 = arith.constant 0 : index
    %c0_0 = arith.constant 0 : index
    %0 = vector.load %arg5[%c0, %c0_0] : memref<1x128xf32, #tpu.memory_space<vmem>>, vector<1x128xf32>
    %c0_1 = arith.constant 0 : index
    %c0_2 = arith.constant 0 : index
    %1 = vector.load %arg6[%c0_1, %c0_2] : memref<1x128xf32, #tpu.memory_space<vmem>>, vector<1x128xf32>
    %c0_3 = arith.constant 0 : index
    %c0_4 = arith.constant 0 : index
    %c0_5 = arith.constant 0 : index
    %c0_6 = arith.constant 0 : index
    %2 = vector.load %arg2[%c0_3, %c0_4, %c0_5, %c0_6] : memref<1x2x2x128xf32, #tpu.memory_space<vmem>>, vector<1x2x2x128xf32>
    %3 = vector.shape_cast %2 : vector<1x2x2x128xf32> to vector<2x2x128xf32>
    %4 = vector.shape_cast %0 : vector<1x128xf32> to vector<1x1x128xf32>
    %5 = vector.broadcast %4 : vector<1x1x128xf32> to vector<2x2x128xf32>
    %6 = arith.mulf %3, %5 : vector<2x2x128xf32>
    %7 = vector.shape_cast %1 : vector<1x128xf32> to vector<1x1x128xf32>
    %8 = vector.broadcast %7 : vector<1x1x128xf32> to vector<2x2x128xf32>
    %9 = arith.addf %6, %8 : vector<2x2x128xf32>
    %c0_i32 = arith.constant 0 : i32
    %10 = arith.cmpi sgt, %arg1, %c0_i32 : i32
    %c0_7 = arith.constant 0 : index
    %c0_8 = arith.constant 0 : index
    %c0_9 = arith.constant 0 : index
    %c0_10 = arith.constant 0 : index
    %11 = vector.load %arg3[%c0_7, %c0_8, %c0_9, %c0_10] : memref<1x1x2x128xf32, #tpu.memory_space<vmem>>, vector<1x1x2x128xf32>
    %12 = vector.shape_cast %11 : vector<1x1x2x128xf32> to vector<2x128xf32>
    %13 = vector.broadcast %0 : vector<1x128xf32> to vector<2x128xf32>
    %14 = arith.mulf %12, %13 : vector<2x128xf32>
    %15 = vector.broadcast %1 : vector<1x128xf32> to vector<2x128xf32>
    %16 = arith.addf %14, %15 : vector<2x128xf32>
    %cst = arith.constant 0.000000e+00 : f32
    %17 = vector.broadcast %cst : f32 to vector<2x128xf32>
    %18 = arith.select %10, %16, %17 : vector<2x128xf32>
    %c0_i32_11 = arith.constant 0 : i32
    %19 = arith.cmpi slt, %arg1, %c0_i32_11 : i32
    %c0_12 = arith.constant 0 : index
    %c0_13 = arith.constant 0 : index
    %c0_14 = arith.constant 0 : index
    %c0_15 = arith.constant 0 : index
    %20 = vector.load %arg4[%c0_12, %c0_13, %c0_14, %c0_15] : memref<1x1x2x128xf32, #tpu.memory_space<vmem>>, vector<1x1x2x128xf32>
    %21 = vector.shape_cast %20 : vector<1x1x2x128xf32> to vector<2x128xf32>
    %22 = vector.broadcast %0 : vector<1x128xf32> to vector<2x128xf32>
    %23 = arith.mulf %21, %22 : vector<2x128xf32>
    %24 = vector.broadcast %1 : vector<1x128xf32> to vector<2x128xf32>
    %25 = arith.addf %23, %24 : vector<2x128xf32>
    %cst_16 = arith.constant 0.000000e+00 : f32
    %26 = vector.broadcast %cst_16 : f32 to vector<2x128xf32>
    %27 = arith.select %19, %25, %26 : vector<2x128xf32>
    %28 = vector.shape_cast %18 : vector<2x128xf32> to vector<1x2x128xf32>
    %29 = vector.shape_cast %27 : vector<2x128xf32> to vector<1x2x128xf32>
    %30 = tpu.concatenate %28, %9, %29 in 0 : vector<1x2x128xf32>, vector<2x2x128xf32>, vector<1x2x128xf32> -> vector<4x2x128xf32>
    %31 = arith.truncf %30 : vector<4x2x128xf32> to vector<4x2x128xbf16>
    %cst_17 = arith.constant 0.000000e+00 : bf16
    %32 = vector.broadcast %cst_17 : bf16 to vector<4x1x128xbf16>
    %33 = vector.extract_strided_slice %31 {offsets = [0, 0, 0], sizes = [4, 1, 128], strides = [1, 1, 1]} : vector<4x2x128xbf16> to vector<4x1x128xbf16>
    %34 = tpu.concatenate %32, %33 in 1 : vector<4x1x128xbf16>, vector<4x1x128xbf16> -> vector<4x2x128xbf16>
    %35 = vector.extract_strided_slice %31 {offsets = [0, 1, 0], sizes = [4, 1, 128], strides = [1, 1, 1]} : vector<4x2x128xbf16> to vector<4x1x128xbf16>
    %36 = tpu.concatenate %35, %32 in 1 : vector<4x1x128xbf16>, vector<4x1x128xbf16> -> vector<4x2x128xbf16>
    %37 = tpu.concatenate %34, %31, %36 in 2 : vector<4x2x128xbf16>, vector<4x2x128xbf16>, vector<4x2x128xbf16> -> vector<4x2x384xbf16>
    %38 = vector.shape_cast %37 : vector<4x2x384xbf16> to vector<8x384xbf16>
    %39 = vector.extract_strided_slice %38 {offsets = [0, 0], sizes = [4, 384], strides = [1, 1]} : vector<8x384xbf16> to vector<4x384xbf16>
    %40 = vector.extract_strided_slice %38 {offsets = [2, 0], sizes = [4, 384], strides = [1, 1]} : vector<8x384xbf16> to vector<4x384xbf16>
    %41 = vector.extract_strided_slice %38 {offsets = [4, 0], sizes = [4, 384], strides = [1, 1]} : vector<8x384xbf16> to vector<4x384xbf16>
    %c0_18 = arith.constant 0 : index
    %c0_19 = arith.constant 0 : index
    %42 = vector.load %arg8[%c0_18, %c0_19] : memref<1x256xf32, #tpu.memory_space<vmem>>, vector<1x256xf32>
    %c0_20 = arith.constant 0 : index
    %c0_21 = arith.constant 0 : index
    %c0_22 = arith.constant 0 : index
    %43 = vector.load %arg7[%c0_20, %c0_21, %c0_22] : memref<4x384x256xbf16, #tpu.memory_space<vmem>>, vector<1x384x256xbf16>
    %44 = vector.shape_cast %43 : vector<1x384x256xbf16> to vector<384x256xbf16>
    %cst_23 = arith.constant dense<0.000000e+00> : vector<4x256xf32>
    %45 = tpu.matmul %39, %44, %cst_23 {dimension_numbers = #tpu.dot_dimension_numbers<[1], [0], [0], [1], [0, 0, 1, 1], [], []>} : vector<4x384xbf16>, vector<384x256xbf16>, vector<4x256xf32> -> vector<4x256xf32>
    %c1 = arith.constant 1 : index
    %c0_24 = arith.constant 0 : index
    %c0_25 = arith.constant 0 : index
    %46 = vector.load %arg7[%c1, %c0_24, %c0_25] : memref<4x384x256xbf16, #tpu.memory_space<vmem>>, vector<1x384x256xbf16>
    %47 = vector.shape_cast %46 : vector<1x384x256xbf16> to vector<384x256xbf16>
    %cst_26 = arith.constant dense<0.000000e+00> : vector<4x256xf32>
    %48 = tpu.matmul %40, %47, %cst_26 {dimension_numbers = #tpu.dot_dimension_numbers<[1], [0], [0], [1], [0, 0, 1, 1], [], []>} : vector<4x384xbf16>, vector<384x256xbf16>, vector<4x256xf32> -> vector<4x256xf32>
    %49 = arith.addf %45, %48 : vector<4x256xf32>
    %50 = vector.broadcast %42 : vector<1x256xf32> to vector<4x256xf32>
    %51 = arith.addf %49, %50 : vector<4x256xf32>
    %c2 = arith.constant 2 : index
    %c0_27 = arith.constant 0 : index
    %c0_28 = arith.constant 0 : index
    %52 = vector.load %arg7[%c2, %c0_27, %c0_28] : memref<4x384x256xbf16, #tpu.memory_space<vmem>>, vector<1x384x256xbf16>
    %53 = vector.shape_cast %52 : vector<1x384x256xbf16> to vector<384x256xbf16>
    %cst_29 = arith.constant dense<0.000000e+00> : vector<4x256xf32>
    %54 = tpu.matmul %40, %53, %cst_29 {dimension_numbers = #tpu.dot_dimension_numbers<[1], [0], [0], [1], [0, 0, 1, 1], [], []>} : vector<4x384xbf16>, vector<384x256xbf16>, vector<4x256xf32> -> vector<4x256xf32>
    %c3 = arith.constant 3 : index
    %c0_30 = arith.constant 0 : index
    %c0_31 = arith.constant 0 : index
    %55 = vector.load %arg7[%c3, %c0_30, %c0_31] : memref<4x384x256xbf16, #tpu.memory_space<vmem>>, vector<1x384x256xbf16>
    %56 = vector.shape_cast %55 : vector<1x384x256xbf16> to vector<384x256xbf16>
    %cst_32 = arith.constant dense<0.000000e+00> : vector<4x256xf32>
    %57 = tpu.matmul %41, %56, %cst_32 {dimension_numbers = #tpu.dot_dimension_numbers<[1], [0], [0], [1], [0, 0, 1, 1], [], []>} : vector<4x384xbf16>, vector<384x256xbf16>, vector<4x256xf32> -> vector<4x256xf32>
    %58 = arith.addf %54, %57 : vector<4x256xf32>
    %59 = vector.broadcast %42 : vector<1x256xf32> to vector<4x256xf32>
    %60 = arith.addf %58, %59 : vector<4x256xf32>
    %61 = vector.shape_cast %51 : vector<4x256xf32> to vector<2x1x2x256xf32>
    %62 = arith.truncf %61 : vector<2x1x2x256xf32> to vector<2x1x2x256xbf16>
    %63 = vector.shape_cast %60 : vector<4x256xf32> to vector<2x1x2x256xf32>
    %64 = arith.truncf %63 : vector<2x1x2x256xf32> to vector<2x1x2x256xbf16>
    %65 = tpu.concatenate %62, %64 in 1 : vector<2x1x2x256xbf16>, vector<2x1x2x256xbf16> -> vector<2x2x2x256xbf16>
    %c0_33 = arith.constant 0 : index
    %c0_34 = arith.constant 0 : index
    %c0_35 = arith.constant 0 : index
    %c0_36 = arith.constant 0 : index
    %c0_37 = arith.constant 0 : index
    %66 = vector.load %arg9[%c0_33, %c0_34, %c0_35, %c0_36, %c0_37] : memref<1x2x2x2x256xbf16, #tpu.memory_space<vmem>>, vector<1x2x2x2x256xbf16>
    %67 = vector.shape_cast %66 : vector<1x2x2x2x256xbf16> to vector<2x2x2x256xbf16>
    %68 = vector.shape_cast %65 : vector<2x2x2x256xbf16> to vector<1x2x2x2x256xbf16>
    tpu.vector_store %arg9[%c0_33, %c0_34, %c0_35, %c0_36, %c0_37], %68 {strides = array<i32>} : memref<1x2x2x2x256xbf16, #tpu.memory_space<vmem>>, vector<1x2x2x2x256xbf16>,
    %cst_38 = arith.constant dense<0.000000e+00> : vector<256xf32>
    %69 = vector.multi_reduction <add>, %51, %cst_38 [0] : vector<4x256xf32> to vector<256xf32>
    %70 = vector.shape_cast %69 : vector<256xf32> to vector<1x256xf32>
    %cst_39 = arith.constant dense<0.000000e+00> : vector<256xf32>
    %71 = vector.multi_reduction <add>, %60, %cst_39 [0] : vector<4x256xf32> to vector<256xf32>
    %72 = vector.shape_cast %71 : vector<256xf32> to vector<1x256xf32>
    %73 = arith.addf %70, %72 : vector<1x256xf32>
    %74 = arith.mulf %51, %51 : vector<4x256xf32>
    %cst_40 = arith.constant dense<0.000000e+00> : vector<256xf32>
    %75 = vector.multi_reduction <add>, %74, %cst_40 [0] : vector<4x256xf32> to vector<256xf32>
    %76 = vector.shape_cast %75 : vector<256xf32> to vector<1x256xf32>
    %77 = arith.mulf %60, %60 : vector<4x256xf32>
    %cst_41 = arith.constant dense<0.000000e+00> : vector<256xf32>
    %78 = vector.multi_reduction <add>, %77, %cst_41 [0] : vector<4x256xf32> to vector<256xf32>
    %79 = vector.shape_cast %78 : vector<256xf32> to vector<1x256xf32>
    %80 = arith.addf %76, %79 : vector<1x256xf32>
    %81 = vector.extract_strided_slice %73 {offsets = [0, 0], sizes = [1, 128], strides = [1, 1]} : vector<1x256xf32> to vector<1x128xf32>
    %82 = vector.extract_strided_slice %73 {offsets = [0, 128], sizes = [1, 128], strides = [1, 1]} : vector<1x256xf32> to vector<1x128xf32>
    %83 = arith.addf %81, %82 : vector<1x128xf32>
    %c0_42 = arith.constant 0 : index
    %c0_43 = arith.constant 0 : index
    %c0_44 = arith.constant 0 : index
    %c0_45 = arith.constant 0 : index
    %84 = vector.load %arg10[%c0_42, %c0_43, %c0_44, %c0_45] : memref<1x1x1x128xf32, #tpu.memory_space<vmem>>, vector<1x1x1x128xf32>
    %85 = vector.shape_cast %84 : vector<1x1x1x128xf32> to vector<1x128xf32>
    %86 = vector.shape_cast %83 : vector<1x128xf32> to vector<1x1x1x128xf32>
    tpu.vector_store %arg10[%c0_42, %c0_43, %c0_44, %c0_45], %86 {strides = array<i32>} : memref<1x1x1x128xf32, #tpu.memory_space<vmem>>, vector<1x1x1x128xf32>,
    %87 = vector.extract_strided_slice %80 {offsets = [0, 0], sizes = [1, 128], strides = [1, 1]} : vector<1x256xf32> to vector<1x128xf32>
    %88 = vector.extract_strided_slice %80 {offsets = [0, 128], sizes = [1, 128], strides = [1, 1]} : vector<1x256xf32> to vector<1x128xf32>
    %89 = arith.addf %87, %88 : vector<1x128xf32>
    %c0_46 = arith.constant 0 : index
    %c0_47 = arith.constant 0 : index
    %c0_48 = arith.constant 0 : index
    %c0_49 = arith.constant 0 : index
    %90 = vector.load %arg11[%c0_46, %c0_47, %c0_48, %c0_49] : memref<1x1x1x128xf32, #tpu.memory_space<vmem>>, vector<1x1x1x128xf32>
    %91 = vector.shape_cast %90 : vector<1x1x1x128xf32> to vector<1x128xf32>
    %92 = vector.shape_cast %89 : vector<1x128xf32> to vector<1x1x1x128xf32>
    tpu.vector_store %arg11[%c0_46, %c0_47, %c0_48, %c0_49], %92 {strides = array<i32>} : memref<1x1x1x128xf32, #tpu.memory_space<vmem>>, vector<1x1x1x128xf32>,
    return
  }
  func.func @transform_0(%arg0: i32, %arg1: i32) -> (i32, i32, i32, i32) {
    %c0_i32 = arith.constant 0 : i32
    %c0_i32_0 = arith.constant 0 : i32
    %c0_i32_1 = arith.constant 0 : i32
    return %arg0, %arg1, %c0_i32, %c0_i32_0 : i32, i32, i32, i32
  }
  func.func @transform_1(%arg0: i32, %arg1: i32) -> (i32, i32, i32, i32) {
    %c2_i32 = arith.constant 2 : i32
    %0 = arith.muli %arg1, %c2_i32 : i32
    %c1_i32 = arith.constant 1 : i32
    %1 = arith.subi %0, %c1_i32 : i32
    %c0_i32 = arith.constant 0 : i32
    %2 = arith.maxsi %1, %c0_i32 : i32
    %c0_i32_0 = arith.constant 0 : i32
    %c0_i32_1 = arith.constant 0 : i32
    %c0_i32_2 = arith.constant 0 : i32
    return %arg0, %2, %c0_i32_0, %c0_i32_1 : i32, i32, i32, i32
  }
  func.func @transform_2(%arg0: i32, %arg1: i32) -> (i32, i32, i32, i32) {
    %c1_i32 = arith.constant 1 : i32
    %0 = arith.addi %arg1, %c1_i32 : i32
    %c2_i32 = arith.constant 2 : i32
    %1 = arith.muli %0, %c2_i32 : i32
    %c1_i32_0 = arith.constant 1 : i32
    %2 = arith.minsi %1, %c1_i32_0 : i32
    %c0_i32 = arith.constant 0 : i32
    %c0_i32_1 = arith.constant 0 : i32
    %c0_i32_2 = arith.constant 0 : i32
    return %arg0, %2, %c0_i32, %c0_i32_1 : i32, i32, i32, i32
  }
  func.func @transform_3(%arg0: i32, %arg1: i32) -> (i32, i32) {
    %c0_i32 = arith.constant 0 : i32
    %c0_i32_0 = arith.constant 0 : i32
    %c0_i32_1 = arith.constant 0 : i32
    return %c0_i32, %c0_i32_0 : i32, i32
  }
  func.func @transform_4(%arg0: i32, %arg1: i32) -> (i32, i32) {
    %c0_i32 = arith.constant 0 : i32
    %c0_i32_0 = arith.constant 0 : i32
    %c0_i32_1 = arith.constant 0 : i32
    return %c0_i32, %c0_i32_0 : i32, i32
  }
  func.func @transform_5(%arg0: i32, %arg1: i32) -> (i32, i32, i32) {
    %c0_i32 = arith.constant 0 : i32
    %c0_i32_0 = arith.constant 0 : i32
    %c0_i32_1 = arith.constant 0 : i32
    %c0_i32_2 = arith.constant 0 : i32
    return %c0_i32, %c0_i32_0, %c0_i32_1 : i32, i32, i32
  }
  func.func @transform_6(%arg0: i32, %arg1: i32) -> (i32, i32) {
    %c0_i32 = arith.constant 0 : i32
    %c0_i32_0 = arith.constant 0 : i32
    %c0_i32_1 = arith.constant 0 : i32
    return %c0_i32, %c0_i32_0 : i32, i32
  }
  func.func @transform_7(%arg0: i32, %arg1: i32) -> (i32, i32, i32, i32, i32) {
    %c0_i32 = arith.constant 0 : i32
    %c0_i32_0 = arith.constant 0 : i32
    %c0_i32_1 = arith.constant 0 : i32
    %c0_i32_2 = arith.constant 0 : i32
    return %arg0, %arg1, %c0_i32, %c0_i32_0, %c0_i32_1 : i32, i32, i32, i32, i32
  }
  func.func @transform_8(%arg0: i32, %arg1: i32) -> (i32, i32, i32, i32) {
    %c0_i32 = arith.constant 0 : i32
    %c0_i32_0 = arith.constant 0 : i32
    %c0_i32_1 = arith.constant 0 : i32
    return %arg0, %arg1, %c0_i32, %c0_i32_0 : i32, i32, i32, i32
  }
  func.func @transform_9(%arg0: i32, %arg1: i32) -> (i32, i32, i32, i32) {
    %c0_i32 = arith.constant 0 : i32
    %c0_i32_0 = arith.constant 0 : i32
    %c0_i32_1 = arith.constant 0 : i32
    return %arg0, %arg1, %c0_i32, %c0_i32_0 : i32, i32, i32, i32
  }
}

module attributes {stable_mosaic.version = 11 : i64} {
  func.func @_fused_block_kernel(%arg0: i32, %arg1: i32, %arg2: memref<1x4x4x128xbf16, #tpu.memory_space<vmem>>, %arg3: memref<1x1x4x128xbf16, #tpu.memory_space<vmem>>, %arg4: memref<1x1x4x128xbf16, #tpu.memory_space<vmem>>, %arg5: memref<1x128xf32, #tpu.memory_space<vmem>>, %arg6: memref<1x128xf32, #tpu.memory_space<vmem>>, %arg7: memref<4x384x128xbf16, #tpu.memory_space<vmem>>, %arg8: memref<1x128xf32, #tpu.memory_space<vmem>>, %arg9: memref<1x4x2x4x128xbf16, #tpu.memory_space<vmem>>, %arg10: memref<1x1x1x64xf32, #tpu.memory_space<vmem>>, %arg11: memref<1x1x1x64xf32, #tpu.memory_space<vmem>>) attributes {dimension_semantics = [#tpu.dimension_semantics<parallel>, #tpu.dimension_semantics<parallel>], iteration_bounds = array<i64: 2, 1>, scalar_prefetch = 0 : i64, scratch_operands = 0 : i64, tpu.core_type = #tpu.core_type<tc>, window_params = [{transform_indices = @transform_0, window_bounds = array<i64: 1, 4, 4, 128>}, {transform_indices = @transform_1, window_bounds = array<i64: 1, 1, 4, 128>}, {transform_indices = @transform_2, window_bounds = array<i64: 1, 1, 4, 128>}, {pipeline_mode = #tpu.pipeline_mode<synchronous>, transform_indices = @transform_3, window_bounds = array<i64: 1, 128>}, {pipeline_mode = #tpu.pipeline_mode<synchronous>, transform_indices = @transform_4, window_bounds = array<i64: 1, 128>}, {pipeline_mode = #tpu.pipeline_mode<synchronous>, transform_indices = @transform_5, window_bounds = array<i64: 4, 384, 128>}, {pipeline_mode = #tpu.pipeline_mode<synchronous>, transform_indices = @transform_6, window_bounds = array<i64: 1, 128>}, {transform_indices = @transform_7, window_bounds = array<i64: 1, 4, 2, 4, 128>}, {transform_indices = @transform_8, window_bounds = array<i64: 1, 1, 1, 64>}, {transform_indices = @transform_9, window_bounds = array<i64: 1, 1, 1, 64>}]} {
    %c0 = arith.constant 0 : index
    %c0_0 = arith.constant 0 : index
    %0 = vector.load %arg5[%c0, %c0_0] : memref<1x128xf32, #tpu.memory_space<vmem>>, vector<1x128xf32>
    %c0_1 = arith.constant 0 : index
    %c0_2 = arith.constant 0 : index
    %1 = vector.load %arg6[%c0_1, %c0_2] : memref<1x128xf32, #tpu.memory_space<vmem>>, vector<1x128xf32>
    %c0_3 = arith.constant 0 : index
    %c0_4 = arith.constant 0 : index
    %c0_5 = arith.constant 0 : index
    %c0_6 = arith.constant 0 : index
    %2 = vector.load %arg2[%c0_3, %c0_4, %c0_5, %c0_6] : memref<1x4x4x128xbf16, #tpu.memory_space<vmem>>, vector<1x4x4x128xbf16>
    %3 = vector.shape_cast %2 : vector<1x4x4x128xbf16> to vector<4x4x128xbf16>
    %4 = arith.extf %3 : vector<4x4x128xbf16> to vector<4x4x128xf32>
    %5 = vector.shape_cast %0 : vector<1x128xf32> to vector<1x1x128xf32>
    %6 = vector.broadcast %5 : vector<1x1x128xf32> to vector<4x4x128xf32>
    %7 = arith.mulf %4, %6 : vector<4x4x128xf32>
    %8 = vector.shape_cast %1 : vector<1x128xf32> to vector<1x1x128xf32>
    %9 = vector.broadcast %8 : vector<1x1x128xf32> to vector<4x4x128xf32>
    %10 = arith.addf %7, %9 : vector<4x4x128xf32>
    %cst = arith.constant 0.000000e+00 : f32
    %11 = vector.broadcast %cst : f32 to vector<4x4x128xf32>
    %12 = arith.cmpf oge, %10, %11 : vector<4x4x128xf32>
    %cst_7 = arith.constant 2.000000e-01 : f32
    %13 = vector.broadcast %cst_7 : f32 to vector<4x4x128xf32>
    %14 = arith.mulf %13, %10 : vector<4x4x128xf32>
    %15 = arith.select %12, %10, %14 : vector<4x4x128xi1>, vector<4x4x128xf32>
    %c0_i32 = arith.constant 0 : i32
    %16 = arith.cmpi sgt, %arg1, %c0_i32 : i32
    %c0_8 = arith.constant 0 : index
    %c0_9 = arith.constant 0 : index
    %c0_10 = arith.constant 0 : index
    %c0_11 = arith.constant 0 : index
    %17 = vector.load %arg3[%c0_8, %c0_9, %c0_10, %c0_11] : memref<1x1x4x128xbf16, #tpu.memory_space<vmem>>, vector<1x1x4x128xbf16>
    %18 = vector.shape_cast %17 : vector<1x1x4x128xbf16> to vector<4x128xbf16>
    %19 = arith.extf %18 : vector<4x128xbf16> to vector<4x128xf32>
    %20 = vector.broadcast %0 : vector<1x128xf32> to vector<4x128xf32>
    %21 = arith.mulf %19, %20 : vector<4x128xf32>
    %22 = vector.broadcast %1 : vector<1x128xf32> to vector<4x128xf32>
    %23 = arith.addf %21, %22 : vector<4x128xf32>
    %cst_12 = arith.constant 0.000000e+00 : f32
    %24 = vector.broadcast %cst_12 : f32 to vector<4x128xf32>
    %25 = arith.cmpf oge, %23, %24 : vector<4x128xf32>
    %cst_13 = arith.constant 2.000000e-01 : f32
    %26 = vector.broadcast %cst_13 : f32 to vector<4x128xf32>
    %27 = arith.mulf %26, %23 : vector<4x128xf32>
    %28 = arith.select %25, %23, %27 : vector<4x128xi1>, vector<4x128xf32>
    %cst_14 = arith.constant 0.000000e+00 : f32
    %29 = vector.broadcast %cst_14 : f32 to vector<4x128xf32>
    %30 = arith.select %16, %28, %29 : vector<4x128xf32>
    %c0_i32_15 = arith.constant 0 : i32
    %31 = arith.cmpi slt, %arg1, %c0_i32_15 : i32
    %c0_16 = arith.constant 0 : index
    %c0_17 = arith.constant 0 : index
    %c0_18 = arith.constant 0 : index
    %c0_19 = arith.constant 0 : index
    %32 = vector.load %arg4[%c0_16, %c0_17, %c0_18, %c0_19] : memref<1x1x4x128xbf16, #tpu.memory_space<vmem>>, vector<1x1x4x128xbf16>
    %33 = vector.shape_cast %32 : vector<1x1x4x128xbf16> to vector<4x128xbf16>
    %34 = arith.extf %33 : vector<4x128xbf16> to vector<4x128xf32>
    %35 = vector.broadcast %0 : vector<1x128xf32> to vector<4x128xf32>
    %36 = arith.mulf %34, %35 : vector<4x128xf32>
    %37 = vector.broadcast %1 : vector<1x128xf32> to vector<4x128xf32>
    %38 = arith.addf %36, %37 : vector<4x128xf32>
    %cst_20 = arith.constant 0.000000e+00 : f32
    %39 = vector.broadcast %cst_20 : f32 to vector<4x128xf32>
    %40 = arith.cmpf oge, %38, %39 : vector<4x128xf32>
    %cst_21 = arith.constant 2.000000e-01 : f32
    %41 = vector.broadcast %cst_21 : f32 to vector<4x128xf32>
    %42 = arith.mulf %41, %38 : vector<4x128xf32>
    %43 = arith.select %40, %38, %42 : vector<4x128xi1>, vector<4x128xf32>
    %cst_22 = arith.constant 0.000000e+00 : f32
    %44 = vector.broadcast %cst_22 : f32 to vector<4x128xf32>
    %45 = arith.select %31, %43, %44 : vector<4x128xf32>
    %46 = vector.shape_cast %30 : vector<4x128xf32> to vector<1x4x128xf32>
    %47 = vector.shape_cast %45 : vector<4x128xf32> to vector<1x4x128xf32>
    %48 = tpu.concatenate %46, %15, %47 in 0 : vector<1x4x128xf32>, vector<4x4x128xf32>, vector<1x4x128xf32> -> vector<6x4x128xf32>
    %49 = arith.truncf %48 : vector<6x4x128xf32> to vector<6x4x128xbf16>
    %cst_23 = arith.constant 0.000000e+00 : bf16
    %50 = vector.broadcast %cst_23 : bf16 to vector<6x1x128xbf16>
    %51 = vector.extract_strided_slice %49 {offsets = [0, 0, 0], sizes = [6, 3, 128], strides = [1, 1, 1]} : vector<6x4x128xbf16> to vector<6x3x128xbf16>
    %52 = tpu.concatenate %50, %51 in 1 : vector<6x1x128xbf16>, vector<6x3x128xbf16> -> vector<6x4x128xbf16>
    %53 = vector.extract_strided_slice %49 {offsets = [0, 1, 0], sizes = [6, 3, 128], strides = [1, 1, 1]} : vector<6x4x128xbf16> to vector<6x3x128xbf16>
    %54 = tpu.concatenate %53, %50 in 1 : vector<6x3x128xbf16>, vector<6x1x128xbf16> -> vector<6x4x128xbf16>
    %55 = tpu.concatenate %52, %49, %54 in 2 : vector<6x4x128xbf16>, vector<6x4x128xbf16>, vector<6x4x128xbf16> -> vector<6x4x384xbf16>
    %56 = vector.shape_cast %55 : vector<6x4x384xbf16> to vector<24x384xbf16>
    %57 = vector.extract_strided_slice %56 {offsets = [0, 0], sizes = [16, 384], strides = [1, 1]} : vector<24x384xbf16> to vector<16x384xbf16>
    %58 = vector.extract_strided_slice %56 {offsets = [4, 0], sizes = [16, 384], strides = [1, 1]} : vector<24x384xbf16> to vector<16x384xbf16>
    %59 = vector.extract_strided_slice %56 {offsets = [8, 0], sizes = [16, 384], strides = [1, 1]} : vector<24x384xbf16> to vector<16x384xbf16>
    %c0_24 = arith.constant 0 : index
    %c0_25 = arith.constant 0 : index
    %60 = vector.load %arg8[%c0_24, %c0_25] : memref<1x128xf32, #tpu.memory_space<vmem>>, vector<1x128xf32>
    %c0_26 = arith.constant 0 : index
    %c0_27 = arith.constant 0 : index
    %c0_28 = arith.constant 0 : index
    %61 = vector.load %arg7[%c0_26, %c0_27, %c0_28] : memref<4x384x128xbf16, #tpu.memory_space<vmem>>, vector<1x384x128xbf16>
    %62 = vector.shape_cast %61 : vector<1x384x128xbf16> to vector<384x128xbf16>
    %cst_29 = arith.constant dense<0.000000e+00> : vector<16x128xf32>
    %63 = tpu.matmul %57, %62, %cst_29 {dimension_numbers = #tpu.dot_dimension_numbers<[1], [0], [0], [1], [0, 0, 1, 1], [], []>} : vector<16x384xbf16>, vector<384x128xbf16>, vector<16x128xf32> -> vector<16x128xf32>
    %c1 = arith.constant 1 : index
    %c0_30 = arith.constant 0 : index
    %c0_31 = arith.constant 0 : index
    %64 = vector.load %arg7[%c1, %c0_30, %c0_31] : memref<4x384x128xbf16, #tpu.memory_space<vmem>>, vector<1x384x128xbf16>
    %65 = vector.shape_cast %64 : vector<1x384x128xbf16> to vector<384x128xbf16>
    %cst_32 = arith.constant dense<0.000000e+00> : vector<16x128xf32>
    %66 = tpu.matmul %58, %65, %cst_32 {dimension_numbers = #tpu.dot_dimension_numbers<[1], [0], [0], [1], [0, 0, 1, 1], [], []>} : vector<16x384xbf16>, vector<384x128xbf16>, vector<16x128xf32> -> vector<16x128xf32>
    %67 = arith.addf %63, %66 : vector<16x128xf32>
    %68 = vector.broadcast %60 : vector<1x128xf32> to vector<16x128xf32>
    %69 = arith.addf %67, %68 : vector<16x128xf32>
    %c2 = arith.constant 2 : index
    %c0_33 = arith.constant 0 : index
    %c0_34 = arith.constant 0 : index
    %70 = vector.load %arg7[%c2, %c0_33, %c0_34] : memref<4x384x128xbf16, #tpu.memory_space<vmem>>, vector<1x384x128xbf16>
    %71 = vector.shape_cast %70 : vector<1x384x128xbf16> to vector<384x128xbf16>
    %cst_35 = arith.constant dense<0.000000e+00> : vector<16x128xf32>
    %72 = tpu.matmul %58, %71, %cst_35 {dimension_numbers = #tpu.dot_dimension_numbers<[1], [0], [0], [1], [0, 0, 1, 1], [], []>} : vector<16x384xbf16>, vector<384x128xbf16>, vector<16x128xf32> -> vector<16x128xf32>
    %c3 = arith.constant 3 : index
    %c0_36 = arith.constant 0 : index
    %c0_37 = arith.constant 0 : index
    %73 = vector.load %arg7[%c3, %c0_36, %c0_37] : memref<4x384x128xbf16, #tpu.memory_space<vmem>>, vector<1x384x128xbf16>
    %74 = vector.shape_cast %73 : vector<1x384x128xbf16> to vector<384x128xbf16>
    %cst_38 = arith.constant dense<0.000000e+00> : vector<16x128xf32>
    %75 = tpu.matmul %59, %74, %cst_38 {dimension_numbers = #tpu.dot_dimension_numbers<[1], [0], [0], [1], [0, 0, 1, 1], [], []>} : vector<16x384xbf16>, vector<384x128xbf16>, vector<16x128xf32> -> vector<16x128xf32>
    %76 = arith.addf %72, %75 : vector<16x128xf32>
    %77 = vector.broadcast %60 : vector<1x128xf32> to vector<16x128xf32>
    %78 = arith.addf %76, %77 : vector<16x128xf32>
    %79 = vector.shape_cast %69 : vector<16x128xf32> to vector<4x1x4x128xf32>
    %80 = arith.truncf %79 : vector<4x1x4x128xf32> to vector<4x1x4x128xbf16>
    %81 = vector.shape_cast %78 : vector<16x128xf32> to vector<4x1x4x128xf32>
    %82 = arith.truncf %81 : vector<4x1x4x128xf32> to vector<4x1x4x128xbf16>
    %83 = tpu.concatenate %80, %82 in 1 : vector<4x1x4x128xbf16>, vector<4x1x4x128xbf16> -> vector<4x2x4x128xbf16>
    %c0_39 = arith.constant 0 : index
    %c0_40 = arith.constant 0 : index
    %c0_41 = arith.constant 0 : index
    %c0_42 = arith.constant 0 : index
    %c0_43 = arith.constant 0 : index
    %84 = vector.load %arg9[%c0_39, %c0_40, %c0_41, %c0_42, %c0_43] : memref<1x4x2x4x128xbf16, #tpu.memory_space<vmem>>, vector<1x4x2x4x128xbf16>
    %85 = vector.shape_cast %84 : vector<1x4x2x4x128xbf16> to vector<4x2x4x128xbf16>
    %86 = vector.shape_cast %83 : vector<4x2x4x128xbf16> to vector<1x4x2x4x128xbf16>
    tpu.vector_store %arg9[%c0_39, %c0_40, %c0_41, %c0_42, %c0_43], %86 {strides = array<i32>} : memref<1x4x2x4x128xbf16, #tpu.memory_space<vmem>>, vector<1x4x2x4x128xbf16>,
    %cst_44 = arith.constant dense<0.000000e+00> : vector<128xf32>
    %87 = vector.multi_reduction <add>, %69, %cst_44 [0] : vector<16x128xf32> to vector<128xf32>
    %88 = vector.shape_cast %87 : vector<128xf32> to vector<1x128xf32>
    %cst_45 = arith.constant dense<0.000000e+00> : vector<128xf32>
    %89 = vector.multi_reduction <add>, %78, %cst_45 [0] : vector<16x128xf32> to vector<128xf32>
    %90 = vector.shape_cast %89 : vector<128xf32> to vector<1x128xf32>
    %91 = arith.addf %88, %90 : vector<1x128xf32>
    %92 = arith.mulf %69, %69 : vector<16x128xf32>
    %cst_46 = arith.constant dense<0.000000e+00> : vector<128xf32>
    %93 = vector.multi_reduction <add>, %92, %cst_46 [0] : vector<16x128xf32> to vector<128xf32>
    %94 = vector.shape_cast %93 : vector<128xf32> to vector<1x128xf32>
    %95 = arith.mulf %78, %78 : vector<16x128xf32>
    %cst_47 = arith.constant dense<0.000000e+00> : vector<128xf32>
    %96 = vector.multi_reduction <add>, %95, %cst_47 [0] : vector<16x128xf32> to vector<128xf32>
    %97 = vector.shape_cast %96 : vector<128xf32> to vector<1x128xf32>
    %98 = arith.addf %94, %97 : vector<1x128xf32>
    %99 = vector.extract_strided_slice %91 {offsets = [0, 0], sizes = [1, 64], strides = [1, 1]} : vector<1x128xf32> to vector<1x64xf32>
    %100 = vector.extract_strided_slice %91 {offsets = [0, 64], sizes = [1, 64], strides = [1, 1]} : vector<1x128xf32> to vector<1x64xf32>
    %101 = arith.addf %99, %100 : vector<1x64xf32>
    %c0_48 = arith.constant 0 : index
    %c0_49 = arith.constant 0 : index
    %c0_50 = arith.constant 0 : index
    %c0_51 = arith.constant 0 : index
    %102 = vector.load %arg10[%c0_48, %c0_49, %c0_50, %c0_51] : memref<1x1x1x64xf32, #tpu.memory_space<vmem>>, vector<1x1x1x64xf32>
    %103 = vector.shape_cast %102 : vector<1x1x1x64xf32> to vector<1x64xf32>
    %104 = vector.shape_cast %101 : vector<1x64xf32> to vector<1x1x1x64xf32>
    tpu.vector_store %arg10[%c0_48, %c0_49, %c0_50, %c0_51], %104 {strides = array<i32>} : memref<1x1x1x64xf32, #tpu.memory_space<vmem>>, vector<1x1x1x64xf32>,
    %105 = vector.extract_strided_slice %98 {offsets = [0, 0], sizes = [1, 64], strides = [1, 1]} : vector<1x128xf32> to vector<1x64xf32>
    %106 = vector.extract_strided_slice %98 {offsets = [0, 64], sizes = [1, 64], strides = [1, 1]} : vector<1x128xf32> to vector<1x64xf32>
    %107 = arith.addf %105, %106 : vector<1x64xf32>
    %c0_52 = arith.constant 0 : index
    %c0_53 = arith.constant 0 : index
    %c0_54 = arith.constant 0 : index
    %c0_55 = arith.constant 0 : index
    %108 = vector.load %arg11[%c0_52, %c0_53, %c0_54, %c0_55] : memref<1x1x1x64xf32, #tpu.memory_space<vmem>>, vector<1x1x1x64xf32>
    %109 = vector.shape_cast %108 : vector<1x1x1x64xf32> to vector<1x64xf32>
    %110 = vector.shape_cast %107 : vector<1x64xf32> to vector<1x1x1x64xf32>
    tpu.vector_store %arg11[%c0_52, %c0_53, %c0_54, %c0_55], %110 {strides = array<i32>} : memref<1x1x1x64xf32, #tpu.memory_space<vmem>>, vector<1x1x1x64xf32>,
    return
  }
  func.func @transform_0(%arg0: i32, %arg1: i32) -> (i32, i32, i32, i32) {
    %c0_i32 = arith.constant 0 : i32
    %c0_i32_0 = arith.constant 0 : i32
    %c0_i32_1 = arith.constant 0 : i32
    return %arg0, %arg1, %c0_i32, %c0_i32_0 : i32, i32, i32, i32
  }
  func.func @transform_1(%arg0: i32, %arg1: i32) -> (i32, i32, i32, i32) {
    %c4_i32 = arith.constant 4 : i32
    %0 = arith.muli %arg1, %c4_i32 : i32
    %c1_i32 = arith.constant 1 : i32
    %1 = arith.subi %0, %c1_i32 : i32
    %c0_i32 = arith.constant 0 : i32
    %2 = arith.maxsi %1, %c0_i32 : i32
    %c0_i32_0 = arith.constant 0 : i32
    %c0_i32_1 = arith.constant 0 : i32
    %c0_i32_2 = arith.constant 0 : i32
    return %arg0, %2, %c0_i32_0, %c0_i32_1 : i32, i32, i32, i32
  }
  func.func @transform_2(%arg0: i32, %arg1: i32) -> (i32, i32, i32, i32) {
    %c1_i32 = arith.constant 1 : i32
    %0 = arith.addi %arg1, %c1_i32 : i32
    %c4_i32 = arith.constant 4 : i32
    %1 = arith.muli %0, %c4_i32 : i32
    %c3_i32 = arith.constant 3 : i32
    %2 = arith.minsi %1, %c3_i32 : i32
    %c0_i32 = arith.constant 0 : i32
    %c0_i32_0 = arith.constant 0 : i32
    %c0_i32_1 = arith.constant 0 : i32
    return %arg0, %2, %c0_i32, %c0_i32_0 : i32, i32, i32, i32
  }
  func.func @transform_3(%arg0: i32, %arg1: i32) -> (i32, i32) {
    %c0_i32 = arith.constant 0 : i32
    %c0_i32_0 = arith.constant 0 : i32
    %c0_i32_1 = arith.constant 0 : i32
    return %c0_i32, %c0_i32_0 : i32, i32
  }
  func.func @transform_4(%arg0: i32, %arg1: i32) -> (i32, i32) {
    %c0_i32 = arith.constant 0 : i32
    %c0_i32_0 = arith.constant 0 : i32
    %c0_i32_1 = arith.constant 0 : i32
    return %c0_i32, %c0_i32_0 : i32, i32
  }
  func.func @transform_5(%arg0: i32, %arg1: i32) -> (i32, i32, i32) {
    %c0_i32 = arith.constant 0 : i32
    %c0_i32_0 = arith.constant 0 : i32
    %c0_i32_1 = arith.constant 0 : i32
    %c0_i32_2 = arith.constant 0 : i32
    return %c0_i32, %c0_i32_0, %c0_i32_1 : i32, i32, i32
  }
  func.func @transform_6(%arg0: i32, %arg1: i32) -> (i32, i32) {
    %c0_i32 = arith.constant 0 : i32
    %c0_i32_0 = arith.constant 0 : i32
    %c0_i32_1 = arith.constant 0 : i32
    return %c0_i32, %c0_i32_0 : i32, i32
  }
  func.func @transform_7(%arg0: i32, %arg1: i32) -> (i32, i32, i32, i32, i32) {
    %c0_i32 = arith.constant 0 : i32
    %c0_i32_0 = arith.constant 0 : i32
    %c0_i32_1 = arith.constant 0 : i32
    %c0_i32_2 = arith.constant 0 : i32
    return %arg0, %arg1, %c0_i32, %c0_i32_0, %c0_i32_1 : i32, i32, i32, i32, i32
  }
  func.func @transform_8(%arg0: i32, %arg1: i32) -> (i32, i32, i32, i32) {
    %c0_i32 = arith.constant 0 : i32
    %c0_i32_0 = arith.constant 0 : i32
    %c0_i32_1 = arith.constant 0 : i32
    return %arg0, %arg1, %c0_i32, %c0_i32_0 : i32, i32, i32, i32
  }
  func.func @transform_9(%arg0: i32, %arg1: i32) -> (i32, i32, i32, i32) {
    %c0_i32 = arith.constant 0 : i32
    %c0_i32_0 = arith.constant 0 : i32
    %c0_i32_1 = arith.constant 0 : i32
    return %arg0, %arg1, %c0_i32, %c0_i32_0 : i32, i32, i32, i32
  }
}

module attributes {stable_mosaic.version = 11 : i64} {
  func.func @_fused_block_kernel(%arg0: i32, %arg1: i32, %arg2: memref<1x8x8x64xbf16, #tpu.memory_space<vmem>>, %arg3: memref<1x1x8x64xbf16, #tpu.memory_space<vmem>>, %arg4: memref<1x1x8x64xbf16, #tpu.memory_space<vmem>>, %arg5: memref<1x64xf32, #tpu.memory_space<vmem>>, %arg6: memref<1x64xf32, #tpu.memory_space<vmem>>, %arg7: memref<4x192x128xbf16, #tpu.memory_space<vmem>>, %arg8: memref<1x128xf32, #tpu.memory_space<vmem>>, %arg9: memref<1x8x2x8x128xbf16, #tpu.memory_space<vmem>>, %arg10: memref<1x1x1x64xf32, #tpu.memory_space<vmem>>, %arg11: memref<1x1x1x64xf32, #tpu.memory_space<vmem>>) attributes {dimension_semantics = [#tpu.dimension_semantics<parallel>, #tpu.dimension_semantics<parallel>], iteration_bounds = array<i64: 2, 1>, scalar_prefetch = 0 : i64, scratch_operands = 0 : i64, tpu.core_type = #tpu.core_type<tc>, window_params = [{transform_indices = @transform_0, window_bounds = array<i64: 1, 8, 8, 64>}, {transform_indices = @transform_1, window_bounds = array<i64: 1, 1, 8, 64>}, {transform_indices = @transform_2, window_bounds = array<i64: 1, 1, 8, 64>}, {pipeline_mode = #tpu.pipeline_mode<synchronous>, transform_indices = @transform_3, window_bounds = array<i64: 1, 64>}, {pipeline_mode = #tpu.pipeline_mode<synchronous>, transform_indices = @transform_4, window_bounds = array<i64: 1, 64>}, {pipeline_mode = #tpu.pipeline_mode<synchronous>, transform_indices = @transform_5, window_bounds = array<i64: 4, 192, 128>}, {pipeline_mode = #tpu.pipeline_mode<synchronous>, transform_indices = @transform_6, window_bounds = array<i64: 1, 128>}, {transform_indices = @transform_7, window_bounds = array<i64: 1, 8, 2, 8, 128>}, {transform_indices = @transform_8, window_bounds = array<i64: 1, 1, 1, 64>}, {transform_indices = @transform_9, window_bounds = array<i64: 1, 1, 1, 64>}]} {
    %c0 = arith.constant 0 : index
    %c0_0 = arith.constant 0 : index
    %0 = vector.load %arg5[%c0, %c0_0] : memref<1x64xf32, #tpu.memory_space<vmem>>, vector<1x64xf32>
    %c0_1 = arith.constant 0 : index
    %c0_2 = arith.constant 0 : index
    %1 = vector.load %arg6[%c0_1, %c0_2] : memref<1x64xf32, #tpu.memory_space<vmem>>, vector<1x64xf32>
    %c0_3 = arith.constant 0 : index
    %c0_4 = arith.constant 0 : index
    %c0_5 = arith.constant 0 : index
    %c0_6 = arith.constant 0 : index
    %2 = vector.load %arg2[%c0_3, %c0_4, %c0_5, %c0_6] : memref<1x8x8x64xbf16, #tpu.memory_space<vmem>>, vector<1x8x8x64xbf16>
    %3 = vector.shape_cast %2 : vector<1x8x8x64xbf16> to vector<8x8x64xbf16>
    %4 = arith.extf %3 : vector<8x8x64xbf16> to vector<8x8x64xf32>
    %5 = vector.shape_cast %0 : vector<1x64xf32> to vector<1x1x64xf32>
    %6 = vector.broadcast %5 : vector<1x1x64xf32> to vector<8x8x64xf32>
    %7 = arith.mulf %4, %6 : vector<8x8x64xf32>
    %8 = vector.shape_cast %1 : vector<1x64xf32> to vector<1x1x64xf32>
    %9 = vector.broadcast %8 : vector<1x1x64xf32> to vector<8x8x64xf32>
    %10 = arith.addf %7, %9 : vector<8x8x64xf32>
    %cst = arith.constant 0.000000e+00 : f32
    %11 = vector.broadcast %cst : f32 to vector<8x8x64xf32>
    %12 = arith.cmpf oge, %10, %11 : vector<8x8x64xf32>
    %cst_7 = arith.constant 2.000000e-01 : f32
    %13 = vector.broadcast %cst_7 : f32 to vector<8x8x64xf32>
    %14 = arith.mulf %13, %10 : vector<8x8x64xf32>
    %15 = arith.select %12, %10, %14 : vector<8x8x64xi1>, vector<8x8x64xf32>
    %c0_i32 = arith.constant 0 : i32
    %16 = arith.cmpi sgt, %arg1, %c0_i32 : i32
    %c0_8 = arith.constant 0 : index
    %c0_9 = arith.constant 0 : index
    %c0_10 = arith.constant 0 : index
    %c0_11 = arith.constant 0 : index
    %17 = vector.load %arg3[%c0_8, %c0_9, %c0_10, %c0_11] : memref<1x1x8x64xbf16, #tpu.memory_space<vmem>>, vector<1x1x8x64xbf16>
    %18 = vector.shape_cast %17 : vector<1x1x8x64xbf16> to vector<8x64xbf16>
    %19 = arith.extf %18 : vector<8x64xbf16> to vector<8x64xf32>
    %20 = vector.broadcast %0 : vector<1x64xf32> to vector<8x64xf32>
    %21 = arith.mulf %19, %20 : vector<8x64xf32>
    %22 = vector.broadcast %1 : vector<1x64xf32> to vector<8x64xf32>
    %23 = arith.addf %21, %22 : vector<8x64xf32>
    %cst_12 = arith.constant 0.000000e+00 : f32
    %24 = vector.broadcast %cst_12 : f32 to vector<8x64xf32>
    %25 = arith.cmpf oge, %23, %24 : vector<8x64xf32>
    %cst_13 = arith.constant 2.000000e-01 : f32
    %26 = vector.broadcast %cst_13 : f32 to vector<8x64xf32>
    %27 = arith.mulf %26, %23 : vector<8x64xf32>
    %28 = arith.select %25, %23, %27 : vector<8x64xi1>, vector<8x64xf32>
    %cst_14 = arith.constant 0.000000e+00 : f32
    %29 = vector.broadcast %cst_14 : f32 to vector<8x64xf32>
    %30 = arith.select %16, %28, %29 : vector<8x64xf32>
    %c0_i32_15 = arith.constant 0 : i32
    %31 = arith.cmpi slt, %arg1, %c0_i32_15 : i32
    %c0_16 = arith.constant 0 : index
    %c0_17 = arith.constant 0 : index
    %c0_18 = arith.constant 0 : index
    %c0_19 = arith.constant 0 : index
    %32 = vector.load %arg4[%c0_16, %c0_17, %c0_18, %c0_19] : memref<1x1x8x64xbf16, #tpu.memory_space<vmem>>, vector<1x1x8x64xbf16>
    %33 = vector.shape_cast %32 : vector<1x1x8x64xbf16> to vector<8x64xbf16>
    %34 = arith.extf %33 : vector<8x64xbf16> to vector<8x64xf32>
    %35 = vector.broadcast %0 : vector<1x64xf32> to vector<8x64xf32>
    %36 = arith.mulf %34, %35 : vector<8x64xf32>
    %37 = vector.broadcast %1 : vector<1x64xf32> to vector<8x64xf32>
    %38 = arith.addf %36, %37 : vector<8x64xf32>
    %cst_20 = arith.constant 0.000000e+00 : f32
    %39 = vector.broadcast %cst_20 : f32 to vector<8x64xf32>
    %40 = arith.cmpf oge, %38, %39 : vector<8x64xf32>
    %cst_21 = arith.constant 2.000000e-01 : f32
    %41 = vector.broadcast %cst_21 : f32 to vector<8x64xf32>
    %42 = arith.mulf %41, %38 : vector<8x64xf32>
    %43 = arith.select %40, %38, %42 : vector<8x64xi1>, vector<8x64xf32>
    %cst_22 = arith.constant 0.000000e+00 : f32
    %44 = vector.broadcast %cst_22 : f32 to vector<8x64xf32>
    %45 = arith.select %31, %43, %44 : vector<8x64xf32>
    %46 = vector.shape_cast %30 : vector<8x64xf32> to vector<1x8x64xf32>
    %47 = vector.shape_cast %45 : vector<8x64xf32> to vector<1x8x64xf32>
    %48 = tpu.concatenate %46, %15, %47 in 0 : vector<1x8x64xf32>, vector<8x8x64xf32>, vector<1x8x64xf32> -> vector<10x8x64xf32>
    %49 = arith.truncf %48 : vector<10x8x64xf32> to vector<10x8x64xbf16>
    %cst_23 = arith.constant 0.000000e+00 : bf16
    %50 = vector.broadcast %cst_23 : bf16 to vector<10x1x64xbf16>
    %51 = vector.extract_strided_slice %49 {offsets = [0, 0, 0], sizes = [10, 7, 64], strides = [1, 1, 1]} : vector<10x8x64xbf16> to vector<10x7x64xbf16>
    %52 = tpu.concatenate %50, %51 in 1 : vector<10x1x64xbf16>, vector<10x7x64xbf16> -> vector<10x8x64xbf16>
    %53 = vector.extract_strided_slice %49 {offsets = [0, 1, 0], sizes = [10, 7, 64], strides = [1, 1, 1]} : vector<10x8x64xbf16> to vector<10x7x64xbf16>
    %54 = tpu.concatenate %53, %50 in 1 : vector<10x7x64xbf16>, vector<10x1x64xbf16> -> vector<10x8x64xbf16>
    %55 = tpu.concatenate %52, %49, %54 in 2 : vector<10x8x64xbf16>, vector<10x8x64xbf16>, vector<10x8x64xbf16> -> vector<10x8x192xbf16>
    %56 = vector.shape_cast %55 : vector<10x8x192xbf16> to vector<80x192xbf16>
    %57 = vector.extract_strided_slice %56 {offsets = [0, 0], sizes = [64, 192], strides = [1, 1]} : vector<80x192xbf16> to vector<64x192xbf16>
    %58 = vector.extract_strided_slice %56 {offsets = [8, 0], sizes = [64, 192], strides = [1, 1]} : vector<80x192xbf16> to vector<64x192xbf16>
    %59 = vector.extract_strided_slice %56 {offsets = [16, 0], sizes = [64, 192], strides = [1, 1]} : vector<80x192xbf16> to vector<64x192xbf16>
    %c0_24 = arith.constant 0 : index
    %c0_25 = arith.constant 0 : index
    %60 = vector.load %arg8[%c0_24, %c0_25] : memref<1x128xf32, #tpu.memory_space<vmem>>, vector<1x128xf32>
    %c0_26 = arith.constant 0 : index
    %c0_27 = arith.constant 0 : index
    %c0_28 = arith.constant 0 : index
    %61 = vector.load %arg7[%c0_26, %c0_27, %c0_28] : memref<4x192x128xbf16, #tpu.memory_space<vmem>>, vector<1x192x128xbf16>
    %62 = vector.shape_cast %61 : vector<1x192x128xbf16> to vector<192x128xbf16>
    %cst_29 = arith.constant dense<0.000000e+00> : vector<64x128xf32>
    %63 = tpu.matmul %57, %62, %cst_29 {dimension_numbers = #tpu.dot_dimension_numbers<[1], [0], [0], [1], [0, 0, 1, 1], [], []>} : vector<64x192xbf16>, vector<192x128xbf16>, vector<64x128xf32> -> vector<64x128xf32>
    %c1 = arith.constant 1 : index
    %c0_30 = arith.constant 0 : index
    %c0_31 = arith.constant 0 : index
    %64 = vector.load %arg7[%c1, %c0_30, %c0_31] : memref<4x192x128xbf16, #tpu.memory_space<vmem>>, vector<1x192x128xbf16>
    %65 = vector.shape_cast %64 : vector<1x192x128xbf16> to vector<192x128xbf16>
    %cst_32 = arith.constant dense<0.000000e+00> : vector<64x128xf32>
    %66 = tpu.matmul %58, %65, %cst_32 {dimension_numbers = #tpu.dot_dimension_numbers<[1], [0], [0], [1], [0, 0, 1, 1], [], []>} : vector<64x192xbf16>, vector<192x128xbf16>, vector<64x128xf32> -> vector<64x128xf32>
    %67 = arith.addf %63, %66 : vector<64x128xf32>
    %68 = vector.broadcast %60 : vector<1x128xf32> to vector<64x128xf32>
    %69 = arith.addf %67, %68 : vector<64x128xf32>
    %c2 = arith.constant 2 : index
    %c0_33 = arith.constant 0 : index
    %c0_34 = arith.constant 0 : index
    %70 = vector.load %arg7[%c2, %c0_33, %c0_34] : memref<4x192x128xbf16, #tpu.memory_space<vmem>>, vector<1x192x128xbf16>
    %71 = vector.shape_cast %70 : vector<1x192x128xbf16> to vector<192x128xbf16>
    %cst_35 = arith.constant dense<0.000000e+00> : vector<64x128xf32>
    %72 = tpu.matmul %58, %71, %cst_35 {dimension_numbers = #tpu.dot_dimension_numbers<[1], [0], [0], [1], [0, 0, 1, 1], [], []>} : vector<64x192xbf16>, vector<192x128xbf16>, vector<64x128xf32> -> vector<64x128xf32>
    %c3 = arith.constant 3 : index
    %c0_36 = arith.constant 0 : index
    %c0_37 = arith.constant 0 : index
    %73 = vector.load %arg7[%c3, %c0_36, %c0_37] : memref<4x192x128xbf16, #tpu.memory_space<vmem>>, vector<1x192x128xbf16>
    %74 = vector.shape_cast %73 : vector<1x192x128xbf16> to vector<192x128xbf16>
    %cst_38 = arith.constant dense<0.000000e+00> : vector<64x128xf32>
    %75 = tpu.matmul %59, %74, %cst_38 {dimension_numbers = #tpu.dot_dimension_numbers<[1], [0], [0], [1], [0, 0, 1, 1], [], []>} : vector<64x192xbf16>, vector<192x128xbf16>, vector<64x128xf32> -> vector<64x128xf32>
    %76 = arith.addf %72, %75 : vector<64x128xf32>
    %77 = vector.broadcast %60 : vector<1x128xf32> to vector<64x128xf32>
    %78 = arith.addf %76, %77 : vector<64x128xf32>
    %79 = vector.shape_cast %69 : vector<64x128xf32> to vector<8x1x8x128xf32>
    %80 = arith.truncf %79 : vector<8x1x8x128xf32> to vector<8x1x8x128xbf16>
    %81 = vector.shape_cast %78 : vector<64x128xf32> to vector<8x1x8x128xf32>
    %82 = arith.truncf %81 : vector<8x1x8x128xf32> to vector<8x1x8x128xbf16>
    %83 = tpu.concatenate %80, %82 in 1 : vector<8x1x8x128xbf16>, vector<8x1x8x128xbf16> -> vector<8x2x8x128xbf16>
    %c0_39 = arith.constant 0 : index
    %c0_40 = arith.constant 0 : index
    %c0_41 = arith.constant 0 : index
    %c0_42 = arith.constant 0 : index
    %c0_43 = arith.constant 0 : index
    %84 = vector.load %arg9[%c0_39, %c0_40, %c0_41, %c0_42, %c0_43] : memref<1x8x2x8x128xbf16, #tpu.memory_space<vmem>>, vector<1x8x2x8x128xbf16>
    %85 = vector.shape_cast %84 : vector<1x8x2x8x128xbf16> to vector<8x2x8x128xbf16>
    %86 = vector.shape_cast %83 : vector<8x2x8x128xbf16> to vector<1x8x2x8x128xbf16>
    tpu.vector_store %arg9[%c0_39, %c0_40, %c0_41, %c0_42, %c0_43], %86 {strides = array<i32>} : memref<1x8x2x8x128xbf16, #tpu.memory_space<vmem>>, vector<1x8x2x8x128xbf16>,
    %cst_44 = arith.constant dense<0.000000e+00> : vector<128xf32>
    %87 = vector.multi_reduction <add>, %69, %cst_44 [0] : vector<64x128xf32> to vector<128xf32>
    %88 = vector.shape_cast %87 : vector<128xf32> to vector<1x128xf32>
    %cst_45 = arith.constant dense<0.000000e+00> : vector<128xf32>
    %89 = vector.multi_reduction <add>, %78, %cst_45 [0] : vector<64x128xf32> to vector<128xf32>
    %90 = vector.shape_cast %89 : vector<128xf32> to vector<1x128xf32>
    %91 = arith.addf %88, %90 : vector<1x128xf32>
    %92 = arith.mulf %69, %69 : vector<64x128xf32>
    %cst_46 = arith.constant dense<0.000000e+00> : vector<128xf32>
    %93 = vector.multi_reduction <add>, %92, %cst_46 [0] : vector<64x128xf32> to vector<128xf32>
    %94 = vector.shape_cast %93 : vector<128xf32> to vector<1x128xf32>
    %95 = arith.mulf %78, %78 : vector<64x128xf32>
    %cst_47 = arith.constant dense<0.000000e+00> : vector<128xf32>
    %96 = vector.multi_reduction <add>, %95, %cst_47 [0] : vector<64x128xf32> to vector<128xf32>
    %97 = vector.shape_cast %96 : vector<128xf32> to vector<1x128xf32>
    %98 = arith.addf %94, %97 : vector<1x128xf32>
    %99 = vector.extract_strided_slice %91 {offsets = [0, 0], sizes = [1, 64], strides = [1, 1]} : vector<1x128xf32> to vector<1x64xf32>
    %100 = vector.extract_strided_slice %91 {offsets = [0, 64], sizes = [1, 64], strides = [1, 1]} : vector<1x128xf32> to vector<1x64xf32>
    %101 = arith.addf %99, %100 : vector<1x64xf32>
    %c0_48 = arith.constant 0 : index
    %c0_49 = arith.constant 0 : index
    %c0_50 = arith.constant 0 : index
    %c0_51 = arith.constant 0 : index
    %102 = vector.load %arg10[%c0_48, %c0_49, %c0_50, %c0_51] : memref<1x1x1x64xf32, #tpu.memory_space<vmem>>, vector<1x1x1x64xf32>
    %103 = vector.shape_cast %102 : vector<1x1x1x64xf32> to vector<1x64xf32>
    %104 = vector.shape_cast %101 : vector<1x64xf32> to vector<1x1x1x64xf32>
    tpu.vector_store %arg10[%c0_48, %c0_49, %c0_50, %c0_51], %104 {strides = array<i32>} : memref<1x1x1x64xf32, #tpu.memory_space<vmem>>, vector<1x1x1x64xf32>,
    %105 = vector.extract_strided_slice %98 {offsets = [0, 0], sizes = [1, 64], strides = [1, 1]} : vector<1x128xf32> to vector<1x64xf32>
    %106 = vector.extract_strided_slice %98 {offsets = [0, 64], sizes = [1, 64], strides = [1, 1]} : vector<1x128xf32> to vector<1x64xf32>
    %107 = arith.addf %105, %106 : vector<1x64xf32>
    %c0_52 = arith.constant 0 : index
    %c0_53 = arith.constant 0 : index
    %c0_54 = arith.constant 0 : index
    %c0_55 = arith.constant 0 : index
    %108 = vector.load %arg11[%c0_52, %c0_53, %c0_54, %c0_55] : memref<1x1x1x64xf32, #tpu.memory_space<vmem>>, vector<1x1x1x64xf32>
    %109 = vector.shape_cast %108 : vector<1x1x1x64xf32> to vector<1x64xf32>
    %110 = vector.shape_cast %107 : vector<1x64xf32> to vector<1x1x1x64xf32>
    tpu.vector_store %arg11[%c0_52, %c0_53, %c0_54, %c0_55], %110 {strides = array<i32>} : memref<1x1x1x64xf32, #tpu.memory_space<vmem>>, vector<1x1x1x64xf32>,
    return
  }
  func.func @transform_0(%arg0: i32, %arg1: i32) -> (i32, i32, i32, i32) {
    %c0_i32 = arith.constant 0 : i32
    %c0_i32_0 = arith.constant 0 : i32
    %c0_i32_1 = arith.constant 0 : i32
    return %arg0, %arg1, %c0_i32, %c0_i32_0 : i32, i32, i32, i32
  }
  func.func @transform_1(%arg0: i32, %arg1: i32) -> (i32, i32, i32, i32) {
    %c8_i32 = arith.constant 8 : i32
    %0 = arith.muli %arg1, %c8_i32 : i32
    %c1_i32 = arith.constant 1 : i32
    %1 = arith.subi %0, %c1_i32 : i32
    %c0_i32 = arith.constant 0 : i32
    %2 = arith.maxsi %1, %c0_i32 : i32
    %c0_i32_0 = arith.constant 0 : i32
    %c0_i32_1 = arith.constant 0 : i32
    %c0_i32_2 = arith.constant 0 : i32
    return %arg0, %2, %c0_i32_0, %c0_i32_1 : i32, i32, i32, i32
  }
  func.func @transform_2(%arg0: i32, %arg1: i32) -> (i32, i32, i32, i32) {
    %c1_i32 = arith.constant 1 : i32
    %0 = arith.addi %arg1, %c1_i32 : i32
    %c8_i32 = arith.constant 8 : i32
    %1 = arith.muli %0, %c8_i32 : i32
    %c7_i32 = arith.constant 7 : i32
    %2 = arith.minsi %1, %c7_i32 : i32
    %c0_i32 = arith.constant 0 : i32
    %c0_i32_0 = arith.constant 0 : i32
    %c0_i32_1 = arith.constant 0 : i32
    return %arg0, %2, %c0_i32, %c0_i32_0 : i32, i32, i32, i32
  }
  func.func @transform_3(%arg0: i32, %arg1: i32) -> (i32, i32) {
    %c0_i32 = arith.constant 0 : i32
    %c0_i32_0 = arith.constant 0 : i32
    %c0_i32_1 = arith.constant 0 : i32
    return %c0_i32, %c0_i32_0 : i32, i32
  }
  func.func @transform_4(%arg0: i32, %arg1: i32) -> (i32, i32) {
    %c0_i32 = arith.constant 0 : i32
    %c0_i32_0 = arith.constant 0 : i32
    %c0_i32_1 = arith.constant 0 : i32
    return %c0_i32, %c0_i32_0 : i32, i32
  }
  func.func @transform_5(%arg0: i32, %arg1: i32) -> (i32, i32, i32) {
    %c0_i32 = arith.constant 0 : i32
    %c0_i32_0 = arith.constant 0 : i32
    %c0_i32_1 = arith.constant 0 : i32
    %c0_i32_2 = arith.constant 0 : i32
    return %c0_i32, %c0_i32_0, %c0_i32_1 : i32, i32, i32
  }
  func.func @transform_6(%arg0: i32, %arg1: i32) -> (i32, i32) {
    %c0_i32 = arith.constant 0 : i32
    %c0_i32_0 = arith.constant 0 : i32
    %c0_i32_1 = arith.constant 0 : i32
    return %c0_i32, %c0_i32_0 : i32, i32
  }
  func.func @transform_7(%arg0: i32, %arg1: i32) -> (i32, i32, i32, i32, i32) {
    %c0_i32 = arith.constant 0 : i32
    %c0_i32_0 = arith.constant 0 : i32
    %c0_i32_1 = arith.constant 0 : i32
    %c0_i32_2 = arith.constant 0 : i32
    return %arg0, %arg1, %c0_i32, %c0_i32_0, %c0_i32_1 : i32, i32, i32, i32, i32
  }
  func.func @transform_8(%arg0: i32, %arg1: i32) -> (i32, i32, i32, i32) {
    %c0_i32 = arith.constant 0 : i32
    %c0_i32_0 = arith.constant 0 : i32
    %c0_i32_1 = arith.constant 0 : i32
    return %arg0, %arg1, %c0_i32, %c0_i32_0 : i32, i32, i32, i32
  }
  func.func @transform_9(%arg0: i32, %arg1: i32) -> (i32, i32, i32, i32) {
    %c0_i32 = arith.constant 0 : i32
    %c0_i32_0 = arith.constant 0 : i32
    %c0_i32_1 = arith.constant 0 : i32
    return %arg0, %arg1, %c0_i32, %c0_i32_0 : i32, i32, i32, i32
  }
}

module attributes {stable_mosaic.version = 11 : i64} {
  func.func @_fused_block_kernel(%arg0: i32, %arg1: i32, %arg2: memref<1x16x16x64xbf16, #tpu.memory_space<vmem>>, %arg3: memref<1x1x16x64xbf16, #tpu.memory_space<vmem>>, %arg4: memref<1x1x16x64xbf16, #tpu.memory_space<vmem>>, %arg5: memref<1x64xf32, #tpu.memory_space<vmem>>, %arg6: memref<1x64xf32, #tpu.memory_space<vmem>>, %arg7: memref<4x192x6xbf16, #tpu.memory_space<vmem>>, %arg8: memref<1x6xf32, #tpu.memory_space<vmem>>, %arg9: memref<1x16x2x16x6xf32, #tpu.memory_space<vmem>>) attributes {dimension_semantics = [#tpu.dimension_semantics<parallel>, #tpu.dimension_semantics<parallel>], iteration_bounds = array<i64: 2, 1>, scalar_prefetch = 0 : i64, scratch_operands = 0 : i64, tpu.core_type = #tpu.core_type<tc>, window_params = [{transform_indices = @transform_0, window_bounds = array<i64: 1, 16, 16, 64>}, {transform_indices = @transform_1, window_bounds = array<i64: 1, 1, 16, 64>}, {transform_indices = @transform_2, window_bounds = array<i64: 1, 1, 16, 64>}, {pipeline_mode = #tpu.pipeline_mode<synchronous>, transform_indices = @transform_3, window_bounds = array<i64: 1, 64>}, {pipeline_mode = #tpu.pipeline_mode<synchronous>, transform_indices = @transform_4, window_bounds = array<i64: 1, 64>}, {pipeline_mode = #tpu.pipeline_mode<synchronous>, transform_indices = @transform_5, window_bounds = array<i64: 4, 192, 6>}, {pipeline_mode = #tpu.pipeline_mode<synchronous>, transform_indices = @transform_6, window_bounds = array<i64: 1, 6>}, {transform_indices = @transform_7, window_bounds = array<i64: 1, 16, 2, 16, 6>}]} {
    %c0 = arith.constant 0 : index
    %c0_0 = arith.constant 0 : index
    %0 = vector.load %arg5[%c0, %c0_0] : memref<1x64xf32, #tpu.memory_space<vmem>>, vector<1x64xf32>
    %c0_1 = arith.constant 0 : index
    %c0_2 = arith.constant 0 : index
    %1 = vector.load %arg6[%c0_1, %c0_2] : memref<1x64xf32, #tpu.memory_space<vmem>>, vector<1x64xf32>
    %c0_3 = arith.constant 0 : index
    %c0_4 = arith.constant 0 : index
    %c0_5 = arith.constant 0 : index
    %c0_6 = arith.constant 0 : index
    %2 = vector.load %arg2[%c0_3, %c0_4, %c0_5, %c0_6] : memref<1x16x16x64xbf16, #tpu.memory_space<vmem>>, vector<1x16x16x64xbf16>
    %3 = vector.shape_cast %2 : vector<1x16x16x64xbf16> to vector<16x16x64xbf16>
    %4 = arith.extf %3 : vector<16x16x64xbf16> to vector<16x16x64xf32>
    %5 = vector.shape_cast %0 : vector<1x64xf32> to vector<1x1x64xf32>
    %6 = vector.broadcast %5 : vector<1x1x64xf32> to vector<16x16x64xf32>
    %7 = arith.mulf %4, %6 : vector<16x16x64xf32>
    %8 = vector.shape_cast %1 : vector<1x64xf32> to vector<1x1x64xf32>
    %9 = vector.broadcast %8 : vector<1x1x64xf32> to vector<16x16x64xf32>
    %10 = arith.addf %7, %9 : vector<16x16x64xf32>
    %cst = arith.constant 0.000000e+00 : f32
    %11 = vector.broadcast %cst : f32 to vector<16x16x64xf32>
    %12 = arith.cmpf oge, %10, %11 : vector<16x16x64xf32>
    %cst_7 = arith.constant 2.000000e-01 : f32
    %13 = vector.broadcast %cst_7 : f32 to vector<16x16x64xf32>
    %14 = arith.mulf %13, %10 : vector<16x16x64xf32>
    %15 = arith.select %12, %10, %14 : vector<16x16x64xi1>, vector<16x16x64xf32>
    %c0_i32 = arith.constant 0 : i32
    %16 = arith.cmpi sgt, %arg1, %c0_i32 : i32
    %c0_8 = arith.constant 0 : index
    %c0_9 = arith.constant 0 : index
    %c0_10 = arith.constant 0 : index
    %c0_11 = arith.constant 0 : index
    %17 = vector.load %arg3[%c0_8, %c0_9, %c0_10, %c0_11] : memref<1x1x16x64xbf16, #tpu.memory_space<vmem>>, vector<1x1x16x64xbf16>
    %18 = vector.shape_cast %17 : vector<1x1x16x64xbf16> to vector<16x64xbf16>
    %19 = arith.extf %18 : vector<16x64xbf16> to vector<16x64xf32>
    %20 = vector.broadcast %0 : vector<1x64xf32> to vector<16x64xf32>
    %21 = arith.mulf %19, %20 : vector<16x64xf32>
    %22 = vector.broadcast %1 : vector<1x64xf32> to vector<16x64xf32>
    %23 = arith.addf %21, %22 : vector<16x64xf32>
    %cst_12 = arith.constant 0.000000e+00 : f32
    %24 = vector.broadcast %cst_12 : f32 to vector<16x64xf32>
    %25 = arith.cmpf oge, %23, %24 : vector<16x64xf32>
    %cst_13 = arith.constant 2.000000e-01 : f32
    %26 = vector.broadcast %cst_13 : f32 to vector<16x64xf32>
    %27 = arith.mulf %26, %23 : vector<16x64xf32>
    %28 = arith.select %25, %23, %27 : vector<16x64xi1>, vector<16x64xf32>
    %cst_14 = arith.constant 0.000000e+00 : f32
    %29 = vector.broadcast %cst_14 : f32 to vector<16x64xf32>
    %30 = arith.select %16, %28, %29 : vector<16x64xf32>
    %c0_i32_15 = arith.constant 0 : i32
    %31 = arith.cmpi slt, %arg1, %c0_i32_15 : i32
    %c0_16 = arith.constant 0 : index
    %c0_17 = arith.constant 0 : index
    %c0_18 = arith.constant 0 : index
    %c0_19 = arith.constant 0 : index
    %32 = vector.load %arg4[%c0_16, %c0_17, %c0_18, %c0_19] : memref<1x1x16x64xbf16, #tpu.memory_space<vmem>>, vector<1x1x16x64xbf16>
    %33 = vector.shape_cast %32 : vector<1x1x16x64xbf16> to vector<16x64xbf16>
    %34 = arith.extf %33 : vector<16x64xbf16> to vector<16x64xf32>
    %35 = vector.broadcast %0 : vector<1x64xf32> to vector<16x64xf32>
    %36 = arith.mulf %34, %35 : vector<16x64xf32>
    %37 = vector.broadcast %1 : vector<1x64xf32> to vector<16x64xf32>
    %38 = arith.addf %36, %37 : vector<16x64xf32>
    %cst_20 = arith.constant 0.000000e+00 : f32
    %39 = vector.broadcast %cst_20 : f32 to vector<16x64xf32>
    %40 = arith.cmpf oge, %38, %39 : vector<16x64xf32>
    %cst_21 = arith.constant 2.000000e-01 : f32
    %41 = vector.broadcast %cst_21 : f32 to vector<16x64xf32>
    %42 = arith.mulf %41, %38 : vector<16x64xf32>
    %43 = arith.select %40, %38, %42 : vector<16x64xi1>, vector<16x64xf32>
    %cst_22 = arith.constant 0.000000e+00 : f32
    %44 = vector.broadcast %cst_22 : f32 to vector<16x64xf32>
    %45 = arith.select %31, %43, %44 : vector<16x64xf32>
    %46 = vector.shape_cast %30 : vector<16x64xf32> to vector<1x16x64xf32>
    %47 = vector.shape_cast %45 : vector<16x64xf32> to vector<1x16x64xf32>
    %48 = tpu.concatenate %46, %15, %47 in 0 : vector<1x16x64xf32>, vector<16x16x64xf32>, vector<1x16x64xf32> -> vector<18x16x64xf32>
    %49 = arith.truncf %48 : vector<18x16x64xf32> to vector<18x16x64xbf16>
    %cst_23 = arith.constant 0.000000e+00 : bf16
    %50 = vector.broadcast %cst_23 : bf16 to vector<18x1x64xbf16>
    %51 = vector.extract_strided_slice %49 {offsets = [0, 0, 0], sizes = [18, 15, 64], strides = [1, 1, 1]} : vector<18x16x64xbf16> to vector<18x15x64xbf16>
    %52 = tpu.concatenate %50, %51 in 1 : vector<18x1x64xbf16>, vector<18x15x64xbf16> -> vector<18x16x64xbf16>
    %53 = vector.extract_strided_slice %49 {offsets = [0, 1, 0], sizes = [18, 15, 64], strides = [1, 1, 1]} : vector<18x16x64xbf16> to vector<18x15x64xbf16>
    %54 = tpu.concatenate %53, %50 in 1 : vector<18x15x64xbf16>, vector<18x1x64xbf16> -> vector<18x16x64xbf16>
    %55 = tpu.concatenate %52, %49, %54 in 2 : vector<18x16x64xbf16>, vector<18x16x64xbf16>, vector<18x16x64xbf16> -> vector<18x16x192xbf16>
    %56 = vector.shape_cast %55 : vector<18x16x192xbf16> to vector<288x192xbf16>
    %57 = vector.extract_strided_slice %56 {offsets = [0, 0], sizes = [256, 192], strides = [1, 1]} : vector<288x192xbf16> to vector<256x192xbf16>
    %58 = vector.extract_strided_slice %56 {offsets = [16, 0], sizes = [256, 192], strides = [1, 1]} : vector<288x192xbf16> to vector<256x192xbf16>
    %59 = vector.extract_strided_slice %56 {offsets = [32, 0], sizes = [256, 192], strides = [1, 1]} : vector<288x192xbf16> to vector<256x192xbf16>
    %c0_24 = arith.constant 0 : index
    %c0_25 = arith.constant 0 : index
    %60 = vector.load %arg8[%c0_24, %c0_25] : memref<1x6xf32, #tpu.memory_space<vmem>>, vector<1x6xf32>
    %c0_26 = arith.constant 0 : index
    %c0_27 = arith.constant 0 : index
    %c0_28 = arith.constant 0 : index
    %61 = vector.load %arg7[%c0_26, %c0_27, %c0_28] : memref<4x192x6xbf16, #tpu.memory_space<vmem>>, vector<1x192x6xbf16>
    %62 = vector.shape_cast %61 : vector<1x192x6xbf16> to vector<192x6xbf16>
    %cst_29 = arith.constant dense<0.000000e+00> : vector<256x6xf32>
    %63 = tpu.matmul %57, %62, %cst_29 {dimension_numbers = #tpu.dot_dimension_numbers<[1], [0], [0], [1], [0, 0, 1, 1], [], []>} : vector<256x192xbf16>, vector<192x6xbf16>, vector<256x6xf32> -> vector<256x6xf32>
    %c1 = arith.constant 1 : index
    %c0_30 = arith.constant 0 : index
    %c0_31 = arith.constant 0 : index
    %64 = vector.load %arg7[%c1, %c0_30, %c0_31] : memref<4x192x6xbf16, #tpu.memory_space<vmem>>, vector<1x192x6xbf16>
    %65 = vector.shape_cast %64 : vector<1x192x6xbf16> to vector<192x6xbf16>
    %cst_32 = arith.constant dense<0.000000e+00> : vector<256x6xf32>
    %66 = tpu.matmul %58, %65, %cst_32 {dimension_numbers = #tpu.dot_dimension_numbers<[1], [0], [0], [1], [0, 0, 1, 1], [], []>} : vector<256x192xbf16>, vector<192x6xbf16>, vector<256x6xf32> -> vector<256x6xf32>
    %67 = arith.addf %63, %66 : vector<256x6xf32>
    %68 = vector.broadcast %60 : vector<1x6xf32> to vector<256x6xf32>
    %69 = arith.addf %67, %68 : vector<256x6xf32>
    %c2 = arith.constant 2 : index
    %c0_33 = arith.constant 0 : index
    %c0_34 = arith.constant 0 : index
    %70 = vector.load %arg7[%c2, %c0_33, %c0_34] : memref<4x192x6xbf16, #tpu.memory_space<vmem>>, vector<1x192x6xbf16>
    %71 = vector.shape_cast %70 : vector<1x192x6xbf16> to vector<192x6xbf16>
    %cst_35 = arith.constant dense<0.000000e+00> : vector<256x6xf32>
    %72 = tpu.matmul %58, %71, %cst_35 {dimension_numbers = #tpu.dot_dimension_numbers<[1], [0], [0], [1], [0, 0, 1, 1], [], []>} : vector<256x192xbf16>, vector<192x6xbf16>, vector<256x6xf32> -> vector<256x6xf32>
    %c3 = arith.constant 3 : index
    %c0_36 = arith.constant 0 : index
    %c0_37 = arith.constant 0 : index
    %73 = vector.load %arg7[%c3, %c0_36, %c0_37] : memref<4x192x6xbf16, #tpu.memory_space<vmem>>, vector<1x192x6xbf16>
    %74 = vector.shape_cast %73 : vector<1x192x6xbf16> to vector<192x6xbf16>
    %cst_38 = arith.constant dense<0.000000e+00> : vector<256x6xf32>
    %75 = tpu.matmul %59, %74, %cst_38 {dimension_numbers = #tpu.dot_dimension_numbers<[1], [0], [0], [1], [0, 0, 1, 1], [], []>} : vector<256x192xbf16>, vector<192x6xbf16>, vector<256x6xf32> -> vector<256x6xf32>
    %76 = arith.addf %72, %75 : vector<256x6xf32>
    %77 = vector.broadcast %60 : vector<1x6xf32> to vector<256x6xf32>
    %78 = arith.addf %76, %77 : vector<256x6xf32>
    %79 = math.tanh %69 : vector<256x6xf32>
    %80 = math.tanh %78 : vector<256x6xf32>
    %81 = vector.shape_cast %79 : vector<256x6xf32> to vector<16x1x16x6xf32>
    %82 = vector.shape_cast %80 : vector<256x6xf32> to vector<16x1x16x6xf32>
    %83 = tpu.concatenate %81, %82 in 1 : vector<16x1x16x6xf32>, vector<16x1x16x6xf32> -> vector<16x2x16x6xf32>
    %c0_39 = arith.constant 0 : index
    %c0_40 = arith.constant 0 : index
    %c0_41 = arith.constant 0 : index
    %c0_42 = arith.constant 0 : index
    %c0_43 = arith.constant 0 : index
    %84 = vector.load %arg9[%c0_39, %c0_40, %c0_41, %c0_42, %c0_43] : memref<1x16x2x16x6xf32, #tpu.memory_space<vmem>>, vector<1x16x2x16x6xf32>
    %85 = vector.shape_cast %84 : vector<1x16x2x16x6xf32> to vector<16x2x16x6xf32>
    %86 = vector.shape_cast %83 : vector<16x2x16x6xf32> to vector<1x16x2x16x6xf32>
    tpu.vector_store %arg9[%c0_39, %c0_40, %c0_41, %c0_42, %c0_43], %86 {strides = array<i32>} : memref<1x16x2x16x6xf32, #tpu.memory_space<vmem>>, vector<1x16x2x16x6xf32>,
    return
  }
  func.func @transform_0(%arg0: i32, %arg1: i32) -> (i32, i32, i32, i32) {
    %c0_i32 = arith.constant 0 : i32
    %c0_i32_0 = arith.constant 0 : i32
    %c0_i32_1 = arith.constant 0 : i32
    return %arg0, %arg1, %c0_i32, %c0_i32_0 : i32, i32, i32, i32
  }
  func.func @transform_1(%arg0: i32, %arg1: i32) -> (i32, i32, i32, i32) {
    %c16_i32 = arith.constant 16 : i32
    %0 = arith.muli %arg1, %c16_i32 : i32
    %c1_i32 = arith.constant 1 : i32
    %1 = arith.subi %0, %c1_i32 : i32
    %c0_i32 = arith.constant 0 : i32
    %2 = arith.maxsi %1, %c0_i32 : i32
    %c0_i32_0 = arith.constant 0 : i32
    %c0_i32_1 = arith.constant 0 : i32
    %c0_i32_2 = arith.constant 0 : i32
    return %arg0, %2, %c0_i32_0, %c0_i32_1 : i32, i32, i32, i32
  }
  func.func @transform_2(%arg0: i32, %arg1: i32) -> (i32, i32, i32, i32) {
    %c1_i32 = arith.constant 1 : i32
    %0 = arith.addi %arg1, %c1_i32 : i32
    %c16_i32 = arith.constant 16 : i32
    %1 = arith.muli %0, %c16_i32 : i32
    %c15_i32 = arith.constant 15 : i32
    %2 = arith.minsi %1, %c15_i32 : i32
    %c0_i32 = arith.constant 0 : i32
    %c0_i32_0 = arith.constant 0 : i32
    %c0_i32_1 = arith.constant 0 : i32
    return %arg0, %2, %c0_i32, %c0_i32_0 : i32, i32, i32, i32
  }
  func.func @transform_3(%arg0: i32, %arg1: i32) -> (i32, i32) {
    %c0_i32 = arith.constant 0 : i32
    %c0_i32_0 = arith.constant 0 : i32
    %c0_i32_1 = arith.constant 0 : i32
    return %c0_i32, %c0_i32_0 : i32, i32
  }
  func.func @transform_4(%arg0: i32, %arg1: i32) -> (i32, i32) {
    %c0_i32 = arith.constant 0 : i32
    %c0_i32_0 = arith.constant 0 : i32
    %c0_i32_1 = arith.constant 0 : i32
    return %c0_i32, %c0_i32_0 : i32, i32
  }
  func.func @transform_5(%arg0: i32, %arg1: i32) -> (i32, i32, i32) {
    %c0_i32 = arith.constant 0 : i32
    %c0_i32_0 = arith.constant 0 : i32
    %c0_i32_1 = arith.constant 0 : i32
    %c0_i32_2 = arith.constant 0 : i32
    return %c0_i32, %c0_i32_0, %c0_i32_1 : i32, i32, i32
  }
  func.func @transform_6(%arg0: i32, %arg1: i32) -> (i32, i32) {
    %c0_i32 = arith.constant 0 : i32
    %c0_i32_0 = arith.constant 0 : i32
    %c0_i32_1 = arith.constant 0 : i32
    return %c0_i32, %c0_i32_0 : i32, i32
  }
  func.func @transform_7(%arg0: i32, %arg1: i32) -> (i32, i32, i32, i32, i32) {
    %c0_i32 = arith.constant 0 : i32
    %c0_i32_0 = arith.constant 0 : i32
    %c0_i32_1 = arith.constant 0 : i32
    %c0_i32_2 = arith.constant 0 : i32
    return %arg0, %arg1, %c0_i32, %c0_i32_0, %c0_i32_1 : i32, i32, i32, i32, i32
  }
}

</mosaic_0001>

<bundles_post_ra>
// kernel: generator_forward.5
= control target key start
LH: loop header
LB: loop body
LE: loop exit
PB: predicated region body
PF: predicated region fallthrough
CT: control target
= control target key end

     0   :  { %8 = vsyncpa [#allocation3], 0  ;;  %s318_s0 = inlined_call_operand.hbm [shape: f32[2,32], index: 0, kind: input, shape index: {}]   ;;  %s319_s1 = inlined_call_operand.hbm [shape: bf16[32,512], index: 1, kind: input, shape index: {}]   ;;  %s320_s2 = inlined_call_operand.vmem [shape: f32[1,512], index: 2, kind: input, shape index: {}]   ;;  %s321_s3 = inlined_call_operand.vmem [shape: f32[2,512], index: 3, kind: output, shape index: {}]  }
   0x1   :  { %s15_s14 = sshll.u32 %s318_s0, 4  ;;  %s16_s14 = int_to_ptr.hbm [resolvable:$true] %s15_s14 }
   0x2   :  { %9 = vsyncpa [#allocation5], 0  ;;  %s282_s15 = smov [#allocation2]   ;;  %s25_s19 = sshll.u32 %s319_s1, 4  ;;  %s26_s19 = int_to_ptr.hbm [resolvable:$true] %s25_s19 }
   0x3   :  { %s17_s16 = sshll.u32 %s282_s15, 4  ;;  %s283_s20 = smov [#allocation4]   ;;  %s18_s16 = int_to_ptr.vmem [resolvable:$true] %s17_s16 }
   0x4   :  { %20 = dma.hbm_to_vmem [thread:$0]  %s16_s14, 32, %s18_s16, [#allocation3]  }
   0x5   :  { %s27_s21 = sshll.u32 %s283_s20, 4  ;;  %s284_s22 = smov 256   ;;  %s28_s21 = int_to_ptr.vmem [resolvable:$true] %s27_s21 }
   0x6   :  { %s285_s23 = smov 16  }
   0x7   :  { %33 = dma.hbm_to_vmem [thread:$0]  %s26_s19, 1024, %s28_s21, [#allocation5], %s284_s22, %s284_s22, %s285_s23  }
   0x8   :  { %278 = dma.done.wait [#allocation3], 32  }
   0x9   :  { %279 = vsyncadd [#allocation3], 4294967264 }
   0xa   :  { %280 = dma.done.wait [#allocation5], 1024  }
   0xb   :  { %281 = vsyncadd [#allocation5], 4294966272  ;;  %v200_v0 = vld [vmem:[#allocation4 + $0x20] sm:$0xf]  ;;  %v224_v1 = vld [vmem:[#allocation4 + $0x2c] sm:$0xf0] }
   0xc   :  { %v222_v2 = vld [vmem:[#allocation4 + $0x24] sm:$0xf]  ;;  %v201_v3 = vor.u32 %v224_v1, %v200_v0  ;;  %v202_v4 = vld [vmem:[#allocation4 + $0x30] sm:$0xf0]  ;;  %v208_v5 = vld [vmem:[#allocation4 + $0x28] sm:$0xf] }
   0xd   :  { %v225_v6 = vld [vmem:[#allocation4 + $0x34] sm:$0xf0]  ;;  %v205_v7 = vor.u32 %v222_v2, %v202_v4  ;;  %v223_v9 = vld [vmem:[#allocation4 + $0x2c] sm:$0xf]  ;;  %v210_v10 = vld [vmem:[#allocation4 + $0x38] sm:$0xf0] }
   0xe   :  { %v209_v8 = vor.u32 %v225_v6, %v208_v5  ;;  %v184_v11 = vld [vmem:[#allocation4] sm:$0xf]  ;;  %115 = vmatpush.bf16.msra.mxu0 %v201_v3  ;;  %v213_v12 = vor.u32 %v223_v9, %v210_v10  ;;  %v220_v13 = vld [vmem:[#allocation4 + $0xc] sm:$0xf0]  ;;  %v218_v14 = vld [vmem:[#allocation4 + $0x4] sm:$0xf] }
   0xf   :  { %v186_v15 = vld [vmem:[#allocation4 + $0x10] sm:$0xf0]  ;;  %128 = vmatpush.bf16.msra.mxu1 %v205_v7  ;;  %v185_v16 = vor.u32 %v220_v13, %v184_v11  ;;  %v192_v18 = vld [vmem:[#allocation4 + $0x8] sm:$0xf]  ;;  %v221_v19 = vld [vmem:[#allocation4 + $0x14] sm:$0xf0] }
  0x10   :  { %141 = vmatpush.bf16.msra.mxu2 %v209_v8  ;;  %v189_v17 = vor.u32 %v218_v14, %v186_v15  ;;  %v219_v20 = vld [vmem:[#allocation4 + $0xc] sm:$0xf]  ;;  %154 = vmatpush.bf16.msra.mxu3 %v213_v12  ;;  %v193_v21 = vor.u32 %v221_v19, %v192_v18  ;;  %v194_v22 = vld [vmem:[#allocation4 + $0x18] sm:$0xf0]  ;;  %vm105_vm0 = vcmask 261120   ;;  %vm168_vm1 = vcmask 1041408  }
  0x11   :  { %v45_v23 = vld [vmem:[#allocation2] sm:$0x3]  ;;  %v197_v24 = vor.u32 %v219_v20, %v194_v22  ;;  %vm170_vm2 = vcmask 1045508   ;;  %vm172_vm3 = vcmask 1043456  }
  0x12   :  { %v46_v25 = vpack.c.bf16 %v45_v23, %v45_v23  ;;  %116 = vmatpush.bf16.msra.mxu0 %v185_v16  ;;  %v55_v26 = vld [vmem:[%s320_s2] sm:$0xf] }
  0x13   :  { %129 = vmatpush.bf16.msra.mxu1 %v189_v17  ;;  %v58_v28 = vperm.slane %v55_v26, 1  ;;  %v59_v30 = vperm.slane %v55_v26, 2  ;;  %v57_v31 = vperm.slane %v55_v26, 0  ;;  %v60_v33 = vperm.slane %v55_v26, 3 }
  0x14   :  { %142 = vmatpush.bf16.msra.mxu2 %v193_v21  ;;  %155 = vmatpush.bf16.msra.mxu3 %v197_v24 }
  0x15   :  { %214 = vmatmul.msk.bf16.vlgmr.msra.gmra.mxu0 %vm105_vm0, %v46_v25 }
  0x16   :  { %215 = vmatmul.msk.bf16.vlgmr.msra.gmra.mxu1 %vm105_vm0, %v46_v25 }
  0x17   :  { %216 = vmatmul.msk.bf16.vlgmr.msra.gmra.mxu2 %vm105_vm0, %v46_v25  ;;  %217 = vmatmul.msk.bf16.vlgmr.msra.gmra.mxu3 %vm105_vm0, %v46_v25 }
  0x92   :  { %v118_v27 = vpop.f32.mrf.mxu0 }
  0x93   :  { %v131_v29 = vpop.f32.mrf.mxu1  ;;  %v119_v38 = vadd.f32 %v118_v27, %v57_v31 }
  0x94   :  { %v132_v32 = vadd.f32 %v131_v29, %v58_v28 }
  0x96   :  { %v165_v39 = vrot.slane %v132_v32, 6 }
  0x98   :  { %v169_v44 = vsel %vm168_vm1, %v119_v38, %v165_v39 }
  0x9a   :  { %v144_v34 = vpop.f32.mrf.mxu2  ;;  %v157_v36 = vpop.f32.mrf.mxu3 }
  0x9b   :  { %v145_v35 = vadd.f32 %v144_v34, %v59_v30  ;;  %v120_v37 = vpop.f32.mrf.mxu0  ;;  %v158_v40 = vadd.f32 %v157_v36, %v60_v33  ;;  %v133_v41 = vpop.f32.mrf.mxu1 }
  0x9d   :  { %v166_v42 = vrot.slane %v145_v35, 4  ;;  %v167_v43 = vrot.slane %v158_v40, 2 }
  0x9f   :  { %v171_v45 = vsel %vm170_vm2, %v166_v42, %v167_v43 }
  0xa0   :  { %v173_v46 = vsel %vm172_vm3, %v169_v44, %v171_v45 }
  0xa1   :  { %175 = vst [vmem:[%s321_s3] sm:$0xff] %v173_v46 }
  0xa2   :  { %v146_v47 = vpop.f32.mrf.mxu2  ;;  %v159_v48 = vpop.f32.mrf.mxu3 }
  0xa3   :  { %180 = vsyncpa [#allocation3], 1 }
  0xa4   :  { %181 = vsyncpa [#allocation5], 1 }

// kernel: generator_forward.7
= control target key start
LH: loop header
LB: loop body
LE: loop exit
PB: predicated region body
PF: predicated region fallthrough
CT: control target
= control target key end

     0   :  { %15 = vsyncpa [#allocation3], 0  ;;  %s2703_s28 = smov 0   ;;  %s2705_s29 = smov 0   ;;  %s2884_s0 = inlined_call_operand.vmem [shape: bf16[2,4,4,128], index: 0, kind: input, shape index: {}, may-alias: {0,1,2}]   ;;  %s2885_s1 = inlined_call_operand.vmem [shape: bf16[2,4,4,128], index: 1, kind: input, shape index: {}, may-alias: {0,1,2}]   ;;  %s2886_s2 = inlined_call_operand.vmem [shape: bf16[2,4,4,128], index: 2, kind: input, shape index: {}, may-alias: {0,1,2}]   ;;  %s2887_s3 = inlined_call_operand.vmem [shape: f32[1,128], index: 3, kind: input, shape index: {}]   ;;  %s2888_s4 = inlined_call_operand.vmem [shape: f32[1,128], index: 4, kind: input, shape index: {}]   ;;  %s2889_s5 = inlined_call_operand.hbm [shape: bf16[4,384,128], index: 5, kind: input, shape index: {}]   ;;  %s2890_s6 = inlined_call_operand.vmem [shape: f32[1,128], index: 6, kind: input, shape index: {}]   ;;  %s2891_s7 = inlined_call_operand.vmem [shape: bf16[2,4,2,4,128], index: 7, kind: output, shape index: {0}]   ;;  %s2892_s8 = inlined_call_operand.vmem [shape: f32[2,1,1,64], index: 8, kind: output, shape index: {1}]   ;;  %s2893_s9 = inlined_call_operand.vmem [shape: f32[2,1,1,64], index: 9, kind: output, shape index: {2}]  }
   0x1   :  { %s2707_s30 = smov 0  }
   0x2 LB: > { %s2046_s10 = sadd.s32 4294967295, %s2646_s30   ;;  %s33_s11 = sadd.s32 1, %s2642_s29  ;;  %s2646_s30 = sphi %s2707_s30, %s21_s30   ;;  %s2642_s29 = sphi %s2705_s29, %s2899_s29   ;;  %s2638_s28 = sphi %s2703_s28, %s2898_s28  }
   0x3   : > { %p35_p0 = scmp.ge.s32.totalorder %s33_s11, 2  ;;  %p2048_p1 = scmp.ge.s32.totalorder %s2646_s30, 1 }
   0x4   : > { %p306_p2 = scmp.lt.s32.totalorder %s2646_s30, 3  ;;  %p2556_p4 = scmp.eq.s32.totalorder %s2046_s10, 0 }
   0x5   : > { %s2901_s11 = smov (%p35_p0, %s33_s11), 0  ;;  %s323_s14 = sshll.u32 %s2889_s5, 4  ;;  %s324_s14 = int_to_ptr.hbm [resolvable:$true] %s323_s14 }
   0x6   : > { %p307_p3 = pnand %p2048_p1, %p306_p2  ;;  %s2648_s15 = smov [#allocation2]  }
   0x7   : > { %s325_s16 = sshll.u32 %s2648_s15, 4  ;;  %s2649_s17 = smov 64   ;;  %s326_s16 = int_to_ptr.vmem [resolvable:$true] %s325_s16 }
   0x8   : > { %p2552_p5 = pneg %p307_p3  ;;  %s2650_s18 = smov 4  }
   0x9   : > { %395 = sbr.rel (%p307_p3) target bundleno = 401 (0x191), region = 48 }
   0xa   : > { %p2553_p6 = pnand %p2556_p4, %p2552_p5 }
   0xc   : > { %2555 = dma.hbm_to_vmem [thread:$0]  (!%p2553_p6), %s324_s14, 12288, %s326_s16, [#allocation3], %s2649_s17, %s2649_s17, %s2650_s18  }
   0xe   : > { %2633 = dma.done.wait (%p2556_p4), [#allocation3], 12288  }
   0xf   : > { %2635 = vsyncadd (%p2556_p4), [#allocation3], 4294955008  ;;  %v2483_v0 = vld [vmem:[#allocation2 + $0xf8] sm:$0xff]  ;;  %v2482_v4 = vld [vmem:[#allocation2 + $0xf0] sm:$0xff]  ;;  %p478_p7 = scmp.lt.s32.totalorder %s2638_s28, 1  ;;  %v2651_v26 = vmov 0.0|0.0  }
  0x10   : > { %v2491_v1 = vld [vmem:[#allocation2 + $0x138] sm:$0xff]  ;;  %1016 = vmatpush.bf16.msra.mxu0 %v2483_v0  ;;  %v2490_v5 = vld [vmem:[#allocation2 + $0x130] sm:$0xff]  ;;  %v2481_v8 = vld [vmem:[#allocation2 + $0xe8] sm:$0xff]  ;;  %v615_v27 = vunpack.c.l.b16 %v2651_v26  ;;  %vm702_vm4 = vcmask 1041408   ;;  %vm675_vm5 = vcmask 1040384   ;;  %vm733_vm8 = vcmask 1043456  }
  0x11   : > { %v2499_v2 = vld [vmem:[#allocation2 + $0x178] sm:$0xff]  ;;  %1030 = vmatpush.bf16.msra.mxu1 %v2491_v1  ;;  %v2498_v6 = vld [vmem:[#allocation2 + $0x170] sm:$0xff]  ;;  %v2489_v9 = vld [vmem:[#allocation2 + $0x128] sm:$0xff]  ;;  %s2903_s28 = smov (!%p478_p7, %s2638_s28), 1  ;;  %vm703_vm6 = vsmask.f32 1280 }
  0x12   : > { %v2459_v3 = vld [vmem:[#allocation2 + $0x38] sm:$0xff]  ;;  %1044 = vmatpush.bf16.msra.mxu2 %v2499_v2  ;;  %v2458_v7 = vld [vmem:[#allocation2 + $0x30] sm:$0xff]  ;;  %v2497_v10 = vld [vmem:[#allocation2 + $0x168] sm:$0xff]  ;;  %s2447_s19 = sshll.u32 %s2903_s28, 3  ;;  %v2742_v40 = vpack.c.b16 %v615_v27, %v615_v27  ;;  %vm676_vm7 = vsmask.f32 256  ;;  %s535_s17 = scalar_lea.vmem %s2892_s8, %s2903_s28 }
  0x13   : > { %1215 = vmatpush.bf16.msra.mxu3 %v2459_v3  ;;  %v2457_v11 = vld [vmem:[#allocation2 + $0x28] sm:$0xff]  ;;  %v2480_v12 = vld [vmem:[#allocation2 + $0xe0] sm:$0xff]  ;;  %s485_s22 = scalar_lea.vmem %s2884_s0, %s2447_s19  ;;  %v2479_v16 = vld [vmem:[#allocation2 + $0xd8] sm:$0xff]  ;;  %s2451_s2 = sshll.u32 %s2903_s28, 4  ;;  %vm1827_vm11 = vcmask 516096  }
  0x14   : > { %1017 = vmatpush.bf16.msra.mxu0 %v2482_v4  ;;  %v2488_v13 = vld [vmem:[#allocation2 + $0x120] sm:$0xff]  ;;  %v2487_v17 = vld [vmem:[#allocation2 + $0x118] sm:$0xff]  ;;  %v2478_v20 = vld [vmem:[#allocation2 + $0xd0] sm:$0xff]  ;;  %v628_v56 = vshrl.u32 %v2742_v40, 16  ;;  %v631_v62 = vshll.u32 %v2742_v40, 16  ;;  %s2857_s13 = scalar_lea.vmem %s2891_s7, %s2451_s2  ;;  %s2652_s14 = smov 64  }
  0x15   : > { %1031 = vmatpush.bf16.msra.mxu1 %v2490_v5  ;;  %v2496_v14 = vld [vmem:[#allocation2 + $0x160] sm:$0xff]  ;;  %v2495_v18 = vld [vmem:[#allocation2 + $0x158] sm:$0xff]  ;;  %v2486_v28 = vld [vmem:[#allocation2 + $0x110] sm:$0xff]  ;;  %s541_s20 = scalar_lea.vmem %s2893_s9, %s2903_s28 }
  0x16   : > { %1045 = vmatpush.bf16.msra.mxu2 %v2498_v6  ;;  %v2456_v15 = vld [vmem:[#allocation2 + $0x20] sm:$0xff]  ;;  %v2455_v19 = vld [vmem:[#allocation2 + $0x18] sm:$0xff]  ;;  %v2494_v34 = vld [vmem:[#allocation2 + $0x150] sm:$0xff] }
  0x17   : > { %1216 = vmatpush.bf16.msra.mxu3 %v2458_v7  ;;  %v545_v21 = vld [vmem:[%s485_s22] sm:$0x3]  ;;  %v546_v22 = vld [vmem:[%s485_s22 + $0x2] sm:$0x3]  ;;  %v547_v23 = vld [vmem:[%s485_s22 + $0x4] sm:$0x3] }
  0x18   : > { %1018 = vmatpush.bf16.msra.mxu0 %v2481_v8  ;;  %v548_v24 = vld [vmem:[%s485_s22 + $0x6] sm:$0x3]  ;;  %v549_v25 = vunpack.c.l.bf16 %v545_v21  ;;  %v550_v29 = vunpack.c.l.bf16 %v546_v22  ;;  %v551_v30 = vunpack.c.l.bf16 %v547_v23  ;;  %v2587_v32 = vld [vmem:[%s2887_s3] ss:$0 sm:$0xff]  ;;  %v2454_v35 = vld [vmem:[#allocation2 + $0x10] sm:$0xff] }
  0x19   : > { %1032 = vmatpush.bf16.msra.mxu1 %v2489_v9  ;;  %v552_v31 = vunpack.c.l.bf16 %v548_v24  ;;  %v2588_v33 = vld [vmem:[%s2888_s4] ss:$0 sm:$0xff]  ;;  %v2477_v41 = vld [vmem:[#allocation2 + $0xc8] sm:$0xff]  ;;  %v2476_v52 = vld [vmem:[#allocation2 + $0xc0] sm:$0xff] }
  0x1a   : > { %1046 = vmatpush.bf16.msra.mxu2 %v2497_v10  ;;  %v556_v36 = vmul.f32 %v2587_v32, %v549_v25  ;;  %v557_v37 = vmul.f32 %v2587_v32, %v550_v29  ;;  %v558_v38 = vmul.f32 %v2587_v32, %v551_v30  ;;  %v2485_v42 = vld [vmem:[#allocation2 + $0x108] sm:$0xff]  ;;  %v2484_v53 = vld [vmem:[#allocation2 + $0x100] sm:$0xff]  ;;  %v2467_v63 = vld [vmem:[#allocation2 + $0x78] sm:$0xff]  ;;  %v2762_v10 = vrot.slane %v628_v56, 7 }
  0x1b   : > { %1217 = vmatpush.bf16.msra.mxu3 %v2457_v11  ;;  %v559_v39 = vmul.f32 %v2587_v32, %v552_v31  ;;  %v2493_v46 = vld [vmem:[#allocation2 + $0x148] sm:$0xff]  ;;  %v2492_v57 = vld [vmem:[#allocation2 + $0x140] sm:$0xff]  ;;  %v2475_v0 = vld [vmem:[#allocation2 + $0xb8] sm:$0xff] }
  0x1c   : > { %1019 = vmatpush.bf16.msra.mxu0 %v2480_v12  ;;  %v563_v43 = vadd.f32 %v2588_v33, %v556_v36  ;;  %v564_v44 = vadd.f32 %v2588_v33, %v557_v37  ;;  %v565_v45 = vadd.f32 %v2588_v33, %v558_v38  ;;  %v2453_v47 = vld [vmem:[#allocation2 + $0x8] sm:$0xff]  ;;  %v2452_v58 = vld [vmem:[#allocation2] sm:$0xff]  ;;  %v2531_v4 = vld [vmem:[#allocation2 + $0x278] sm:$0xff] }
  0x1d   : > { %1033 = vmatpush.bf16.msra.mxu1 %v2488_v13  ;;  %v566_v48 = vadd.f32 %v2588_v33, %v559_v39  ;;  %v2539_v5 = vld [vmem:[#allocation2 + $0x2b8] sm:$0xff]  ;;  %v2530_v21 = vld [vmem:[#allocation2 + $0x270] sm:$0xff]  ;;  %vm2775_vm9 = vmand %vm675_vm5, %vm676_vm7 }
  0x1e   : > { %1047 = vmatpush.bf16.msra.mxu2 %v2496_v14  ;;  %vm567_vm0 = vcmp.ge.f32.partialorder %v563_v43, 0.0  ;;  %vm568_vm1 = vcmp.ge.f32.partialorder %v564_v44, 0.0  ;;  %vm569_vm2 = vcmp.ge.f32.partialorder %v565_v45, 0.0  ;;  %v571_v49 = vmul.f32 0.2, %v563_v43  ;;  %v2538_v22 = vld [vmem:[#allocation2 + $0x2b0] sm:$0xff]  ;;  %vm2781_vm10 = vmand %vm702_vm4, %vm703_vm6 }
  0x1f   : > { %1218 = vmatpush.bf16.msra.mxu3 %v2456_v15  ;;  %vm570_vm3 = vcmp.ge.f32.partialorder %v566_v48, 0.0  ;;  %v572_v50 = vmul.f32 0.2, %v564_v44  ;;  %v573_v51 = vmul.f32 0.2, %v565_v45  ;;  %v2768_v14 = vrot.slane %v631_v62, 1 }
  0x20   : > { %1020 = vmatpush.bf16.msra.mxu0 %v2479_v16  ;;  %v574_v54 = vmul.f32 0.2, %v566_v48  ;;  %v575_v55 = vsel %vm567_vm0, %v563_v43, %v571_v49  ;;  %v2466_v15 = vld [vmem:[#allocation2 + $0x70] sm:$0xff]  ;;  %v2465_v37 = vld [vmem:[#allocation2 + $0x68] sm:$0xff] }
  0x21   : > { %1034 = vmatpush.bf16.msra.mxu1 %v2487_v17  ;;  %v576_v59 = vsel %vm568_vm1, %v564_v44, %v572_v50  ;;  %v577_v60 = vsel %vm569_vm2, %v565_v45, %v573_v51  ;;  %v2747_v61 = vpack.c.bf16 %v575_v55, %v575_v55  ;;  %v2474_v16 = vld [vmem:[#allocation2 + $0xb0] sm:$0xff]  ;;  %v2473_v38 = vld [vmem:[#allocation2 + $0xa8] sm:$0xff]  ;;  %v2547_v44 = vld [vmem:[#allocation2 + $0x2f8] sm:$0xff] }
  0x22   : > { %1048 = vmatpush.bf16.msra.mxu2 %v2495_v18  ;;  %v578_v1 = vsel %vm570_vm3, %v566_v48, %v574_v54  ;;  %v2751_v2 = vpack.c.bf16 %v576_v59, %v576_v59  ;;  %v2753_v3 = vpack.c.bf16 %v577_v60, %v577_v60  ;;  %v2529_v45 = vld [vmem:[#allocation2 + $0x268] sm:$0xff]  ;;  %v2464_v60 = vld [vmem:[#allocation2 + $0x60] sm:$0xff] }
  0x23   : > { %1219 = vmatpush.bf16.msra.mxu3 %v2455_v19  ;;  %v2755_v6 = vpack.c.bf16 %v578_v1, %v578_v1  ;;  %v616_v7 = vunpack.c.l.b16 %v2747_v61  ;;  %v719_v13 = vrot.slane %v2747_v61, 6 }
  0x24   : > { %1021 = vmatpush.bf16.msra.mxu0 %v2478_v20  ;;  %v617_v8 = vunpack.c.l.b16 %v2751_v2  ;;  %v618_v9 = vunpack.c.l.b16 %v2753_v3  ;;  %v721_v19 = vrot.slane %v2751_v2, 6  ;;  %v723_v20 = vrot.slane %v2753_v3, 6  ;;  %v2527_v3 = vld [vmem:[#allocation2 + $0x258] sm:$0xff] }
  0x25   : > { %1035 = vmatpush.bf16.msra.mxu1 %v2486_v28  ;;  %v619_v11 = vunpack.c.l.b16 %v2755_v6  ;;  %v622_v12 = vpack.c.b16 %v616_v7, %v616_v7  ;;  %v725_v27 = vrot.slane %v2755_v6, 6  ;;  %v2528_v6 = vld [vmem:[#allocation2 + $0x260] sm:$0xff] }
  0x26   : > { %1049 = vmatpush.bf16.msra.mxu2 %v2494_v34  ;;  %v623_v17 = vpack.c.b16 %v617_v8, %v617_v8  ;;  %v624_v18 = vpack.c.b16 %v618_v9, %v618_v9  ;;  %v2536_v7 = vld [vmem:[#allocation2 + $0x2a0] sm:$0xff] }
  0x27   : > { %1220 = vmatpush.bf16.msra.mxu3 %v2454_v35  ;;  %v625_v23 = vpack.c.b16 %v619_v11, %v619_v11  ;;  %v635_v24 = vshrl.u32 %v622_v12, 16  ;;  %v638_v25 = vshll.u32 %v622_v12, 16 }
  0x28   : > { %1022 = vmatpush.bf16.msra.mxu0 %v2477_v41  ;;  %v642_v28 = vshrl.u32 %v623_v17, 16  ;;  %v645_v29 = vshll.u32 %v623_v17, 16  ;;  %v649_v30 = vshrl.u32 %v624_v18, 16  ;;  %v652_v31 = vshll.u32 %v624_v18, 16 }
  0x29   : > { %1036 = vmatpush.bf16.msra.mxu1 %v2485_v42  ;;  %v637_v32 = vrot.slane %v635_v24, 7  ;;  %v656_v33 = vshrl.u32 %v625_v23, 16  ;;  %v659_v34 = vshll.u32 %v625_v23, 16  ;;  %v686_v36 = vrot.slane %v638_v25, 1 }
  0x2a   : > { %1050 = vmatpush.bf16.msra.mxu2 %v2493_v46  ;;  %v644_v39 = vrot.slane %v642_v28, 7  ;;  %v651_v41 = vrot.slane %v649_v30, 7  ;;  %v688_v42 = vrot.slane %v645_v29, 1  ;;  %v690_v43 = vrot.slane %v652_v31, 1  ;;  %v2537_v46 = vld [vmem:[#allocation2 + $0x2a8] sm:$0xff] }
  0x2b   : > { %1221 = vmatpush.bf16.msra.mxu3 %v2453_v47  ;;  %v640_v47 = vor.u32 %v638_v25, %v637_v32  ;;  %v658_v48 = vrot.slane %v656_v33, 7  ;;  %v687_v49 = vor.u32 %v686_v36, %v635_v24  ;;  %v692_v50 = vrot.slane %v659_v34, 1  ;;  %v2533_v36 = vld [vmem:[#allocation2 + $0x288] sm:$0xff] }
  0x2c   : > { %1023 = vmatpush.bf16.msra.mxu0 %v2476_v52  ;;  %v647_v51 = vor.u32 %v645_v29, %v644_v39  ;;  %v654_v52 = vor.u32 %v652_v31, %v651_v41  ;;  %v691_v54 = vor.u32 %v690_v43, %v649_v30  ;;  %v685_v25 = vor.u32 %v2768_v14, %v628_v56  ;;  %v2470_v29 = vld [vmem:[#allocation2 + $0x90] sm:$0xff]  ;;  %v2460_v39 = vld [vmem:[#allocation2 + $0x40] sm:$0xff] }
  0x2d   : > { %1037 = vmatpush.bf16.msra.mxu1 %v2484_v53  ;;  %v689_v53 = vor.u32 %v688_v42, %v642_v28  ;;  %v661_v55 = vor.u32 %v659_v34, %v658_v48  ;;  %v706_v59 = vsel %vm2781_vm10, %v687_v49, 0  ;;  %v2462_v28 = vld [vmem:[#allocation2 + $0x50] sm:$0xff]  ;;  %v717_v31 = vrot.slane %v2651_v26, 6  ;;  %v2525_v34 = vld [vmem:[#allocation2 + $0x248] sm:$0xff]  ;;  %v2468_v41 = vld [vmem:[#allocation2 + $0x80] sm:$0xff] }
  0x2e   : > { %1051 = vmatpush.bf16.msra.mxu2 %v2492_v57  ;;  %v679_v57 = vsel %vm2775_vm9, 0, %v640_v47  ;;  %v681_v1 = vsel %vm2775_vm9, 0, %v654_v52  ;;  %v720_v11 = vrot.slane %v706_v59, 4  ;;  %v705_v30 = vsel %vm2781_vm10, %v685_v25, 0  ;;  %v2526_v56 = vld [vmem:[#allocation2 + $0x250] sm:$0xff]  ;;  %v2524_v42 = vld [vmem:[#allocation2 + $0x240] sm:$0xff] }
  0x2f   : > { %1222 = vmatpush.bf16.msra.mxu3 %v2452_v58  ;;  %v693_v58 = vor.u32 %v692_v50, %v656_v33  ;;  %v682_v8 = vsel %vm2775_vm9, 0, %v661_v55  ;;  %v738_v17 = vsel %vm702_vm4, %v679_v57, %v719_v13  ;;  %v748_v23 = vsel %vm702_vm4, %v681_v1, %v723_v20  ;;  %v2463_v13 = vld [vmem:[#allocation2 + $0x58] sm:$0xff]  ;;  %v2534_v14 = vld [vmem:[#allocation2 + $0x290] sm:$0xff]  ;;  %v2469_v33 = vld [vmem:[#allocation2 + $0x88] sm:$0xff] }
  0x30   : > { %1229 = vmatpush.bf16.msrb.mxu0 %v2467_v63  ;;  %v2472_v63 = vld [vmem:[#allocation2 + $0xa0] sm:$0xff]  ;;  %v753_v24 = vsel %vm702_vm4, %v682_v8, %v725_v27  ;;  %v2535_v20 = vld [vmem:[#allocation2 + $0x298] sm:$0xff]  ;;  %v633_v27 = vor.u32 %v631_v62, %v2762_v10  ;;  %v718_v40 = vrot.slane %v705_v30, 4  ;;  %v2461_v62 = vld [vmem:[#allocation2 + $0x48] sm:$0xff] }
  0x31   : > { %1243 = vmatpush.bf16.msrb.mxu1 %v2475_v0  ;;  %v680_v0 = vsel %vm2775_vm9, 0, %v647_v51  ;;  %v709_v9 = vsel %vm2781_vm10, %v693_v58, 0  ;;  %v2532_v43 = vld [vmem:[#allocation2 + $0x280] sm:$0xff]  ;;  %v2546_v47 = vld [vmem:[#allocation2 + $0x2f0] sm:$0xff]  ;;  %v2523_v49 = vld [vmem:[#allocation2 + $0x238] sm:$0xff] }
  0x32   : > { %1517 = vmatpush.bf16.msrb.mxu2 %v2531_v4  ;;  %v707_v4 = vsel %vm2781_vm10, %v689_v53, 0  ;;  %v743_v18 = vsel %vm702_vm4, %v680_v0, %v721_v19  ;;  %v2471_v19 = vld [vmem:[#allocation2 + $0x98] sm:$0xff]  ;;  %v678_v32 = vsel %vm2775_vm9, 0, %v633_v27  ;;  %v2506_v48 = vld [vmem:[#allocation2 + $0x1b0] sm:$0xff]  ;;  %v2545_v51 = vld [vmem:[#allocation2 + $0x2e8] sm:$0xff] }
  0x33   : > { %1531 = vmatpush.bf16.msrb.mxu3 %v2539_v5  ;;  %v708_v5 = vsel %vm2781_vm10, %v691_v54, 0  ;;  %v722_v12 = vrot.slane %v707_v4, 4  ;;  %v732_v10 = vsel %vm702_vm4, %v678_v32, %v717_v31  ;;  %v2514_v50 = vld [vmem:[#allocation2 + $0x1f0] sm:$0xff]  ;;  %v2505_v57 = vld [vmem:[#allocation2 + $0x1a8] sm:$0xff]  ;;  %v2544_v59 = vld [vmem:[#allocation2 + $0x2e0] sm:$0xff] }
  0x34   : > { %1230 = vmatpush.bf16.msrb.mxu0 %v2466_v15  ;;  %v724_v15 = vrot.slane %v708_v5, 4  ;;  %v735_v35 = vsel %vm733_vm8, %v732_v10, %v718_v40  ;;  %v2522_v55 = vld [vmem:[#allocation2 + $0x230] sm:$0xff]  ;;  %v2513_v58 = vld [vmem:[#allocation2 + $0x1e8] sm:$0xff]  ;;  %v2512_v0 = vld [vmem:[#allocation2 + $0x1e0] sm:$0xff] }
  0x35   : > { %1244 = vmatpush.bf16.msrb.mxu1 %v2474_v16  ;;  %v726_v16 = vrot.slane %v709_v9, 4  ;;  %v2543_v1 = vld [vmem:[#allocation2 + $0x2d8] sm:$0xff]  ;;  %v2520_v4 = vld [vmem:[#allocation2 + $0x220] sm:$0xff]  ;;  %v2542_v8 = vld [vmem:[#allocation2 + $0x2d0] sm:$0xff] }
  0x36   : > { %1518 = vmatpush.bf16.msrb.mxu2 %v2530_v21  ;;  %v2808_v21 = vsel %vm733_vm8, %v738_v17, %v720_v11  ;;  %v2818_v61 = vsel %vm733_vm8, %v748_v23, %v724_v15  ;;  %v2503_v5 = vld [vmem:[#allocation2 + $0x198] sm:$0xff]  ;;  %v2502_v15 = vld [vmem:[#allocation2 + $0x190] sm:$0xff]  ;;  %v2541_v17 = vld [vmem:[#allocation2 + $0x2c8] sm:$0xff] }
  0x37   : > { %1532 = vmatpush.bf16.msrb.mxu3 %v2538_v22  ;;  %v2811_v22 = vsel %vm733_vm8, %v743_v18, %v722_v12  ;;  %v2821_v2 = vsel %vm733_vm8, %v753_v24, %v726_v16  ;;  %859 = vst [vmem:[#allocation1] ss:$4 sm:$0xff] %v2808_v21  ;;  %v2519_v12 = vld [vmem:[#allocation2 + $0x218] sm:$0xff]  ;;  %v2510_v16 = vld [vmem:[#allocation2 + $0x1d0] sm:$0xff]  ;;  %v2501_v23 = vld [vmem:[#allocation2 + $0x188] sm:$0xff] }
  0x38   : > { %1231 = vmatpush.bf16.msrb.mxu0 %v2465_v37  ;;  %861 = vst [vmem:[#allocation1 + $0x1] ss:$4 sm:$0xff] %v2811_v22  ;;  %v2518_v18 = vld [vmem:[#allocation2 + $0x210] sm:$0xff]  ;;  %v2509_v24 = vld [vmem:[#allocation2 + $0x1c8] sm:$0xff] }
  0x39   : > { %1245 = vmatpush.bf16.msrb.mxu1 %v2473_v38  ;;  %863 = vst [vmem:[#allocation1 + $0x2] ss:$4 sm:$0xff] %v2818_v61 }
  0x3a   : > { %1519 = vmatpush.bf16.msrb.mxu2 %v2529_v45  ;;  %865 = vst [vmem:[#allocation1 + $0x3] ss:$4 sm:$0xff] %v2821_v2  ;;  %v2507_v45 = vld [vmem:[#allocation2 + $0x1b8] sm:$0xff] }
  0x3b   : > { %1533 = vmatpush.bf16.msrb.mxu3 %v2537_v46  ;;  %v2515_v46 = vld [vmem:[#allocation2 + $0x1f8] sm:$0xff] }
  0x3c   : > { %1232 = vmatpush.bf16.msrb.mxu0 %v2464_v60  ;;  %v2521_v60 = vld [vmem:[#allocation2 + $0x228] sm:$0xff] }
  0x3d   : > { %1246 = vmatpush.bf16.msrb.mxu1 %v2472_v63  ;;  %v2504_v63 = vld [vmem:[#allocation2 + $0x1a0] sm:$0xff] }
  0x3e   : > { %1520 = vmatpush.bf16.msrb.mxu2 %v2528_v6  ;;  %v2511_v6 = vld [vmem:[#allocation2 + $0x1d8] sm:$0xff] }
  0x3f   : > { %1534 = vmatpush.bf16.msrb.mxu3 %v2536_v7 }
  0x40   : > { %1233 = vmatpush.bf16.msrb.mxu0 %v2463_v13  ;;  %v2540_v13 = vld [vmem:[#allocation2 + $0x2c0] sm:$0xff] }
  0x41   : > { %1247 = vmatpush.bf16.msrb.mxu1 %v2471_v19  ;;  %v866_v37 = vld.sshfl [vmem:[#allocation1] sm:$0xff pattern:$0x73625140]  ;;  %v867_v38 = vld.sshfl [vmem:[#allocation1 + $0x8] sm:$0xff pattern:$0x73625140] }
  0x42   : > { %1521 = vmatpush.bf16.msrb.mxu2 %v2527_v3  ;;  %1024 = vmatmul.bf16.vlgmr.msra.gmra.mxu0 %v866_v37  ;;  %v868_v26 = vld.sshfl [vmem:[#allocation1 + $0x10] sm:$0xff pattern:$0x73625140]  ;;  %v2500_v19 = vld [vmem:[#allocation2 + $0x180] sm:$0xff] }
  0x43   : > { %1535 = vmatpush.bf16.msrb.mxu3 %v2535_v20  ;;  %1038 = vmatmul.bf16.vlgmr.msra.gmra.mxu1 %v867_v38  ;;  %1060 = vst [vmem:[#allocation1 + $0x1] ss:$4 sm:$0xff] %v2808_v21 }
  0x44   : > { %1234 = vmatpush.bf16.msrb.mxu0 %v2462_v28  ;;  %1052 = vmatmul.bf16.vlgmr.msra.gmra.mxu2 %v868_v26  ;;  %1062 = vst [vmem:[#allocation1 + $0x2] ss:$4 sm:$0xff] %v2811_v22 }
  0x45   : > { %1248 = vmatpush.bf16.msrb.mxu1 %v2470_v29  ;;  %1064 = vst [vmem:[#allocation1 + $0x3] ss:$4 sm:$0xff] %v2818_v61 }
  0x46   : > { %1522 = vmatpush.bf16.msrb.mxu2 %v2526_v56  ;;  %1058 = vst [vmem:[#allocation1] ss:$4 sm:$0xff] %v735_v35 }
  0x47   : > { %1536 = vmatpush.bf16.msrb.mxu3 %v2534_v14 }
  0x48   : > { %1235 = vmatpush.bf16.msrb.mxu0 %v2461_v62 }
  0x49   : > { %1249 = vmatpush.bf16.msrb.mxu1 %v2469_v33 }
  0x4a   : > { %1523 = vmatpush.bf16.msrb.mxu2 %v2525_v34 }
  0x4b   : > { %1537 = vmatpush.bf16.msrb.mxu3 %v2533_v36  ;;  %v2589_v36 = vld [vmem:[%s2890_s6] ss:$0 sm:$0xff] }
  0x4c   : > { %1236 = vmatpush.bf16.msrb.mxu0 %v2460_v39 }
  0x4d   : > { %1250 = vmatpush.bf16.msrb.mxu1 %v2468_v41  ;;  %v1065_v52 = vld.sshfl [vmem:[#allocation1] sm:$0xff pattern:$0x73625140]  ;;  %v1066_v53 = vld.sshfl [vmem:[#allocation1 + $0x8] sm:$0xff pattern:$0x73625140] }
  0x4e   : > { %1524 = vmatpush.bf16.msrb.mxu2 %v2524_v42  ;;  %1223 = vmatmul.bf16.vlgmr.msra.gmra.mxu3 %v1065_v52  ;;  %v1067_v54 = vld.sshfl [vmem:[#allocation1 + $0x10] sm:$0xff pattern:$0x73625140] }
  0x4f   : > { %1538 = vmatpush.bf16.msrb.mxu3 %v2532_v43  ;;  %1360 = vst [vmem:[#allocation1] ss:$4 sm:$0xff] %v2811_v22 }
  0x50   : > { %1545 = vmatpush.bf16.msra.mxu0 %v2547_v44  ;;  %1362 = vst [vmem:[#allocation1 + $0x1] ss:$4 sm:$0xff] %v2818_v61 }
  0x51   : > { %1716 = vmatpush.bf16.msra.mxu1 %v2507_v45  ;;  %1364 = vst [vmem:[#allocation1 + $0x2] ss:$4 sm:$0xff] %v2821_v2 }
  0x52   : > { %1730 = vmatpush.bf16.msra.mxu2 %v2515_v46  ;;  %1237 = vmatmul.bf16.vlgmr.msrb.gmra.mxu0 %v1066_v53  ;;  %1366 = vst [vmem:[#allocation1 + $0x3] ss:$4 sm:$0xff] %v735_v35 }
  0x53   : > { %1744 = vmatpush.bf16.msra.mxu3 %v2523_v49  ;;  %1251 = vmatmul.bf16.vlgmr.msrb.gmra.mxu1 %v1067_v54 }
  0x54   : > { %1546 = vmatpush.bf16.msra.mxu0 %v2546_v47 }
  0x55   : > { %1717 = vmatpush.bf16.msra.mxu1 %v2506_v48 }
  0x56   : > { %1731 = vmatpush.bf16.msra.mxu2 %v2514_v50 }
  0x57   : > { %1745 = vmatpush.bf16.msra.mxu3 %v2522_v55 }
  0x58   : > { %1547 = vmatpush.bf16.msra.mxu0 %v2545_v51 }
  0x59   : > { %1718 = vmatpush.bf16.msra.mxu1 %v2505_v57  ;;  %v1367_v7 = vld.sshfl [vmem:[#allocation1] sm:$0xff pattern:$0x73625140]  ;;  %v1368_v9 = vld.sshfl [vmem:[#allocation1 + $0x8] sm:$0xff pattern:$0x73625140] }
  0x5a   : > { %1732 = vmatpush.bf16.msra.mxu2 %v2513_v58  ;;  %v1369_v11 = vld.sshfl [vmem:[#allocation1 + $0x10] sm:$0xff pattern:$0x73625140] }
  0x5b   : > { %1746 = vmatpush.bf16.msra.mxu3 %v2521_v60  ;;  %1525 = vmatmul.bf16.vlgmr.msrb.gmra.mxu2 %v1367_v7  ;;  %1559 = vst [vmem:[#allocation1] ss:$4 sm:$0xff] %v2808_v21  ;;  %v2517_v21 = vld [vmem:[#allocation2 + $0x208] sm:$0xff] }
  0x5c   : > { %1548 = vmatpush.bf16.msra.mxu0 %v2544_v59  ;;  %1561 = vst [vmem:[#allocation1 + $0x1] ss:$4 sm:$0xff] %v2811_v22  ;;  %v2508_v22 = vld [vmem:[#allocation2 + $0x1c0] sm:$0xff] }
  0x5d   : > { %1719 = vmatpush.bf16.msra.mxu1 %v2504_v63  ;;  %1563 = vst [vmem:[#allocation1 + $0x2] ss:$4 sm:$0xff] %v2818_v61  ;;  %v2516_v61 = vld [vmem:[#allocation2 + $0x200] sm:$0xff] }
  0x5e   : > { %1733 = vmatpush.bf16.msra.mxu2 %v2512_v0  ;;  %1539 = vmatmul.bf16.vlgmr.msrb.gmra.mxu3 %v1368_v9  ;;  %1565 = vst [vmem:[#allocation1 + $0x3] ss:$4 sm:$0xff] %v2821_v2 }
  0x5f   : > { %1747 = vmatpush.bf16.msra.mxu3 %v2520_v4 }
  0x60   : > { %1549 = vmatpush.bf16.msra.mxu0 %v2543_v1 }
  0x61   : > { %1720 = vmatpush.bf16.msra.mxu1 %v2503_v5 }
  0x62   : > { %1734 = vmatpush.bf16.msra.mxu2 %v2511_v6 }
  0x63   : > { %1748 = vmatpush.bf16.msra.mxu3 %v2519_v12 }
  0x64   : > { %1550 = vmatpush.bf16.msra.mxu0 %v2542_v8 }
  0x65   : > { %1721 = vmatpush.bf16.msra.mxu1 %v2502_v15  ;;  %v1566_v3 = vld.sshfl [vmem:[#allocation1] sm:$0xff pattern:$0x73625140]  ;;  %v1567_v2 = vld.sshfl [vmem:[#allocation1 + $0x8] sm:$0xff pattern:$0x73625140] }
  0x66   : > { %1735 = vmatpush.bf16.msra.mxu2 %v2510_v16  ;;  %v1568_v20 = vld.sshfl [vmem:[#allocation1 + $0x10] sm:$0xff pattern:$0x73625140] }
  0x67   : > { %1749 = vmatpush.bf16.msra.mxu3 %v2518_v18 }
  0x68   : > { %1551 = vmatpush.bf16.msra.mxu0 %v2541_v17 }
  0x69   : > { %1722 = vmatpush.bf16.msra.mxu1 %v2501_v23 }
  0x6a   : > { %1736 = vmatpush.bf16.msra.mxu2 %v2509_v24 }
  0x6b   : > { %1750 = vmatpush.bf16.msra.mxu3 %v2517_v21 }
  0x6c   : > { %1552 = vmatpush.bf16.msra.mxu0 %v2540_v13 }
  0x6d   : > { %1723 = vmatpush.bf16.msra.mxu1 %v2500_v19 }
  0x6e   : > { %1737 = vmatpush.bf16.msra.mxu2 %v2508_v22 }
  0x6f   : > { %1553 = vmatmul.bf16.vlgmr.msra.gmra.mxu0 %v1369_v11  ;;  %1751 = vmatpush.bf16.msra.mxu3 %v2516_v61 }
  0x70   : > { %1724 = vmatmul.bf16.vlgmr.msra.gmra.mxu1 %v1566_v3 }
  0x71   : > { %1738 = vmatmul.bf16.vlgmr.msra.gmra.mxu2 %v1567_v2 }
  0x72   : > { %1752 = vmatmul.bf16.vlgmr.msra.gmra.mxu3 %v1568_v20 }
  0xbf   : > { %v1025_v25 = vpop.f32.mrf.mxu0 }
  0xc0   : > { %v1039_v27 = vpop.f32.mrf.mxu1 }
  0xc1   : > { %v1040_v31 = vadd.f32 %v1039_v27, %v1025_v25 }
  0xc7   : > { %v1027_v28 = vpop.f32.mrf.mxu0  ;;  %v1053_v30 = vpop.f32.mrf.mxu2 }
  0xc8   : > { %v1041_v29 = vpop.f32.mrf.mxu1  ;;  %v1054_v56 = vadd.f32 %v1053_v30, %v1040_v31 }
  0xc9   : > { %v1042_v62 = vadd.f32 %v1041_v29, %v1027_v28 }
  0xcf   : > { %v1238_v14 = vpop.f32.mrf.mxu0  ;;  %v1055_v33 = vpop.f32.mrf.mxu2 }
  0xd0   : > { %v1252_v40 = vpop.f32.mrf.mxu1  ;;  %v1056_v37 = vadd.f32 %v1055_v33, %v1042_v62 }
  0xd1   : > { %v1224_v32 = vpop.f32.mrf.mxu3 }
  0xd2   : > { %v1225_v10 = vadd.f32 %v1224_v32, %v1054_v56 }
  0xd4   : > { %v1239_v34 = vadd.f32 %v1238_v14, %v1225_v10 }
  0xd6   : > { %v1253_v38 = vadd.f32 %v1252_v40, %v1239_v34 }
  0xd7   : > { %v1240_v39 = vpop.f32.mrf.mxu0 }
  0xd8   : > { %v1260_v26 = vadd.f32 %v2589_v36, %v1253_v38  ;;  %v1254_v44 = vpop.f32.mrf.mxu1 }
  0xd9   : > { %v1226_v35 = vpop.f32.mrf.mxu3 }
  0xda   : > { %v1762_v41 = vrot.slane %v1260_v26, 4  ;;  %v1766_v42 = vpack.c.bf16 %v1260_v26, %v1260_v26  ;;  %v1227_v43 = vadd.f32 %v1226_v35, %v1056_v37  ;;  %v1803_v13 = vmul.f32 %v1260_v26, %v1260_v26 }
  0xdc   : > { %v1767_v45 = vpack.c.bf16 %v1762_v41, %v1762_v41  ;;  %1780 = vst [vmem:[%s2857_s13] sm:$0x3] %v1766_v42  ;;  %v1241_v46 = vadd.f32 %v1240_v39, %v1227_v43 }
  0xde   : > { %v1526_v47 = vpop.f32.mrf.mxu2  ;;  %1782 = vst [vmem:[%s2857_s13 + $0x4] sm:$0x3] %v1767_v45  ;;  %v1255_v48 = vadd.f32 %v1254_v44, %v1241_v46 }
  0xe0   : > { %v1261_v49 = vadd.f32 %v2589_v36, %v1255_v48 }
  0xe1   : > { %v1540_v50 = vpop.f32.mrf.mxu3 }
  0xe2   : > { %v1763_v51 = vrot.slane %v1261_v49, 4  ;;  %v1768_v52 = vpack.c.bf16 %v1261_v49, %v1261_v49  ;;  %v1541_v57 = vadd.f32 %v1540_v50, %v1526_v47  ;;  %v1788_v8 = vadd.f32 %v1261_v49, %v1260_v26 }
  0xe3   : > { %v1804_v15 = vmul.f32 %v1261_v49, %v1261_v49 }
  0xe4   : > { %v1769_v53 = vpack.c.bf16 %v1763_v51, %v1763_v51  ;;  %1784 = vst [vmem:[%s2857_s13 + $0x8] sm:$0x3] %v1768_v52  ;;  %v1789_v17 = vrot.slane %v1788_v8, 4 }
  0xe5   : > { %v1805_v3 = vadd.f32 %v1804_v15, %v1803_v13 }
  0xe6   : > { %1786 = vst [vmem:[%s2857_s13 + $0xc] sm:$0x3] %v1769_v53  ;;  %v1528_v55 = vpop.f32.mrf.mxu2  ;;  %v1790_v61 = vadd.f32 %v1789_v17, %v1788_v8 }
  0xe7   : > { %v1806_v28 = vrot.slane %v1805_v3, 4 }
  0xe8   : > { %v1791_v27 = vrot.slane %v1790_v61, 2 }
  0xe9   : > { %v1542_v58 = vpop.f32.mrf.mxu3  ;;  %v1807_v33 = vadd.f32 %v1806_v28, %v1805_v3 }
  0xea   : > { %v1543_v4 = vadd.f32 %v1542_v58, %v1528_v55  ;;  %v1792_v62 = vadd.f32 %v1791_v27, %v1790_v61 }
  0xeb   : > { %v1808_v35 = vrot.slane %v1807_v33, 2 }
  0xec   : > { %v1554_v54 = vpop.f32.mrf.mxu0  ;;  %v1793_v26 = vrot.slane %v1792_v62, 1 }
  0xed   : > { %v1555_v59 = vadd.f32 %v1554_v54, %v1541_v57  ;;  %v1725_v60 = vpop.f32.mrf.mxu1  ;;  %v1809_v45 = vadd.f32 %v1808_v35, %v1807_v33 }
  0xee   : > { %v1794_v43 = vadd.f32 %v1793_v26, %v1792_v62 }
  0xef   : > { %v1726_v63 = vadd.f32 %v1725_v60, %v1555_v59  ;;  %v1810_v48 = vrot.slane %v1809_v45, 1 }
  0xf1   : > { %v1811_v50 = vadd.f32 %v1810_v48, %v1809_v45 }
  0xf4   : > { %v1739_v0 = vpop.f32.mrf.mxu2  ;;  %v1556_v1 = vpop.f32.mrf.mxu0 }
  0xf5   : > { %v1740_v5 = vadd.f32 %v1739_v0, %v1726_v63  ;;  %v1753_v6 = vpop.f32.mrf.mxu3  ;;  %v1557_v7 = vadd.f32 %v1556_v1, %v1543_v4  ;;  %v1727_v12 = vpop.f32.mrf.mxu1 }
  0xf7   : > { %v1754_v9 = vadd.f32 %v1753_v6, %v1740_v5  ;;  %v1728_v16 = vadd.f32 %v1727_v12, %v1557_v7 }
  0xf9   : > { %v1758_v11 = vadd.f32 %v2589_v36, %v1754_v9 }
  0xfb   : > { %v1772_v18 = vrot.slane %v1758_v11, 4  ;;  %v1776_v23 = vpack.c.bf16 %v1758_v11, %v1758_v11  ;;  %v1812_v25 = vmul.f32 %v1758_v11, %v1758_v11 }
  0xfc   : > { %v1741_v24 = vpop.f32.mrf.mxu2 }
  0xfd   : > { %v1742_v21 = vadd.f32 %v1741_v24, %v1728_v16  ;;  %v1777_v19 = vpack.c.bf16 %v1772_v18, %v1772_v18  ;;  %1781 = vst [vmem:[%s2857_s13 + $0x2] sm:$0x3] %v1776_v23  ;;  %v1755_v22 = vpop.f32.mrf.mxu3 }
  0xff   : > { %1783 = vst [vmem:[%s2857_s13 + $0x6] sm:$0x3] %v1777_v19  ;;  %v1756_v2 = vadd.f32 %v1755_v22, %v1742_v21 }
 0x101   : > { %v1759_v20 = vadd.f32 %v2589_v36, %v1756_v2 }
 0x103   : > { %v1773_v29 = vrot.slane %v1759_v20, 4  ;;  %v1778_v30 = vpack.c.bf16 %v1759_v20, %v1759_v20  ;;  %v1813_v31 = vmul.f32 %v1759_v20, %v1759_v20  ;;  %v1795_v56 = vadd.f32 %v1759_v20, %v1758_v11 }
 0x105   : > { %v1779_v14 = vpack.c.bf16 %v1773_v29, %v1773_v29  ;;  %1785 = vst [vmem:[%s2857_s13 + $0xa] sm:$0x3] %v1778_v30  ;;  %v1796_v32 = vrot.slane %v1795_v56, 4  ;;  %v1814_v40 = vadd.f32 %v1813_v31, %v1812_v25 }
 0x107   : > { %1787 = vst [vmem:[%s2857_s13 + $0xe] sm:$0x3] %v1779_v14  ;;  %v1797_v10 = vadd.f32 %v1796_v32, %v1795_v56  ;;  %v1815_v34 = vrot.slane %v1814_v40, 4 }
 0x109   : > { %v1798_v37 = vrot.slane %v1797_v10, 2  ;;  %v1816_v38 = vadd.f32 %v1815_v34, %v1814_v40 }
 0x10b   : > { %v1799_v36 = vadd.f32 %v1798_v37, %v1797_v10  ;;  %v1817_v39 = vrot.slane %v1816_v38, 2 }
 0x10d   : > { %v1800_v41 = vrot.slane %v1799_v36, 1  ;;  %v1818_v42 = vadd.f32 %v1817_v39, %v1816_v38 }
 0x10f   : > { %v1801_v44 = vadd.f32 %v1800_v41, %v1799_v36  ;;  %v1819_v47 = vrot.slane %v1818_v42, 1 }
 0x111   : > { %v1802_v46 = vadd.f32 %v1801_v44, %v1794_v43  ;;  %v1820_v49 = vadd.f32 %v1819_v47, %v1818_v42 }
 0x113   : > { %1823 = vrot.lane.b32.xlu0 %v1802_v46, %s2652_s14  ;;  %v1821_v51 = vadd.f32 %v1820_v49, %v1811_v50 }
 0x11b   : > { %1830 = vrot.lane.b32.xlu0 %v1821_v51, %s2652_s14 }
 0x185   : > { %v1824_v52 = vpop.permute.xlu0 %1823 }
 0x186   : > { %v1826_v53 = vadd.f32 %v1824_v52, %v1802_v46 }
 0x188   : > { %1828 = vst.msk [vmem:[%s535_s17] sm:$0x1] %vm1827_vm11, %v1826_v53 }
 0x18d   : > { %v1831_v54 = vpop.permute.xlu0 %1830 }
 0x18e   : > { %v1833_v55 = vadd.f32 %v1831_v54, %v1821_v51 }
 0x190   : > { %1834 = vst.msk [vmem:[%s541_s20] sm:$0x1] %vm1827_vm11, %v1833_v55 }
 0x191 PF: > { %s21_s30 = sadd.s32 1, %s2646_s30   ;;  %s2898_s28 = smov %s2642_s29 }
 0x192   : > { %p18_p8 = scmp.ge.s32.totalorder %s21_s30, 4   ;;  %s2899_s29 = smov %s2901_s11 }
 0x194   :  { %20 = sbr.rel (!%p18_p8) target bundleno = 2 (0x2), region = 128 }
 0x199   :  { %1903 = vsyncpa [#allocation3], 1 }
 0x19a   :  { %1905 = vsyncpa [#allocation3 + $0x1], 1 }

// kernel: generator_forward.8
= control target key start
LH: loop header
LB: loop body
LE: loop exit
PB: predicated region body
PF: predicated region fallthrough
CT: control target
= control target key end

     0   :  { %15 = vsyncpa [#allocation3], 0  ;;  %s2416_s28 = smov 0   ;;  %s2418_s29 = smov 0   ;;  %s2830_s0 = inlined_call_operand.vmem [shape: bf16[2,8,8,64], index: 0, kind: input, shape index: {}, may-alias: {0,1,2}]   ;;  %s2831_s1 = inlined_call_operand.vmem [shape: bf16[2,8,8,64], index: 1, kind: input, shape index: {}, may-alias: {0,1,2}]   ;;  %s2832_s2 = inlined_call_operand.vmem [shape: bf16[2,8,8,64], index: 2, kind: input, shape index: {}, may-alias: {0,1,2}]   ;;  %s2833_s3 = inlined_call_operand.vmem [shape: f32[1,64], index: 3, kind: input, shape index: {}]   ;;  %s2834_s4 = inlined_call_operand.vmem [shape: f32[1,64], index: 4, kind: input, shape index: {}]   ;;  %s2835_s5 = inlined_call_operand.hbm [shape: bf16[4,192,128], index: 5, kind: input, shape index: {}]   ;;  %s2836_s6 = inlined_call_operand.vmem [shape: f32[1,128], index: 6, kind: input, shape index: {}]   ;;  %s2837_s7 = inlined_call_operand.vmem [shape: bf16[2,8,2,8,128], index: 7, kind: output, shape index: {0}]   ;;  %s2838_s8 = inlined_call_operand.vmem [shape: f32[2,1,1,64], index: 8, kind: output, shape index: {1}]   ;;  %s2839_s9 = inlined_call_operand.vmem [shape: f32[2,1,1,64], index: 9, kind: output, shape index: {2}]  }
   0x1   :  { %s2420_s30 = smov 0  }
   0x2 LB: > { %s1917_s10 = sadd.s32 4294967295, %s2359_s30   ;;  %s33_s11 = sadd.s32 1, %s2355_s29  ;;  %s2359_s30 = sphi %s2420_s30, %s21_s30   ;;  %s2355_s29 = sphi %s2418_s29, %s2845_s29   ;;  %s2351_s28 = sphi %s2416_s28, %s2844_s28  }
   0x3   : > { %p35_p0 = scmp.ge.s32.totalorder %s33_s11, 2  ;;  %p1919_p1 = scmp.ge.s32.totalorder %s2359_s30, 1 }
   0x4   : > { %p306_p2 = scmp.lt.s32.totalorder %s2359_s30, 3  ;;  %p2269_p4 = scmp.eq.s32.totalorder %s1917_s10, 0 }
   0x5   : > { %s2847_s11 = smov (%p35_p0, %s33_s11), 0  ;;  %s323_s14 = sshll.u32 %s2835_s5, 4  ;;  %s324_s14 = int_to_ptr.hbm [resolvable:$true] %s323_s14 }
   0x6   : > { %p307_p3 = pnand %p1919_p1, %p306_p2  ;;  %s2361_s15 = smov [#allocation2]  }
   0x7   : > { %s325_s16 = sshll.u32 %s2361_s15, 4  ;;  %s2362_s17 = smov 64   ;;  %s326_s16 = int_to_ptr.vmem [resolvable:$true] %s325_s16 }
   0x8   : > { %p2265_p5 = pneg %p307_p3  ;;  %s2363_s18 = smov 4  }
   0x9   : > { %395 = sbr.rel (%p307_p3) target bundleno = 546 (0x222), region = 48 }
   0xa   : > { %p2266_p6 = pnand %p2269_p4, %p2265_p5 }
   0xc   : > { %2268 = dma.hbm_to_vmem [thread:$0]  (!%p2266_p6), %s324_s14, 6144, %s326_s16, [#allocation3], %s2362_s17, %s2362_s17, %s2363_s18  }
   0xe   : > { %2346 = dma.done.wait (%p2269_p4), [#allocation3], 6144  }
   0xf   : > { %2348 = vsyncadd (%p2269_p4), [#allocation3], 4294961152  ;;  %p478_p7 = scmp.lt.s32.totalorder %s2351_s28, 1  ;;  %v2364_v0 = vmov 0.0|0.0   ;;  %s2365_s20 = smov 64   ;;  %v2158_v13 = vld [vmem:[#allocation2 + $0x58] sm:$0xff] }
  0x10   : > { %v651_v1 = vunpack.c.l.b16 %v2364_v0  ;;  %v2451_v5 = vld [vmem:[%s2833_s3] ss:$0 sm:$0xff]  ;;  %v2170_v20 = vld [vmem:[#allocation2 + $0xb8] sm:$0xff]  ;;  %1231 = vmatpush.bf16.msra.mxu3 %v2158_v13  ;;  %v2157_v24 = vld [vmem:[#allocation2 + $0x50] sm:$0xff]  ;;  %vm794_vm0 = vcmask 1043456   ;;  %vm827_vm10 = vcmask 523264  }
  0x11   : > { %s2849_s28 = smov (!%p478_p7, %s2351_s28), 1  ;;  %v2456_v6 = vld [vmem:[%s2834_s4] ss:$0 sm:$0xff]  ;;  %vm795_vm1 = vsmask.f32 3328  ;;  %1077 = vmatpush.bf16.msra.mxu1 %v2170_v20  ;;  %v2169_v29 = vld [vmem:[#allocation2 + $0xb0] sm:$0xff] }
  0x12   : > { %v2440_v2 = vpack.c.b16 %v651_v1, %v651_v1  ;;  %s2142_s19 = sshll.u32 %s2849_s28, 5  ;;  %v2156_v38 = vld [vmem:[#allocation2 + $0x48] sm:$0xff]  ;;  %v2155_v54 = vld [vmem:[#allocation2 + $0x40] sm:$0xff]  ;;  %v2166_v60 = vld [vmem:[#allocation2 + $0x98] sm:$0xff]  ;;  %vm751_vm12 = vcmask 1040384   ;;  %s2146_s10 = sshll.u32 %s2849_s28, 6 }
  0x13   : > { %s485_s23 = scalar_lea.vmem %s2830_s0, %s2142_s19  ;;  %v2168_v43 = vld [vmem:[#allocation2 + $0xa8] sm:$0xff]  ;;  %v2167_v59 = vld [vmem:[#allocation2 + $0xa0] sm:$0xff]  ;;  %v2154_v61 = vld [vmem:[#allocation2 + $0x38] sm:$0xff]  ;;  %1044 = vmatpush.bf16.msra.mxu0 %v2166_v60  ;;  %vm752_vm13 = vsmask.f32 256  ;;  %s2782_s14 = scalar_lea.vmem %s2837_s7, %s2146_s10  ;;  %vm1698_vm15 = vcmask 516096  }
  0x14   : > { %807 = vrot.lane.b32.xlu0 %v2440_v2, %s2365_s20  ;;  %v2196_v3 = vld [vmem:[%s485_s23] sm:$0xff]   ;;  %v2251_v8 = vld [vmem:[%s485_s23 + $0x8] sm:$0xff]   ;;  %v2252_v10 = vld [vmem:[%s485_s23 + $0x10] sm:$0xff]   ;;  %v672_v14 = vshrl.u32 %v2440_v2, 16  ;;  %v675_v15 = vshll.u32 %v2440_v2, 16  ;;  %1232 = vmatpush.bf16.msra.mxu3 %v2157_v24  ;;  %s541_s17 = scalar_lea.vmem %s2839_s9, %s2849_s28  ;;  %s535_s21 = scalar_lea.vmem %s2838_s8, %s2849_s28 }
  0x15   : > { %v2198_v4 = vunpack.c.h.bf16 %v2196_v3  ;;  %v2197_v7 = vunpack.c.l.bf16 %v2196_v3  ;;  %v2201_v9 = vunpack.c.l.bf16 %v2251_v8  ;;  %v2202_v11 = vunpack.c.h.bf16 %v2251_v8  ;;  %v2458_v12 = vld [vmem:[%s485_s23 + $0x18] sm:$0xff]   ;;  %1078 = vmatpush.bf16.msra.mxu1 %v2169_v29  ;;  %vm2487_vm9 = vmand %vm794_vm0, %vm795_vm1  ;;  %1198 = vmatpush.bf16.msra.mxu2 %v2154_v61 }
  0x16   : > { %v2206_v18 = vunpack.c.h.bf16 %v2252_v10  ;;  %v2209_v19 = vunpack.c.l.bf16 %v2458_v12  ;;  %v2205_v23 = vunpack.c.l.bf16 %v2252_v10  ;;  %v764_v33 = vrot.slane %v675_v15, 1  ;;  %vm2637_vm14 = vmand %vm751_vm12, %vm752_vm13 }
  0x17   : > { %v565_v16 = vmul.f32 %v2451_v5, %v2198_v4  ;;  %v564_v17 = vmul.f32 %v2451_v5, %v2197_v7  ;;  %v566_v21 = vmul.f32 %v2451_v5, %v2201_v9  ;;  %v567_v22 = vmul.f32 %v2451_v5, %v2202_v11  ;;  %v2159_v4 = vld [vmem:[#allocation2 + $0x60] sm:$0xff] }
  0x18   : > { %v569_v27 = vmul.f32 %v2451_v5, %v2206_v18  ;;  %v570_v28 = vmul.f32 %v2451_v5, %v2209_v19  ;;  %v568_v32 = vmul.f32 %v2451_v5, %v2205_v23  ;;  %v765_v50 = vor.u32 %v764_v33, %v672_v14  ;;  %1233 = vmatpush.bf16.msra.mxu3 %v2156_v38 }
  0x19   : > { %v576_v25 = vadd.f32 %v2456_v6, %v565_v16  ;;  %v575_v26 = vadd.f32 %v2456_v6, %v564_v17  ;;  %v577_v30 = vadd.f32 %v2456_v6, %v566_v21  ;;  %v578_v31 = vadd.f32 %v2456_v6, %v567_v22  ;;  %1079 = vmatpush.bf16.msra.mxu1 %v2168_v43 }
  0x1a   : > { %v580_v37 = vadd.f32 %v2456_v6, %v569_v27  ;;  %v581_v42 = vadd.f32 %v2456_v6, %v570_v28  ;;  %v579_v58 = vadd.f32 %v2456_v6, %v568_v32  ;;  %v797_v20 = vsel %vm2487_vm9, %v765_v50, 0 }
  0x1b   : > { %vm584_vm2 = vcmp.ge.f32.partialorder %v576_v25, 0.0  ;;  %v592_v34 = vmul.f32 0.2, %v576_v25  ;;  %vm583_vm3 = vcmp.ge.f32.partialorder %v575_v26, 0.0  ;;  %v591_v35 = vmul.f32 0.2, %v575_v26 }
  0x1c   : > { %vm585_vm4 = vcmp.ge.f32.partialorder %v577_v30, 0.0  ;;  %v593_v36 = vmul.f32 0.2, %v577_v30  ;;  %vm586_vm5 = vcmp.ge.f32.partialorder %v578_v31, 0.0  ;;  %v594_v41 = vmul.f32 0.2, %v578_v31  ;;  %1234 = vmatpush.bf16.msra.mxu3 %v2155_v54 }
  0x1d   : > { %v600_v39 = vsel %vm584_vm2, %v576_v25, %v592_v34  ;;  %v599_v40 = vsel %vm583_vm3, %v575_v26, %v591_v35  ;;  %vm588_vm6 = vcmp.ge.f32.partialorder %v580_v37, 0.0  ;;  %v596_v48 = vmul.f32 0.2, %v580_v37  ;;  %1080 = vmatpush.bf16.msra.mxu1 %v2167_v59  ;;  %v2189_v54 = vld [vmem:[#allocation2 + $0x150] sm:$0xff]  ;;  %v2151_v59 = vld [vmem:[#allocation2 + $0x20] sm:$0xff] }
  0x1e   : > { %v633_v44 = vpack.c.bf16 %v600_v39, %v600_v39  ;;  %v632_v45 = vpack.c.bf16 %v599_v40, %v599_v40  ;;  %v601_v46 = vsel %vm585_vm4, %v577_v30, %v593_v36  ;;  %v602_v49 = vsel %vm586_vm5, %v578_v31, %v594_v41 }
  0x1f   : > { %v634_v47 = vpack.c.bf16 %v601_v46, %v601_v46  ;;  %v635_v53 = vpack.c.bf16 %v602_v49, %v602_v49  ;;  %vm589_vm7 = vcmp.ge.f32.partialorder %v581_v42, 0.0  ;;  %v604_v56 = vsel %vm588_vm6, %v580_v37, %v596_v48  ;;  %v2190_v49 = vld [vmem:[#allocation2 + $0x158] sm:$0xff] }
  0x20   : > { %v653_v51 = vunpack.c.l.b16 %v633_v44  ;;  %v652_v52 = vunpack.c.l.b16 %v632_v45  ;;  %v597_v57 = vmul.f32 0.2, %v581_v42  ;;  %v637_v0 = vpack.c.bf16 %v604_v56, %v604_v56  ;;  %v2165_v44 = vld [vmem:[#allocation2 + $0x90] sm:$0xff] }
  0x21   : > { %v654_v55 = vunpack.c.l.b16 %v634_v47  ;;  %v655_v1 = vunpack.c.l.b16 %v635_v53  ;;  %vm587_vm8 = vcmp.ge.f32.partialorder %v579_v58, 0.0  ;;  %v595_v3 = vmul.f32 0.2, %v579_v58  ;;  %v2153_v45 = vld [vmem:[#allocation2 + $0x30] sm:$0xff]  ;;  %1045 = vmatpush.bf16.msra.mxu0 %v2165_v44  ;;  %1395 = vmatpush.bf16.msrb.mxu1 %v2190_v49  ;;  %v2194_v44 = vld [vmem:[#allocation2 + $0x178] sm:$0xff]  ;;  %v2187_v49 = vld [vmem:[#allocation2 + $0x140] sm:$0xff] }
  0x22   : > { %v2481_v62 = vpack.c.b16 %v653_v51, %v653_v51  ;;  %v2483_v63 = vpack.c.b16 %v652_v52, %v652_v52  ;;  %v657_v11 = vunpack.c.l.b16 %v637_v0  ;;  %v605_v16 = vsel %vm589_vm7, %v581_v42, %v597_v57  ;;  %1199 = vmatpush.bf16.msra.mxu2 %v2153_v45  ;;  %v2152_v52 = vld [vmem:[#allocation2 + $0x28] sm:$0xff]  ;;  %v2163_v57 = vld [vmem:[#allocation2 + $0x80] sm:$0xff]  ;;  %v2161_v45 = vld [vmem:[#allocation2 + $0x70] sm:$0xff]  ;;  %1428 = vmatpush.bf16.msrb.mxu3 %v2194_v44 }
  0x23   : > { %v2498_v10 = vpack.c.b16 %v654_v55, %v654_v55  ;;  %v2500_v13 = vpack.c.b16 %v655_v1, %v655_v1  ;;  %v603_v18 = vsel %vm587_vm8, %v579_v58, %v595_v3  ;;  %v638_v24 = vpack.c.bf16 %v605_v16, %v605_v16  ;;  %v2188_v0 = vld [vmem:[#allocation2 + $0x148] sm:$0xff]  ;;  %v2181_v44 = vld [vmem:[#allocation2 + $0x110] sm:$0xff] }
  0x24   : > { %811 = vrot.lane.b32.xlu1 %v2481_v62, %s2365_s20  ;;  %v689_v7 = vshll.u32 %v2481_v62, 16  ;;  %809 = vrot.lane.b32.xlu0 %v2483_v63, %s2365_s20  ;;  %v679_v8 = vshrl.u32 %v2483_v63, 16  ;;  %v682_v9 = vshll.u32 %v2483_v63, 16  ;;  %v686_v17 = vshrl.u32 %v2481_v62, 16 }
  0x25   : > { %v696_v21 = vshll.u32 %v2498_v10, 16  ;;  %815 = vrot.lane.b32.xlu2 %v2500_v13, %s2365_s20  ;;  %v636_v22 = vpack.c.bf16 %v603_v18, %v603_v18  ;;  %v2512_v23 = vpack.c.b16 %v657_v11, %v657_v11  ;;  %v2518_v28 = vunpack.c.l.b16 %v797_v20  ;;  %1396 = vmatpush.bf16.msrb.mxu1 %v2189_v54  ;;  %v2162_v11 = vld [vmem:[#allocation2 + $0x78] sm:$0xff]  ;;  %v2148_v54 = vld [vmem:[#allocation2 + $0x8] sm:$0xff] }
  0x26   : > { %v766_v19 = vrot.slane %v682_v9, 1  ;;  %v768_v26 = vrot.slane %v689_v7, 1  ;;  %v2210_v29 = vunpack.c.h.bf16 %v2458_v12  ;;  %v703_v30 = vshll.u32 %v2500_v13, 16  ;;  %1200 = vmatpush.bf16.msra.mxu2 %v2152_v52  ;;  %v2150_v18 = vld [vmem:[#allocation2 + $0x18] sm:$0xff]  ;;  %v2160_v52 = vld [vmem:[#allocation2 + $0x68] sm:$0xff] }
  0x27   : > { %v656_v27 = vunpack.c.l.b16 %v636_v22  ;;  %v693_v33 = vshrl.u32 %v2498_v10, 16  ;;  %v658_v12 = vunpack.c.l.b16 %v638_v24  ;;  %v770_v38 = vrot.slane %v696_v21, 1 }
  0x28   : > { %v767_v25 = vor.u32 %v766_v19, %v679_v8  ;;  %v769_v32 = vor.u32 %v768_v26, %v686_v17  ;;  %v571_v36 = vmul.f32 %v2451_v5, %v2210_v29  ;;  %v700_v41 = vshrl.u32 %v2500_v13, 16 }
  0x29   : > { %v2527_v34 = vpack.c.b16 %v656_v27, %v656_v27  ;;  %v772_v42 = vrot.slane %v703_v30, 1  ;;  %v2548_v46 = vpack.c.b16 %v658_v12, %v658_v12  ;;  %v771_v48 = vor.u32 %v770_v38, %v693_v33  ;;  %1397 = vmatpush.bf16.msrb.mxu1 %v2188_v0  ;;  %v2192_v0 = vld [vmem:[#allocation2 + $0x168] sm:$0xff] }
  0x2a   : > { %v798_v31 = vsel %vm2487_vm9, %v767_v25, 0  ;;  %v799_v37 = vsel %vm2487_vm9, %v769_v32, 0  ;;  %v582_v5 = vadd.f32 %v2456_v6, %v571_v36  ;;  %v2164_v6 = vld [vmem:[#allocation2 + $0x88] sm:$0xff]  ;;  %v717_v16 = vshll.u32 %v2512_v23, 16  ;;  %1201 = vmatpush.bf16.msra.mxu2 %v2151_v59 }
  0x2b   : > { %v881_v35 = vunpack.c.l.b16 %v798_v31  ;;  %v883_v40 = vunpack.c.l.b16 %v799_v37  ;;  %v773_v51 = vor.u32 %v772_v42, %v700_v41  ;;  %v800_v55 = vsel %vm2487_vm9, %v771_v48, 0  ;;  %1046 = vmatpush.bf16.msra.mxu0 %v2164_v6 }
  0x2c   : > { %813 = vrot.lane.b32.xlu1 %v2498_v10, %s2365_s20  ;;  %819 = vrot.lane.b32.xlu0 %v2512_v23, %s2365_s20  ;;  %vm590_vm11 = vcmp.ge.f32.partialorder %v582_v5, 0.0  ;;  %v598_v47 = vmul.f32 0.2, %v582_v5  ;;  %v885_v61 = vunpack.c.l.b16 %v800_v55  ;;  %v710_v1 = vshll.u32 %v2527_v34, 16  ;;  %v2186_v55 = vld [vmem:[#allocation2 + $0x138] sm:$0xff] }
  0x2d   : > { %v1103_v39 = vpack.c.b16 %v881_v35, %v2518_v28  ;;  %817 = vrot.lane.b32.xlu2 %v2527_v34, %s2365_s20  ;;  %v2546_v43 = vpack.c.b16 %v883_v40, %v881_v35  ;;  %v801_v58 = vsel %vm2487_vm9, %v773_v51, 0  ;;  %v707_v20 = vshrl.u32 %v2527_v34, 16  ;;  %1398 = vmatpush.bf16.msrb.mxu1 %v2187_v49 }
  0x2e   : > { %v606_v50 = vsel %vm590_vm11, %v582_v5, %v598_v47  ;;  %v887_v3 = vunpack.c.l.b16 %v801_v58  ;;  %v2570_v19 = vpack.c.b16 %v885_v61, %v883_v40  ;;  %v774_v22 = vrot.slane %v710_v1, 1  ;;  %1202 = vmatpush.bf16.msra.mxu2 %v2150_v18  ;;  %v2149_v47 = vld [vmem:[#allocation2 + $0x10] sm:$0xff]  ;;  %v2191_v18 = vld [vmem:[#allocation2 + $0x160] sm:$0xff] }
  0x2f   : > { %2032 = vmatmul.msk.bf16.vlgmr.msra.gmra.mxu3 %vm827_vm10, %v1103_v39  ;;  %1980 = vmatmul.msk.bf16.vlgmr.msra.gmra.mxu1 %vm827_vm10, %v2546_v43  ;;  %v639_v53 = vpack.c.bf16 %v606_v50, %v606_v50  ;;  %v714_v25 = vshrl.u32 %v2512_v23, 16  ;;  %v776_v26 = vrot.slane %v717_v16, 1  ;;  %v724_v38 = vshll.u32 %v2548_v46, 16  ;;  %v2193_v50 = vld [vmem:[#allocation2 + $0x170] sm:$0xff] }
  0x30   : > { %1047 = vmatpush.bf16.msra.mxu0 %v2163_v57  ;;  %v2575_v24 = vpack.c.b16 %v887_v3, %v885_v61  ;;  %v775_v27 = vor.u32 %v774_v22, %v707_v20  ;;  %v721_v40 = vshrl.u32 %v2548_v46, 16  ;;  %1429 = vmatpush.bf16.msrb.mxu3 %v2193_v50  ;;  %v2184_v22 = vld [vmem:[#allocation2 + $0x128] sm:$0xff]  ;;  %v702_v49 = vrot.slane %v700_v41, 7 }
  0x31   : > { %v659_v56 = vunpack.c.l.b16 %v639_v53  ;;  %v777_v29 = vor.u32 %v776_v26, %v714_v25  ;;  %v778_v42 = vrot.slane %v724_v38, 1  ;;  %1399 = vmatpush.bf16.msrb.mxu1 %v2186_v55  ;;  %v2182_v26 = vld [vmem:[#allocation2 + $0x118] sm:$0xff] }
  0x32   : > { %v802_v31 = vsel %vm2487_vm9, %v775_v27, 0  ;;  %1203 = vmatpush.bf16.msra.mxu2 %v2149_v47  ;;  %v2183_v27 = vld [vmem:[#allocation2 + $0x120] sm:$0xff]  ;;  %v723_v62 = vrot.slane %v721_v40, 7  ;;  %v705_v41 = vor.u32 %v703_v30, %v702_v49  ;;  %v709_v30 = vrot.slane %v707_v20, 7 }
  0x33   : > { %v2564_v60 = vpack.c.b16 %v659_v56, %v659_v56  ;;  %v803_v32 = vsel %vm2487_vm9, %v777_v29, 0  ;;  %v889_v35 = vunpack.c.l.b16 %v802_v31  ;;  %v779_v6 = vor.u32 %v778_v42, %v721_v40  ;;  %v2178_v29 = vld [vmem:[#allocation2 + $0xf8] sm:$0xff]  ;;  %v2177_v31 = vld [vmem:[#allocation2 + $0xf0] sm:$0xff] }
  0x34   : > { %821 = vrot.lane.b32.xlu1 %v2548_v46, %s2365_s20  ;;  %825 = vrot.lane.b32.xlu0 %v2440_v2, %s2365_s20  ;;  %v891_v36 = vunpack.c.l.b16 %v803_v32  ;;  %v674_v32 = vrot.slane %v672_v14, 7  ;;  %v681_v42 = vrot.slane %v679_v8, 7  ;;  %v726_v50 = vor.u32 %v724_v38, %v723_v62 }
  0x35   : > { %823 = vrot.lane.b32.xlu2 %v2564_v60, %s2365_s20  ;;  %1048 = vmatpush.bf16.msra.mxu0 %v2162_v11  ;;  %v2592_v12 = vpack.c.b16 %v889_v35, %v887_v3  ;;  %v731_v39 = vshll.u32 %v2564_v60, 16  ;;  %v728_v5 = vshrl.u32 %v2564_v60, 16  ;;  %v804_v53 = vsel %vm2487_vm9, %v779_v6, 0  ;;  %v2147_v3 = vld [vmem:[#allocation2] sm:$0xff]  ;;  %v2185_v11 = vld [vmem:[#allocation2 + $0x130] sm:$0xff] }
  0x36   : > { %v2594_v37 = vpack.c.b16 %v891_v36, %v889_v35  ;;  %v893_v56 = vunpack.c.l.b16 %v804_v53  ;;  %1204 = vmatpush.bf16.msra.mxu2 %v2148_v54  ;;  %1430 = vmatpush.bf16.msrb.mxu3 %v2192_v0  ;;  %v684_v8 = vor.u32 %v682_v9, %v681_v42  ;;  %v2175_v6 = vld [vmem:[#allocation2 + $0xe0] sm:$0xff]  ;;  %v2174_v0 = vld [vmem:[#allocation2 + $0xd8] sm:$0xff]  ;;  %v758_v10 = vsel %vm2637_vm14, 0, %v705_v41 }
  0x37   : > { %v780_v48 = vrot.slane %v731_v39, 1  ;;  %1400 = vmatpush.bf16.msrb.mxu1 %v2185_v11  ;;  %v716_v20 = vrot.slane %v714_v25, 7 }
  0x38   : > { %v2618_v59 = vpack.c.b16 %v893_v56, %v891_v36  ;;  %v688_v36 = vrot.slane %v686_v17, 7 }
  0x39   : > { %1049 = vmatpush.bf16.msra.mxu0 %v2161_v45  ;;  %v781_v51 = vor.u32 %v780_v48, %v728_v5  ;;  %v677_v45 = vor.u32 %v675_v15, %v674_v32  ;;  %v755_v48 = vsel %vm2637_vm14, 0, %v684_v8  ;;  %v719_v42 = vor.u32 %v717_v16, %v716_v20 }
  0x3a   : > { %1205 = vmatpush.bf16.msra.mxu2 %v2147_v3  ;;  %1431 = vmatpush.bf16.msrb.mxu3 %v2191_v18  ;;  %v691_v14 = vor.u32 %v689_v7, %v688_v36  ;;  %v730_v18 = vrot.slane %v728_v5, 7 }
  0x3b   : > { %v805_v57 = vsel %vm2487_vm9, %v781_v51, 0  ;;  %1401 = vmatpush.bf16.msrb.mxu1 %v2184_v22  ;;  %v2649_v17 = vsel %vm2637_vm14, 0, %v677_v45 }
  0x3c   : > { %v2616_v58 = vunpack.c.l.b16 %v805_v57  ;;  %v756_v15 = vsel %vm2637_vm14, 0, %v691_v14  ;;  %v2180_v57 = vld [vmem:[#allocation2 + $0x108] sm:$0xff] }
  0x3d   : > { %1050 = vmatpush.bf16.msra.mxu0 %v2160_v52  ;;  %v2172_v14 = vld [vmem:[#allocation2 + $0xc8] sm:$0xff] }
  0x3e   : > { %v2621_v61 = vpack.c.b16 %v2616_v58, %v893_v56  ;;  %1558 = vmatpush.bf16.msrb.mxu2 %v2182_v26  ;;  %v712_v26 = vor.u32 %v710_v1, %v709_v30  ;;  %v1318_v45 = vpack.c.b16 %v2518_v28, %v2616_v58 }
  0x3f   : > { %2033 = vmatmul.msk.bf16.gmra.mxu3 %vm827_vm10, %v2570_v19  ;;  %1981 = vmatmul.msk.bf16.gmra.mxu1 %vm827_vm10, %v2575_v24 }
  0x40   : > { %1402 = vmatpush.bf16.msrb.mxu1 %v2183_v27  ;;  %v761_v27 = vsel %vm2637_vm14, 0, %v726_v50  ;;  %v759_v1 = vsel %vm2637_vm14, 0, %v712_v26 }
  0x41   : > { %1051 = vmatpush.bf16.msra.mxu0 %v2159_v4 }
  0x42   : > { %1559 = vmatpush.bf16.msrb.mxu2 %v2181_v44 }
  0x45   : > { %1525 = vmatpush.bf16.msrb.mxu0 %v2178_v29 }
  0x46   : > { %1560 = vmatpush.bf16.msrb.mxu2 %v2180_v57 }
  0x49   : > { %1526 = vmatpush.bf16.msrb.mxu0 %v2177_v31  ;;  %v2173_v31 = vld [vmem:[#allocation2 + $0xd0] sm:$0xff] }
  0x4f   : > { %2034 = vmatmul.msk.bf16.gmra.mxu3 %vm827_vm10, %v2592_v12  ;;  %1982 = vmatmul.msk.bf16.gmra.mxu1 %vm827_vm10, %v2594_v37 }
  0x5f   : > { %2035 = vmatmul.msk.bf16.gmra.mxu3 %vm827_vm10, %v2618_v59  ;;  %1983 = vmatmul.msk.bf16.gmra.mxu1 %vm827_vm10, %v2621_v61 }
  0x6f   : > { %2084 = vmatmul.msk.bf16.vlgmr.msrb.gmra.mxu3 %vm827_vm10, %v2570_v19  ;;  %v2176_v19 = vld [vmem:[#allocation2 + $0xe8] sm:$0xff] }
  0x70   : > { %1527 = vmatpush.bf16.msrb.mxu0 %v2176_v19  ;;  %v2179_v19 = vld [vmem:[#allocation2 + $0x100] sm:$0xff] }
  0x71   : > { %1561 = vmatpush.bf16.msrb.mxu2 %v2179_v19 }
  0x74   : > { %1528 = vmatpush.bf16.msrb.mxu0 %v2175_v6 }
  0x78   : > { %1529 = vmatpush.bf16.msrb.mxu0 %v2174_v0 }
  0x7c   : > { %1530 = vmatpush.bf16.msrb.mxu0 %v2173_v31 }
  0x7f   : > { %2085 = vmatmul.msk.bf16.gmra.mxu3 %vm827_vm10, %v2592_v12  ;;  %v816_v2 = vpop.permute.xlu2 %815  ;;  %v695_v12 = vrot.slane %v693_v33, 7 }
  0x80   : > { %v842_v3 = vsel %vm827_vm10, %v758_v10, %v816_v2  ;;  %v760_v2 = vsel %vm2637_vm14, 0, %v719_v42  ;;  %1531 = vmatpush.bf16.msrb.mxu0 %v2172_v14 }
  0x81   : > { %v698_v40 = vor.u32 %v696_v21, %v695_v12  ;;  %v886_v22 = vunpack.c.l.b16 %v842_v3  ;;  %v2171_v12 = vld [vmem:[#allocation2 + $0xc0] sm:$0xff] }
  0x83   : > { %v757_v46 = vsel %vm2637_vm14, 0, %v698_v40 }
  0x84   : > { %1532 = vmatpush.bf16.msrb.mxu0 %v2171_v12 }
  0x86   : > { %v808_v35 = vpop.permute.xlu0 %807 }
  0x87   : > { %v830_v63 = vsel %vm827_vm10, %v2649_v17, %v808_v35  ;;  %v818_v38 = vpop.permute.xlu2 %817 }
  0x88   : > { %v878_v52 = vunpack.c.l.b16 %v830_v63  ;;  %v845_v25 = vsel %vm827_vm10, %v759_v1, %v818_v38 }
  0x89   : > { %v888_v8 = vunpack.c.l.b16 %v845_v25 }
  0x8b   : > { %v1106_v16 = vpack.c.b16 %v888_v8, %v886_v22 }
  0x8f   : > { %2086 = vmatmul.msk.bf16.gmra.mxu3 %vm827_vm10, %v2618_v59  ;;  %v733_v59 = vor.u32 %v731_v39, %v730_v18  ;;  %v824_v29 = vpop.permute.xlu2 %823 }
  0x91   : > { %v762_v5 = vsel %vm2637_vm14, 0, %v733_v59 }
  0x92   : > { %v854_v34 = vsel %vm827_vm10, %v762_v5, %v824_v29 }
  0x93   : > { %v894_v39 = vunpack.c.l.b16 %v854_v34 }
  0x96   : > { %v812_v7 = vpop.permute.xlu1 %811  ;;  %v810_v9 = vpop.permute.xlu0 %809 }
  0x97   : > { %v836_v51 = vsel %vm827_vm10, %v756_v15, %v812_v7  ;;  %v833_v33 = vsel %vm827_vm10, %v755_v48, %v810_v9 }
  0x98   : > { %v882_v53 = vunpack.c.l.b16 %v836_v51  ;;  %v880_v54 = vunpack.c.l.b16 %v833_v33 }
  0x9a   : > { %v2669_v55 = vpack.c.b16 %v882_v53, %v880_v54  ;;  %v1102_v56 = vpack.c.b16 %v880_v54, %v878_v52 }
  0x9c   : > { %1052 = vmatmul.bf16.vlgmr.msra.gmra.mxu0 %v2669_v55  ;;  %1206 = vmatmul.bf16.vlgmr.msra.gmra.mxu2 %v1102_v56 }
  0x9e   : > { %v814_v4 = vpop.permute.xlu1 %813  ;;  %v820_v15 = vpop.permute.xlu0 %819 }
  0x9f   : > { %v839_v21 = vsel %vm827_vm10, %v757_v46, %v814_v4  ;;  %2087 = vmatmul.msk.bf16.gmra.mxu3 %vm827_vm10, %v1318_v45  ;;  %v848_v23 = vsel %vm827_vm10, %v760_v2, %v820_v15 }
  0xa0   : > { %v884_v13 = vunpack.c.l.b16 %v839_v21  ;;  %v890_v48 = vunpack.c.l.b16 %v848_v23 }
  0xa2   : > { %v1104_v11 = vpack.c.b16 %v884_v13, %v882_v53  ;;  %v950_v36 = vpack.c.b16 %v886_v22, %v884_v13  ;;  %v952_v6 = vpack.c.b16 %v890_v48, %v888_v8 }
  0xa4   : > { %1403 = vmatmul.bf16.vlgmr.msrb.gmra.mxu1 %v1104_v11 }
  0xa6   : > { %v822_v32 = vpop.permute.xlu1 %821  ;;  %v826_v58 = vpop.permute.xlu0 %825 }
  0xa7   : > { %v851_v35 = vsel %vm827_vm10, %v761_v27, %v822_v32  ;;  %v857_v47 = vsel %vm827_vm10, %v2649_v17, %v826_v58 }
  0xa8   : > { %v892_v60 = vunpack.c.l.b16 %v851_v35  ;;  %v896_v62 = vunpack.c.l.b16 %v857_v47 }
  0xaa   : > { %v954_v44 = vpack.c.b16 %v894_v39, %v892_v60  ;;  %v1108_v28 = vpack.c.b16 %v892_v60, %v890_v48  ;;  %v1317_v63 = vpack.c.b16 %v896_v62, %v894_v39 }
  0xac   : > { %1057 = vmatmul.bf16.gmra.mxu0 %v950_v36  ;;  %1211 = vmatmul.bf16.gmra.mxu2 %v1104_v11  ;;  %v1082_v7 = vpop.f32.mrf.mxu1 }
  0xb2   : > { %v1236_v9 = vpop.f32.mrf.mxu3 }
  0xb4   : > { %1408 = vmatmul.bf16.gmra.mxu1 %v1106_v16  ;;  %v1084_v17 = vpop.f32.mrf.mxu1 }
  0xba   : > { %v1238_v49 = vpop.f32.mrf.mxu3 }
  0xbc   : > { %1062 = vmatmul.bf16.gmra.mxu0 %v952_v6  ;;  %1216 = vmatmul.bf16.gmra.mxu2 %v1106_v16  ;;  %v1087_v50 = vpop.f32.mrf.mxu1 }
  0xc2   : > { %v1241_v51 = vpop.f32.mrf.mxu3 }
  0xc4   : > { %1413 = vmatmul.bf16.gmra.mxu1 %v1108_v28  ;;  %v1089_v33 = vpop.f32.mrf.mxu1 }
  0xcc   : > { %1067 = vmatmul.bf16.gmra.mxu0 %v954_v44  ;;  %1221 = vmatmul.bf16.gmra.mxu2 %v1108_v28 }
  0xd4   : > { %1418 = vmatmul.bf16.gmra.mxu1 %v1317_v63 }
  0xdc   : > { %1533 = vmatmul.bf16.vlgmr.msrb.gmra.mxu0 %v2669_v55  ;;  %2136 = vmatmul.msk.bf16.vlgmr.msrb.gmra.mxu2 %vm827_vm10, %v2546_v43  ;;  %v1243_v43 = vpop.f32.mrf.mxu3  ;;  %v1092_v55 = vpop.f32.mrf.mxu1 }
  0xe4   : > { %v1246_v56 = vpop.f32.mrf.mxu3  ;;  %v1094_v10 = vpop.f32.mrf.mxu1 }
  0xec   : > { %1538 = vmatmul.bf16.gmra.mxu0 %v950_v36  ;;  %2137 = vmatmul.msk.bf16.gmra.mxu2 %vm827_vm10, %v2575_v24  ;;  %v1248_v21 = vpop.f32.mrf.mxu3  ;;  %v1097_v20 = vpop.f32.mrf.mxu1 }
  0xf4   : > { %v1251_v32 = vpop.f32.mrf.mxu3  ;;  %v1099_v8 = vpop.f32.mrf.mxu1 }
  0xfc   : > { %1543 = vmatmul.bf16.gmra.mxu0 %v952_v6  ;;  %2138 = vmatmul.msk.bf16.gmra.mxu2 %vm827_vm10, %v2594_v37  ;;  %v2723_v37 = vld [vmem:[%s2836_s6] ss:$0 sm:$0xff]  ;;  %v1253_v2 = vpop.f32.mrf.mxu3 }
 0x10c   : > { %1548 = vmatmul.bf16.gmra.mxu0 %v954_v44  ;;  %2139 = vmatmul.msk.bf16.gmra.mxu2 %vm827_vm10, %v2621_v61 }
 0x119   : > { %v1053_v52 = vpop.f32.mrf.mxu0 }
 0x11a   : > { %v1083_v53 = vadd.f32 %v1082_v7, %v1053_v52 }
 0x11f   : > { %v1207_v54 = vpop.f32.mrf.mxu2 }
 0x120   : > { %v1208_v24 = vadd.f32 %v1207_v54, %v1083_v53 }
 0x121   : > { %v1055_v40 = vpop.f32.mrf.mxu0 }
 0x122   : > { %v1237_v41 = vadd.f32 %v1236_v9, %v1208_v24  ;;  %v1085_v46 = vadd.f32 %v1084_v17, %v1055_v40  ;;  %v1404_v9 = vpop.f32.mrf.mxu1  ;;  %v1433_v17 = vpop.f32.mrf.mxu3 }
 0x124   : > { %v2726_v0 = vadd.f32 %v2723_v37, %v1237_v41 }
 0x126   : > { %v1650_v30 = vmul.f32 %v2726_v0, %v2726_v0 }
 0x127   : > { %v1209_v38 = vpop.f32.mrf.mxu2 }
 0x128   : > { %v1210_v61 = vadd.f32 %v1209_v38, %v1085_v46 }
 0x129   : > { %v1058_v57 = vpop.f32.mrf.mxu0 }
 0x12a   : > { %v1239_v4 = vadd.f32 %v1238_v49, %v1210_v61  ;;  %v1088_v18 = vadd.f32 %v1087_v50, %v1058_v57 }
 0x12c   : > { %v2729_v13 = vadd.f32 %v2723_v37, %v1239_v4 }
 0x12e   : > { %v1623_v3 = vadd.f32 %v2729_v13, %v2726_v0  ;;  %v1651_v11 = vmul.f32 %v2729_v13, %v2729_v13 }
 0x12f   : > { %v1212_v22 = vpop.f32.mrf.mxu2 }
 0x130   : > { %v1658_v26 = vadd.f32 %v1651_v11, %v1650_v30  ;;  %v1213_v27 = vadd.f32 %v1212_v22, %v1088_v18 }
 0x131   : > { %v1060_v59 = vpop.f32.mrf.mxu0 }
 0x132   : > { %v1242_v29 = vadd.f32 %v1241_v51, %v1213_v27  ;;  %v1090_v34 = vadd.f32 %v1089_v33, %v1060_v59 }
 0x134   : > { %v2738_v31 = vadd.f32 %v2723_v37, %v1242_v29 }
 0x136   : > { %v1624_v5 = vadd.f32 %v1623_v3, %v2738_v31  ;;  %v1652_v35 = vmul.f32 %v2738_v31, %v2738_v31  ;;  %v1434_v3 = vadd.f32 %v1433_v17, %v1404_v9 }
 0x137   : > { %v1214_v1 = vpop.f32.mrf.mxu2 }
 0x138   : > { %v1659_v36 = vadd.f32 %v1658_v26, %v1652_v35  ;;  %v1215_v60 = vadd.f32 %v1214_v1, %v1090_v34 }
 0x139   : > { %v1063_v39 = vpop.f32.mrf.mxu0 }
 0x13a   : > { %v1244_v42 = vadd.f32 %v1243_v43, %v1215_v60  ;;  %v1093_v45 = vadd.f32 %v1092_v55, %v1063_v39  ;;  %v1406_v55 = vpop.f32.mrf.mxu1 }
 0x13c   : > { %v2744_v44 = vadd.f32 %v2723_v37, %v1244_v42 }
 0x13e   : > { %v1625_v25 = vadd.f32 %v1624_v5, %v2744_v44  ;;  %v1653_v19 = vmul.f32 %v2744_v44, %v2744_v44 }
 0x13f   : > { %v1217_v14 = vpop.f32.mrf.mxu2 }
 0x140   : > { %v1660_v15 = vadd.f32 %v1659_v36, %v1653_v19  ;;  %v1218_v23 = vadd.f32 %v1217_v14, %v1093_v45 }
 0x141   : > { %v1065_v16 = vpop.f32.mrf.mxu0 }
 0x142   : > { %v1247_v48 = vadd.f32 %v1246_v56, %v1218_v23  ;;  %v1095_v58 = vadd.f32 %v1094_v10, %v1065_v16  ;;  %v1435_v56 = vpop.f32.mrf.mxu3  ;;  %v1409_v18 = vpop.f32.mrf.mxu1 }
 0x143   : > { %v1436_v34 = vadd.f32 %v1435_v56, %v1406_v55 }
 0x144   : > { %v2750_v12 = vadd.f32 %v2723_v37, %v1247_v48 }
 0x146   : > { %v1626_v6 = vadd.f32 %v1625_v25, %v2750_v12  ;;  %v1654_v28 = vmul.f32 %v2750_v12, %v2750_v12 }
 0x147   : > { %v1219_v47 = vpop.f32.mrf.mxu2 }
 0x148   : > { %v1661_v62 = vadd.f32 %v1660_v15, %v1654_v28  ;;  %v1220_v63 = vadd.f32 %v1219_v47, %v1095_v58 }
 0x149   : > { %v1068_v7 = vpop.f32.mrf.mxu0 }
 0x14a   : > { %v1249_v49 = vadd.f32 %v1248_v21, %v1220_v63  ;;  %v1098_v43 = vadd.f32 %v1097_v20, %v1068_v7  ;;  %v1438_v22 = vpop.f32.mrf.mxu3  ;;  %v1411_v39 = vpop.f32.mrf.mxu1 }
 0x14b   : > { %v1439_v14 = vadd.f32 %v1438_v22, %v1409_v18 }
 0x14c   : > { %v2756_v50 = vadd.f32 %v2723_v37, %v1249_v49 }
 0x14e   : > { %v1627_v51 = vadd.f32 %v1626_v6, %v2756_v50  ;;  %v1655_v33 = vmul.f32 %v2756_v50, %v2756_v50 }
 0x14f   : > { %v1222_v52 = vpop.f32.mrf.mxu2 }
 0x150   : > { %v1662_v53 = vadd.f32 %v1661_v62, %v1655_v33  ;;  %v1223_v54 = vadd.f32 %v1222_v52, %v1098_v43 }
 0x151   : > { %v1070_v24 = vpop.f32.mrf.mxu0 }
 0x152   : > { %v1252_v40 = vadd.f32 %v1251_v32, %v1223_v54  ;;  %v1100_v61 = vadd.f32 %v1099_v8, %v1070_v24  ;;  %v1440_v42 = vpop.f32.mrf.mxu3 }
 0x153   : > { %v1441_v28 = vadd.f32 %v1440_v42, %v1411_v39 }
 0x154   : > { %v2762_v41 = vadd.f32 %v2723_v37, %v1252_v40 }
 0x156   : > { %v1628_v46 = vadd.f32 %v1627_v51, %v2762_v41  ;;  %v1656_v38 = vmul.f32 %v2762_v41, %v2762_v41 }
 0x157   : > { %v1224_v57 = vpop.f32.mrf.mxu2 }
 0x158   : > { %v1663_v4 = vadd.f32 %v1662_v53, %v1656_v38  ;;  %v1225_v10 = vadd.f32 %v1224_v57, %v1100_v61 }
 0x159   : > { %v1534_v21 = vpop.f32.mrf.mxu0 }
 0x15a   : > { %v1254_v30 = vadd.f32 %v1253_v2, %v1225_v10  ;;  %v1535_v59 = vadd.f32 %v1534_v21, %v1434_v3  ;;  %v1443_v48 = vpop.f32.mrf.mxu3 }
 0x15c   : > { %v2768_v11 = vadd.f32 %v2723_v37, %v1254_v30 }
 0x15e   : > { %v2771_v26 = vadd.f32 %v1628_v46, %v2768_v11  ;;  %v1657_v27 = vmul.f32 %v2768_v11, %v2768_v11 }
 0x15f   : > { %v1563_v29 = vpop.f32.mrf.mxu2 }
 0x160   : > { %v2775_v20 = vadd.f32 %v1663_v4, %v1657_v27  ;;  %v1564_v32 = vadd.f32 %v1563_v29, %v1535_v59 }
 0x161   : > { %v1536_v5 = vpop.f32.mrf.mxu0 }
 0x162   : > { %v1583_v35 = vadd.f32 %v2723_v37, %v1564_v32  ;;  %v1537_v36 = vadd.f32 %v1536_v5, %v1436_v34  ;;  %v1445_v49 = vpop.f32.mrf.mxu3 }
 0x164   : > { %v2214_v1 = vpack.c.bf16 %v1583_v35, %v2726_v0  ;;  %v1414_v0 = vpop.f32.mrf.mxu1  ;;  %v1671_v22 = vmul.f32 %v1583_v35, %v1583_v35 }
 0x165   : > { %v1444_v9 = vadd.f32 %v1443_v48, %v1414_v0 }
 0x166   : > { %2215 = vst [vmem:[%s2782_s14] sm:$0xff] %v2214_v1   ;;  %v1630_v1 = vrot.slane %v2771_v26, 4 }
 0x167   : > { %v1565_v60 = vpop.f32.mrf.mxu2 }
 0x168   : > { %v1566_v25 = vadd.f32 %v1565_v60, %v1537_v36 }
 0x169   : > { %v1539_v19 = vpop.f32.mrf.mxu0 }
 0x16a   : > { %v1584_v45 = vadd.f32 %v2723_v37, %v1566_v25  ;;  %v1540_v2 = vadd.f32 %v1539_v19, %v1439_v14  ;;  %v1448_v55 = vpop.f32.mrf.mxu3  ;;  %v1665_v19 = vrot.slane %v2775_v20, 4 }
 0x16c   : > { %v2219_v8 = vpack.c.bf16 %v1584_v45, %v2729_v13  ;;  %v1416_v17 = vpop.f32.mrf.mxu1  ;;  %v1672_v10 = vmul.f32 %v1584_v45, %v1584_v45 }
 0x16d   : > { %v1446_v54 = vadd.f32 %v1445_v49, %v1416_v17 }
 0x16e   : > { %2254 = vst [vmem:[%s2782_s14 + $0x8] sm:$0xff] %v2219_v8   ;;  %v1679_v29 = vadd.f32 %v1672_v10, %v1671_v22 }
 0x16f   : > { %v1568_v15 = vpop.f32.mrf.mxu2 }
 0x170   : > { %v1569_v23 = vadd.f32 %v1568_v15, %v1540_v2  ;;  %v1631_v15 = vadd.f32 %v1630_v1, %v2771_v26 }
 0x171   : > { %v1541_v16 = vpop.f32.mrf.mxu0 }
 0x172   : > { %v1585_v6 = vadd.f32 %v2723_v37, %v1569_v23  ;;  %v1542_v47 = vadd.f32 %v1541_v16, %v1441_v28  ;;  %v1450_v18 = vpop.f32.mrf.mxu3 }
 0x174   : > { %v2224_v58 = vpack.c.bf16 %v1585_v6, %v2738_v31  ;;  %v1419_v40 = vpop.f32.mrf.mxu1  ;;  %v1673_v27 = vmul.f32 %v1585_v6, %v1585_v6 }
 0x175   : > { %v1449_v57 = vadd.f32 %v1448_v55, %v1419_v40 }
 0x176   : > { %2255 = vst [vmem:[%s2782_s14 + $0x10] sm:$0xff] %v2224_v58   ;;  %v1680_v60 = vadd.f32 %v1679_v29, %v1673_v27 }
 0x177   : > { %v1570_v62 = vpop.f32.mrf.mxu2 }
 0x178   : > { %v1571_v63 = vadd.f32 %v1570_v62, %v1542_v47  ;;  %v1632_v47 = vrot.slane %v1631_v15, 2 }
 0x179   : > { %v1544_v7 = vpop.f32.mrf.mxu0 }
 0x17a   : > { %v1586_v13 = vadd.f32 %v2723_v37, %v1571_v63  ;;  %v1545_v33 = vadd.f32 %v1544_v7, %v1444_v9 }
 0x17c   : > { %v2229_v51 = vpack.c.bf16 %v1586_v13, %v2744_v44  ;;  %v1421_v3 = vpop.f32.mrf.mxu1  ;;  %v1674_v5 = vmul.f32 %v1586_v13, %v1586_v13 }
 0x17d   : > { %v1451_v36 = vadd.f32 %v1450_v18, %v1421_v3 }
 0x17e   : > { %2256 = vst [vmem:[%s2782_s14 + $0x18] sm:$0xff] %v2229_v51  }
 0x17f   : > { %v1573_v43 = vpop.f32.mrf.mxu2 }
 0x180   : > { %v1574_v52 = vadd.f32 %v1573_v43, %v1545_v33  ;;  %v1633_v33 = vadd.f32 %v1632_v47, %v1631_v15 }
 0x181   : > { %v1546_v53 = vpop.f32.mrf.mxu0 }
 0x182   : > { %v1587_v31 = vadd.f32 %v2723_v37, %v1574_v52  ;;  %v1547_v56 = vadd.f32 %v1546_v53, %v1446_v54 }
 0x184   : > { %v2234_v24 = vpack.c.bf16 %v1587_v31, %v2750_v12  ;;  %v1636_v12 = vadd.f32 %v1584_v45, %v1583_v35  ;;  %v1675_v42 = vmul.f32 %v1587_v31, %v1587_v31  ;;  %v1681_v35 = vadd.f32 %v1680_v60, %v1674_v5 }
 0x186   : > { %2257 = vst [vmem:[%s2782_s14 + $0x20] sm:$0xff] %v2234_v24   ;;  %v1637_v32 = vadd.f32 %v1636_v12, %v1585_v6  ;;  %v1682_v23 = vadd.f32 %v1681_v35, %v1675_v42 }
 0x187   : > { %v1575_v46 = vpop.f32.mrf.mxu2 }
 0x188   : > { %v1576_v38 = vadd.f32 %v1575_v46, %v1547_v56  ;;  %v1638_v39 = vadd.f32 %v1637_v32, %v1586_v13 }
 0x189   : > { %v1549_v61 = vpop.f32.mrf.mxu0 }
 0x18a   : > { %v1588_v44 = vadd.f32 %v2723_v37, %v1576_v38  ;;  %v1550_v21 = vadd.f32 %v1549_v61, %v1449_v57  ;;  %v1639_v45 = vadd.f32 %v1638_v39, %v1587_v31 }
 0x18c   : > { %v2239_v4 = vpack.c.bf16 %v1588_v44, %v2756_v50  ;;  %v1676_v14 = vmul.f32 %v1588_v44, %v1588_v44  ;;  %v1640_v16 = vadd.f32 %v1639_v45, %v1588_v44 }
 0x18e   : > { %2258 = vst [vmem:[%s2782_s14 + $0x28] sm:$0xff] %v2239_v4   ;;  %v1683_v6 = vadd.f32 %v1682_v23, %v1676_v14 }
 0x18f   : > { %v1578_v30 = vpop.f32.mrf.mxu2 }
 0x190   : > { %v1579_v59 = vadd.f32 %v1578_v30, %v1550_v21 }
 0x191   : > { %v1551_v50 = vpop.f32.mrf.mxu0 }
 0x192   : > { %v1589_v34 = vadd.f32 %v2723_v37, %v1579_v59  ;;  %v1552_v8 = vadd.f32 %v1551_v50, %v1451_v36 }
 0x194   : > { %v2244_v25 = vpack.c.bf16 %v1589_v34, %v2762_v41  ;;  %v1677_v0 = vmul.f32 %v1589_v34, %v1589_v34  ;;  %v1641_v28 = vadd.f32 %v1640_v16, %v1589_v34  ;;  %v1666_v41 = vadd.f32 %v1665_v19, %v2775_v20 }
 0x196   : > { %2259 = vst [vmem:[%s2782_s14 + $0x30] sm:$0xff] %v2244_v25   ;;  %v1684_v62 = vadd.f32 %v1683_v6, %v1677_v0  ;;  %v1667_v26 = vrot.slane %v1666_v41, 2 }
 0x197   : > { %v1580_v2 = vpop.f32.mrf.mxu2 }
 0x198   : > { %v1581_v48 = vadd.f32 %v1580_v2, %v1552_v8  ;;  %v1668_v52 = vadd.f32 %v1667_v26, %v1666_v41 }
 0x19a   : > { %v1590_v58 = vadd.f32 %v2723_v37, %v1581_v48  ;;  %v1634_v37 = vrot.slane %v1633_v33, 1  ;;  %v1669_v24 = vrot.slane %v1668_v52, 1 }
 0x19c   : > { %v2249_v63 = vpack.c.bf16 %v1590_v58, %v2768_v11  ;;  %v1642_v7 = vadd.f32 %v1641_v28, %v1590_v58  ;;  %v1678_v13 = vmul.f32 %v1590_v58, %v1590_v58  ;;  %v1635_v40 = vadd.f32 %v1634_v37, %v1633_v33 }
 0x19d   : > { %v1670_v38 = vadd.f32 %v1669_v24, %v1668_v52 }
 0x19e   : > { %2260 = vst [vmem:[%s2782_s14 + $0x38] sm:$0xff] %v2249_v63   ;;  %v1643_v9 = vrot.slane %v1642_v7, 4  ;;  %v1685_v17 = vadd.f32 %v1684_v62, %v1678_v13 }
 0x1a0   : > { %v1644_v49 = vadd.f32 %v1643_v9, %v1642_v7  ;;  %v1686_v51 = vrot.slane %v1685_v17, 4 }
 0x1a2   : > { %v1645_v43 = vrot.slane %v1644_v49, 2  ;;  %v1687_v53 = vadd.f32 %v1686_v51, %v1685_v17 }
 0x1a4   : > { %v1646_v31 = vadd.f32 %v1645_v43, %v1644_v49  ;;  %v1688_v20 = vrot.slane %v1687_v53, 2 }
 0x1a6   : > { %v1647_v54 = vrot.slane %v1646_v31, 1  ;;  %v1689_v11 = vadd.f32 %v1688_v20, %v1687_v53 }
 0x1a8   : > { %v1648_v55 = vadd.f32 %v1647_v54, %v1646_v31  ;;  %v1690_v56 = vrot.slane %v1689_v11, 1 }
 0x1aa   : > { %v1649_v46 = vadd.f32 %v1648_v55, %v1635_v40  ;;  %v1691_v61 = vadd.f32 %v1690_v56, %v1689_v11 }
 0x1ac   : > { %1694 = vrot.lane.b32.xlu1 %v1649_v46, %s2365_s20  ;;  %v1692_v44 = vadd.f32 %v1691_v61, %v1670_v38 }
 0x1ae   : > { %1701 = vrot.lane.b32.xlu2 %v1692_v44, %s2365_s20 }
 0x208   : > { %v1702_v57 = vpop.permute.xlu2 %1701 }
 0x209   : > { %v1704_v4 = vadd.f32 %v1702_v57, %v1692_v44 }
 0x20b   : > { %1705 = vst.msk [vmem:[%s541_s17] sm:$0x1] %vm1698_vm15, %v1704_v4 }
 0x21e   : > { %v1695_v10 = vpop.permute.xlu1 %1694 }
 0x21f   : > { %v1697_v21 = vadd.f32 %v1695_v10, %v1649_v46 }
 0x221   : > { %1699 = vst.msk [vmem:[%s535_s21] sm:$0x1] %vm1698_vm15, %v1697_v21 }
 0x222 PF: > { %s21_s30 = sadd.s32 1, %s2359_s30   ;;  %s2844_s28 = smov %s2355_s29 }
 0x223   : > { %p18_p8 = scmp.ge.s32.totalorder %s21_s30, 4   ;;  %s2845_s29 = smov %s2847_s11 }
 0x225   :  { %20 = sbr.rel (!%p18_p8) target bundleno = 2 (0x2), region = 116 }
 0x22a   :  { %1774 = vsyncpa [#allocation3], 1 }
 0x22b   :  { %1776 = vsyncpa [#allocation3 + $0x1], 1 }

// kernel: generator_forward.6
= control target key start
LH: loop header
LB: loop body
LE: loop exit
PB: predicated region body
PF: predicated region fallthrough
CT: control target
= control target key end

     0   :  { %15 = vsyncpa [#allocation3], 0  ;;  %s3646_s28 = smov 0   ;;  %s3648_s29 = smov 0   ;;  %s3816_s0 = inlined_call_operand.vmem [shape: f32[2,2,2,128], index: 0, kind: input, shape index: {}, may-alias: {0,1,2}]   ;;  %s3817_s1 = inlined_call_operand.vmem [shape: f32[2,2,2,128], index: 1, kind: input, shape index: {}, may-alias: {0,1,2}]   ;;  %s3818_s2 = inlined_call_operand.vmem [shape: f32[2,2,2,128], index: 2, kind: input, shape index: {}, may-alias: {0,1,2}]   ;;  %s3819_s3 = inlined_call_operand.vmem [shape: f32[1,128], index: 3, kind: input, shape index: {}]   ;;  %s3820_s4 = inlined_call_operand.vmem [shape: f32[1,128], index: 4, kind: input, shape index: {}]   ;;  %s3821_s5 = inlined_call_operand.hbm [shape: bf16[4,384,256], index: 5, kind: input, shape index: {}]   ;;  %s3822_s6 = inlined_call_operand.vmem [shape: f32[1,256], index: 6, kind: input, shape index: {}]   ;;  %s3823_s7 = inlined_call_operand.vmem [shape: bf16[2,2,2,2,256], index: 7, kind: output, shape index: {0}]   ;;  %s3824_s8 = inlined_call_operand.vmem [shape: f32[2,1,1,128], index: 8, kind: output, shape index: {1}]   ;;  %s3825_s9 = inlined_call_operand.vmem [shape: f32[2,1,1,128], index: 9, kind: output, shape index: {2}]  }
   0x1   :  { %s3650_s30 = smov 0  }
   0x2 LB: > { %s2514_s10 = sadd.s32 4294967295, %s3590_s30   ;;  %s33_s11 = sadd.s32 1, %s3586_s29  ;;  %s3590_s30 = sphi %s3650_s30, %s21_s30   ;;  %s3586_s29 = sphi %s3648_s29, %s3829_s29   ;;  %s3582_s28 = sphi %s3646_s28, %s3828_s28  }
   0x3   : > { %p35_p0 = scmp.ge.s32.totalorder %s33_s11, 2  ;;  %p2516_p1 = scmp.ge.s32.totalorder %s3590_s30, 1 }
   0x4   : > { %p306_p2 = scmp.lt.s32.totalorder %s3590_s30, 3  ;;  %p3502_p4 = scmp.eq.s32.totalorder %s2514_s10, 0 }
   0x5   : > { %s3831_s11 = smov (%p35_p0, %s33_s11), 0  ;;  %s323_s14 = sshll.u32 %s3821_s5, 4  ;;  %s324_s14 = int_to_ptr.hbm [resolvable:$true] %s323_s14 }
   0x6   : > { %p307_p3 = pnand %p2516_p1, %p306_p2  ;;  %s3592_s15 = smov [#allocation2]  }
   0x7   : > { %s325_s16 = sshll.u32 %s3592_s15, 4  ;;  %s3593_s17 = smov 128   ;;  %s326_s16 = int_to_ptr.vmem [resolvable:$true] %s325_s16 }
   0x8   : > { %p3498_p5 = pneg %p307_p3  ;;  %s3594_s18 = smov 8  }
   0x9   : > { %395 = sbr.rel (%p307_p3) target bundleno = 369 (0x171), region = 48 }
   0xa   : > { %p3499_p6 = pnand %p3502_p4, %p3498_p5 }
   0xc   : > { %3501 = dma.hbm_to_vmem [thread:$0]  (!%p3499_p6), %s324_s14, 24576, %s326_s16, [#allocation3], %s3593_s17, %s3593_s17, %s3594_s18  }
   0xe   : > { %3577 = dma.done.wait (%p3502_p4), [#allocation3], 24576  }
   0xf   : > { %3579 = vsyncadd (%p3502_p4), [#allocation3], 4294942720  ;;  %v2586_v0 = vld [vmem:[#allocation2 + $0x1f0] sm:$0xf]  ;;  %v3365_v1 = vld [vmem:[#allocation2 + $0x1f4] sm:$0xf0] }
  0x10   : > { %v2650_v2 = vld [vmem:[#allocation2 + $0x270] sm:$0xf]  ;;  %v2587_v3 = vor.u32 %v3365_v1, %v2586_v0  ;;  %v3381_v4 = vld [vmem:[#allocation2 + $0x274] sm:$0xf0]  ;;  %v3364_v9 = vld [vmem:[#allocation2 + $0x1f4] sm:$0xf] }
  0x11   : > { %v2714_v5 = vld [vmem:[#allocation2 + $0x2f0] sm:$0xf]  ;;  %v3397_v6 = vld [vmem:[#allocation2 + $0x2f4] sm:$0xf0]  ;;  %v2651_v7 = vor.u32 %v3381_v4, %v2650_v2  ;;  %v2588_v10 = vld [vmem:[#allocation2 + $0x1f8] sm:$0xf0] }
  0x12   : > { %v2715_v8 = vor.u32 %v3397_v6, %v2714_v5  ;;  %v2578_v11 = vld [vmem:[#allocation2 + $0x1e0] sm:$0xf]  ;;  %1007 = vmatpush.bf16.msra.mxu0 %v2587_v3  ;;  %v2591_v12 = vor.u32 %v3364_v9, %v2588_v10  ;;  %v3363_v13 = vld [vmem:[#allocation2 + $0x1e4] sm:$0xf0]  ;;  %v3362_v20 = vld [vmem:[#allocation2 + $0x1e4] sm:$0xf] }
  0x13   : > { %v2642_v14 = vld [vmem:[#allocation2 + $0x260] sm:$0xf]  ;;  %v3379_v15 = vld [vmem:[#allocation2 + $0x264] sm:$0xf0]  ;;  %1020 = vmatpush.bf16.msra.mxu1 %v2651_v7  ;;  %v2579_v16 = vor.u32 %v3363_v13, %v2578_v11  ;;  %v2580_v22 = vld [vmem:[#allocation2 + $0x1e8] sm:$0xf0] }
  0x14   : > { %1033 = vmatpush.bf16.msra.mxu2 %v2715_v8  ;;  %v2643_v17 = vor.u32 %v3379_v15, %v2642_v14  ;;  %v2706_v18 = vld [vmem:[#allocation2 + $0x2e0] sm:$0xf]  ;;  %v3395_v19 = vld [vmem:[#allocation2 + $0x2e4] sm:$0xf0]  ;;  %1046 = vmatpush.bf16.msra.mxu3 %v2591_v12  ;;  %v2570_v23 = vld [vmem:[#allocation2 + $0x1d0] sm:$0xf]  ;;  %v2583_v25 = vor.u32 %v3362_v20, %v2580_v22 }
  0x15   : > { %v2707_v21 = vor.u32 %v3395_v19, %v2706_v18  ;;  %v3361_v24 = vld [vmem:[#allocation2 + $0x1d4] sm:$0xf0]  ;;  %v2634_v26 = vld [vmem:[#allocation2 + $0x250] sm:$0xf]  ;;  %v3360_v31 = vld [vmem:[#allocation2 + $0x1d4] sm:$0xf] }
  0x16   : > { %v3377_v27 = vld [vmem:[#allocation2 + $0x254] sm:$0xf0]  ;;  %v2698_v28 = vld [vmem:[#allocation2 + $0x2d0] sm:$0xf]  ;;  %1008 = vmatpush.bf16.msra.mxu0 %v2579_v16  ;;  %v2571_v29 = vor.u32 %v3361_v24, %v2570_v23  ;;  %v2572_v32 = vld [vmem:[#allocation2 + $0x1d8] sm:$0xf0] }
  0x17   : > { %v3393_v30 = vld [vmem:[#allocation2 + $0x2d4] sm:$0xf0]  ;;  %1021 = vmatpush.bf16.msra.mxu1 %v2643_v17  ;;  %v2635_v33 = vor.u32 %v3377_v27, %v2634_v26  ;;  %v2562_v35 = vld [vmem:[#allocation2 + $0x1c0] sm:$0xf]  ;;  %v3359_v36 = vld [vmem:[#allocation2 + $0x1c4] sm:$0xf0]  ;;  %v2575_v38 = vor.u32 %v3360_v31, %v2572_v32 }
  0x18   : > { %1034 = vmatpush.bf16.msra.mxu2 %v2707_v21  ;;  %v2699_v34 = vor.u32 %v3393_v30, %v2698_v28  ;;  %v2626_v37 = vld [vmem:[#allocation2 + $0x240] sm:$0xf]  ;;  %1047 = vmatpush.bf16.msra.mxu3 %v2583_v25  ;;  %v3375_v39 = vld [vmem:[#allocation2 + $0x244] sm:$0xf0]  ;;  %v3358_v42 = vld [vmem:[#allocation2 + $0x1c4] sm:$0xf]  ;;  %v2563_v44 = vor.u32 %v3359_v36, %v2562_v35 }
  0x19   : > { %v2690_v40 = vld [vmem:[#allocation2 + $0x2c0] sm:$0xf]  ;;  %v3391_v41 = vld [vmem:[#allocation2 + $0x2c4] sm:$0xf0]  ;;  %v2564_v43 = vld [vmem:[#allocation2 + $0x1c8] sm:$0xf0]  ;;  %v2627_v45 = vor.u32 %v3375_v39, %v2626_v37 }
  0x1a   : > { %1009 = vmatpush.bf16.msra.mxu0 %v2571_v29  ;;  %v2691_v46 = vor.u32 %v3391_v41, %v2690_v40  ;;  %v2554_v47 = vld [vmem:[#allocation2 + $0x1b0] sm:$0xf]  ;;  %v3357_v48 = vld [vmem:[#allocation2 + $0x1b4] sm:$0xf0]  ;;  %v2567_v50 = vor.u32 %v3358_v42, %v2564_v43  ;;  %v3356_v54 = vld [vmem:[#allocation2 + $0x1b4] sm:$0xf] }
  0x1b   : > { %1022 = vmatpush.bf16.msra.mxu1 %v2635_v33  ;;  %v2618_v49 = vld [vmem:[#allocation2 + $0x230] sm:$0xf]  ;;  %v3373_v51 = vld [vmem:[#allocation2 + $0x234] sm:$0xf0]  ;;  %v2556_v55 = vld [vmem:[#allocation2 + $0x1b8] sm:$0xf0]  ;;  %v2555_v56 = vor.u32 %v3357_v48, %v2554_v47 }
  0x1c   : > { %1035 = vmatpush.bf16.msra.mxu2 %v2699_v34  ;;  %1048 = vmatpush.bf16.msra.mxu3 %v2575_v38  ;;  %v2682_v52 = vld [vmem:[#allocation2 + $0x2b0] sm:$0xf]  ;;  %v3389_v53 = vld [vmem:[#allocation2 + $0x2b4] sm:$0xf0]  ;;  %p477_p7 = scmp.lt.s32.totalorder %s3582_s28, 1  ;;  %v2619_v57 = vor.u32 %v3373_v51, %v2618_v49  ;;  %v2559_v62 = vor.u32 %v3356_v54, %v2556_v55  ;;  %vm603_vm0 = vcmask 1040384  }
  0x1d   : > { %v2683_v58 = vor.u32 %v3389_v53, %v2682_v52  ;;  %v2546_v59 = vld [vmem:[#allocation2 + $0x1a0] sm:$0xf]  ;;  %v3355_v60 = vld [vmem:[#allocation2 + $0x1a4] sm:$0xf0]  ;;  %v3354_v2 = vld [vmem:[#allocation2 + $0x1a4] sm:$0xf] }
  0x1e   : > { %1010 = vmatpush.bf16.msra.mxu0 %v2563_v44  ;;  %v2610_v61 = vld [vmem:[#allocation2 + $0x220] sm:$0xf]  ;;  %v3371_v63 = vld [vmem:[#allocation2 + $0x224] sm:$0xf0]  ;;  %v2548_v3 = vld [vmem:[#allocation2 + $0x1a8] sm:$0xf0]  ;;  %v2547_v4 = vor.u32 %v3355_v60, %v2546_v59 }
  0x1f   : > { %1023 = vmatpush.bf16.msra.mxu1 %v2627_v45  ;;  %v2674_v0 = vld [vmem:[#allocation2 + $0x2a0] sm:$0xf]  ;;  %v3387_v1 = vld [vmem:[#allocation2 + $0x2a4] sm:$0xf0]  ;;  %s3833_s28 = smov (!%p477_p7, %s3582_s28), 1  ;;  %v2611_v5 = vor.u32 %v3371_v63, %v2610_v61  ;;  %v2551_v10 = vor.u32 %v3354_v2, %v2548_v3  ;;  %vm642_vm2 = vcmask 1041408  }
  0x20   : > { %1036 = vmatpush.bf16.msra.mxu2 %v2691_v46  ;;  %1049 = vmatpush.bf16.msra.mxu3 %v2567_v50  ;;  %v2675_v6 = vor.u32 %v3387_v1, %v2674_v0  ;;  %v2538_v7 = vld [vmem:[#allocation2 + $0x190] sm:$0xf]  ;;  %v3353_v8 = vld [vmem:[#allocation2 + $0x194] sm:$0xf0]  ;;  %v3352_v14 = vld [vmem:[#allocation2 + $0x194] sm:$0xf]  ;;  %s533_s16 = scalar_lea.vmem %s3824_s8, %s3833_s28 }
  0x21   : > { %v2602_v9 = vld [vmem:[#allocation2 + $0x210] sm:$0xf]  ;;  %v3369_v11 = vld [vmem:[#allocation2 + $0x214] sm:$0xf0]  ;;  %v2540_v15 = vld [vmem:[#allocation2 + $0x198] sm:$0xf0]  ;;  %v2539_v16 = vor.u32 %v3353_v8, %v2538_v7 }
  0x22   : > { %1011 = vmatpush.bf16.msra.mxu0 %v2555_v56  ;;  %v2666_v12 = vld [vmem:[#allocation2 + $0x290] sm:$0xf]  ;;  %v3385_v13 = vld [vmem:[#allocation2 + $0x294] sm:$0xf0]  ;;  %v2530_v17 = vld [vmem:[#allocation2 + $0x180] sm:$0xf]  ;;  %v2603_v19 = vor.u32 %v3369_v11, %v2602_v9  ;;  %v2543_v24 = vor.u32 %v3352_v14, %v2540_v15 }
  0x23   : > { %1024 = vmatpush.bf16.msra.mxu1 %v2619_v57  ;;  %v3351_v18 = vld [vmem:[#allocation2 + $0x184] sm:$0xf0]  ;;  %s3298_s19 = sshll.u32 %s3833_s28, 2  ;;  %v2667_v20 = vor.u32 %v3385_v13, %v2666_v12  ;;  %v2594_v21 = vld [vmem:[#allocation2 + $0x200] sm:$0xf]  ;;  %vm2177_vm4 = vcmask 1043458  }
  0x24   : > { %1037 = vmatpush.bf16.msra.mxu2 %v2683_v58  ;;  %1050 = vmatpush.bf16.msra.mxu3 %v2559_v62  ;;  %v3367_v22 = vld [vmem:[#allocation2 + $0x204] sm:$0xf0]  ;;  %v2658_v23 = vld [vmem:[#allocation2 + $0x280] sm:$0xf]  ;;  %v3350_v26 = vld [vmem:[#allocation2 + $0x184] sm:$0xf]  ;;  %v2531_v31 = vor.u32 %v3351_v18, %v2530_v17  ;;  %s484_s22 = scalar_lea.vmem %s3816_s0, %s3298_s19  ;;  %s539_s19 = scalar_lea.vmem %s3825_s9, %s3833_s28 }
  0x25   : > { %v3383_v25 = vld [vmem:[#allocation2 + $0x284] sm:$0xf0]  ;;  %v2532_v27 = vld [vmem:[#allocation2 + $0x188] sm:$0xf0]  ;;  %v3380_v28 = vld [vmem:[#allocation2 + $0x274] sm:$0xf]  ;;  %v2595_v35 = vor.u32 %v3367_v22, %v2594_v21 }
  0x26   : > { %1012 = vmatpush.bf16.msra.mxu0 %v2547_v4  ;;  %v2652_v29 = vld [vmem:[#allocation2 + $0x278] sm:$0xf0]  ;;  %v3396_v30 = vld [vmem:[#allocation2 + $0x2f4] sm:$0xf]  ;;  %v2778_v33 = vld [vmem:[#allocation2 + $0x70] sm:$0xf]  ;;  %v2659_v36 = vor.u32 %v3383_v25, %v2658_v23  ;;  %v2535_v39 = vor.u32 %v3350_v26, %v2532_v27 }
  0x27   : > { %1025 = vmatpush.bf16.msra.mxu1 %v2611_v5  ;;  %v2716_v32 = vld [vmem:[#allocation2 + $0x2f8] sm:$0xf0]  ;;  %v3317_v34 = vld [vmem:[#allocation2 + $0x74] sm:$0xf0]  ;;  %v2842_v37 = vld [vmem:[#allocation2 + $0xf0] sm:$0xf]  ;;  %v2655_v40 = vor.u32 %v3380_v28, %v2652_v29 }
  0x28   : > { %1038 = vmatpush.bf16.msra.mxu2 %v2675_v6  ;;  %1051 = vmatpush.bf16.msra.mxu3 %v2551_v10  ;;  %v3333_v38 = vld [vmem:[#allocation2 + $0xf4] sm:$0xf0]  ;;  %v3378_v41 = vld [vmem:[#allocation2 + $0x264] sm:$0xf]  ;;  %v2644_v42 = vld [vmem:[#allocation2 + $0x268] sm:$0xf0]  ;;  %v2719_v43 = vor.u32 %v3396_v30, %v2716_v32  ;;  %v2779_v44 = vor.u32 %v3317_v34, %v2778_v33 }
  0x29   : > { %v3394_v45 = vld [vmem:[#allocation2 + $0x2e4] sm:$0xf]  ;;  %v2708_v46 = vld [vmem:[#allocation2 + $0x2e8] sm:$0xf0]  ;;  %v2770_v47 = vld [vmem:[#allocation2 + $0x60] sm:$0xf]  ;;  %v2843_v48 = vor.u32 %v3333_v38, %v2842_v37  ;;  %v2647_v53 = vor.u32 %v3378_v41, %v2644_v42 }
  0x2a   : > { %1013 = vmatpush.bf16.msra.mxu0 %v2539_v16  ;;  %v3315_v49 = vld [vmem:[#allocation2 + $0x64] sm:$0xf0]  ;;  %v2834_v50 = vld [vmem:[#allocation2 + $0xe0] sm:$0xf]  ;;  %v543_v52 = vld [vmem:[%s484_s22] sm:$0x3]  ;;  %v2711_v57 = vor.u32 %v3394_v45, %v2708_v46 }
  0x2b   : > { %1026 = vmatpush.bf16.msra.mxu1 %v2603_v19  ;;  %v3331_v51 = vld [vmem:[#allocation2 + $0xe4] sm:$0xf0]  ;;  %v544_v54 = vld [vmem:[%s484_s22 + $0x2] sm:$0x3]  ;;  %v3532_v55 = vld [vmem:[%s3819_s3] ss:$0 sm:$0xff]  ;;  %v2771_v58 = vor.u32 %v3315_v49, %v2770_v47 }
  0x2c   : > { %1039 = vmatpush.bf16.msra.mxu2 %v2667_v20  ;;  %1052 = vmatpush.bf16.msra.mxu3 %v2543_v24  ;;  %v3533_v56 = vld [vmem:[%s3820_s4] ss:$0 sm:$0xff]  ;;  %v3376_v59 = vld [vmem:[#allocation2 + $0x254] sm:$0xf]  ;;  %v2636_v60 = vld [vmem:[#allocation2 + $0x258] sm:$0xf0]  ;;  %v2835_v62 = vor.u32 %v3331_v51, %v2834_v50  ;;  %v548_v2 = vmul.f32 %v3532_v55, %v543_v52  ;;  %v549_v3 = vmul.f32 %v3532_v55, %v544_v54 }
  0x2d   : > { %v3392_v61 = vld [vmem:[#allocation2 + $0x2d4] sm:$0xf]  ;;  %v2700_v63 = vld [vmem:[#allocation2 + $0x2d8] sm:$0xf0]  ;;  %v2762_v0 = vld [vmem:[#allocation2 + $0x50] sm:$0xf]  ;;  %v2639_v6 = vor.u32 %v3376_v59, %v2636_v60 }
  0x2e   : > { %1014 = vmatpush.bf16.msra.mxu0 %v2531_v31  ;;  %v3313_v1 = vld [vmem:[#allocation2 + $0x54] sm:$0xf0]  ;;  %v2826_v4 = vld [vmem:[#allocation2 + $0xd0] sm:$0xf]  ;;  %v3374_v7 = vld [vmem:[#allocation2 + $0x244] sm:$0xf]  ;;  %v553_v10 = vadd.f32 %v3533_v56, %v548_v2  ;;  %v554_v11 = vadd.f32 %v3533_v56, %v549_v3  ;;  %v2703_v12 = vor.u32 %v3392_v61, %v2700_v63 }
  0x2f   : > { %1027 = vmatpush.bf16.msra.mxu1 %v2595_v35  ;;  %v3329_v5 = vld [vmem:[#allocation2 + $0xd4] sm:$0xf0]  ;;  %v2628_v8 = vld [vmem:[#allocation2 + $0x248] sm:$0xf0]  ;;  %v3390_v9 = vld [vmem:[#allocation2 + $0x2c4] sm:$0xf]  ;;  %v2763_v13 = vor.u32 %v3313_v1, %v2762_v0 }
  0x30   : > { %1040 = vmatpush.bf16.msra.mxu2 %v2659_v36  ;;  %1053 = vmatpush.bf16.msra.mxu3 %v2535_v39  ;;  %v2692_v14 = vld [vmem:[#allocation2 + $0x2c8] sm:$0xf0]  ;;  %v2754_v15 = vld [vmem:[#allocation2 + $0x40] sm:$0xf]  ;;  %v3311_v16 = vld [vmem:[#allocation2 + $0x44] sm:$0xf0]  ;;  %v2827_v17 = vor.u32 %v3329_v5, %v2826_v4  ;;  %v572_v20 = vpack.c.bf16 %v553_v10, %v553_v10  ;;  %v573_v21 = vpack.c.bf16 %v554_v11, %v554_v11 }
  0x31   : > { %v2818_v18 = vld [vmem:[#allocation2 + $0xc0] sm:$0xf]  ;;  %v3327_v19 = vld [vmem:[#allocation2 + $0xc4] sm:$0xf0]  ;;  %vm604_vm1 = vsmask.f32 256  ;;  %v2631_v23 = vor.u32 %v3374_v7, %v2628_v8  ;;  %v2695_v29 = vor.u32 %v3390_v9, %v2692_v14  ;;  %v2755_v30 = vor.u32 %v3311_v16, %v2754_v15 }
  0x32   : > { %1059 = vmatpush.bf16.msrb.mxu0 %v2655_v40  ;;  %v3372_v22 = vld [vmem:[#allocation2 + $0x234] sm:$0xf]  ;;  %v580_v24 = vunpack.c.l.b16 %v572_v20  ;;  %v581_v25 = vunpack.c.l.b16 %v573_v21  ;;  %v2620_v26 = vld [vmem:[#allocation2 + $0x238] sm:$0xf0]  ;;  %v2746_v31 = vld [vmem:[#allocation2 + $0x30] sm:$0xf]  ;;  %v2819_v34 = vor.u32 %v3327_v19, %v2818_v18 }
  0x33   : > { %1072 = vmatpush.bf16.msrb.mxu1 %v2719_v43  ;;  %v3388_v27 = vld [vmem:[#allocation2 + $0x2b4] sm:$0xf]  ;;  %v2684_v28 = vld [vmem:[#allocation2 + $0x2b8] sm:$0xf0]  ;;  %v3595_v32 = vmov 0.0|0.0   ;;  %vm3690_vm3 = vmand %vm603_vm0, %vm604_vm1  ;;  %v632_v41 = vrot.slane %v572_v20, 7  ;;  %v2623_v43 = vor.u32 %v3372_v22, %v2620_v26 }
  0x34   : > { %1334 = vmatpush.bf16.msrb.mxu2 %v2779_v44  ;;  %1347 = vmatpush.bf16.msrb.mxu3 %v2843_v48  ;;  %v579_v33 = vunpack.c.l.b16 %v3595_v32  ;;  %v584_v35 = vpack.c.b16 %v580_v24, %v580_v24  ;;  %v585_v36 = vpack.c.b16 %v581_v25, %v581_v25  ;;  %v3309_v37 = vld [vmem:[#allocation2 + $0x34] sm:$0xf0]  ;;  %v2810_v38 = vld [vmem:[#allocation2 + $0xb0] sm:$0xf]  ;;  %v634_v42 = vrot.slane %v573_v21, 7  ;;  %s2527_s2 = sshll.u32 %s3833_s28, 3 }
  0x35   : > { %v3325_v39 = vld [vmem:[#allocation2 + $0xb4] sm:$0xf0]  ;;  %v2687_v44 = vor.u32 %v3388_v27, %v2684_v28  ;;  %v3370_v45 = vld [vmem:[#allocation2 + $0x224] sm:$0xf]  ;;  %v2612_v46 = vld [vmem:[#allocation2 + $0x228] sm:$0xf0]  ;;  %v2747_v52 = vor.u32 %v3309_v37, %v2746_v31  ;;  %s3777_s13 = scalar_lea.vmem %s3823_s7, %s2527_s2 }
  0x36   : > { %1060 = vmatpush.bf16.msrb.mxu0 %v2647_v53  ;;  %v591_v47 = vshll.u32 %v584_v35, 16  ;;  %v594_v48 = vshll.u32 %v585_v36, 16  ;;  %v612_v49 = vshrl.u32 %v584_v35, 16  ;;  %v614_v50 = vshrl.u32 %v585_v36, 16  ;;  %v3386_v51 = vld [vmem:[#allocation2 + $0x2a4] sm:$0xf] }
  0x37   : > { %1073 = vmatpush.bf16.msrb.mxu1 %v2711_v57  ;;  %v2811_v53 = vor.u32 %v3325_v39, %v2810_v38  ;;  %v2676_v54 = vld [vmem:[#allocation2 + $0x2a8] sm:$0xf0]  ;;  %v2738_v55 = vld [vmem:[#allocation2 + $0x20] sm:$0xf]  ;;  %v3307_v56 = vld [vmem:[#allocation2 + $0x24] sm:$0xf0]  ;;  %v583_v57 = vpack.c.b16 %v579_v33, %v579_v33  ;;  %v2615_v5 = vor.u32 %v3370_v45, %v2612_v46 }
  0x38   : > { %1335 = vmatpush.bf16.msrb.mxu2 %v2771_v58  ;;  %1348 = vmatpush.bf16.msrb.mxu3 %v2835_v62  ;;  %v607_v58 = vsel %vm3690_vm3, 0, %v591_v47  ;;  %v608_v59 = vsel %vm3690_vm3, 0, %v594_v48  ;;  %v623_v60 = vsel %vm3690_vm3, %v612_v49, 0  ;;  %v624_v61 = vsel %vm3690_vm3, %v614_v50, 0  ;;  %v2802_v62 = vld [vmem:[#allocation2 + $0xa0] sm:$0xf] }
  0x39   : > { %v633_v63 = vrot.slane %v623_v60, 6  ;;  %v635_v0 = vrot.slane %v624_v61, 6  ;;  %v647_v1 = vsel %vm603_vm0, %v607_v58, %v632_v41  ;;  %v652_v2 = vsel %vm603_vm0, %v608_v59, %v634_v42  ;;  %v3323_v3 = vld [vmem:[#allocation2 + $0xa4] sm:$0xf0]  ;;  %v3368_v4 = vld [vmem:[#allocation2 + $0x214] sm:$0xf] }
  0x3a   : > { %1061 = vmatpush.bf16.msrb.mxu0 %v2639_v6  ;;  %v2679_v6 = vor.u32 %v3386_v51, %v2676_v54  ;;  %v2604_v7 = vld [vmem:[#allocation2 + $0x218] sm:$0xf0]  ;;  %v3384_v8 = vld [vmem:[#allocation2 + $0x294] sm:$0xf]  ;;  %v3305_v14 = vld [vmem:[#allocation2 + $0x14] sm:$0xf0]  ;;  %v2803_v16 = vor.u32 %v3323_v3, %v2802_v62 }
  0x3b   : > { %1074 = vmatpush.bf16.msrb.mxu1 %v2703_v12  ;;  %v2668_v9 = vld [vmem:[#allocation2 + $0x298] sm:$0xf0]  ;;  %v3705_v10 = vsel %vm642_vm2, %v647_v1, %v633_v63  ;;  %v3708_v11 = vsel %vm642_vm2, %v652_v2, %v635_v0  ;;  %v2739_v12 = vor.u32 %v3307_v56, %v2738_v55  ;;  %v588_v15 = vshll.u32 %v583_v57, 16  ;;  %v3321_v20 = vld [vmem:[#allocation2 + $0x94] sm:$0xf0] }
  0x3c   : > { %1336 = vmatpush.bf16.msrb.mxu2 %v2763_v13  ;;  %1349 = vmatpush.bf16.msrb.mxu3 %v2827_v17  ;;  %v2730_v13 = vld [vmem:[#allocation2 + $0x10] sm:$0xf]  ;;  %758 = vst [vmem:[#allocation1] ss:$9 sm:$0xff] %v3705_v10  ;;  %v610_v18 = vshrl.u32 %v583_v57, 16  ;;  %v630_v19 = vrot.slane %v3595_v32, 7  ;;  %v2607_v22 = vor.u32 %v3368_v4, %v2604_v7  ;;  %v2671_v26 = vor.u32 %v3384_v8, %v2668_v9 }
  0x3d   : > { %v2794_v17 = vld [vmem:[#allocation2 + $0x90] sm:$0xf]  ;;  %760 = vst [vmem:[#allocation1 + $0x1] ss:$9 sm:$0xff] %v3708_v11  ;;  %v606_v21 = vsel %vm3690_vm3, 0, %v588_v15  ;;  %v2731_v27 = vor.u32 %v3305_v14, %v2730_v13  ;;  %vm2240_vm5 = vcmask 1043456  }
  0x3e   : > { %1062 = vmatpush.bf16.msrb.mxu0 %v2631_v23  ;;  %v3366_v23 = vld [vmem:[#allocation2 + $0x204] sm:$0xf]  ;;  %v2596_v24 = vld [vmem:[#allocation2 + $0x208] sm:$0xf0]  ;;  %v622_v25 = vsel %vm3690_vm3, %v610_v18, 0  ;;  %v2795_v31 = vor.u32 %v3321_v20, %v2794_v17  ;;  %v641_v35 = vsel %vm603_vm0, %v606_v21, %v630_v19 }
  0x3f   : > { %1075 = vmatpush.bf16.msrb.mxu1 %v2695_v29  ;;  %v3382_v28 = vld [vmem:[#allocation2 + $0x284] sm:$0xf]  ;;  %v2660_v29 = vld [vmem:[#allocation2 + $0x288] sm:$0xf0]  ;;  %v2722_v32 = vld [vmem:[#allocation2] sm:$0xf]  ;;  %v2599_v42 = vor.u32 %v3366_v23, %v2596_v24 }
  0x40   : > { %1337 = vmatpush.bf16.msrb.mxu2 %v2755_v30  ;;  %1350 = vmatpush.bf16.msrb.mxu3 %v2819_v34  ;;  %v631_v30 = vrot.slane %v622_v25, 6  ;;  %v3303_v33 = vld [vmem:[#allocation2 + $0x4] sm:$0xf0]  ;;  %v2786_v34 = vld [vmem:[#allocation2 + $0x80] sm:$0xf] }
  0x41   : > { %v3319_v36 = vld [vmem:[#allocation2 + $0x84] sm:$0xf0]  ;;  %v2906_v37 = vld [vmem:[#allocation2 + $0x170] sm:$0xf]  ;;  %v3349_v38 = vld [vmem:[#allocation2 + $0x174] sm:$0xf0]  ;;  %v2723_v51 = vor.u32 %v3303_v33, %v2722_v32 }
  0x42   : > { %1063 = vmatpush.bf16.msrb.mxu0 %v2623_v43  ;;  %v3316_v39 = vld [vmem:[#allocation2 + $0x74] sm:$0xf]  ;;  %v2780_v40 = vld [vmem:[#allocation2 + $0x78] sm:$0xf0]  ;;  %v2663_v43 = vor.u32 %v3382_v28, %v2660_v29  ;;  %v3718_v47 = vsel %vm642_vm2, %v641_v35, %v631_v30  ;;  %v2907_v54 = vor.u32 %v3349_v38, %v2906_v37  ;;  %v3347_v56 = vld [vmem:[#allocation2 + $0x164] sm:$0xf0] }
  0x43   : > { %1076 = vmatpush.bf16.msrb.mxu1 %v2687_v44  ;;  %v3332_v41 = vld [vmem:[#allocation2 + $0xf4] sm:$0xf]  ;;  %v2844_v44 = vld [vmem:[#allocation2 + $0xf8] sm:$0xf0]  ;;  %v2783_v55 = vor.u32 %v3316_v39, %v2780_v40  ;;  %v3314_v57 = vld [vmem:[#allocation2 + $0x64] sm:$0xf] }
  0x44   : > { %1338 = vmatpush.bf16.msrb.mxu2 %v2747_v52  ;;  %1351 = vmatpush.bf16.msrb.mxu3 %v2811_v53  ;;  %v3348_v45 = vld [vmem:[#allocation2 + $0x174] sm:$0xf]  ;;  %v2908_v46 = vld [vmem:[#allocation2 + $0x178] sm:$0xf0]  ;;  %v3720_v48 = vld [vmem:[#allocation1 + $0x12] sm:$0xff]  ;;  %v2787_v52 = vor.u32 %v3319_v36, %v2786_v34  ;;  %v2847_v58 = vor.u32 %v3332_v41, %v2844_v44 }
  0x45   : > { %v761_v49 = vld [vmem:[#allocation1] sm:$0xff]  ;;  %v3722_v50 = vld [vmem:[#allocation1 + $0x9] sm:$0xff]  ;;  %1041 = vmatmul.bf16.vlgmr.msra.gmra.mxu2 %v3720_v48  ;;  %v2911_v59 = vor.u32 %v3348_v45, %v2908_v46  ;;  %v2772_v60 = vld [vmem:[#allocation2 + $0x68] sm:$0xf0] }
  0x46   : > { %1064 = vmatpush.bf16.msrb.mxu0 %v2615_v5  ;;  %v2898_v53 = vld [vmem:[#allocation2 + $0x160] sm:$0xf]  ;;  %1054 = vmatmul.bf16.vlgmr.msra.gmra.mxu3 %v761_v49  ;;  %1087 = vst [vmem:[#allocation1 + $0x1] ss:$9 sm:$0xff] %v3705_v10  ;;  %v3330_v61 = vld [vmem:[#allocation2 + $0xe4] sm:$0xf]  ;;  %v2775_v2 = vor.u32 %v3314_v57, %v2772_v60 }
  0x47   : > { %1077 = vmatpush.bf16.msrb.mxu1 %v2679_v6  ;;  %1015 = vmatmul.bf16.vlgmr.msra.gmra.mxu0 %v761_v49  ;;  %1085 = vst [vmem:[#allocation1] ss:$9 sm:$0xff] %v3718_v47  ;;  %v2836_v62 = vld [vmem:[#allocation2 + $0xe8] sm:$0xf0]  ;;  %v3346_v63 = vld [vmem:[#allocation2 + $0x164] sm:$0xf]  ;;  %v2899_v1 = vor.u32 %v3347_v56, %v2898_v53 }
  0x48   : > { %1339 = vmatpush.bf16.msrb.mxu2 %v2739_v12  ;;  %1352 = vmatpush.bf16.msrb.mxu3 %v2803_v16  ;;  %v2900_v0 = vld [vmem:[#allocation2 + $0x168] sm:$0xf0]  ;;  %v2890_v3 = vld [vmem:[#allocation2 + $0x150] sm:$0xf]  ;;  %v3345_v4 = vld [vmem:[#allocation2 + $0x154] sm:$0xf0]  ;;  %v2839_v5 = vor.u32 %v3330_v61, %v2836_v62 }
  0x49   : > { %1028 = vmatmul.bf16.vlgmr.msra.gmra.mxu1 %v3722_v50  ;;  %v2903_v6 = vor.u32 %v3346_v63, %v2900_v0  ;;  %v3312_v7 = vld [vmem:[#allocation2 + $0x54] sm:$0xf]  ;;  %v2764_v8 = vld [vmem:[#allocation2 + $0x58] sm:$0xf0]  ;;  %v2891_v15 = vor.u32 %v3345_v4, %v2890_v3  ;;  %v2882_v19 = vld [vmem:[#allocation2 + $0x140] sm:$0xf] }
  0x4a   : > { %1065 = vmatpush.bf16.msrb.mxu0 %v2607_v22  ;;  %v3328_v9 = vld [vmem:[#allocation2 + $0xd4] sm:$0xf]  ;;  %v2828_v12 = vld [vmem:[#allocation2 + $0xd8] sm:$0xf0]  ;;  %v2767_v16 = vor.u32 %v3312_v7, %v2764_v8  ;;  %v3343_v20 = vld [vmem:[#allocation2 + $0x144] sm:$0xf0] }
  0x4b   : > { %1078 = vmatpush.bf16.msrb.mxu1 %v2671_v26  ;;  %v3344_v13 = vld [vmem:[#allocation2 + $0x154] sm:$0xf]  ;;  %v2892_v14 = vld [vmem:[#allocation2 + $0x158] sm:$0xf0]  ;;  %v2831_v17 = vor.u32 %v3328_v9, %v2828_v12  ;;  %v3310_v21 = vld [vmem:[#allocation2 + $0x44] sm:$0xf]  ;;  %v2883_v29 = vor.u32 %v3343_v20, %v2882_v19 }
  0x4c   : > { %1340 = vmatpush.bf16.msrb.mxu2 %v2731_v27  ;;  %1353 = vmatpush.bf16.msrb.mxu3 %v2795_v31  ;;  %v2895_v18 = vor.u32 %v3344_v13, %v2892_v14  ;;  %v2756_v22 = vld [vmem:[#allocation2 + $0x48] sm:$0xf0]  ;;  %v3326_v23 = vld [vmem:[#allocation2 + $0xc4] sm:$0xf]  ;;  %v2874_v31 = vld [vmem:[#allocation2 + $0x130] sm:$0xf] }
  0x4d   : > { %v2820_v24 = vld [vmem:[#allocation2 + $0xc8] sm:$0xf0]  ;;  %v3342_v25 = vld [vmem:[#allocation2 + $0x144] sm:$0xf]  ;;  %v2759_v30 = vor.u32 %v3310_v21, %v2756_v22  ;;  %v3341_v32 = vld [vmem:[#allocation2 + $0x134] sm:$0xf0] }
  0x4e   : > { %1066 = vmatpush.bf16.msrb.mxu0 %v2599_v42  ;;  %v2884_v26 = vld [vmem:[#allocation2 + $0x148] sm:$0xf0]  ;;  %v3728_v27 = vld [vmem:[#allocation1] sm:$0xff]  ;;  %v3730_v28 = vld [vmem:[#allocation1 + $0x9] sm:$0xff]  ;;  %v2823_v34 = vor.u32 %v3326_v23, %v2820_v24  ;;  %v2875_v42 = vor.u32 %v3341_v32, %v2874_v31 }
  0x4f   : > { %1079 = vmatpush.bf16.msrb.mxu1 %v2663_v43  ;;  %v3308_v33 = vld [vmem:[#allocation2 + $0x34] sm:$0xf]  ;;  %v2887_v35 = vor.u32 %v3342_v25, %v2884_v26  ;;  %v2748_v36 = vld [vmem:[#allocation2 + $0x38] sm:$0xf0]  ;;  %v3734_v41 = vld [vmem:[#allocation1 + $0x12] sm:$0xff] }
  0x50   : > { %1341 = vmatpush.bf16.msrb.mxu2 %v2723_v51  ;;  %1354 = vmatpush.bf16.msrb.mxu3 %v2787_v52  ;;  %v3324_v37 = vld [vmem:[#allocation2 + $0xb4] sm:$0xf]  ;;  %v2812_v38 = vld [vmem:[#allocation2 + $0xb8] sm:$0xf0]  ;;  %1517 = vst [vmem:[#allocation1] ss:$9 sm:$0xff] %v3708_v11  ;;  %v2751_v43 = vor.u32 %v3308_v33, %v2748_v36 }
  0x51   : > { %v3340_v39 = vld [vmem:[#allocation2 + $0x134] sm:$0xf]  ;;  %v2876_v40 = vld [vmem:[#allocation2 + $0x138] sm:$0xf0]  ;;  %v2866_v44 = vld [vmem:[#allocation2 + $0x120] sm:$0xf]  ;;  %v2815_v46 = vor.u32 %v3324_v37, %v2812_v38 }
  0x52   : > { %1360 = vmatpush.bf16.msra.mxu0 %v2907_v54  ;;  %v3339_v45 = vld [vmem:[#allocation2 + $0x124] sm:$0xf0]  ;;  %1519 = vst [vmem:[#allocation1 + $0x1] ss:$9 sm:$0xff] %v3718_v47  ;;  %v2879_v49 = vor.u32 %v3340_v39, %v2876_v40  ;;  %v3306_v51 = vld [vmem:[#allocation2 + $0x24] sm:$0xf] }
  0x53   : > { %1373 = vmatpush.bf16.msra.mxu1 %v2783_v55  ;;  %v2740_v52 = vld [vmem:[#allocation2 + $0x28] sm:$0xf0]  ;;  %v3322_v53 = vld [vmem:[#allocation2 + $0xa4] sm:$0xf]  ;;  %v2867_v55 = vor.u32 %v3339_v45, %v2866_v44  ;;  %v2858_v57 = vld [vmem:[#allocation2 + $0x110] sm:$0xf] }
  0x54   : > { %1386 = vmatpush.bf16.msra.mxu2 %v2847_v58  ;;  %1399 = vmatpush.bf16.msra.mxu3 %v2911_v59  ;;  %v3338_v54 = vld [vmem:[#allocation2 + $0x124] sm:$0xf]  ;;  %v2743_v56 = vor.u32 %v3306_v51, %v2740_v52  ;;  %v3337_v58 = vld [vmem:[#allocation2 + $0x114] sm:$0xf0]  ;;  %v3304_v60 = vld [vmem:[#allocation2 + $0x14] sm:$0xf] }
  0x55   : > { %1342 = vmatmul.bf16.vlgmr.msrb.gmra.mxu2 %v3728_v27  ;;  %v2732_v61 = vld [vmem:[#allocation2 + $0x18] sm:$0xf0]  ;;  %v3320_v62 = vld [vmem:[#allocation2 + $0x94] sm:$0xf]  ;;  %v2859_v3 = vor.u32 %v3337_v58, %v2858_v57  ;;  %v2724_v7 = vld [vmem:[#allocation2 + $0x8] sm:$0xf0] }
  0x56   : > { %1361 = vmatpush.bf16.msra.mxu0 %v2899_v1  ;;  %1355 = vmatmul.bf16.vlgmr.msrb.gmra.mxu3 %v3730_v28  ;;  %v2796_v63 = vld [vmem:[#allocation2 + $0x98] sm:$0xf0]  ;;  %v3336_v0 = vld [vmem:[#allocation2 + $0x114] sm:$0xf]  ;;  %v2735_v4 = vor.u32 %v3304_v60, %v2732_v61  ;;  %v3318_v12 = vld [vmem:[#allocation2 + $0x84] sm:$0xf] }
  0x57   : > { %1374 = vmatpush.bf16.msra.mxu1 %v2775_v2  ;;  %1067 = vmatmul.bf16.vlgmr.msrb.gmra.mxu0 %v3722_v50  ;;  %v2804_v50 = vld [vmem:[#allocation2 + $0xa8] sm:$0xf0]  ;;  %v2860_v1 = vld [vmem:[#allocation2 + $0x118] sm:$0xf0]  ;;  %v2850_v2 = vld [vmem:[#allocation2 + $0x100] sm:$0xf]  ;;  %v2799_v8 = vor.u32 %v3320_v62, %v2796_v63 }
  0x58   : > { %1387 = vmatpush.bf16.msra.mxu2 %v2839_v5  ;;  %1400 = vmatpush.bf16.msra.mxu3 %v2903_v6  ;;  %v2807_v59 = vor.u32 %v3322_v53, %v2804_v50  ;;  %v3335_v5 = vld [vmem:[#allocation2 + $0x104] sm:$0xf0]  ;;  %v3302_v6 = vld [vmem:[#allocation2 + $0x4] sm:$0xf]  ;;  %v2863_v9 = vor.u32 %v3336_v0, %v2860_v1  ;;  %v2788_v13 = vld [vmem:[#allocation2 + $0x88] sm:$0xf0] }
  0x59   : > { %1080 = vmatmul.bf16.vlgmr.msrb.gmra.mxu1 %v3720_v48  ;;  %v2868_v48 = vld [vmem:[#allocation2 + $0x128] sm:$0xf0]  ;;  %v3334_v14 = vld [vmem:[#allocation2 + $0x104] sm:$0xf]  ;;  %v3477_v19 = vld [vmem:[#allocation2 + $0x574] sm:$0xf0]  ;;  %v2851_v21 = vor.u32 %v3335_v5, %v2850_v2  ;;  %v2727_v22 = vor.u32 %v3302_v6, %v2724_v7  ;;  %v2791_v26 = vor.u32 %v3318_v12, %v2788_v13 }
  0x5a   : > { %1362 = vmatpush.bf16.msra.mxu0 %v2891_v15  ;;  %v2871_v47 = vor.u32 %v3338_v54, %v2868_v48  ;;  %v2852_v15 = vld [vmem:[#allocation2 + $0x108] sm:$0xf0]  ;;  %v3098_v20 = vld [vmem:[#allocation2 + $0x5f0] sm:$0xf]  ;;  %v3493_v23 = vld [vmem:[#allocation2 + $0x5f4] sm:$0xf0] }
  0x5b   : > { %1375 = vmatpush.bf16.msra.mxu1 %v2767_v16  ;;  %v2970_v16 = vld [vmem:[#allocation2 + $0x4f0] sm:$0xf]  ;;  %v3460_v24 = vld [vmem:[#allocation2 + $0x4f4] sm:$0xf]  ;;  %v2972_v25 = vld [vmem:[#allocation2 + $0x4f8] sm:$0xf0] }
  0x5c   : > { %1388 = vmatpush.bf16.msra.mxu2 %v2831_v17  ;;  %1401 = vmatpush.bf16.msra.mxu3 %v2895_v18  ;;  %v3461_v17 = vld [vmem:[#allocation2 + $0x4f4] sm:$0xf0]  ;;  %v3034_v18 = vld [vmem:[#allocation2 + $0x570] sm:$0xf]  ;;  %v2962_v32 = vld [vmem:[#allocation2 + $0x4e0] sm:$0xf] }
  0x5d   : > { %v3035_v31 = vor.u32 %v3477_v19, %v3034_v18  ;;  %v3459_v33 = vld [vmem:[#allocation2 + $0x4e4] sm:$0xf0]  ;;  %v3026_v36 = vld [vmem:[#allocation2 + $0x560] sm:$0xf]  ;;  %v3458_v40 = vld [vmem:[#allocation2 + $0x4e4] sm:$0xf] }
  0x5e   : > { %1363 = vmatpush.bf16.msra.mxu0 %v2883_v29  ;;  %v2855_v29 = vor.u32 %v3334_v14, %v2852_v15  ;;  %v3475_v37 = vld [vmem:[#allocation2 + $0x564] sm:$0xf0]  ;;  %v3090_v38 = vld [vmem:[#allocation2 + $0x5e0] sm:$0xf]  ;;  %v2954_v45 = vld [vmem:[#allocation2 + $0x4d0] sm:$0xf] }
  0x5f   : > { %1376 = vmatpush.bf16.msra.mxu1 %v2759_v30  ;;  %v2971_v30 = vor.u32 %v3461_v17, %v2970_v16  ;;  %v3491_v39 = vld [vmem:[#allocation2 + $0x5e4] sm:$0xf0]  ;;  %v3027_v44 = vor.u32 %v3475_v37, %v3026_v36  ;;  %v3018_v52 = vld [vmem:[#allocation2 + $0x550] sm:$0xf]  ;;  %v3473_v53 = vld [vmem:[#allocation2 + $0x554] sm:$0xf0] }
  0x60   : > { %1389 = vmatpush.bf16.msra.mxu2 %v2823_v34  ;;  %1402 = vmatpush.bf16.msra.mxu3 %v2887_v35  ;;  %v3099_v34 = vor.u32 %v3493_v23, %v3098_v20  ;;  %v2975_v35 = vor.u32 %v3460_v24, %v2972_v25  ;;  %v3082_v50 = vld [vmem:[#allocation2 + $0x5d0] sm:$0xf]  ;;  %v3489_v54 = vld [vmem:[#allocation2 + $0x5d4] sm:$0xf0]  ;;  %v3456_v48 = vld [vmem:[#allocation2 + $0x4d4] sm:$0xf]  ;;  %v3019_v57 = vor.u32 %v3473_v53, %v3018_v52 }
  0x61   : > { %v2946_v58 = vld [vmem:[#allocation2 + $0x4c0] sm:$0xf]  ;;  %v3471_v62 = vld [vmem:[#allocation2 + $0x544] sm:$0xf0]  ;;  %v3454_v0 = vld [vmem:[#allocation2 + $0x4c4] sm:$0xf] }
  0x62   : > { %1364 = vmatpush.bf16.msra.mxu0 %v2875_v42  ;;  %v2964_v42 = vld [vmem:[#allocation2 + $0x4e8] sm:$0xf0]  ;;  %v3010_v61 = vld [vmem:[#allocation2 + $0x540] sm:$0xf]  ;;  %v3487_v63 = vld [vmem:[#allocation2 + $0x5c4] sm:$0xf0] }
  0x63   : > { %1377 = vmatpush.bf16.msra.mxu1 %v2751_v43  ;;  %v2963_v43 = vor.u32 %v3459_v33, %v2962_v32  ;;  %v2967_v51 = vor.u32 %v3458_v40, %v2964_v42  ;;  %v2948_v1 = vld [vmem:[#allocation2 + $0x4c8] sm:$0xf0]  ;;  %v2938_v2 = vld [vmem:[#allocation2 + $0x4b0] sm:$0xf]  ;;  %v3469_v7 = vld [vmem:[#allocation2 + $0x534] sm:$0xf0] }
  0x64   : > { %1390 = vmatpush.bf16.msra.mxu2 %v2815_v46  ;;  %1403 = vmatpush.bf16.msra.mxu3 %v2879_v49  ;;  %v3457_v46 = vld [vmem:[#allocation2 + $0x4d4] sm:$0xf0]  ;;  %v3091_v49 = vor.u32 %v3491_v39, %v3090_v38  ;;  %v2951_v5 = vor.u32 %v3454_v0, %v2948_v1  ;;  %v3002_v6 = vld [vmem:[#allocation2 + $0x530] sm:$0xf]  ;;  %v3452_v12 = vld [vmem:[#allocation2 + $0x4b4] sm:$0xf] }
  0x65   : > { %v2940_v13 = vld [vmem:[#allocation2 + $0x4b8] sm:$0xf0]  ;;  %v3003_v15 = vor.u32 %v3469_v7, %v3002_v6  ;;  %v2930_v16 = vld [vmem:[#allocation2 + $0x4a0] sm:$0xf]  ;;  %v3451_v17 = vld [vmem:[#allocation2 + $0x4a4] sm:$0xf0] }
  0x66   : > { %1365 = vmatpush.bf16.msra.mxu0 %v2867_v55  ;;  %v2956_v55 = vld [vmem:[#allocation2 + $0x4d8] sm:$0xf0]  ;;  %v2943_v19 = vor.u32 %v3452_v12, %v2940_v13  ;;  %v2994_v20 = vld [vmem:[#allocation2 + $0x520] sm:$0xf]  ;;  %v3483_v23 = vld [vmem:[#allocation2 + $0x5a4] sm:$0xf0] }
  0x67   : > { %1378 = vmatpush.bf16.msra.mxu1 %v2743_v56  ;;  %v2955_v56 = vor.u32 %v3457_v46, %v2954_v45  ;;  %v2959_v60 = vor.u32 %v3456_v48, %v2956_v55  ;;  %v3450_v24 = vld [vmem:[#allocation2 + $0x4a4] sm:$0xf]  ;;  %v2932_v25 = vld [vmem:[#allocation2 + $0x4a8] sm:$0xf0]  ;;  %v3050_v36 = vld [vmem:[#allocation2 + $0x590] sm:$0xf] }
  0x68   : > { %1391 = vmatpush.bf16.msra.mxu2 %v2807_v59  ;;  %1404 = vmatpush.bf16.msra.mxu3 %v2871_v47  ;;  %v3455_v59 = vld [vmem:[#allocation2 + $0x4c4] sm:$0xf0]  ;;  %v3083_v47 = vor.u32 %v3489_v54, %v3082_v50  ;;  %v2935_v33 = vor.u32 %v3450_v24, %v2932_v25  ;;  %v3481_v37 = vld [vmem:[#allocation2 + $0x594] sm:$0xf0]  ;;  %v3448_v38 = vld [vmem:[#allocation2 + $0x494] sm:$0xf] }
  0x69   : > { %v2924_v39 = vld [vmem:[#allocation2 + $0x498] sm:$0xf0]  ;;  %v2914_v40 = vld [vmem:[#allocation2 + $0x480] sm:$0xf]  ;;  %v3447_v42 = vld [vmem:[#allocation2 + $0x484] sm:$0xf0]  ;;  %v3051_v54 = vor.u32 %v3481_v37, %v3050_v36 }
  0x6a   : > { %1366 = vmatpush.bf16.msra.mxu0 %v2859_v3  ;;  %v3453_v3 = vld [vmem:[#allocation2 + $0x4b4] sm:$0xf0]  ;;  %v3744_v52 = vld [vmem:[#allocation1 + $0x12] sm:$0xff]  ;;  %v3746_v50 = vld [vmem:[#allocation1 + $0x9] sm:$0xff]  ;;  %v2927_v48 = vor.u32 %v3448_v38, %v2924_v39 }
  0x6b   : > { %1379 = vmatpush.bf16.msra.mxu1 %v2735_v4  ;;  %v2939_v14 = vor.u32 %v3453_v3, %v2938_v2  ;;  %v1520_v53 = vld [vmem:[#allocation1] sm:$0xff]  ;;  %v3446_v55 = vld [vmem:[#allocation2 + $0x484] sm:$0xf]  ;;  %v3028_v3 = vld [vmem:[#allocation2 + $0x568] sm:$0xf0] }
  0x6c   : > { %1392 = vmatpush.bf16.msra.mxu2 %v2799_v8  ;;  %1405 = vmatpush.bf16.msra.mxu3 %v2863_v9  ;;  %v3066_v8 = vld [vmem:[#allocation2 + $0x5b0] sm:$0xf]  ;;  %v3485_v9 = vld [vmem:[#allocation2 + $0x5b4] sm:$0xf0]  ;;  %1844 = vst [vmem:[#allocation1] ss:$9 sm:$0xff] %v3705_v10 }
  0x6d   : > { %v3067_v18 = vor.u32 %v3485_v9, %v3066_v8  ;;  %1846 = vst [vmem:[#allocation1 + $0x1] ss:$9 sm:$0xff] %v3708_v11  ;;  %v3429_v0 = vld [vmem:[#allocation2 + $0x3f4] sm:$0xf0]  ;;  %v3474_v2 = vld [vmem:[#allocation2 + $0x564] sm:$0xf] }
  0x6e   : > { %1367 = vmatpush.bf16.msra.mxu0 %v2851_v21  ;;  %v3467_v21 = vld [vmem:[#allocation2 + $0x524] sm:$0xf0]  ;;  %v3092_v6 = vld [vmem:[#allocation2 + $0x5e8] sm:$0xf0]  ;;  %v3154_v7 = vld [vmem:[#allocation2 + $0x360] sm:$0xf]  ;;  %v3031_v13 = vor.u32 %v3474_v2, %v3028_v3 }
  0x6f   : > { %1380 = vmatpush.bf16.msra.mxu1 %v2727_v22  ;;  %v3058_v22 = vld [vmem:[#allocation2 + $0x5a0] sm:$0xf]  ;;  %v3411_v8 = vld [vmem:[#allocation2 + $0x364] sm:$0xf0]  ;;  %v3425_v24 = vld [vmem:[#allocation2 + $0x3d4] sm:$0xf0] }
  0x70   : > { %1393 = vmatpush.bf16.msra.mxu2 %v2791_v26  ;;  %1406 = vmatpush.bf16.msra.mxu3 %v2855_v29  ;;  %v2931_v26 = vor.u32 %v3451_v17, %v2930_v16  ;;  %v2995_v29 = vor.u32 %v3467_v21, %v2994_v20  ;;  %v3059_v32 = vor.u32 %v3483_v23, %v3058_v22  ;;  %v3218_v9 = vld [vmem:[#allocation2 + $0x3e0] sm:$0xf]  ;;  %v3427_v12 = vld [vmem:[#allocation2 + $0x3e4] sm:$0xf0]  ;;  %v3020_v16 = vld [vmem:[#allocation2 + $0x558] sm:$0xf0] }
  0x71   : > { %1368 = vmatmul.bf16.vlgmr.msra.gmra.mxu0 %v3734_v41  ;;  %v3155_v17 = vor.u32 %v3411_v8, %v3154_v7  ;;  %v3084_v20 = vld [vmem:[#allocation2 + $0x5d8] sm:$0xf0]  ;;  %v3146_v21 = vld [vmem:[#allocation2 + $0x350] sm:$0xf]  ;;  %v3409_v22 = vld [vmem:[#allocation2 + $0x354] sm:$0xf0] }
  0x72   : > { %1766 = vmatpush.bf16.msrb.mxu0 %v2971_v30  ;;  %1381 = vmatmul.bf16.vlgmr.msra.gmra.mxu1 %v3728_v27  ;;  %v3074_v27 = vld [vmem:[#allocation2 + $0x5c0] sm:$0xf]  ;;  %v2922_v30 = vld [vmem:[#allocation2 + $0x490] sm:$0xf]  ;;  %v3407_v36 = vld [vmem:[#allocation2 + $0x344] sm:$0xf0] }
  0x73   : > { %1779 = vmatpush.bf16.msrb.mxu1 %v3035_v31  ;;  %1394 = vmatmul.bf16.vlgmr.msra.gmra.mxu2 %v3730_v28  ;;  %v2947_v28 = vor.u32 %v3455_v59, %v2946_v58  ;;  %v3075_v4 = vor.u32 %v3487_v63, %v3074_v27  ;;  %v3449_v31 = vld [vmem:[#allocation2 + $0x494] sm:$0xf0]  ;;  %v3036_v58 = vld [vmem:[#allocation2 + $0x578] sm:$0xf0]  ;;  %v3492_v59 = vld [vmem:[#allocation2 + $0x5f4] sm:$0xf] }
  0x74   : > { %1792 = vmatpush.bf16.msrb.mxu2 %v3099_v34  ;;  %1805 = vmatpush.bf16.msrb.mxu3 %v2975_v35  ;;  %v2986_v34 = vld [vmem:[#allocation2 + $0x510] sm:$0xf]  ;;  %v3465_v35 = vld [vmem:[#allocation2 + $0x514] sm:$0xf0]  ;;  %v2923_v45 = vor.u32 %v3449_v31, %v2922_v30  ;;  %v3012_v30 = vld [vmem:[#allocation2 + $0x548] sm:$0xf0]  ;;  %v3147_v31 = vor.u32 %v3409_v22, %v3146_v21 }
  0x75   : > { %1407 = vmatmul.bf16.vlgmr.msra.gmra.mxu3 %v3734_v41  ;;  %v3011_v41 = vor.u32 %v3471_v62, %v3010_v61  ;;  %v2987_v46 = vor.u32 %v3465_v35, %v2986_v34  ;;  %v2915_v61 = vor.u32 %v3447_v42, %v2914_v40  ;;  %v3413_v27 = vld [vmem:[#allocation2 + $0x374] sm:$0xf0]  ;;  %v3226_v63 = vld [vmem:[#allocation2 + $0x3f0] sm:$0xf]  ;;  %v3076_v34 = vld [vmem:[#allocation2 + $0x5c8] sm:$0xf0] }
  0x76   : > { %1767 = vmatpush.bf16.msrb.mxu0 %v2963_v43  ;;  %v2978_v43 = vld [vmem:[#allocation2 + $0x500] sm:$0xf]  ;;  %v3227_v11 = vor.u32 %v3429_v0, %v3226_v63  ;;  %v3210_v23 = vld [vmem:[#allocation2 + $0x3d0] sm:$0xf]  ;;  %v3423_v38 = vld [vmem:[#allocation2 + $0x3c4] sm:$0xf0] }
  0x77   : > { %1780 = vmatpush.bf16.msrb.mxu1 %v3027_v44  ;;  %v3463_v44 = vld [vmem:[#allocation2 + $0x504] sm:$0xf0]  ;;  %v3138_v35 = vld [vmem:[#allocation2 + $0x340] sm:$0xf]  ;;  %v3468_v42 = vld [vmem:[#allocation2 + $0x534] sm:$0xf] }
  0x78   : > { %1793 = vmatpush.bf16.msrb.mxu2 %v3091_v49  ;;  %1806 = vmatpush.bf16.msrb.mxu3 %v2967_v51  ;;  %v3042_v49 = vld [vmem:[#allocation2 + $0x580] sm:$0xf]  ;;  %v3479_v51 = vld [vmem:[#allocation2 + $0x584] sm:$0xf0]  ;;  %v2979_v62 = vor.u32 %v3463_v44, %v2978_v43  ;;  %v3004_v43 = vld [vmem:[#allocation2 + $0x538] sm:$0xf0]  ;;  %v3139_v44 = vor.u32 %v3407_v36, %v3138_v35 }
  0x79   : > { %v3043_v1 = vor.u32 %v3479_v51, %v3042_v49  ;;  %v3202_v37 = vld [vmem:[#allocation2 + $0x3c0] sm:$0xf]  ;;  %v3068_v49 = vld [vmem:[#allocation2 + $0x5b8] sm:$0xf0]  ;;  %v3130_v51 = vld [vmem:[#allocation2 + $0x330] sm:$0xf] }
  0x7a   : > { %1768 = vmatpush.bf16.msrb.mxu0 %v2955_v56  ;;  %v2916_v56 = vld [vmem:[#allocation2 + $0x488] sm:$0xf0]  ;;  %v3186_v63 = vld [vmem:[#allocation2 + $0x3a0] sm:$0xf]  ;;  %v3419_v0 = vld [vmem:[#allocation2 + $0x3a4] sm:$0xf0] }
  0x7b   : > { %1781 = vmatpush.bf16.msrb.mxu1 %v3019_v57  ;;  %v3476_v57 = vld [vmem:[#allocation2 + $0x574] sm:$0xf]  ;;  %v3187_v3 = vor.u32 %v3419_v0, %v3186_v63  ;;  %v3178_v7 = vld [vmem:[#allocation2 + $0x390] sm:$0xf]  ;;  %v3417_v8 = vld [vmem:[#allocation2 + $0x394] sm:$0xf0] }
  0x7c   : > { %1794 = vmatpush.bf16.msrb.mxu2 %v3083_v47  ;;  %1807 = vmatpush.bf16.msrb.mxu3 %v2959_v60  ;;  %v3100_v47 = vld [vmem:[#allocation2 + $0x5f8] sm:$0xf0]  ;;  %v3162_v60 = vld [vmem:[#allocation2 + $0x370] sm:$0xf]  ;;  %v3170_v21 = vld [vmem:[#allocation2 + $0x380] sm:$0xf] }
  0x7d   : > { %v3103_v10 = vor.u32 %v3492_v59, %v3100_v47  ;;  %v3415_v22 = vld [vmem:[#allocation2 + $0x384] sm:$0xf0]  ;;  %v3440_v63 = vld [vmem:[#allocation2 + $0x454] sm:$0xf]  ;;  %v3276_v0 = vld [vmem:[#allocation2 + $0x458] sm:$0xf0] }
  0x7e   : > { %1769 = vmatpush.bf16.msrb.mxu0 %v2947_v28  ;;  %v2919_v28 = vor.u32 %v3446_v55, %v2916_v56  ;;  %v3007_v55 = vor.u32 %v3468_v42, %v3004_v43  ;;  %v3171_v36 = vor.u32 %v3415_v22, %v3170_v21 }
  0x7f   : > { %1782 = vmatpush.bf16.msrb.mxu1 %v3011_v41  ;;  %v3039_v41 = vor.u32 %v3476_v57, %v3036_v58  ;;  %v3466_v57 = vld [vmem:[#allocation2 + $0x524] sm:$0xf]  ;;  %v2996_v58 = vld [vmem:[#allocation2 + $0x528] sm:$0xf0] }
  0x80   : > { %1795 = vmatpush.bf16.msrb.mxu2 %v3075_v4  ;;  %1808 = vmatpush.bf16.msrb.mxu3 %v2951_v5  ;;  %v3163_v4 = vor.u32 %v3413_v27, %v3162_v60  ;;  %v3490_v5 = vld [vmem:[#allocation2 + $0x5e4] sm:$0xf]  ;;  %v3403_v27 = vld [vmem:[#allocation2 + $0x324] sm:$0xf0] }
  0x81   : > { %v3482_v60 = vld [vmem:[#allocation2 + $0x5a4] sm:$0xf] }
  0x82   : > { %1770 = vmatpush.bf16.msrb.mxu0 %v2939_v14  ;;  %v3095_v14 = vor.u32 %v3490_v5, %v3092_v6  ;;  %v3114_v5 = vld [vmem:[#allocation2 + $0x310] sm:$0xf]  ;;  %v3401_v6 = vld [vmem:[#allocation2 + $0x314] sm:$0xf0] }
  0x83   : > { %1783 = vmatpush.bf16.msrb.mxu1 %v3003_v15  ;;  %v3472_v15 = vld [vmem:[#allocation2 + $0x554] sm:$0xf] }
  0x84   : > { %1796 = vmatpush.bf16.msrb.mxu2 %v3067_v18  ;;  %1809 = vmatpush.bf16.msrb.mxu3 %v2943_v19  ;;  %v3219_v18 = vor.u32 %v3427_v12, %v3218_v9  ;;  %v3488_v19 = vld [vmem:[#allocation2 + $0x5d4] sm:$0xf]  ;;  %v3023_v25 = vor.u32 %v3472_v15, %v3020_v16  ;;  %v3462_v9 = vld [vmem:[#allocation2 + $0x504] sm:$0xf]  ;;  %v3044_v16 = vld [vmem:[#allocation2 + $0x588] sm:$0xf0] }
  0x85   : > { %v3478_v15 = vld [vmem:[#allocation2 + $0x584] sm:$0xf] }
  0x86   : > { %1771 = vmatpush.bf16.msrb.mxu0 %v2931_v26  ;;  %v3087_v26 = vor.u32 %v3488_v19, %v3084_v20  ;;  %v3106_v19 = vld [vmem:[#allocation2 + $0x300] sm:$0xf]  ;;  %v3399_v20 = vld [vmem:[#allocation2 + $0x304] sm:$0xf0] }
  0x87   : > { %1784 = vmatpush.bf16.msrb.mxu1 %v2995_v29  ;;  %v3470_v29 = vld [vmem:[#allocation2 + $0x544] sm:$0xf]  ;;  %v3107_v35 = vor.u32 %v3399_v20, %v3106_v19  ;;  %v3436_v19 = vld [vmem:[#allocation2 + $0x434] sm:$0xf]  ;;  %v3260_v20 = vld [vmem:[#allocation2 + $0x438] sm:$0xf0] }
  0x88   : > { %1797 = vmatpush.bf16.msrb.mxu2 %v3059_v32  ;;  %1810 = vmatpush.bf16.msrb.mxu3 %v2935_v33  ;;  %v3211_v32 = vor.u32 %v3425_v24, %v3210_v23  ;;  %v3486_v33 = vld [vmem:[#allocation2 + $0x5c4] sm:$0xf]  ;;  %v3015_v39 = vor.u32 %v3470_v29, %v3012_v30  ;;  %v3290_v23 = vld [vmem:[#allocation2 + $0x470] sm:$0xf]  ;;  %v3445_v24 = vld [vmem:[#allocation2 + $0x474] sm:$0xf0] }
  0x89   : > { %v3079_v40 = vor.u32 %v3486_v33, %v3076_v34  ;;  %v3428_v29 = vld [vmem:[#allocation2 + $0x3f4] sm:$0xf]  ;;  %v3292_v34 = vld [vmem:[#allocation2 + $0x478] sm:$0xf0] }
  0x8a   : > { %1772 = vmatpush.bf16.msrb.mxu0 %v2923_v45  ;;  %v3203_v45 = vor.u32 %v3423_v38, %v3202_v37  ;;  %v3444_v33 = vld [vmem:[#allocation2 + $0x474] sm:$0xf]  ;;  %v3291_v37 = vor.u32 %v3445_v24, %v3290_v23  ;;  %v3250_v23 = vld [vmem:[#allocation2 + $0x420] sm:$0xf]  ;;  %v3435_v24 = vld [vmem:[#allocation2 + $0x424] sm:$0xf0] }
  0x8b   : > { %1785 = vmatpush.bf16.msrb.mxu1 %v2987_v46  ;;  %v3484_v46 = vld [vmem:[#allocation2 + $0x5b4] sm:$0xf]  ;;  %v3295_v43 = vor.u32 %v3444_v33, %v3292_v34  ;;  %v3434_v33 = vld [vmem:[#allocation2 + $0x424] sm:$0xf]  ;;  %v3252_v34 = vld [vmem:[#allocation2 + $0x428] sm:$0xf0] }
  0x8c   : > { %1798 = vmatpush.bf16.msrb.mxu2 %v3051_v54  ;;  %1811 = vmatpush.bf16.msrb.mxu3 %v2927_v48  ;;  %v3194_v54 = vld [vmem:[#allocation2 + $0x3b0] sm:$0xf]  ;;  %v3421_v48 = vld [vmem:[#allocation2 + $0x3b4] sm:$0xf0]  ;;  %v3071_v56 = vor.u32 %v3484_v46, %v3068_v49  ;;  %v3426_v46 = vld [vmem:[#allocation2 + $0x3e4] sm:$0xf] }
  0x8d   : > { %v3195_v47 = vor.u32 %v3421_v48, %v3194_v54  ;;  %v3220_v49 = vld [vmem:[#allocation2 + $0x3e8] sm:$0xf0]  ;;  %v3752_v54 = vld [vmem:[#allocation1] sm:$0xff]  ;;  %v3754_v48 = vld [vmem:[#allocation1 + $0x9] sm:$0xff] }
  0x8e   : > { %1773 = vmatpush.bf16.msrb.mxu0 %v2915_v61  ;;  %v3060_v61 = vld [vmem:[#allocation2 + $0x5a8] sm:$0xf0] }
  0x8f   : > { %1786 = vmatpush.bf16.msrb.mxu1 %v2979_v62  ;;  %v3122_v62 = vld [vmem:[#allocation2 + $0x320] sm:$0xf] }
  0x90   : > { %1799 = vmatpush.bf16.msrb.mxu2 %v3043_v1  ;;  %1812 = vmatpush.bf16.msrb.mxu3 %v2919_v28  ;;  %v2999_v1 = vor.u32 %v3466_v57, %v2996_v58  ;;  %v3063_v28 = vor.u32 %v3482_v60, %v3060_v61  ;;  %v3123_v2 = vor.u32 %v3403_v27, %v3122_v62  ;;  %v3274_v57 = vld [vmem:[#allocation2 + $0x450] sm:$0xf]  ;;  %v3441_v58 = vld [vmem:[#allocation2 + $0x454] sm:$0xf0]  ;;  %v3408_v60 = vld [vmem:[#allocation2 + $0x354] sm:$0xf] }
  0x91   : > { %1774 = vmatmul.bf16.vlgmr.msrb.gmra.mxu0 %v1520_v53  ;;  %v3148_v61 = vld [vmem:[#allocation2 + $0x358] sm:$0xf0]  ;;  %v3424_v62 = vld [vmem:[#allocation2 + $0x3d4] sm:$0xf] }
  0x92   : > { %1818 = vmatpush.bf16.msra.mxu0 %v3039_v41  ;;  %1787 = vmatmul.bf16.vlgmr.msrb.gmra.mxu1 %v3746_v50  ;;  %v3464_v41 = vld [vmem:[#allocation2 + $0x514] sm:$0xf]  ;;  %v3212_v27 = vld [vmem:[#allocation2 + $0x3d8] sm:$0xf0] }
  0x93   : > { %1831 = vmatpush.bf16.msra.mxu1 %v3103_v10  ;;  %1800 = vmatmul.bf16.vlgmr.msrb.gmra.mxu2 %v3744_v52  ;;  %v2988_v10 = vld [vmem:[#allocation2 + $0x518] sm:$0xf0] }
  0x94   : > { %2093 = vmatpush.bf16.msra.mxu2 %v3163_v4  ;;  %2106 = vmatpush.bf16.msra.mxu3 %v3227_v11  ;;  %v3480_v4 = vld [vmem:[#allocation2 + $0x594] sm:$0xf]  ;;  %v3052_v11 = vld [vmem:[#allocation2 + $0x598] sm:$0xf0]  ;;  %v2991_v12 = vor.u32 %v3464_v41, %v2988_v10  ;;  %v3266_v41 = vld [vmem:[#allocation2 + $0x440] sm:$0xf] }
  0x95   : > { %1813 = vmatmul.bf16.vlgmr.msrb.gmra.mxu3 %v1520_v53  ;;  %v3405_v53 = vld [vmem:[#allocation2 + $0x334] sm:$0xf0]  ;;  %v3439_v10 = vld [vmem:[#allocation2 + $0x444] sm:$0xf0] }
  0x96   : > { %1819 = vmatpush.bf16.msra.mxu0 %v3031_v13  ;;  %v3131_v59 = vor.u32 %v3405_v53, %v3130_v51  ;;  %v3055_v13 = vor.u32 %v3480_v4, %v3052_v11  ;;  %v3442_v51 = vld [vmem:[#allocation2 + $0x464] sm:$0xf]  ;;  %v3284_v53 = vld [vmem:[#allocation2 + $0x468] sm:$0xf0] }
  0x97   : > { %1832 = vmatpush.bf16.msra.mxu1 %v3095_v14  ;;  %v2980_v14 = vld [vmem:[#allocation2 + $0x508] sm:$0xf0]  ;;  %v3406_v4 = vld [vmem:[#allocation2 + $0x344] sm:$0xf] }
  0x98   : > { %2094 = vmatpush.bf16.msra.mxu2 %v3155_v17  ;;  %2107 = vmatpush.bf16.msra.mxu3 %v3219_v18  ;;  %v3115_v17 = vor.u32 %v3401_v6, %v3114_v5  ;;  %v3179_v18 = vor.u32 %v3417_v8, %v3178_v7  ;;  %v2983_v30 = vor.u32 %v3462_v9, %v2980_v14  ;;  %v3140_v11 = vld [vmem:[#allocation2 + $0x348] sm:$0xf0]  ;;  %v3422_v5 = vld [vmem:[#allocation2 + $0x3c4] sm:$0xf]  ;;  %v3258_v9 = vld [vmem:[#allocation2 + $0x430] sm:$0xf] }
  0x99   : > { %v3204_v6 = vld [vmem:[#allocation2 + $0x3c8] sm:$0xf0]  ;;  %v3438_v7 = vld [vmem:[#allocation2 + $0x444] sm:$0xf] }
  0x9a   : > { %1820 = vmatpush.bf16.msra.mxu0 %v3023_v25  ;;  %v3412_v25 = vld [vmem:[#allocation2 + $0x374] sm:$0xf]  ;;  %v3268_v8 = vld [vmem:[#allocation2 + $0x448] sm:$0xf0] }
  0x9b   : > { %1833 = vmatpush.bf16.msra.mxu1 %v3087_v26  ;;  %v3164_v26 = vld [vmem:[#allocation2 + $0x378] sm:$0xf0]  ;;  %v3271_v14 = vor.u32 %v3438_v7, %v3268_v8 }
  0x9c   : > { %2095 = vmatpush.bf16.msra.mxu2 %v3147_v31  ;;  %2108 = vmatpush.bf16.msra.mxu3 %v3211_v32  ;;  %v3047_v31 = vor.u32 %v3478_v15, %v3044_v16  ;;  %v3228_v32 = vld [vmem:[#allocation2 + $0x3f8] sm:$0xf0]  ;;  %v3167_v38 = vor.u32 %v3412_v25, %v3164_v26  ;;  %v3404_v15 = vld [vmem:[#allocation2 + $0x334] sm:$0xf]  ;;  %v3263_v26 = vor.u32 %v3436_v19, %v3260_v20 }
  0x9d   : > { %v3231_v42 = vor.u32 %v3428_v29, %v3228_v32  ;;  %v3132_v16 = vld [vmem:[#allocation2 + $0x338] sm:$0xf0]  ;;  %v3402_v29 = vld [vmem:[#allocation2 + $0x324] sm:$0xf]  ;;  %v3188_v32 = vld [vmem:[#allocation2 + $0x3a8] sm:$0xf0] }
  0x9e   : > { %1821 = vmatpush.bf16.msra.mxu0 %v3015_v39  ;;  %v3282_v39 = vld [vmem:[#allocation2 + $0x460] sm:$0xf]  ;;  %v3135_v22 = vor.u32 %v3404_v15, %v3132_v16 }
  0x9f   : > { %1834 = vmatpush.bf16.msra.mxu1 %v3079_v40  ;;  %v3443_v40 = vld [vmem:[#allocation2 + $0x464] sm:$0xf0] }
  0xa0   : > { %2096 = vmatpush.bf16.msra.mxu2 %v3139_v44  ;;  %2109 = vmatpush.bf16.msra.mxu3 %v3203_v45  ;;  %v3410_v44 = vld [vmem:[#allocation2 + $0x364] sm:$0xf]  ;;  %v3156_v45 = vld [vmem:[#allocation2 + $0x368] sm:$0xf0] }
  0xa2   : > { %1822 = vmatpush.bf16.msra.mxu0 %v3007_v55  ;;  %v3283_v55 = vor.u32 %v3443_v40, %v3282_v39  ;;  %v3255_v40 = vor.u32 %v3434_v33, %v3252_v34 }
  0xa3   : > { %1835 = vmatpush.bf16.msra.mxu1 %v3071_v56  ;;  %v3159_v56 = vor.u32 %v3410_v44, %v3156_v45  ;;  %v3416_v44 = vld [vmem:[#allocation2 + $0x394] sm:$0xf]  ;;  %v3180_v45 = vld [vmem:[#allocation2 + $0x398] sm:$0xf0] }
  0xa4   : > { %2097 = vmatpush.bf16.msra.mxu2 %v3131_v59  ;;  %2110 = vmatpush.bf16.msra.mxu3 %v3195_v47  ;;  %v3223_v59 = vor.u32 %v3426_v46, %v3220_v49  ;;  %v3287_v47 = vor.u32 %v3442_v51, %v3284_v53  ;;  %v3432_v46 = vld [vmem:[#allocation2 + $0x414] sm:$0xf]  ;;  %v3244_v49 = vld [vmem:[#allocation2 + $0x418] sm:$0xf0] }
  0xa6   : > { %1823 = vmatpush.bf16.msra.mxu0 %v2999_v1  ;;  %v3275_v1 = vor.u32 %v3441_v58, %v3274_v57  ;;  %v3183_v57 = vor.u32 %v3416_v44, %v3180_v45  ;;  %v3247_v58 = vor.u32 %v3432_v46, %v3244_v49 }
  0xa7   : > { %1836 = vmatpush.bf16.msra.mxu1 %v3063_v28  ;;  %v3151_v28 = vor.u32 %v3408_v60, %v3148_v61  ;;  %v3414_v60 = vld [vmem:[#allocation2 + $0x384] sm:$0xf]  ;;  %v3172_v61 = vld [vmem:[#allocation2 + $0x388] sm:$0xf0] }
  0xa8   : > { %2098 = vmatpush.bf16.msra.mxu2 %v3123_v2  ;;  %2111 = vmatpush.bf16.msra.mxu3 %v3187_v3  ;;  %v3215_v2 = vor.u32 %v3424_v62, %v3212_v27  ;;  %v3279_v3 = vor.u32 %v3440_v63, %v3276_v0  ;;  %v3430_v62 = vld [vmem:[#allocation2 + $0x404] sm:$0xf]  ;;  %v3236_v27 = vld [vmem:[#allocation2 + $0x408] sm:$0xf0] }
  0xaa   : > { %1824 = vmatpush.bf16.msra.mxu0 %v2991_v12  ;;  %v3437_v12 = vld [vmem:[#allocation2 + $0x434] sm:$0xf0] }
  0xab   : > { %1837 = vmatpush.bf16.msra.mxu1 %v3055_v13  ;;  %v3207_v13 = vor.u32 %v3422_v5, %v3204_v6  ;;  %v3259_v21 = vor.u32 %v3437_v12, %v3258_v9 }
  0xac   : > { %2099 = vmatpush.bf16.msra.mxu2 %v3115_v17  ;;  %2112 = vmatpush.bf16.msra.mxu3 %v3179_v18  ;;  %v3420_v17 = vld [vmem:[#allocation2 + $0x3b4] sm:$0xf]  ;;  %v3196_v18 = vld [vmem:[#allocation2 + $0x3b8] sm:$0xf0] }
  0xad   : > { %v3199_v25 = vor.u32 %v3420_v17, %v3196_v18 }
  0xae   : > { %1825 = vmatpush.bf16.msra.mxu0 %v2983_v30  ;;  %v3124_v30 = vld [vmem:[#allocation2 + $0x328] sm:$0xf0] }
  0xaf   : > { %1838 = vmatpush.bf16.msra.mxu1 %v3047_v31  ;;  %v3418_v31 = vld [vmem:[#allocation2 + $0x3a4] sm:$0xf] }
  0xb0   : > { %2100 = vmatpush.bf16.msra.mxu2 %v3107_v35  ;;  %2113 = vmatpush.bf16.msra.mxu3 %v3171_v36  ;;  %v3251_v35 = vor.u32 %v3435_v24, %v3250_v23  ;;  %v3127_v36 = vor.u32 %v3402_v29, %v3124_v30  ;;  %v3191_v39 = vor.u32 %v3418_v31, %v3188_v32 }
  0xb1   : > { %1826 = vmatmul.bf16.vlgmr.msra.gmra.mxu0 %v3746_v50  ;;  %v3267_v50 = vor.u32 %v3439_v10, %v3266_v41  ;;  %v1849_v41 = vld [vmem:[#allocation1 + $0x12] sm:$0xff] }
  0xb2   : > { %2119 = vmatpush.bf16.msrb.mxu0 %v3291_v37  ;;  %1839 = vmatmul.bf16.vlgmr.msra.gmra.mxu1 %v3744_v52  ;;  %v3143_v52 = vor.u32 %v3406_v4, %v3140_v11  ;;  %v3242_v37 = vld [vmem:[#allocation2 + $0x410] sm:$0xf] }
  0xb3   : > { %2132 = vmatpush.bf16.msrb.mxu1 %v3167_v38  ;;  %2101 = vmatmul.bf16.vlgmr.msra.gmra.mxu2 %v3752_v54  ;;  %v3433_v38 = vld [vmem:[#allocation2 + $0x414] sm:$0xf0] }
  0xb4   : > { %2145 = vmatpush.bf16.msrb.mxu2 %v3231_v42  ;;  %2158 = vmatpush.bf16.msrb.mxu3 %v3295_v43  ;;  %v3400_v42 = vld [vmem:[#allocation2 + $0x314] sm:$0xf]  ;;  %v3116_v43 = vld [vmem:[#allocation2 + $0x318] sm:$0xf0]  ;;  %v3243_v51 = vor.u32 %v3433_v38, %v3242_v37 }
  0xb5   : > { %2114 = vmatmul.bf16.vlgmr.msra.gmra.mxu3 %v3754_v48  ;;  %v3119_v53 = vor.u32 %v3400_v42, %v3116_v43 }
  0xb6   : > { %2120 = vmatpush.bf16.msrb.mxu0 %v3283_v55  ;;  %v3234_v55 = vld [vmem:[#allocation2 + $0x400] sm:$0xf] }
  0xb7   : > { %2133 = vmatpush.bf16.msrb.mxu1 %v3159_v56  ;;  %v3431_v56 = vld [vmem:[#allocation2 + $0x404] sm:$0xf0] }
  0xb8   : > { %2146 = vmatpush.bf16.msrb.mxu2 %v3223_v59  ;;  %2159 = vmatpush.bf16.msrb.mxu3 %v3287_v47  ;;  %v3398_v59 = vld [vmem:[#allocation2 + $0x304] sm:$0xf]  ;;  %v3108_v47 = vld [vmem:[#allocation2 + $0x308] sm:$0xf0]  ;;  %v3235_v63 = vor.u32 %v3431_v56, %v3234_v55 }
  0xb9   : > { %v3111_v0 = vor.u32 %v3398_v59, %v3108_v47 }
  0xba   : > { %2121 = vmatpush.bf16.msrb.mxu0 %v3275_v1  ;;  %v3175_v1 = vor.u32 %v3414_v60, %v3172_v61 }
  0xbb   : > { %2134 = vmatpush.bf16.msrb.mxu1 %v3151_v28  ;;  %v3239_v28 = vor.u32 %v3430_v62, %v3236_v27 }
  0xbc   : > { %2147 = vmatpush.bf16.msrb.mxu2 %v3215_v2  ;;  %2160 = vmatpush.bf16.msrb.mxu3 %v3279_v3 }
  0xbe   : > { %2122 = vmatpush.bf16.msrb.mxu0 %v3267_v50 }
  0xbf   : > { %2135 = vmatpush.bf16.msrb.mxu1 %v3143_v52 }
  0xc0   : > { %2148 = vmatpush.bf16.msrb.mxu2 %v3207_v13  ;;  %2161 = vmatpush.bf16.msrb.mxu3 %v3271_v14 }
  0xc2   : > { %2123 = vmatpush.bf16.msrb.mxu0 %v3259_v21 }
  0xc3   : > { %2136 = vmatpush.bf16.msrb.mxu1 %v3135_v22  ;;  %v3765_v22 = vld [vmem:[%s3822_s6] sm:$0x3] }
  0xc4   : > { %2149 = vmatpush.bf16.msrb.mxu2 %v3199_v25  ;;  %2162 = vmatpush.bf16.msrb.mxu3 %v3263_v26  ;;  %v1016_v10 = vpop.f32.mrf.mxu0  ;;  %v1414_v29 = vperm.slane %v3765_v22, 1  ;;  %v1413_v33 = vperm.slane %v3765_v22, 0 }
  0xc6   : > { %2124 = vmatpush.bf16.msrb.mxu0 %v3251_v35  ;;  %v1029_v2 = vpop.f32.mrf.mxu1 }
  0xc7   : > { %2137 = vmatpush.bf16.msrb.mxu1 %v3127_v36  ;;  %v1030_v16 = vadd.f32 %v1029_v2, %v1016_v10 }
  0xc8   : > { %2150 = vmatpush.bf16.msrb.mxu2 %v3191_v39  ;;  %2163 = vmatpush.bf16.msrb.mxu3 %v3255_v40  ;;  %v1042_v3 = vpop.f32.mrf.mxu2 }
  0xc9   : > { %v1055_v4 = vpop.f32.mrf.mxu3 }
  0xca   : > { %2125 = vmatpush.bf16.msrb.mxu0 %v3243_v51 }
  0xcb   : > { %2138 = vmatpush.bf16.msrb.mxu1 %v3119_v53 }
  0xcc   : > { %2151 = vmatpush.bf16.msrb.mxu2 %v3183_v57  ;;  %2164 = vmatpush.bf16.msrb.mxu3 %v3247_v58  ;;  %v1018_v11 = vpop.f32.mrf.mxu0 }
  0xce   : > { %2126 = vmatpush.bf16.msrb.mxu0 %v3235_v63  ;;  %v1031_v5 = vpop.f32.mrf.mxu1 }
  0xcf   : > { %2139 = vmatpush.bf16.msrb.mxu1 %v3111_v0 }
  0xd0   : > { %2152 = vmatpush.bf16.msrb.mxu2 %v3175_v1  ;;  %2165 = vmatpush.bf16.msrb.mxu3 %v3239_v28  ;;  %v1044_v6 = vpop.f32.mrf.mxu2 }
  0xd1   : > { %2127 = vmatmul.bf16.vlgmr.msrb.gmra.mxu0 %v1849_v41  ;;  %v1057_v7 = vpop.f32.mrf.mxu3 }
  0xd2   : > { %2140 = vmatmul.bf16.vlgmr.msrb.gmra.mxu1 %v3752_v54  ;;  %v1043_v54 = vadd.f32 %v1042_v3, %v1030_v16 }
  0xd3   : > { %2153 = vmatmul.bf16.vlgmr.msrb.gmra.mxu2 %v3754_v48  ;;  %2166 = vmatmul.bf16.vlgmr.msrb.gmra.mxu3 %v1849_v41 }
  0xd4   : > { %v1068_v8 = vpop.f32.mrf.mxu0 }
  0xd5   : > { %v1069_v17 = vadd.f32 %v1068_v8, %v1055_v4 }
  0xd6   : > { %v1081_v50 = vpop.f32.mrf.mxu1 }
  0xd7   : > { %v1082_v20 = vadd.f32 %v1081_v50, %v1069_v17 }
  0xd8   : > { %v1343_v52 = vpop.f32.mrf.mxu2 }
  0xd9   : > { %v1356_v9 = vpop.f32.mrf.mxu3  ;;  %v1344_v19 = vadd.f32 %v1343_v52, %v1043_v54 }
  0xdb   : > { %v1357_v25 = vadd.f32 %v1356_v9, %v1344_v19 }
  0xdc   : > { %v1070_v12 = vpop.f32.mrf.mxu0 }
  0xde   : > { %v1083_v13 = vpop.f32.mrf.mxu1 }
  0xe0   : > { %v1345_v14 = vpop.f32.mrf.mxu2 }
  0xe1   : > { %v1358_v15 = vpop.f32.mrf.mxu3 }
  0xee   : > { %v1369_v18 = vpop.f32.mrf.mxu0 }
  0xef   : > { %v1382_v48 = vpop.f32.mrf.mxu1  ;;  %v1370_v32 = vadd.f32 %v1369_v18, %v1357_v25 }
  0xf0   : > { %v1383_v21 = vadd.f32 %v1382_v48, %v1082_v20 }
  0xf1   : > { %v1417_v36 = vadd.f32 %v1413_v33, %v1370_v32 }
  0xf3   : > { %v2271_v50 = vmul.f32 %v1417_v36, %v1417_v36  ;;  %v2241_v14 = vsel %vm2240_vm5, %v1417_v36, 0.0 }
  0xf4   : > { %v2242_v54 = vrot.slane %v2241_v14, 4 }
  0xf5   : > { %v2273_v18 = vsel %vm2240_vm5, %v2271_v50, 0.0 }
  0xf6   : > { %v1395_v23 = vpop.f32.mrf.mxu2  ;;  %v1371_v31 = vpop.f32.mrf.mxu0 }
  0xf7   : > { %v1396_v26 = vadd.f32 %v1395_v23, %v1383_v21  ;;  %v1384_v30 = vpop.f32.mrf.mxu1 }
  0xf8   : > { %v1408_v24 = vpop.f32.mrf.mxu3 }
  0xf9   : > { %v1409_v34 = vadd.f32 %v1408_v24, %v1396_v26  ;;  %v2274_v26 = vrot.slane %v2273_v18, 4 }
  0xfb   : > { %v1418_v35 = vadd.f32 %v1414_v29, %v1409_v34 }
  0xfd   : > { %v2175_v37 = vrot.slane %v1418_v35, 6  ;;  %v2272_v52 = vmul.f32 %v1418_v35, %v1418_v35  ;;  %v2248_v16 = vsel %vm2240_vm5, %v1418_v35, 0.0  ;;  %v2243_v35 = vadd.f32 %v2242_v54, %v2241_v14 }
  0xfe   : > { %v1397_v38 = vpop.f32.mrf.mxu2  ;;  %v2249_v20 = vrot.slane %v2248_v16, 4 }
  0xff   : > { %v2176_v40 = vsel %vm642_vm2, %v1417_v36, %v2175_v37  ;;  %v2178_v42 = vsel %vm2177_vm4, %v1417_v36, %v2175_v37  ;;  %v2280_v48 = vsel %vm2240_vm5, %v2272_v52, 0.0 }
 0x100   : > { %v1410_v39 = vpop.f32.mrf.mxu3  ;;  %v2179_v43 = vrot.slane %v2178_v42, 2  ;;  %2180 = vst [vmem:[#allocation1] ss:$4 sm:$0xff] %v2176_v40  ;;  %v2281_v30 = vrot.slane %v2280_v48, 4  ;;  %v2250_v40 = vadd.f32 %v2249_v20, %v2248_v16 }
 0x102   : > { %2184 = vst [vmem:[#allocation1 + $0x20] ss:$4 sm:$0xff] %v2179_v43 }
 0x107   : > { %v2181_v44 = vld.sshfl [vmem:[#allocation1] sm:$0xff pattern:$0x73625140]  ;;  %v2182_v45 = vld.sshfl [vmem:[#allocation1 + $0x8] sm:$0xff pattern:$0x73625140] }
 0x108   : > { %v2191_v46 = vpack.c.bf16 %v2182_v45, %v2181_v44  ;;  %v2275_v45 = vadd.f32 %v2274_v26, %v2273_v18 }
 0x109   : > { %v2185_v49 = vld.sshfl [vmem:[#allocation1 + $0x20] sm:$0xff pattern:$0x73625140]  ;;  %v2186_v51 = vld.sshfl [vmem:[#allocation1 + $0x28] sm:$0xff pattern:$0x73625140] }
 0x10a   : > { %v2216_v53 = vrot.slane %v2191_v46, 3  ;;  %v2192_v55 = vpack.c.bf16 %v2186_v51, %v2185_v49  ;;  %v2244_v49 = vrot.slane %v2243_v35, 2 }
 0x10c   : > { %v2222_v56 = vsel %vm603_vm0, %v2191_v46, %v2216_v53  ;;  %v2218_v57 = vrot.slane %v2192_v55, 3  ;;  %v2282_v46 = vadd.f32 %v2281_v30, %v2280_v48  ;;  %v2251_v53 = vrot.slane %v2250_v40, 2 }
 0x10d   : > { %2236 = vst [vmem:[%s3777_s13] sm:$0x3] %v2222_v56 }
 0x10e   : > { %v1775_v58 = vpop.f32.mrf.mxu0  ;;  %v2228_v47 = vsel %vm603_vm0, %v2192_v55, %v2218_v57 }
 0x10f   : > { %v1788_v59 = vpop.f32.mrf.mxu1  ;;  %2238 = vst [vmem:[%s3777_s13 + $0x4] sm:$0x3] %v2228_v47  ;;  %v2283_v47 = vrot.slane %v2282_v46, 2 }
 0x110   : > { %v1789_v5 = vadd.f32 %v1788_v59, %v1775_v58  ;;  %v2276_v59 = vrot.slane %v2275_v45, 2 }
 0x116   : > { %v1801_v60 = vpop.f32.mrf.mxu2  ;;  %v1777_v62 = vpop.f32.mrf.mxu0 }
 0x117   : > { %v1790_v27 = vpop.f32.mrf.mxu1  ;;  %v1802_v6 = vadd.f32 %v1801_v60, %v1789_v5 }
 0x118   : > { %v1814_v61 = vpop.f32.mrf.mxu3 }
 0x11e   : > { %v1803_v63 = vpop.f32.mrf.mxu2 }
 0x11f   : > { %v2245_v63 = vadd.f32 %v2244_v49, %v2243_v35 }
 0x120   : > { %v1816_v0 = vpop.f32.mrf.mxu3 }
 0x12e   : > { %v1827_v1 = vpop.f32.mrf.mxu0 }
 0x12f   : > { %v1840_v28 = vpop.f32.mrf.mxu1  ;;  %v1828_v9 = vadd.f32 %v1827_v1, %v1814_v61 }
 0x131   : > { %v1841_v19 = vadd.f32 %v1840_v28, %v1828_v9  ;;  %v2252_v28 = vadd.f32 %v2251_v53, %v2250_v40 }
 0x136   : > { %v2102_v41 = vpop.f32.mrf.mxu2  ;;  %v1829_v3 = vpop.f32.mrf.mxu0 }
 0x137   : > { %v1842_v2 = vpop.f32.mrf.mxu1  ;;  %v2103_v7 = vadd.f32 %v2102_v41, %v1802_v6  ;;  %v2246_v6 = vrot.slane %v2245_v63, 1 }
 0x138   : > { %v2115_v10 = vpop.f32.mrf.mxu3 }
 0x139   : > { %v2116_v8 = vadd.f32 %v2115_v10, %v2103_v7  ;;  %v2247_v16 = vadd.f32 %v2246_v6, %v2245_v63 }
 0x13e   : > { %v2104_v4 = vpop.f32.mrf.mxu2 }
 0x13f   : > { %v2277_v4 = vadd.f32 %v2276_v59, %v2275_v45 }
 0x140   : > { %v2117_v11 = vpop.f32.mrf.mxu3 }
 0x141   : > { %v2284_v11 = vadd.f32 %v2283_v47, %v2282_v46 }
 0x143   : > { %v2285_v14 = vrot.slane %v2284_v11, 1 }
 0x145   : > { %v2286_v35 = vadd.f32 %v2285_v14, %v2284_v11 }
 0x14e   : > { %v2128_v12 = vpop.f32.mrf.mxu0 }
 0x14f   : > { %v2141_v13 = vpop.f32.mrf.mxu1  ;;  %v2129_v15 = vadd.f32 %v2128_v12, %v2116_v8  ;;  %v2253_v8 = vrot.slane %v2252_v28, 1 }
 0x150   : > { %v2142_v25 = vadd.f32 %v2141_v13, %v1841_v19  ;;  %v2278_v13 = vrot.slane %v2277_v4, 1 }
 0x151   : > { %v2171_v17 = vadd.f32 %v2129_v15, %v1413_v33  ;;  %v2254_v48 = vadd.f32 %v2253_v8, %v2252_v28 }
 0x153   : > { %v2255_v21 = vsel %vm2240_vm5, %v2171_v17, 0.0  ;;  %v2287_v23 = vmul.f32 %v2171_v17, %v2171_v17 }
 0x154   : > { %v2256_v24 = vrot.slane %v2255_v21, 4 }
 0x155   : > { %v2289_v31 = vsel %vm2240_vm5, %v2287_v23, 0.0 }
 0x156   : > { %v2154_v32 = vpop.f32.mrf.mxu2  ;;  %v2167_v34 = vpop.f32.mrf.mxu3  ;;  %v2257_v33 = vadd.f32 %v2256_v24, %v2255_v21  ;;  %v2290_v36 = vrot.slane %v2289_v31, 4 }
 0x157   : > { %v2155_v37 = vadd.f32 %v2154_v32, %v2142_v25  ;;  %v2130_v38 = vpop.f32.mrf.mxu0  ;;  %v2143_v39 = vpop.f32.mrf.mxu1 }
 0x158   : > { %v2258_v42 = vrot.slane %v2257_v33, 2  ;;  %v2291_v43 = vadd.f32 %v2290_v36, %v2289_v31 }
 0x159   : > { %v2168_v44 = vadd.f32 %v2167_v34, %v2155_v37  ;;  %v2279_v34 = vadd.f32 %v2278_v13, %v2277_v4 }
 0x15a   : > { %v2259_v55 = vadd.f32 %v2258_v42, %v2257_v33  ;;  %v2292_v56 = vrot.slane %v2291_v43, 2 }
 0x15b   : > { %v2172_v51 = vadd.f32 %v2168_v44, %v1414_v29 }
 0x15c   : > { %v2260_v10 = vrot.slane %v2259_v55, 1  ;;  %v2293_v2 = vadd.f32 %v2292_v56, %v2291_v43 }
 0x15d   : > { %v2195_v57 = vrot.slane %v2172_v51, 6  ;;  %v2262_v58 = vsel %vm2240_vm5, %v2172_v51, 0.0  ;;  %v2288_v61 = vmul.f32 %v2172_v51, %v2172_v51 }
 0x15e   : > { %v2263_v60 = vrot.slane %v2262_v58, 4  ;;  %v2156_v62 = vpop.f32.mrf.mxu2  ;;  %v2169_v27 = vpop.f32.mrf.mxu3  ;;  %v2261_v52 = vadd.f32 %v2260_v10, %v2259_v55  ;;  %v2294_v9 = vrot.slane %v2293_v2, 1 }
 0x15f   : > { %v2196_v0 = vsel %vm642_vm2, %v2171_v17, %v2195_v57  ;;  %v2197_v1 = vsel %vm2177_vm4, %v2171_v17, %v2195_v57  ;;  %v2296_v41 = vsel %vm2240_vm5, %v2288_v61, 0.0 }
 0x160   : > { %v2198_v22 = vrot.slane %v2197_v1, 2  ;;  %2199 = vst [vmem:[#allocation1] ss:$4 sm:$0xff] %v2196_v0  ;;  %v2264_v29 = vadd.f32 %v2263_v60, %v2262_v58  ;;  %v2297_v3 = vrot.slane %v2296_v41, 4  ;;  %v2269_v21 = vadd.f32 %v2261_v52, %v2247_v16 }
 0x161   : > { %v2295_v23 = vadd.f32 %v2294_v9, %v2293_v2 }
 0x162   : > { %2203 = vst [vmem:[#allocation1 + $0x20] ss:$4 sm:$0xff] %v2198_v22  ;;  %v2265_v5 = vrot.slane %v2264_v29, 2  ;;  %v2298_v7 = vadd.f32 %v2297_v3, %v2296_v41 }
 0x163   : > { %v2303_v39 = vadd.f32 %v2295_v23, %v2279_v34 }
 0x164   : > { %v2266_v50 = vadd.f32 %v2265_v5, %v2264_v29  ;;  %v2299_v12 = vrot.slane %v2298_v7, 2 }
 0x166   : > { %v2267_v15 = vrot.slane %v2266_v50, 1  ;;  %v2300_v18 = vadd.f32 %v2299_v12, %v2298_v7 }
 0x167   : > { %v2200_v17 = vld.sshfl [vmem:[#allocation1] sm:$0xff pattern:$0x73625140]  ;;  %v2201_v54 = vld.sshfl [vmem:[#allocation1 + $0x8] sm:$0xff pattern:$0x73625140] }
 0x168   : > { %v2210_v19 = vpack.c.bf16 %v2201_v54, %v2200_v17  ;;  %v2268_v20 = vadd.f32 %v2267_v15, %v2266_v50  ;;  %v2301_v32 = vrot.slane %v2300_v18, 1 }
 0x169   : > { %v2204_v24 = vld.sshfl [vmem:[#allocation1 + $0x20] sm:$0xff pattern:$0x73625140]  ;;  %v2205_v25 = vld.sshfl [vmem:[#allocation1 + $0x28] sm:$0xff pattern:$0x73625140] }
 0x16a   : > { %v2211_v26 = vpack.c.bf16 %v2205_v25, %v2204_v24  ;;  %v2217_v30 = vrot.slane %v2210_v19, 3  ;;  %v2270_v31 = vadd.f32 %v2268_v20, %v2254_v48  ;;  %v2302_v37 = vadd.f32 %v2301_v32, %v2300_v18 }
 0x16c   : > { %v2219_v33 = vrot.slane %v2211_v26, 3  ;;  %v2225_v36 = vsel %vm603_vm0, %v2210_v19, %v2217_v30  ;;  %v2305_v38 = vadd.f32 %v2270_v31, %v2269_v21  ;;  %v2304_v42 = vadd.f32 %v2302_v37, %v2286_v35 }
 0x16d   : > { %2237 = vst [vmem:[%s3777_s13 + $0x2] sm:$0x3] %v2225_v36 }
 0x16e   : > { %v2231_v40 = vsel %vm603_vm0, %v2211_v26, %v2219_v33  ;;  %2306 = vst [vmem:[%s533_s16] sm:$0x1] %v2305_v38  ;;  %v2307_v43 = vadd.f32 %v2304_v42, %v2303_v39 }
 0x16f   : > { %2239 = vst [vmem:[%s3777_s13 + $0x6] sm:$0x3] %v2231_v40 }
 0x170   : > { %2308 = vst [vmem:[%s539_s19] sm:$0x1] %v2307_v43 }
 0x171 PF: > { %s21_s30 = sadd.s32 1, %s3590_s30   ;;  %s3828_s28 = smov %s3586_s29 }
 0x172   : > { %p18_p8 = scmp.ge.s32.totalorder %s21_s30, 4   ;;  %s3829_s29 = smov %s3831_s11 }
 0x174   :  { %20 = sbr.rel (!%p18_p8) target bundleno = 2 (0x2), region = 122 }
 0x179   :  { %2375 = vsyncpa [#allocation3], 1 }
 0x17a   :  { %2377 = vsyncpa [#allocation3 + $0x1], 1 }

// kernel: generator_forward.9
= control target key start
LH: loop header
LB: loop body
LE: loop exit
PB: predicated region body
PF: predicated region fallthrough
CT: control target
= control target key end

     0   :  { %s3384_s24 = smov 0   ;;  %s3386_s1 = smov 0   ;;  %s4722_s0 = inlined_call_operand.vmem [shape: bf16[2,16,16,64], index: 0, kind: input, shape index: {}, may-alias: {0,1,2}]   ;;  %s4723_s1 = inlined_call_operand.vmem [shape: bf16[2,16,16,64], index: 1, kind: input, shape index: {}, may-alias: {0,1,2}]   ;;  %s4724_s2 = inlined_call_operand.vmem [shape: bf16[2,16,16,64], index: 2, kind: input, shape index: {}, may-alias: {0,1,2}]   ;;  %s4725_s3 = inlined_call_operand.vmem [shape: f32[1,64], index: 3, kind: input, shape index: {}]   ;;  %s4726_s4 = inlined_call_operand.vmem [shape: f32[1,64], index: 4, kind: input, shape index: {}]   ;;  %s4727_s5 = inlined_call_operand.vmem [shape: bf16[4,192,6], index: 5, kind: input, shape index: {}]   ;;  %s4728_s6 = inlined_call_operand.vmem [shape: f32[1,6], index: 6, kind: input, shape index: {}]   ;;  %s4729_s7 = inlined_call_operand.vmem [shape: f32[2,16,2,16,6], index: 7, kind: output, shape index: {}]  }
   0x1   :  { %s3388_s2 = smov 0  }
   0x2 LB: > { %s29_s25 = sadd.s32 1, %s3336_s1  ;;  %p2687_p0 = scmp.ge.s32.totalorder %s3340_s2, 1  ;;  %s3340_s2 = sphi %s3388_s2, %s17_s2   ;;  %s3336_s1 = sphi %s3386_s1, %s4824_s1   ;;  %s3332_s24 = sphi %s3384_s24, %s4823_s24  }
   0x3   : > { %p31_p1 = scmp.ge.s32.totalorder %s29_s25, 2  ;;  %p323_p2 = scmp.lt.s32.totalorder %s3340_s2, 3 }
   0x5   : > { %s4826_s25 = smov (%p31_p1, %s29_s25), 0  ;;  %p324_p3 = pnand %p2687_p0, %p323_p2 }
   0x7   : > { %327 = sbr.rel (%p324_p3) target bundleno = 794 (0x31a), region = 48 }
   0xc   : > { %v3042_v0 = vld [vmem:[%s4727_s5 + $0x58] sm:$0xff]  ;;  %p392_p4 = scmp.lt.s32.totalorder %s3332_s24, 1  ;;  %v3342_v2 = vmov 0.0|0.0   ;;  %v3041_v4 = vld [vmem:[%s4727_s5 + $0x50] sm:$0xff]  ;;  %s3343_s12 = smov 64   ;;  %v3040_v7 = vld [vmem:[%s4727_s5 + $0x48] sm:$0xff] }
   0xd   : > { %v3054_v1 = vld [vmem:[%s4727_s5 + $0xb8] sm:$0xff]  ;;  %v792_v3 = vunpack.c.l.b16 %v3342_v2  ;;  %1711 = vmatpush.bf16.msra.mxu3 %v3042_v0  ;;  %v3053_v5 = vld [vmem:[%s4727_s5 + $0xb0] sm:$0xff]  ;;  %v3052_v8 = vld [vmem:[%s4727_s5 + $0xa8] sm:$0xff]  ;;  %vm1065_vm0 = vcmask 1047552   ;;  %vm1066_vm1 = vsmask.f32 7424 }
   0xe   : > { %1458 = vmatpush.bf16.msra.mxu1 %v3054_v1  ;;  %s4828_s24 = smov (!%p392_p4, %s3332_s24), 1  ;;  %v3435_v9 = vld [vmem:[%s4725_s3] ss:$0 sm:$0xff]  ;;  %vm3454_vm2 = vmand %vm1065_vm0, %vm1066_vm1  ;;  %vm1122_vm3 = vcmask 523264  }
   0xf   : > { %v3416_v6 = vpack.c.b16 %v792_v3, %v792_v3  ;;  %s3026_s11 = sshll.u32 %s4828_s24, 7  ;;  %v3445_v17 = vld [vmem:[%s4726_s4] ss:$0 sm:$0xff]  ;;  %s3030_s30 = sshll.u32 %s4828_s24, 9 }
  0x10   : > { %s3430_s19 = scalar_lea.vmem %s4722_s0, %s3026_s11  ;;  %v3039_v28 = vld [vmem:[%s4727_s5 + $0x40] sm:$0xff]  ;;  %s4137_s9 = scalar_lea.vmem %s4729_s7, %s3030_s30 }
  0x11   : > { %1086 = vrot.lane.b32.xlu0 %v3416_v6, %s3343_s12  ;;  %v847_v10 = vshrl.u32 %v3416_v6, 16  ;;  %v850_v11 = vshll.u32 %v3416_v6, 16  ;;  %1712 = vmatpush.bf16.msra.mxu3 %v3041_v4  ;;  %v3080_v12 = vld [vmem:[%s3430_s19] sm:$0xff]   ;;  %v3143_v13 = vld [vmem:[%s3430_s19 + $0x8] sm:$0xff]   ;;  %v3144_v14 = vld [vmem:[%s3430_s19 + $0x10] sm:$0xff]  }
  0x12   : > { %1459 = vmatpush.bf16.msra.mxu1 %v3053_v5  ;;  %v3081_v15 = vunpack.c.l.bf16 %v3080_v12  ;;  %v3082_v16 = vunpack.c.h.bf16 %v3080_v12  ;;  %v3085_v19 = vunpack.c.l.bf16 %v3143_v13  ;;  %v3086_v20 = vunpack.c.h.bf16 %v3143_v13  ;;  %v3051_v29 = vld [vmem:[%s4727_s5 + $0xa0] sm:$0xff]  ;;  %v3145_v2 = vld [vmem:[%s3430_s19 + $0x18] sm:$0xff]  }
  0x13   : > { %v1011_v18 = vrot.slane %v850_v11, 1  ;;  %v3089_v21 = vunpack.c.l.bf16 %v3144_v14  ;;  %v3090_v22 = vunpack.c.h.bf16 %v3144_v14  ;;  %v3093_v5 = vunpack.c.l.bf16 %v3145_v2 }
  0x14   : > { %v517_v23 = vmul.f32 %v3435_v9, %v3081_v15  ;;  %v518_v24 = vmul.f32 %v3435_v9, %v3082_v16  ;;  %v519_v27 = vmul.f32 %v3435_v9, %v3085_v19  ;;  %v520_v30 = vmul.f32 %v3435_v9, %v3086_v20 }
  0x15   : > { %v1012_v25 = vor.u32 %v1011_v18, %v847_v10  ;;  %1713 = vmatpush.bf16.msra.mxu3 %v3040_v7  ;;  %v521_v31 = vmul.f32 %v3435_v9, %v3089_v21  ;;  %v522_v32 = vmul.f32 %v3435_v9, %v3090_v22  ;;  %v3094_v7 = vunpack.c.h.bf16 %v3145_v2 }
  0x16   : > { %1460 = vmatpush.bf16.msra.mxu1 %v3052_v8  ;;  %v552_v33 = vadd.f32 %v3445_v17, %v517_v23  ;;  %v553_v34 = vadd.f32 %v3445_v17, %v518_v24  ;;  %v554_v35 = vadd.f32 %v3445_v17, %v519_v27  ;;  %v555_v37 = vadd.f32 %v3445_v17, %v520_v30 }
  0x17   : > { %v3473_v36 = vsel %vm3454_vm2, %v1012_v25, 0  ;;  %v556_v38 = vadd.f32 %v3445_v17, %v521_v31  ;;  %v557_v39 = vadd.f32 %v3445_v17, %v522_v32  ;;  %v523_v12 = vmul.f32 %v3435_v9, %v3093_v5  ;;  %v3037_v5 = vld [vmem:[%s4727_s5 + $0x30] sm:$0xff] }
  0x18   : > { %4774 = vst [vmem:[#allocation2_spill] sm:$0xff] %v3473_v36  ;;  %vm584_vm4 = vcmp.ge.f32.partialorder %v552_v33, 0.0  ;;  %vm585_vm5 = vcmp.ge.f32.partialorder %v553_v34, 0.0  ;;  %v616_v40 = vmul.f32 0.2, %v552_v33  ;;  %vm586_vm6 = vcmp.ge.f32.partialorder %v554_v35, 0.0 }
  0x19   : > { %v617_v41 = vmul.f32 0.2, %v553_v34  ;;  %1714 = vmatpush.bf16.msra.mxu3 %v3039_v28  ;;  %vm587_vm7 = vcmp.ge.f32.partialorder %v555_v37, 0.0  ;;  %v618_v42 = vmul.f32 0.2, %v554_v35  ;;  %vm588_vm8 = vcmp.ge.f32.partialorder %v556_v38, 0.0 }
  0x1a   : > { %1461 = vmatpush.bf16.msra.mxu1 %v3051_v29  ;;  %v619_v43 = vmul.f32 0.2, %v555_v37  ;;  %v648_v44 = vsel %vm584_vm4, %v552_v33, %v616_v40  ;;  %vm589_vm9 = vcmp.ge.f32.partialorder %v557_v39, 0.0  ;;  %v620_v52 = vmul.f32 0.2, %v556_v38 }
  0x1b   : > { %v649_v45 = vsel %vm585_vm5, %v553_v34, %v617_v41  ;;  %v722_v46 = vpack.c.bf16 %v648_v44, %v648_v44  ;;  %v650_v48 = vsel %vm586_vm6, %v554_v35, %v618_v42  ;;  %v621_v53 = vmul.f32 0.2, %v557_v39  ;;  %v3146_v34 = vld [vmem:[%s3430_s19 + $0x20] sm:$0xff]  }
  0x1c   : > { %v723_v47 = vpack.c.bf16 %v649_v45, %v649_v45  ;;  %v651_v49 = vsel %vm587_vm7, %v555_v37, %v619_v43  ;;  %2832 = vmatmul.msk.bf16.vlgmr.msra.gmra.mxu3 %vm1122_vm3, %v3473_v36  ;;  %v724_v50 = vpack.c.bf16 %v650_v48, %v650_v48  ;;  %v652_v58 = vsel %vm588_vm8, %v556_v38, %v620_v52 }
  0x1d   : > { %v725_v51 = vpack.c.bf16 %v651_v49, %v651_v49  ;;  %v794_v54 = vunpack.c.l.b16 %v722_v46  ;;  %v653_v59 = vsel %vm589_vm9, %v557_v39, %v621_v53  ;;  %v726_v61 = vpack.c.bf16 %v652_v58, %v652_v58 }
  0x1e   : > { %v795_v55 = vunpack.c.l.b16 %v723_v47  ;;  %v796_v56 = vunpack.c.l.b16 %v724_v50  ;;  %v727_v62 = vpack.c.bf16 %v653_v59, %v653_v59  ;;  %v524_v13 = vmul.f32 %v3435_v9, %v3094_v7  ;;  %v3038_v50 = vld [vmem:[%s4727_s5 + $0x38] sm:$0xff] }
  0x1f   : > { %v797_v57 = vunpack.c.l.b16 %v725_v51  ;;  %v798_v3 = vunpack.c.l.b16 %v726_v61  ;;  %v558_v16 = vadd.f32 %v3445_v17, %v523_v12  ;;  %v3097_v35 = vunpack.c.l.bf16 %v3146_v34  ;;  %1618 = vmatpush.bf16.msra.mxu2 %v3038_v50  ;;  %v3048_v50 = vld [vmem:[%s4727_s5 + $0x88] sm:$0xff] }
  0x20   : > { %v3480_v60 = vpack.c.b16 %v795_v55, %v794_v54  ;;  %v799_v4 = vunpack.c.l.b16 %v727_v62  ;;  %v559_v18 = vadd.f32 %v3445_v17, %v524_v13  ;;  %v3098_v37 = vunpack.c.h.bf16 %v3146_v34  ;;  %v3036_v13 = vld [vmem:[%s4727_s5 + $0x28] sm:$0xff]  ;;  %v3034_v34 = vld [vmem:[%s4727_s5 + $0x18] sm:$0xff] }
  0x21   : > { %v3482_v63 = vpack.c.b16 %v797_v57, %v796_v56  ;;  %v622_v20 = vmul.f32 0.2, %v558_v16  ;;  %vm590_vm10 = vcmp.ge.f32.partialorder %v558_v16, 0.0  ;;  %v525_v38 = vmul.f32 %v3435_v9, %v3097_v35  ;;  %v3147_v57 = vld [vmem:[%s3430_s19 + $0x28] sm:$0xff]  }
  0x22   : > { %1088 = vrot.lane.b32.xlu0 %v3480_v60, %s3343_s12  ;;  %v854_v0 = vshrl.u32 %v3480_v60, 16  ;;  %v857_v1 = vshll.u32 %v3480_v60, 16  ;;  %v3497_v15 = vpack.c.b16 %v799_v4, %v798_v3  ;;  %v623_v21 = vmul.f32 0.2, %v559_v18 }
  0x23   : > { %1090 = vrot.lane.b32.xlu1 %v3482_v63, %s3343_s12  ;;  %v864_v22 = vshll.u32 %v3482_v63, 16  ;;  %vm591_vm11 = vcmp.ge.f32.partialorder %v559_v18, 0.0  ;;  %v654_v23 = vsel %vm590_vm10, %v558_v16, %v622_v20  ;;  %v861_v28 = vshrl.u32 %v3482_v63, 16  ;;  %1619 = vmatpush.bf16.msra.mxu2 %v3037_v5 }
  0x24   : > { %v1013_v8 = vrot.slane %v857_v1, 1  ;;  %v655_v24 = vsel %vm591_vm11, %v559_v18, %v623_v21  ;;  %v728_v25 = vpack.c.bf16 %v654_v23, %v654_v23  ;;  %v526_v39 = vmul.f32 %v3435_v9, %v3098_v37  ;;  %v3050_v21 = vld [vmem:[%s4727_s5 + $0x98] sm:$0xff] }
  0x25   : > { %v729_v27 = vpack.c.bf16 %v655_v24, %v655_v24  ;;  %v1015_v29 = vrot.slane %v864_v22, 1  ;;  %v560_v41 = vadd.f32 %v3445_v17, %v525_v38  ;;  %v871_v45 = vshll.u32 %v3497_v15, 16  ;;  %1365 = vmatpush.bf16.msra.mxu0 %v3050_v21 }
  0x26   : > { %v1014_v14 = vor.u32 %v1013_v8, %v854_v0  ;;  %v800_v30 = vunpack.c.l.b16 %v728_v25  ;;  %v561_v42 = vadd.f32 %v3445_v17, %v526_v39  ;;  %v868_v51 = vshrl.u32 %v3497_v15, 16 }
  0x27   : > { %v801_v31 = vunpack.c.l.b16 %v729_v27  ;;  %v1016_v33 = vor.u32 %v1015_v29, %v861_v28  ;;  %v624_v43 = vmul.f32 0.2, %v560_v41  ;;  %vm592_vm12 = vcmp.ge.f32.partialorder %v560_v41, 0.0  ;;  %1620 = vmatpush.bf16.msra.mxu2 %v3036_v13  ;;  %v3035_v29 = vld [vmem:[%s4727_s5 + $0x20] sm:$0xff] }
  0x28   : > { %v3503_v19 = vsel %vm3454_vm2, %v1014_v14, 0  ;;  %v625_v44 = vmul.f32 0.2, %v561_v42  ;;  %vm593_vm13 = vcmp.ge.f32.partialorder %v561_v42, 0.0  ;;  %v1017_v52 = vrot.slane %v871_v45, 1 }
  0x29   : > { %2768 = vmatmul.msk.bf16.vlgmr.msra.gmra.mxu1 %vm1122_vm3, %v3503_v19  ;;  %v3515_v32 = vpack.c.b16 %v801_v31, %v800_v30  ;;  %v3526_v40 = vsel %vm3454_vm2, %v1016_v33, 0  ;;  %v656_v46 = vsel %vm592_vm12, %v560_v41, %v624_v43  ;;  %v3101_v58 = vunpack.c.l.bf16 %v3147_v57  ;;  %v3148_v33 = vld [vmem:[%s3430_s19 + $0x30] sm:$0xff]  }
  0x2a   : > { %v657_v47 = vsel %vm593_vm13, %v561_v42, %v625_v44  ;;  %v730_v48 = vpack.c.bf16 %v656_v46, %v656_v46  ;;  %v1018_v56 = vor.u32 %v1017_v52, %v868_v51  ;;  %v3102_v59 = vunpack.c.h.bf16 %v3147_v57  ;;  %v3049_v44 = vld [vmem:[%s4727_s5 + $0x90] sm:$0xff]  ;;  %v3032_v52 = vld [vmem:[%s4727_s5 + $0x8] sm:$0xff] }
  0x2b   : > { %1092 = vrot.lane.b32.xlu1 %v3497_v15, %s3343_s12  ;;  %1094 = vrot.lane.b32.xlu2 %v3515_v32, %s3343_s12  ;;  %v731_v49 = vpack.c.bf16 %v657_v47, %v657_v47  ;;  %v527_v61 = vmul.f32 %v3435_v9, %v3101_v58  ;;  %v878_v8 = vshll.u32 %v3515_v32, 16  ;;  %v875_v23 = vshrl.u32 %v3515_v32, 16  ;;  %v3033_v46 = vld [vmem:[%s4727_s5 + $0x10] sm:$0xff] }
  0x2c   : > { %2833 = vmatmul.msk.bf16.gmra.mxu3 %vm1122_vm3, %v3503_v19  ;;  %v802_v53 = vunpack.c.l.b16 %v730_v48  ;;  %v528_v62 = vmul.f32 %v3435_v9, %v3102_v59  ;;  %v3552_v2 = vsel %vm3454_vm2, %v1018_v56, 0  ;;  %1621 = vmatpush.bf16.msra.mxu2 %v3035_v29  ;;  %v3105_v35 = vunpack.c.l.bf16 %v3148_v33  ;;  %v3078_v29 = vld [vmem:[%s4727_s5 + $0x178] sm:$0xff]  ;;  %v3065_v15 = vld [vmem:[%s4727_s5 + $0x110] sm:$0xff] }
  0x2d   : > { %v803_v54 = vunpack.c.l.b16 %v731_v49  ;;  %v562_v3 = vadd.f32 %v3445_v17, %v527_v61  ;;  %v1019_v24 = vrot.slane %v878_v8, 1  ;;  %v3106_v37 = vunpack.c.h.bf16 %v3148_v33  ;;  %1366 = vmatpush.bf16.msra.mxu0 %v3049_v44  ;;  %2049 = vmatpush.bf16.msrb.mxu3 %v3078_v29 }
  0x2e   : > { %v563_v4 = vadd.f32 %v3445_v17, %v528_v62  ;;  %v529_v38 = vmul.f32 %v3435_v9, %v3105_v35  ;;  %vm990_vm8 = vcmask 1040384   ;;  %vm991_vm9 = vsmask.f32 256 }
  0x2f   : > { %v3541_v55 = vpack.c.b16 %v803_v54, %v802_v53  ;;  %vm594_vm14 = vcmp.ge.f32.partialorder %v562_v3, 0.0  ;;  %v626_v7 = vmul.f32 0.2, %v562_v3  ;;  %v1020_v31 = vor.u32 %v1019_v24, %v875_v23  ;;  %vm3691_vm10 = vmand %vm990_vm8, %vm991_vm9 }
  0x30   : > { %vm595_vm15 = vcmp.ge.f32.partialorder %v563_v4, 0.0  ;;  %v627_v12 = vmul.f32 0.2, %v563_v4  ;;  %v530_v39 = vmul.f32 %v3435_v9, %v3106_v37  ;;  %1622 = vmatpush.bf16.msra.mxu2 %v3034_v34  ;;  %v564_v42 = vadd.f32 %v3445_v17, %v529_v38  ;;  %v3066_v34 = vld [vmem:[%s4727_s5 + $0x118] sm:$0xff]  ;;  %v3044_v37 = vld [vmem:[%s4727_s5 + $0x68] sm:$0xff] }
  0x31   : > { %v658_v14 = vsel %vm594_vm14, %v562_v3, %v626_v7  ;;  %v3590_v41 = vsel %vm3454_vm2, %v1020_v31, 0  ;;  %v885_v47 = vshll.u32 %v3541_v55, 16  ;;  %v882_v58 = vshrl.u32 %v3541_v55, 16  ;;  %1367 = vmatpush.bf16.msra.mxu0 %v3048_v50  ;;  %v3047_v3 = vld [vmem:[%s4727_s5 + $0x80] sm:$0xff] }
  0x32   : > { %v659_v16 = vsel %vm595_vm15, %v563_v4, %v627_v12  ;;  %v732_v18 = vpack.c.bf16 %v658_v14, %v658_v14  ;;  %v565_v43 = vadd.f32 %v3445_v17, %v530_v39  ;;  %vm596_vm0 = vcmp.ge.f32.partialorder %v564_v42, 0.0  ;;  %v3031_v4 = vld [vmem:[%s4727_s5] sm:$0xff]  ;;  %v3149_v12 = vld [vmem:[%s3430_s19 + $0x38] sm:$0xff]  }
  0x33   : > { %1096 = vrot.lane.b32.xlu2 %v3541_v55, %s3343_s12  ;;  %v733_v20 = vpack.c.bf16 %v659_v16, %v659_v16  ;;  %v628_v48 = vmul.f32 0.2, %v564_v42  ;;  %v1021_v59 = vrot.slane %v885_v47, 1  ;;  %v3109_v13 = vunpack.c.l.bf16 %v3149_v12  ;;  %v3046_v16 = vld [vmem:[%s4727_s5 + $0x78] sm:$0xff]  ;;  %v3043_v50 = vld [vmem:[%s4727_s5 + $0x60] sm:$0xff] }
  0x34   : > { %v804_v25 = vunpack.c.l.b16 %v732_v18  ;;  %vm597_vm1 = vcmp.ge.f32.partialorder %v565_v43, 0.0  ;;  %v629_v49 = vmul.f32 0.2, %v565_v43  ;;  %1623 = vmatpush.bf16.msra.mxu2 %v3033_v46  ;;  %v3110_v14 = vunpack.c.h.bf16 %v3149_v12 }
  0x35   : > { %v805_v27 = vunpack.c.l.b16 %v733_v20  ;;  %v660_v53 = vsel %vm596_vm0, %v564_v42, %v628_v48  ;;  %v1022_v7 = vor.u32 %v1021_v59, %v882_v58  ;;  %1368 = vmatpush.bf16.msra.mxu0 %v3047_v3  ;;  %v531_v18 = vmul.f32 %v3435_v9, %v3109_v13 }
  0x36   : > { %v661_v54 = vsel %vm597_vm1, %v565_v43, %v629_v49  ;;  %v734_v56 = vpack.c.bf16 %v660_v53, %v660_v53  ;;  %v532_v20 = vmul.f32 %v3435_v9, %v3110_v14  ;;  %v3074_v43 = vld [vmem:[%s4727_s5 + $0x158] sm:$0xff]  ;;  %v849_v13 = vrot.slane %v847_v10, 7 }
  0x37   : > { %v3576_v30 = vpack.c.b16 %v805_v27, %v804_v25  ;;  %v735_v57 = vpack.c.bf16 %v661_v54, %v661_v54  ;;  %v3634_v21 = vsel %vm3454_vm2, %v1022_v7, 0  ;;  %v566_v24 = vadd.f32 %v3445_v17, %v531_v18  ;;  %v3045_v27 = vld [vmem:[%s4727_s5 + $0x70] sm:$0xff]  ;;  %1956 = vmatpush.bf16.msrb.mxu1 %v3074_v43 }
  0x38   : > { %1624 = vmatpush.bf16.msra.mxu2 %v3032_v52  ;;  %v806_v61 = vunpack.c.l.b16 %v734_v56  ;;  %v567_v25 = vadd.f32 %v3445_v17, %v532_v20  ;;  %v3150_v56 = vld [vmem:[%s3430_s19 + $0x40] sm:$0xff]  }
  0x39   : > { %2769 = vmatmul.msk.bf16.gmra.mxu1 %vm1122_vm3, %v3526_v40  ;;  %1098 = vrot.lane.b32.xlu0 %v3576_v30, %s3343_s12  ;;  %v807_v62 = vunpack.c.l.b16 %v735_v57  ;;  %v630_v31 = vmul.f32 0.2, %v566_v24  ;;  %v892_v33 = vshll.u32 %v3576_v30, 16  ;;  %vm598_vm4 = vcmp.ge.f32.partialorder %v566_v24, 0.0 }
  0x3a   : > { %1369 = vmatpush.bf16.msra.mxu0 %v3046_v16  ;;  %vm599_vm5 = vcmp.ge.f32.partialorder %v567_v25, 0.0  ;;  %v631_v35 = vmul.f32 0.2, %v567_v25  ;;  %v889_v46 = vshrl.u32 %v3576_v30, 16  ;;  %v3113_v57 = vunpack.c.l.bf16 %v3150_v56 }
  0x3b   : > { %v3620_v5 = vpack.c.b16 %v807_v62, %v806_v61  ;;  %v662_v38 = vsel %vm598_vm4, %v566_v24, %v630_v31  ;;  %v1023_v48 = vrot.slane %v892_v33, 1  ;;  %v3114_v59 = vunpack.c.h.bf16 %v3150_v56 }
  0x3c   : > { %2834 = vmatmul.msk.bf16.gmra.mxu3 %vm1122_vm3, %v3526_v40  ;;  %1625 = vmatpush.bf16.msra.mxu2 %v3031_v4  ;;  %v663_v39 = vsel %vm599_vm5, %v567_v25, %v631_v35  ;;  %v736_v42 = vpack.c.bf16 %v662_v38, %v662_v38  ;;  %v533_v61 = vmul.f32 %v3435_v9, %v3113_v57  ;;  %v3062_v4 = vld [vmem:[%s4727_s5 + $0xf8] sm:$0xff] }
  0x3d   : > { %1100 = vrot.lane.b32.xlu1 %v3620_v5, %s3343_s12  ;;  %v737_v44 = vpack.c.bf16 %v663_v39, %v663_v39  ;;  %v1024_v54 = vor.u32 %v1023_v48, %v889_v46  ;;  %v534_v62 = vmul.f32 %v3435_v9, %v3114_v59  ;;  %v899_v16 = vshll.u32 %v3620_v5, 16 }
  0x3e   : > { %1370 = vmatpush.bf16.msra.mxu0 %v3045_v27  ;;  %v808_v49 = vunpack.c.l.b16 %v736_v42  ;;  %v568_v7 = vadd.f32 %v3445_v17, %v533_v61  ;;  %v852_v27 = vor.u32 %v850_v11, %v849_v13  ;;  %v896_v31 = vshrl.u32 %v3620_v5, 16  ;;  %v3151_v42 = vld [vmem:[%s3430_s19 + $0x48] sm:$0xff]  }
  0x3f   : > { %v809_v52 = vunpack.c.l.b16 %v737_v44  ;;  %v3675_v3 = vsel %vm3454_vm2, %v1024_v54, 0  ;;  %v569_v12 = vadd.f32 %v3445_v17, %v534_v62  ;;  %v3117_v44 = vunpack.c.l.bf16 %v3151_v42 }
  0x40   : > { %2299 = vmatpush.bf16.msrb.mxu2 %v3066_v34  ;;  %vm600_vm6 = vcmp.ge.f32.partialorder %v568_v7, 0.0  ;;  %v632_v14 = vmul.f32 0.2, %v568_v7  ;;  %v1025_v34 = vrot.slane %v899_v16, 1  ;;  %v3700_v38 = vsel %vm3691_vm10, 0, %v852_v27  ;;  %v3073_v27 = vld [vmem:[%s4727_s5 + $0x150] sm:$0xff] }
  0x41   : > { %v3664_v53 = vpack.c.b16 %v809_v52, %v808_v49  ;;  %vm601_vm7 = vcmp.ge.f32.partialorder %v569_v12, 0.0  ;;  %v633_v18 = vmul.f32 0.2, %v569_v12  ;;  %4777 = vst [vmem:[#allocation3_spill] sm:$0xff] %v3700_v38  ;;  %v3118_v48 = vunpack.c.h.bf16 %v3151_v42  ;;  %1957 = vmatpush.bf16.msrb.mxu1 %v3073_v27 }
  0x42   : > { %1371 = vmatpush.bf16.msra.mxu0 %v3044_v37  ;;  %v664_v20 = vsel %vm600_vm6, %v568_v7, %v632_v14  ;;  %v1026_v11 = vor.u32 %v1025_v34, %v896_v31  ;;  %v856_v59 = vrot.slane %v854_v0, 7 }
  0x43   : > { %1102 = vrot.lane.b32.xlu2 %v3664_v53, %s3343_s12  ;;  %v665_v24 = vsel %vm601_vm7, %v569_v12, %v633_v18  ;;  %v738_v25 = vpack.c.bf16 %v664_v20, %v664_v20  ;;  %v536_v52 = vmul.f32 %v3435_v9, %v3118_v48  ;;  %v4739_v18 = vshrl.u32 %v3664_v53, 16 }
  0x44   : > { %v739_v29 = vpack.c.bf16 %v665_v24, %v665_v24  ;;  %v3715_v54 = vsel %vm3454_vm2, %v1026_v11, 0  ;;  %v859_v0 = vor.u32 %v857_v1, %v856_v59  ;;  %v3152_v1 = vld [vmem:[%s3430_s19 + $0x50] sm:$0xff]   ;;  %2300 = vmatpush.bf16.msrb.mxu2 %v3065_v15 }
  0x45   : > { %v810_v35 = vunpack.c.l.b16 %v738_v25  ;;  %v571_v57 = vadd.f32 %v3445_v17, %v536_v52 }
  0x46   : > { %1372 = vmatpush.bf16.msra.mxu0 %v3043_v50  ;;  %v811_v37 = vunpack.c.l.b16 %v739_v29  ;;  %v535_v50 = vmul.f32 %v3435_v9, %v3117_v44  ;;  %v994_v34 = vsel %vm3691_vm10, 0, %v859_v0 }
  0x47   : > { %v635_v62 = vmul.f32 0.2, %v571_v57  ;;  %vm603_vm12 = vcmp.ge.f32.partialorder %v571_v57, 0.0 }
  0x48   : > { %v3702_v39 = vpack.c.b16 %v811_v37, %v810_v35  ;;  %v570_v56 = vadd.f32 %v3445_v17, %v535_v50  ;;  %v3121_v35 = vunpack.c.l.bf16 %v3152_v1  ;;  %v3122_v37 = vunpack.c.h.bf16 %v3152_v1 }
  0x49   : > { %2770 = vmatmul.msk.bf16.gmra.mxu1 %vm1122_vm3, %v3552_v2  ;;  %v667_v12 = vsel %vm603_vm12, %v571_v57, %v635_v62 }
  0x4a   : > { %2206 = vmatpush.bf16.msrb.mxu0 %v3062_v4  ;;  %1104 = vrot.lane.b32.xlu0 %v3702_v39, %s3343_s12  ;;  %v634_v61 = vmul.f32 0.2, %v570_v56  ;;  %v4738_v4 = vshll.u32 %v3664_v53, 16  ;;  %vm602_vm11 = vcmp.ge.f32.partialorder %v570_v56, 0.0  ;;  %v741_v14 = vpack.c.bf16 %v667_v12, %v667_v12 }
  0x4b   : > { %v538_v44 = vmul.f32 %v3435_v9, %v3122_v37 }
  0x4c   : > { %2835 = vmatmul.msk.bf16.gmra.mxu3 %vm1122_vm3, %v3552_v2  ;;  %v666_v7 = vsel %vm602_vm11, %v570_v56, %v634_v61  ;;  %v1027_v20 = vrot.slane %v4738_v4, 1  ;;  %v813_v25 = vunpack.c.l.b16 %v741_v14  ;;  %v863_v56 = vrot.slane %v861_v28, 7 }
  0x4d   : > { %v740_v13 = vpack.c.bf16 %v666_v7, %v666_v7  ;;  %v573_v52 = vadd.f32 %v3445_v17, %v538_v44  ;;  %v4734_v61 = vshll.u32 %v3702_v39, 16  ;;  %v4736_v28 = vshrl.u32 %v3702_v39, 16 }
  0x4e   : > { %v1028_v60 = vor.u32 %v1027_v20, %v4739_v18  ;;  %v866_v12 = vor.u32 %v864_v22, %v863_v56 }
  0x4f   : > { %v812_v24 = vunpack.c.l.b16 %v740_v13  ;;  %v637_v59 = vmul.f32 0.2, %v573_v52  ;;  %vm605_vm14 = vcmp.ge.f32.partialorder %v573_v52, 0.0  ;;  %v1029_v0 = vrot.slane %v4734_v61, 1 }
  0x50   : > { %v3752_v48 = vsel %vm3454_vm2, %v1028_v60, 0  ;;  %v995_v27 = vsel %vm3691_vm10, 0, %v866_v12  ;;  %v3153_v60 = vld [vmem:[%s3430_s19 + $0x58] sm:$0xff]  }
  0x51   : > { %v3734_v29 = vpack.c.b16 %v813_v25, %v812_v24  ;;  %v669_v7 = vsel %vm605_vm14, %v573_v52, %v637_v59  ;;  %v1030_v22 = vor.u32 %v1029_v0, %v4736_v28  ;;  %v3126_v37 = vunpack.c.h.bf16 %v3153_v60 }
  0x52   : > { %v743_v14 = vpack.c.bf16 %v669_v7, %v669_v7 }
  0x53   : > { %1106 = vrot.lane.b32.xlu1 %v3734_v29, %s3343_s12  ;;  %v4730_v7 = vshll.u32 %v3734_v29, 16 }
  0x54   : > { %v815_v24 = vunpack.c.l.b16 %v743_v14 }
  0x59   : > { %2771 = vmatmul.msk.bf16.gmra.mxu1 %vm1122_vm3, %v3590_v41 }
  0x5c   : > { %2836 = vmatmul.msk.bf16.gmra.mxu3 %vm1122_vm3, %v3590_v41 }
  0x69   : > { %2772 = vmatmul.msk.bf16.gmra.mxu1 %vm1122_vm3, %v3634_v21 }
  0x6c   : > { %2837 = vmatmul.msk.bf16.gmra.mxu3 %vm1122_vm3, %v3634_v21 }
  0x79   : > { %2773 = vmatmul.msk.bf16.gmra.mxu1 %vm1122_vm3, %v3675_v3 }
  0x7c   : > { %2838 = vmatmul.msk.bf16.gmra.mxu3 %vm1122_vm3, %v3675_v3 }
  0x83   : > { %v1087_v43 = vpop.permute.xlu0 %1086 }
  0x84   : > { %v1125_v49 = vsel %vm1122_vm3, %v3700_v38, %v1087_v43  ;;  %v537_v43 = vmul.f32 %v3435_v9, %v3121_v35  ;;  %v3125_v35 = vunpack.c.l.bf16 %v3153_v60  ;;  %v3072_v60 = vld [vmem:[%s4727_s5 + $0x148] sm:$0xff] }
  0x85   : > { %1626 = vmatmul.bf16.vlgmr.msra.gmra.mxu2 %v1125_v49  ;;  %v3061_v49 = vld [vmem:[%s4727_s5 + $0xf0] sm:$0xff]  ;;  %1958 = vmatpush.bf16.msrb.mxu1 %v3072_v60 }
  0x86   : > { %v572_v50 = vadd.f32 %v3445_v17, %v537_v43  ;;  %2207 = vmatpush.bf16.msrb.mxu0 %v3061_v49  ;;  %v540_v43 = vmul.f32 %v3435_v9, %v3126_v37  ;;  %v3793_v49 = vsel %vm3454_vm2, %v1030_v22, 0 }
  0x87   : > { %4779 = vst [vmem:[#allocation5_spill] sm:$0xff] %v3793_v49 }
  0x88   : > { %v636_v57 = vmul.f32 0.2, %v572_v50  ;;  %vm604_vm13 = vcmp.ge.f32.partialorder %v572_v50, 0.0  ;;  %v575_v52 = vadd.f32 %v3445_v17, %v540_v43 }
  0x89   : > { %2774 = vmatmul.msk.bf16.gmra.mxu1 %vm1122_vm3, %v3715_v54 }
  0x8a   : > { %v668_v62 = vsel %vm604_vm13, %v572_v50, %v636_v57  ;;  %v870_v57 = vrot.slane %v868_v51, 7  ;;  %vm607_vm0 = vcmp.ge.f32.partialorder %v575_v52, 0.0 }
  0x8b   : > { %v742_v13 = vpack.c.bf16 %v668_v62, %v668_v62  ;;  %v639_v62 = vmul.f32 0.2, %v575_v52 }
  0x8c   : > { %2839 = vmatmul.msk.bf16.gmra.mxu3 %vm1122_vm3, %v3715_v54  ;;  %v873_v14 = vor.u32 %v871_v45, %v870_v57 }
  0x8d   : > { %v814_v20 = vunpack.c.l.b16 %v742_v13  ;;  %v671_v13 = vsel %vm607_vm0, %v575_v52, %v639_v62  ;;  %v3154_v52 = vld [vmem:[%s3430_s19 + $0x60] sm:$0xff]  }
  0x8e   : > { %v3130_v62 = vunpack.c.h.bf16 %v3154_v52 }
  0x8f   : > { %v3775_v63 = vpack.c.b16 %v815_v24, %v814_v20  ;;  %v745_v20 = vpack.c.bf16 %v671_v13, %v671_v13  ;;  %v4733_v24 = vshrl.u32 %v3734_v29, 16 }
  0x90   : > { %v542_v13 = vmul.f32 %v3435_v9, %v3130_v62 }
  0x91   : > { %1108 = vrot.lane.b32.xlu2 %v3775_v63, %s3343_s12  ;;  %v817_v22 = vunpack.c.l.b16 %v745_v20  ;;  %v3060_v20 = vld [vmem:[%s4727_s5 + $0xe8] sm:$0xff] }
  0x92   : > { %2208 = vmatpush.bf16.msrb.mxu0 %v3060_v20 }
  0x94   : > { %v1089_v11 = vpop.permute.xlu0 %1088 }
  0x95   : > { %v3744_v42 = vsel %vm1122_vm3, %v994_v34, %v1089_v11  ;;  %v1091_v25 = vpop.permute.xlu1 %1090  ;;  %v539_v11 = vmul.f32 %v3435_v9, %v3125_v35  ;;  %v996_v35 = vsel %vm3691_vm10, 0, %v873_v14 }
  0x96   : > { %4778 = vst [vmem:[#allocation4_spill] sm:$0xff] %v3744_v42  ;;  %1373 = vmatmul.bf16.vlgmr.msra.gmra.mxu0 %v3744_v42  ;;  %1631 = vmatmul.bf16.gmra.mxu2 %v3744_v42  ;;  %v3783_v1 = vsel %vm1122_vm3, %v995_v27, %v1091_v25  ;;  %v1031_v25 = vrot.slane %v4730_v7, 1  ;;  %v3077_v27 = vld [vmem:[%s4727_s5 + $0x170] sm:$0xff] }
  0x97   : > { %v574_v50 = vadd.f32 %v3445_v17, %v539_v11  ;;  %2050 = vmatpush.bf16.msrb.mxu3 %v3077_v27  ;;  %v577_v27 = vadd.f32 %v3445_v17, %v542_v13 }
  0x99   : > { %2775 = vmatmul.msk.bf16.gmra.mxu1 %vm1122_vm3, %v3752_v48  ;;  %v638_v59 = vmul.f32 0.2, %v574_v50  ;;  %vm606_vm15 = vcmp.ge.f32.partialorder %v574_v50, 0.0  ;;  %v641_v60 = vmul.f32 0.2, %v577_v27  ;;  %vm609_vm4 = vcmp.ge.f32.partialorder %v577_v27, 0.0 }
  0x9b   : > { %v670_v12 = vsel %vm606_vm15, %v574_v50, %v638_v59  ;;  %v1032_v50 = vor.u32 %v1031_v25, %v4733_v24  ;;  %v3129_v59 = vunpack.c.l.bf16 %v3154_v52 }
  0x9c   : > { %2840 = vmatmul.msk.bf16.gmra.mxu3 %vm1122_vm3, %v3752_v48  ;;  %v744_v0 = vpack.c.bf16 %v670_v12, %v670_v12 }
  0x9d   : > { %v1093_v37 = vpop.permute.xlu1 %1092  ;;  %v541_v12 = vmul.f32 %v3435_v9, %v3129_v59 }
  0x9e   : > { %v816_v45 = vunpack.c.l.b16 %v744_v0  ;;  %v3834_v57 = vsel %vm1122_vm3, %v996_v35, %v1093_v37  ;;  %v3844_v0 = vsel %vm3454_vm2, %v1032_v50, 0  ;;  %v4731_v35 = vshll.u32 %v3775_v63, 16 }
  0x9f   : > { %v3773_v34 = vpop.f32.mrf.mxu3  ;;  %4780 = vst [vmem:[#allocation6_spill] sm:$0xff] %v3844_v0  ;;  %v576_v25 = vadd.f32 %v3445_v17, %v541_v12  ;;  %v673_v50 = vsel %vm609_vm4, %v577_v27, %v641_v60  ;;  %v4732_v12 = vshrl.u32 %v3775_v63, 16 }
  0xa0   : > { %v3826_v43 = vpack.c.b16 %v817_v22, %v816_v45  ;;  %v877_v45 = vrot.slane %v875_v23, 7  ;;  %v747_v62 = vpack.c.bf16 %v673_v50, %v673_v50  ;;  %v1033_v13 = vrot.slane %v4731_v35, 1 }
  0xa1   : > { %v640_v22 = vmul.f32 0.2, %v576_v25  ;;  %vm608_vm1 = vcmp.ge.f32.partialorder %v576_v25, 0.0 }
  0xa2   : > { %1110 = vrot.lane.b32.xlu0 %v3826_v43, %s3343_s12  ;;  %v880_v52 = vor.u32 %v878_v8, %v877_v45  ;;  %v819_v7 = vunpack.c.l.b16 %v747_v62  ;;  %v1034_v45 = vor.u32 %v1033_v13, %v4732_v12  ;;  %v4737_v24 = vshrl.u32 %v3826_v43, 16 }
  0xa3   : > { %v672_v37 = vsel %vm608_vm1, %v576_v25, %v640_v22  ;;  %v1095_v25 = vpop.permute.xlu2 %1094  ;;  %v3155_v22 = vld [vmem:[%s3430_s19 + $0x68] sm:$0xff]  }
  0xa4   : > { %v746_v59 = vpack.c.bf16 %v672_v37, %v672_v37  ;;  %v997_v32 = vsel %vm3691_vm10, 0, %v880_v52  ;;  %v3133_v37 = vunpack.c.l.bf16 %v3155_v22  ;;  %v3134_v50 = vunpack.c.h.bf16 %v3155_v22 }
  0xa5   : > { %v3879_v60 = vsel %vm1122_vm3, %v997_v32, %v1095_v25  ;;  %v3889_v62 = vsel %vm3454_vm2, %v1034_v45, 0  ;;  %v884_v32 = vrot.slane %v882_v58, 7 }
  0xa6   : > { %1378 = vmatmul.bf16.gmra.mxu0 %v3783_v1  ;;  %v3788_v44 = vpop.f32.mrf.mxu1  ;;  %1636 = vmatmul.bf16.gmra.mxu2 %v3783_v1  ;;  %v818_v20 = vunpack.c.l.b16 %v746_v59  ;;  %v543_v59 = vmul.f32 %v3435_v9, %v3133_v37  ;;  %v544_v52 = vmul.f32 %v3435_v9, %v3134_v50  ;;  %4781 = vst [vmem:[#allocation7_spill] sm:$0xff] %v3889_v62  ;;  %v4735_v50 = vshll.u32 %v3826_v43, 16 }
  0xa7   : > { %v3797_v56 = vpop.f32.mrf.mxu3 }
  0xa8   : > { %v3871_v8 = vpack.c.b16 %v819_v7, %v818_v20  ;;  %v578_v13 = vadd.f32 %v3445_v17, %v543_v59  ;;  %v579_v20 = vadd.f32 %v3445_v17, %v544_v52  ;;  %v887_v59 = vor.u32 %v885_v47, %v884_v32 }
  0xa9   : > { %2776 = vmatmul.msk.bf16.gmra.mxu1 %vm1122_vm3, %v3793_v49  ;;  %v1035_v61 = vrot.slane %v4735_v50, 1 }
  0xaa   : > { %1112 = vrot.lane.b32.xlu1 %v3871_v8, %s3343_s12  ;;  %v642_v22 = vmul.f32 0.2, %v578_v13  ;;  %v643_v37 = vmul.f32 0.2, %v579_v20  ;;  %vm610_vm5 = vcmp.ge.f32.partialorder %v578_v13, 0.0  ;;  %vm611_vm6 = vcmp.ge.f32.partialorder %v579_v20, 0.0 }
  0xab   : > { %v998_v47 = vsel %vm3691_vm10, 0, %v887_v59  ;;  %v1099_v30 = vpop.permute.xlu0 %1098 }
  0xac   : > { %2841 = vmatmul.msk.bf16.gmra.mxu3 %vm1122_vm3, %v3793_v49  ;;  %v674_v45 = vsel %vm610_vm5, %v578_v13, %v642_v22  ;;  %v675_v35 = vsel %vm611_vm6, %v579_v20, %v643_v37  ;;  %v3071_v13 = vld [vmem:[%s4727_s5 + $0x140] sm:$0xff]  ;;  %v1036_v37 = vor.u32 %v1035_v61, %v4737_v24  ;;  %v4741_v24 = vshrl.u32 %v3871_v8, 16 }
  0xad   : > { %v748_v52 = vpack.c.bf16 %v674_v45, %v674_v45  ;;  %v749_v12 = vpack.c.bf16 %v675_v35, %v675_v35  ;;  %v1097_v35 = vpop.permute.xlu2 %1096  ;;  %1959 = vmatpush.bf16.msrb.mxu1 %v3071_v13  ;;  %v3156_v45 = vld [vmem:[%s3430_s19 + $0x70] sm:$0xff]  }
  0xae   : > { %v3808_v51 = vpop.f32.mrf.mxu1  ;;  %v3924_v50 = vsel %vm1122_vm3, %v998_v47, %v1097_v35  ;;  %v3934_v61 = vsel %vm3454_vm2, %v1036_v37, 0 }
  0xaf   : > { %v3824_v11 = vpop.f32.mrf.mxu3  ;;  %v820_v20 = vunpack.c.l.b16 %v748_v52  ;;  %v821_v55 = vunpack.c.l.b16 %v749_v12  ;;  %v3137_v12 = vunpack.c.l.bf16 %v3156_v45  ;;  %v3138_v52 = vunpack.c.h.bf16 %v3156_v45  ;;  %4782 = vst [vmem:[#allocation8_spill] sm:$0xff] %v3934_v61 }
  0xb1   : > { %v3916_v22 = vpack.c.b16 %v821_v55, %v820_v20  ;;  %v545_v59 = vmul.f32 %v3435_v9, %v3137_v12  ;;  %v546_v28 = vmul.f32 %v3435_v9, %v3138_v52  ;;  %v3059_v20 = vld [vmem:[%s4727_s5 + $0xe0] sm:$0xff]  ;;  %v891_v9 = vrot.slane %v889_v46, 7 }
  0xb2   : > { %2209 = vmatpush.bf16.msrb.mxu0 %v3059_v20  ;;  %v4740_v12 = vshll.u32 %v3871_v8, 16 }
  0xb3   : > { %1114 = vrot.lane.b32.xlu2 %v3916_v22, %s3343_s12  ;;  %v580_v55 = vadd.f32 %v3445_v17, %v545_v59  ;;  %v581_v47 = vadd.f32 %v3445_v17, %v546_v28  ;;  %v894_v28 = vor.u32 %v892_v33, %v891_v9  ;;  %v4745_v38 = vshrl.u32 %v3916_v22, 16 }
  0xb4   : > { %v1037_v4 = vrot.slane %v4740_v12, 1  ;;  %v4744_v12 = vshll.u32 %v3916_v22, 16 }
  0xb5   : > { %v644_v45 = vmul.f32 0.2, %v580_v55  ;;  %v645_v37 = vmul.f32 0.2, %v581_v47  ;;  %vm612_vm7 = vcmp.ge.f32.partialorder %v580_v55, 0.0  ;;  %vm613_vm8 = vcmp.ge.f32.partialorder %v581_v47, 0.0 }
  0xb6   : > { %1383 = vmatmul.bf16.gmra.mxu0 %v3834_v57  ;;  %v3839_v14 = vpop.f32.mrf.mxu1  ;;  %1641 = vmatmul.bf16.gmra.mxu2 %v3834_v57  ;;  %v1038_v9 = vor.u32 %v1037_v4, %v4741_v24  ;;  %v1039_v36 = vrot.slane %v4744_v12, 1 }
  0xb7   : > { %v3851_v15 = vpop.f32.mrf.mxu3  ;;  %v676_v52 = vsel %vm612_vm7, %v580_v55, %v644_v45  ;;  %v677_v17 = vsel %vm613_vm8, %v581_v47, %v645_v37  ;;  %v999_v55 = vsel %vm3691_vm10, 0, %v894_v28  ;;  %v3157_v45 = vld [vmem:[%s3430_s19 + $0x78] sm:$0xff]   ;;  %v3315_v28 = vld [vmem:[%s4725_s3] ss:$0 sm:$0xff] }
  0xb8   : > { %v750_v46 = vpack.c.bf16 %v676_v52, %v676_v52  ;;  %v751_v59 = vpack.c.bf16 %v677_v17, %v677_v17  ;;  %v3971_v37 = vsel %vm1122_vm3, %v999_v55, %v1099_v30  ;;  %v3141_v52 = vunpack.c.l.bf16 %v3157_v45 }
  0xb9   : > { %2777 = vmatmul.msk.bf16.gmra.mxu1 %vm1122_vm3, %v3844_v0  ;;  %v3142_v17 = vunpack.c.h.bf16 %v3157_v45  ;;  %v3982_v4 = vsel %vm3454_vm2, %v1038_v9, 0 }
  0xba   : > { %v822_v18 = vunpack.c.l.b16 %v750_v46  ;;  %v547_v46 = vmul.f32 %v3315_v28, %v3141_v52  ;;  %4783 = vst [vmem:[#allocation9_spill] sm:$0xff] %v3982_v4  ;;  %v898_v52 = vrot.slane %v896_v31, 7 }
  0xbb   : > { %1120 = vrot.lane.b32.xlu2 %v3416_v6, %s3343_s12  ;;  %v823_v6 = vunpack.c.l.b16 %v751_v59  ;;  %v548_v59 = vmul.f32 %v3315_v28, %v3142_v17 }
  0xbc   : > { %2842 = vmatmul.msk.bf16.gmra.mxu3 %vm1122_vm3, %v3844_v0  ;;  %v1105_v42 = vpop.permute.xlu0 %1104 }
  0xbd   : > { %v3963_v33 = vpack.c.b16 %v823_v6, %v822_v18  ;;  %v3316_v6 = vld [vmem:[%s4726_s4] ss:$0 sm:$0xff] }
  0xbe   : > { %v3862_v23 = vpop.f32.mrf.mxu1  ;;  %v582_v55 = vadd.f32 %v3316_v6, %v547_v46  ;;  %v583_v30 = vadd.f32 %v3316_v6, %v548_v59  ;;  %v901_v46 = vor.u32 %v899_v16, %v898_v52  ;;  %v1101_v16 = vpop.permute.xlu1 %1100  ;;  %v3064_v52 = vld [vmem:[%s4727_s5 + $0x108] sm:$0xff] }
  0xbf   : > { %v3869_v27 = vpop.f32.mrf.mxu3  ;;  %1116 = vrot.lane.b32.xlu0 %v3963_v33, %s3343_s12  ;;  %2301 = vmatpush.bf16.msrb.mxu2 %v3064_v52 }
  0xc0   : > { %v646_v17 = vmul.f32 0.2, %v582_v55  ;;  %v647_v28 = vmul.f32 0.2, %v583_v30  ;;  %vm614_vm9 = vcmp.ge.f32.partialorder %v582_v55, 0.0  ;;  %vm615_vm11 = vcmp.ge.f32.partialorder %v583_v30, 0.0 }
  0xc1   : > { %v1000_v5 = vsel %vm3691_vm10, 0, %v901_v46 }
  0xc2   : > { %v678_v9 = vsel %vm614_vm9, %v582_v55, %v646_v17  ;;  %v679_v24 = vsel %vm615_vm11, %v583_v30, %v647_v28  ;;  %v3076_v55 = vld [vmem:[%s4727_s5 + $0x168] sm:$0xff] }
  0xc3   : > { %v752_v59 = vpack.c.bf16 %v678_v9, %v678_v9  ;;  %v753_v6 = vpack.c.bf16 %v679_v24, %v679_v24  ;;  %2051 = vmatpush.bf16.msrb.mxu3 %v3076_v55  ;;  %v1040_v9 = vor.u32 %v1039_v36, %v4745_v38  ;;  %v4785_v36 = vshrl.u32 %v3664_v53, 16  ;;  %v3068_v38 = vld [vmem:[%s4727_s5 + $0x128] sm:$0xff] }
  0xc5   : > { %v824_v30 = vunpack.c.l.b16 %v752_v59  ;;  %v825_v17 = vunpack.c.l.b16 %v753_v6  ;;  %v4020_v59 = vsel %vm1122_vm3, %v1000_v5, %v1101_v16  ;;  %v4026_v46 = vsel %vm3454_vm2, %v1040_v9, 0  ;;  %v3069_v9 = vld [vmem:[%s4727_s5 + $0x130] sm:$0xff] }
  0xc6   : > { %1388 = vmatmul.bf16.gmra.mxu0 %v3879_v60  ;;  %v3884_v7 = vpop.f32.mrf.mxu1  ;;  %1646 = vmatmul.bf16.gmra.mxu2 %v3879_v60  ;;  %4784 = vst [vmem:[#allocation10_spill] sm:$0xff] %v4026_v46  ;;  %v4746_v5 = vshll.u32 %v3963_v33, 16  ;;  %v4786_v16 = vshll.u32 %v3664_v53, 16 }
  0xc7   : > { %v3893_v25 = vpop.f32.mrf.mxu3  ;;  %v4013_v28 = vpack.c.b16 %v825_v17, %v824_v30  ;;  %v905_v30 = vrot.slane %v4785_v36, 7  ;;  %v3070_v17 = vld [vmem:[%s4727_s5 + $0x138] sm:$0xff] }
  0xc8   : > { %1960 = vmatpush.bf16.msrb.mxu1 %v3070_v17  ;;  %v1041_v12 = vrot.slane %v4746_v5, 1  ;;  %v3075_v17 = vld [vmem:[%s4727_s5 + $0x160] sm:$0xff]  ;;  %v4787_v5 = vshrl.u32 %v3963_v33, 16 }
  0xc9   : > { %2778 = vmatmul.msk.bf16.gmra.mxu1 %vm1122_vm3, %v3889_v62  ;;  %1118 = vrot.lane.b32.xlu1 %v4013_v28, %s3343_s12  ;;  %v908_v52 = vor.u32 %v4786_v16, %v905_v30  ;;  %v1103_v30 = vpop.permute.xlu2 %1102 }
  0xca   : > { %2052 = vmatpush.bf16.msrb.mxu3 %v3075_v17  ;;  %v3067_v17 = vld [vmem:[%s4727_s5 + $0x120] sm:$0xff] }
  0xcb   : > { %v1001_v53 = vsel %vm3691_vm10, 0, %v908_v52  ;;  %v3058_v52 = vld [vmem:[%s4727_s5 + $0xd8] sm:$0xff] }
  0xcc   : > { %2843 = vmatmul.msk.bf16.gmra.mxu3 %vm1122_vm3, %v3889_v62  ;;  %1961 = vmatpush.bf16.msrb.mxu1 %v3069_v9  ;;  %v1042_v9 = vor.u32 %v1041_v12, %v4787_v5  ;;  %v4790_v5 = vshrl.u32 %v3702_v39, 16 }
  0xcd   : > { %2210 = vmatpush.bf16.msrb.mxu0 %v3058_v52  ;;  %v4764_v52 = vshll.u32 %v4013_v28, 16 }
  0xce   : > { %v3904_v58 = vpop.f32.mrf.mxu1  ;;  %v4077_v12 = vsel %vm3454_vm2, %v1042_v9, 0  ;;  %v4765_v9 = vshrl.u32 %v4013_v28, 16 }
  0xcf   : > { %v3914_v32 = vpop.f32.mrf.mxu3  ;;  %4789 = vst [vmem:[#allocation12_spill] sm:$0xff] %v4077_v12 }
  0xd0   : > { %1962 = vmatpush.bf16.msrb.mxu1 %v3068_v38 }
  0xd4   : > { %1963 = vmatpush.bf16.msrb.mxu1 %v3067_v17  ;;  %v1043_v17 = vrot.slane %v4764_v52, 1 }
  0xd6   : > { %1393 = vmatmul.bf16.gmra.mxu0 %v3924_v50  ;;  %v3929_v13 = vpop.f32.mrf.mxu1  ;;  %1651 = vmatmul.bf16.gmra.mxu2 %v3924_v50  ;;  %v1044_v49 = vor.u32 %v1043_v17, %v4765_v9 }
  0xd7   : > { %v3941_v35 = vpop.f32.mrf.mxu3 }
  0xd9   : > { %2779 = vmatmul.msk.bf16.gmra.mxu1 %vm1122_vm3, %v3934_v61 }
  0xdc   : > { %2844 = vmatmul.msk.bf16.gmra.mxu3 %vm1122_vm3, %v3934_v61  ;;  %v4791_v61 = vshll.u32 %v3702_v39, 16 }
  0xde   : > { %v3954_v20 = vpop.f32.mrf.mxu1 }
  0xdf   : > { %v3961_v47 = vpop.f32.mrf.mxu3 }
  0xe6   : > { %1398 = vmatmul.bf16.gmra.mxu0 %v3971_v37  ;;  %v3977_v18 = vpop.f32.mrf.mxu1  ;;  %1656 = vmatmul.bf16.gmra.mxu2 %v3971_v37 }
  0xe7   : > { %v3987_v45 = vpop.f32.mrf.mxu3 }
  0xe9   : > { %2780 = vmatmul.msk.bf16.gmra.mxu1 %vm1122_vm3, %v3982_v4 }
  0xec   : > { %2845 = vmatmul.msk.bf16.gmra.mxu3 %vm1122_vm3, %v3982_v4 }
  0xee   : > { %v3998_v31 = vpop.f32.mrf.mxu1 }
  0xef   : > { %v4008_v24 = vpop.f32.mrf.mxu3 }
  0xf6   : > { %1403 = vmatmul.bf16.gmra.mxu0 %v4020_v59  ;;  %1661 = vmatmul.bf16.gmra.mxu2 %v4020_v59  ;;  %v4028_v6 = vpop.f32.mrf.mxu1 }
  0xf7   : > { %v4030_v55 = vpop.f32.mrf.mxu3 }
  0xf9   : > { %2781 = vmatmul.msk.bf16.gmra.mxu1 %vm1122_vm3, %v4026_v46 }
  0xfc   : > { %2846 = vmatmul.msk.bf16.gmra.mxu3 %vm1122_vm3, %v4026_v46  ;;  %v4065_v46 = vsel %vm1122_vm3, %v1001_v53, %v1103_v30  ;;  %v912_v53 = vrot.slane %v4790_v5, 7 }
  0xfd   : > { %4788 = vst [vmem:[#allocation11_spill] sm:$0xff] %v4065_v46 }
  0xfe   : > { %v4060_v36 = vpop.f32.mrf.mxu1  ;;  %v915_v62 = vor.u32 %v4791_v61, %v912_v53 }
  0xff   : > { %v4055_v16 = vpop.f32.mrf.mxu3 }
 0x100   : > { %v1002_v0 = vsel %vm3691_vm10, 0, %v915_v62  ;;  %v4110_v62 = vld [vmem:[%s4728_s6] ss:$0 sm:$0xff] }
 0x101   : > { %v4100_v39 = vsel %vm1122_vm3, %v1002_v0, %v1105_v42  ;;  %v4116_v42 = vsel %vm3454_vm2, %v1044_v49, 0  ;;  %vm2480_vm2 = vcmask 48128  }
 0x102   : > { %4792 = vst [vmem:[#allocation13_spill] sm:$0xff] %v4100_v39 }
 0x103   : > { %4793 = vst [vmem:[#allocation14_spill] sm:$0xff] %v4116_v42 }
 0x106   : > { %1408 = vmatmul.bf16.gmra.mxu0 %v4065_v46  ;;  %1666 = vmatmul.bf16.gmra.mxu2 %v4065_v46  ;;  %v4086_v4 = vpop.f32.mrf.mxu1 }
 0x107   : > { %v4083_v30 = vpop.f32.mrf.mxu3 }
 0x108   : > { %v1627_v38 = vpop.f32.mrf.mxu2 }
 0x109   : > { %2782 = vmatmul.msk.bf16.gmra.mxu1 %vm1122_vm3, %v4077_v12 }
 0x10c   : > { %2847 = vmatmul.msk.bf16.gmra.mxu3 %vm1122_vm3, %v4077_v12 }
 0x10e   : > { %v4105_v12 = vpop.f32.mrf.mxu1 }
 0x10f   : > { %v4102_v61 = vpop.f32.mrf.mxu3 }
 0x110   : > { %v1629_v5 = vpop.f32.mrf.mxu2 }
 0x113   : > { %v1374_v46 = vpop.f32.mrf.mxu0 }
 0x114   : > { %v1464_v53 = vadd.f32 %v3788_v44, %v1374_v46  ;;  %v4794_v44 = vshrl.u32 %v3734_v29, 16 }
 0x116   : > { %v1628_v52 = vadd.f32 %v1627_v38, %v1464_v53  ;;  %1413 = vmatmul.bf16.gmra.mxu0 %v4100_v39  ;;  %1671 = vmatmul.bf16.gmra.mxu2 %v4100_v39  ;;  %v919_v46 = vrot.slane %v4794_v44, 7  ;;  %v4795_v39 = vshll.u32 %v3734_v29, 16 }
 0x117   : > { %v4128_v49 = vpop.f32.mrf.mxu3 }
 0x118   : > { %v1717_v0 = vadd.f32 %v3773_v34, %v1628_v52  ;;  %v922_v26 = vor.u32 %v4795_v39, %v919_v46  ;;  %v4132_v52 = vpop.f32.mrf.mxu1  ;;  %v1107_v39 = vpop.permute.xlu1 %1106 }
 0x119   : > { %2783 = vmatmul.msk.bf16.gmra.mxu1 %vm1122_vm3, %v4116_v42  ;;  %v1632_v38 = vpop.f32.mrf.mxu2  ;;  %v1109_v42 = vpop.permute.xlu2 %1108 }
 0x11a   : > { %v1799_v17 = vadd.f32 %v4110_v62, %v1717_v0  ;;  %v1003_v29 = vsel %vm3691_vm10, 0, %v922_v26 }
 0x11b   : > { %v1376_v53 = vpop.f32.mrf.mxu0 }
 0x11c   : > { %3187 = vtanh.f32 %v1799_v17  ;;  %v1466_v9 = vadd.f32 %v3808_v51, %v1376_v53  ;;  %2944 = vmatmul.msk.bf16.vlgmr.msrb.gmra.mxu3 %vm1122_vm3, %v3526_v40  ;;  %v3057_v17 = vld [vmem:[%s4727_s5 + $0xd0] sm:$0xff] }
 0x11d   : > { %2211 = vmatpush.bf16.msrb.mxu0 %v3057_v17 }
 0x11e   : > { %v1630_v34 = vadd.f32 %v1629_v5, %v1466_v9  ;;  %v4146_v5 = vsel %vm1122_vm3, %v1003_v29, %v1107_v39 }
 0x11f   : > { %4796 = vst [vmem:[#allocation15_spill] sm:$0xff] %v4146_v5  ;;  %v4154_v26 = vpop.f32.mrf.mxu3 }
 0x120   : > { %v1719_v51 = vadd.f32 %v3797_v56, %v1630_v34  ;;  %v4159_v39 = vpop.f32.mrf.mxu1 }
 0x121   : > { %v1634_v0 = vpop.f32.mrf.mxu2 }
 0x122   : > { %v3188_v44 = vpop.eup %3187  ;;  %v1800_v46 = vadd.f32 %v4110_v62, %v1719_v51  ;;  %v4797_v51 = vshrl.u32 %v3775_v63, 16 }
 0x123   : > { %2481 = vst.msk [vmem:[%s4137_s9] sm:$0xff] %vm2480_vm2, %v3188_v44  ;;  %v1379_v9 = vpop.f32.mrf.mxu0 }
 0x124   : > { %3189 = vtanh.f32 %v1800_v46  ;;  %v1469_v56 = vadd.f32 %v3839_v14, %v1379_v9  ;;  %v926_v29 = vrot.slane %v4797_v51, 7 }
 0x126   : > { %v1633_v53 = vadd.f32 %v1632_v38, %v1469_v56  ;;  %1418 = vmatmul.bf16.gmra.mxu0 %v4146_v5  ;;  %1676 = vmatmul.bf16.gmra.mxu2 %v4146_v5 }
 0x128   : > { %v1722_v34 = vadd.f32 %v3824_v11, %v1633_v53  ;;  %v4798_v11 = vshll.u32 %v3775_v63, 16  ;;  %v4178_v63 = vpop.f32.mrf.mxu1 }
 0x129   : > { %v1637_v44 = vpop.f32.mrf.mxu2  ;;  %1964 = vmatmul.bf16.vlgmr.msrb.gmra.mxu1 %v3783_v1 }
 0x12a   : > { %v3190_v46 = vpop.eup %3189  ;;  %v1801_v14 = vadd.f32 %v4110_v62, %v1722_v34  ;;  %v929_v17 = vor.u32 %v4798_v11, %v926_v29  ;;  %v4173_v34 = vpop.f32.mrf.mxu3 }
 0x12b   : > { %2482 = vst.msk [vmem:[%s4137_s9 + $0x8] sm:$0xff] %vm2480_vm2, %v3190_v46  ;;  %v1381_v38 = vpop.f32.mrf.mxu0 }
 0x12c   : > { %3191 = vtanh.f32 %v1801_v14  ;;  %v1471_v9 = vadd.f32 %v3862_v23, %v1381_v38  ;;  %2945 = vmatmul.msk.bf16.gmra.mxu3 %vm1122_vm3, %v3552_v2  ;;  %v1004_v51 = vsel %vm3691_vm10, 0, %v929_v17 }
 0x12e   : > { %v1635_v56 = vadd.f32 %v1634_v0, %v1471_v9  ;;  %v4181_v0 = vsel %vm1122_vm3, %v1004_v51, %v1109_v42  ;;  %v4799_v9 = vshrl.u32 %v3826_v43, 16 }
 0x130   : > { %v1724_v53 = vadd.f32 %v3851_v15, %v1635_v56  ;;  %v933_v11 = vrot.slane %v4799_v9, 7 }
 0x131   : > { %v1639_v46 = vpop.f32.mrf.mxu2 }
 0x132   : > { %v3192_v5 = vpop.eup %3191  ;;  %v1802_v14 = vadd.f32 %v4110_v62, %v1724_v53  ;;  %v4193_v56 = vpop.f32.mrf.mxu3  ;;  %v4800_v53 = vshll.u32 %v3826_v43, 16 }
 0x133   : > { %2485 = vst.msk [vmem:[%s4137_s9 + $0x20] sm:$0xff] %vm2480_vm2, %v3192_v5  ;;  %v1384_v23 = vpop.f32.mrf.mxu0 }
 0x134   : > { %3193 = vtanh.f32 %v1802_v14  ;;  %v1474_v15 = vadd.f32 %v3884_v7, %v1384_v23  ;;  %v936_v51 = vor.u32 %v4800_v53, %v933_v11  ;;  %v4201_v14 = vpop.f32.mrf.mxu1  ;;  %v4801_v53 = vshrl.u32 %v3871_v8, 16 }
 0x136   : > { %v1638_v29 = vadd.f32 %v1637_v44, %v1474_v15  ;;  %1423 = vmatmul.bf16.gmra.mxu0 %v4181_v0  ;;  %1681 = vmatmul.bf16.gmra.mxu2 %v4181_v0  ;;  %v3063_v44 = vld [vmem:[%s4727_s5 + $0x100] sm:$0xff] }
 0x137   : > { %2302 = vmatpush.bf16.msrb.mxu2 %v3063_v44 }
 0x138   : > { %v1727_v38 = vadd.f32 %v3869_v27, %v1638_v29  ;;  %v1005_v29 = vsel %vm3691_vm10, 0, %v936_v51  ;;  %v940_v51 = vrot.slane %v4801_v53, 7 }
 0x139   : > { %v1642_v5 = vpop.f32.mrf.mxu2  ;;  %1969 = vmatmul.bf16.gmra.mxu1 %v3834_v57 }
 0x13a   : > { %v3194_v17 = vpop.eup %3193  ;;  %v1803_v42 = vadd.f32 %v4110_v62, %v1727_v38  ;;  %v1111_v38 = vpop.permute.xlu0 %1110 }
 0x13b   : > { %2486 = vst.msk [vmem:[%s4137_s9 + $0x28] sm:$0xff] %vm2480_vm2, %v3194_v17  ;;  %v1386_v7 = vpop.f32.mrf.mxu0  ;;  %v4212_v11 = vsel %vm1122_vm3, %v1005_v29, %v1111_v38  ;;  %v4802_v38 = vshll.u32 %v3871_v8, 16 }
 0x13c   : > { %3195 = vtanh.f32 %v1803_v42  ;;  %v1476_v27 = vadd.f32 %v3904_v58, %v1386_v7  ;;  %2946 = vmatmul.msk.bf16.gmra.mxu3 %vm1122_vm3, %v3590_v41  ;;  %v4218_v42 = vpop.f32.mrf.mxu3  ;;  %v4222_v44 = vpop.f32.mrf.mxu1 }
 0x13e   : > { %v1640_v23 = vadd.f32 %v1639_v46, %v1476_v27  ;;  %v3056_v46 = vld [vmem:[%s4727_s5 + $0xc8] sm:$0xff] }
 0x13f   : > { %2212 = vmatpush.bf16.msrb.mxu0 %v3056_v46 }
 0x140   : > { %v1729_v15 = vadd.f32 %v3893_v25, %v1640_v23 }
 0x141   : > { %v1644_v9 = vpop.f32.mrf.mxu2 }
 0x142   : > { %v3196_v17 = vpop.eup %3195  ;;  %v1804_v58 = vadd.f32 %v4110_v62, %v1729_v15 }
 0x143   : > { %2489 = vst.msk [vmem:[%s4137_s9 + $0x40] sm:$0xff] %vm2480_vm2, %v3196_v17  ;;  %v1389_v43 = vpop.f32.mrf.mxu0  ;;  %v943_v17 = vor.u32 %v4802_v38, %v940_v51 }
 0x144   : > { %3197 = vtanh.f32 %v1804_v58  ;;  %v1479_v25 = vadd.f32 %v3929_v13, %v1389_v43  ;;  %v4236_v58 = vpop.f32.mrf.mxu3 }
 0x145   : > { %v1006_v46 = vsel %vm3691_vm10, 0, %v943_v17 }
 0x146   : > { %v1643_v7 = vadd.f32 %v1642_v5, %v1479_v25  ;;  %1428 = vmatmul.bf16.gmra.mxu0 %v4212_v11  ;;  %1686 = vmatmul.bf16.gmra.mxu2 %v4212_v11  ;;  %v1113_v25 = vpop.permute.xlu1 %1112 }
 0x148   : > { %v1732_v27 = vadd.f32 %v3914_v32, %v1643_v7  ;;  %v4241_v7 = vpop.f32.mrf.mxu1 }
 0x149   : > { %v1647_v23 = vpop.f32.mrf.mxu2  ;;  %1974 = vmatmul.bf16.gmra.mxu1 %v3879_v60 }
 0x14a   : > { %v3198_v15 = vpop.eup %3197  ;;  %v1805_v13 = vadd.f32 %v4110_v62, %v1732_v27 }
 0x14b   : > { %2490 = vst.msk [vmem:[%s4137_s9 + $0x48] sm:$0xff] %vm2480_vm2, %v3198_v15  ;;  %v1391_v5 = vpop.f32.mrf.mxu0 }
 0x14c   : > { %3199 = vtanh.f32 %v1805_v13  ;;  %v1481_v29 = vadd.f32 %v3954_v20, %v1391_v5  ;;  %2947 = vmatmul.msk.bf16.gmra.mxu3 %vm1122_vm3, %v3634_v21  ;;  %v4803_v13 = vshrl.u32 %v3916_v22, 16 }
 0x14e   : > { %v1645_v32 = vadd.f32 %v1644_v9, %v1481_v29  ;;  %v4247_v9 = vsel %vm1122_vm3, %v1006_v46, %v1113_v25  ;;  %v947_v5 = vrot.slane %v4803_v13, 7  ;;  %v4255_v29 = vpop.f32.mrf.mxu3 }
 0x150   : > { %v1734_v43 = vadd.f32 %v3941_v35, %v1645_v32 }
 0x151   : > { %v1649_v27 = vpop.f32.mrf.mxu2 }
 0x152   : > { %v3200_v53 = vpop.eup %3199  ;;  %v1806_v20 = vadd.f32 %v4110_v62, %v1734_v43  ;;  %v4804_v43 = vshll.u32 %v3916_v22, 16 }
 0x153   : > { %2493 = vst.msk [vmem:[%s4137_s9 + $0x60] sm:$0xff] %vm2480_vm2, %v3200_v53  ;;  %v1394_v8 = vpop.f32.mrf.mxu0 }
 0x154   : > { %3201 = vtanh.f32 %v1806_v20  ;;  %v1484_v35 = vadd.f32 %v3977_v18, %v1394_v8  ;;  %v4259_v18 = vpop.f32.mrf.mxu1  ;;  %v950_v46 = vor.u32 %v4804_v43, %v947_v5  ;;  %v1115_v8 = vpop.permute.xlu2 %1114 }
 0x156   : > { %v1648_v51 = vadd.f32 %v1647_v23, %v1484_v35  ;;  %1433 = vmatmul.bf16.gmra.mxu0 %v4247_v9  ;;  %1691 = vmatmul.bf16.gmra.mxu2 %v4247_v9  ;;  %v1007_v20 = vsel %vm3691_vm10, 0, %v950_v46 }
 0x157   : > { %v4277_v13 = vsel %vm1122_vm3, %v1007_v20, %v1115_v8 }
 0x158   : > { %v1737_v15 = vadd.f32 %v3961_v47, %v1648_v51 }
 0x159   : > { %v1652_v38 = vpop.f32.mrf.mxu2  ;;  %1979 = vmatmul.bf16.gmra.mxu1 %v3924_v50 }
 0x15a   : > { %v3202_v17 = vpop.eup %3201  ;;  %v1807_v32 = vadd.f32 %v4110_v62, %v1737_v15 }
 0x15b   : > { %2494 = vst.msk [vmem:[%s4137_s9 + $0x68] sm:$0xff] %vm2480_vm2, %v3202_v17  ;;  %v1396_v23 = vpop.f32.mrf.mxu0 }
 0x15c   : > { %3203 = vtanh.f32 %v1807_v32  ;;  %v1486_v47 = vadd.f32 %v3998_v31, %v1396_v23  ;;  %2948 = vmatmul.msk.bf16.gmra.mxu3 %vm1122_vm3, %v3675_v3  ;;  %v4274_v31 = vpop.f32.mrf.mxu3  ;;  %v4283_v5 = vpop.f32.mrf.mxu1  ;;  %v4805_v23 = vshrl.u32 %v3963_v33, 16 }
 0x15e   : > { %v1650_v25 = vadd.f32 %v1649_v27, %v1486_v47  ;;  %v954_v47 = vrot.slane %v4805_v23, 7 }
 0x160   : > { %v1739_v53 = vadd.f32 %v3987_v45, %v1650_v25  ;;  %v3055_v45 = vld [vmem:[%s4727_s5 + $0xc0] sm:$0xff] }
 0x161   : > { %v1654_v35 = vpop.f32.mrf.mxu2  ;;  %2213 = vmatpush.bf16.msrb.mxu0 %v3055_v45  ;;  %v1117_v45 = vpop.permute.xlu0 %1116 }
 0x162   : > { %v3204_v51 = vpop.eup %3203  ;;  %v1808_v15 = vadd.f32 %v4110_v62, %v1739_v53  ;;  %v4806_v53 = vshll.u32 %v3963_v33, 16 }
 0x163   : > { %2497 = vst.msk [vmem:[%s4137_s9 + $0x80] sm:$0xff] %vm2480_vm2, %v3204_v51  ;;  %v1399_v22 = vpop.f32.mrf.mxu0 }
 0x164   : > { %3205 = vtanh.f32 %v1808_v15  ;;  %v1489_v27 = vadd.f32 %v4028_v6, %v1399_v22  ;;  %v957_v20 = vor.u32 %v4806_v53, %v954_v47  ;;  %v4301_v51 = vpop.f32.mrf.mxu1 }
 0x166   : > { %v1653_v17 = vadd.f32 %v1652_v38, %v1489_v27  ;;  %1438 = vmatmul.bf16.gmra.mxu0 %v4277_v13  ;;  %1696 = vmatmul.bf16.gmra.mxu2 %v4277_v13  ;;  %v1008_v22 = vsel %vm3691_vm10, 0, %v957_v20 }
 0x168   : > { %v1742_v32 = vadd.f32 %v4008_v24, %v1653_v17  ;;  %v4297_v24 = vpop.f32.mrf.mxu3 }
 0x169   : > { %v1657_v43 = vpop.f32.mrf.mxu2  ;;  %1984 = vmatmul.bf16.gmra.mxu1 %v3971_v37 }
 0x16a   : > { %v3206_v46 = vpop.eup %3205  ;;  %v1809_v25 = vadd.f32 %v4110_v62, %v1742_v32  ;;  %v4310_v32 = vsel %vm1122_vm3, %v1008_v22, %v1117_v45  ;;  %v1119_v45 = vpop.permute.xlu1 %1118 }
 0x16b   : > { %2498 = vst.msk [vmem:[%s4137_s9 + $0x88] sm:$0xff] %vm2480_vm2, %v3206_v46  ;;  %v1401_v6 = vpop.f32.mrf.mxu0  ;;  %v4807_v46 = vshrl.u32 %v4013_v28, 16 }
 0x16c   : > { %3207 = vtanh.f32 %v1809_v25  ;;  %v1491_v38 = vadd.f32 %v4060_v36, %v1401_v6  ;;  %2949 = vmatmul.msk.bf16.gmra.mxu3 %vm1122_vm3, %v3715_v54  ;;  %v4320_v6 = vpop.f32.mrf.mxu1 }
 0x16d   : > { %v961_v25 = vrot.slane %v4807_v46, 7 }
 0x16e   : > { %v1655_v8 = vadd.f32 %v1654_v35, %v1491_v38 }
 0x170   : > { %v1744_v15 = vadd.f32 %v4030_v55, %v1655_v8  ;;  %v4315_v55 = vpop.f32.mrf.mxu3 }
 0x171   : > { %v1659_v27 = vpop.f32.mrf.mxu2 }
 0x172   : > { %v3208_v17 = vpop.eup %3207  ;;  %v1810_v36 = vadd.f32 %v4110_v62, %v1744_v15 }
 0x173   : > { %2501 = vst.msk [vmem:[%s4137_s9 + $0xa0] sm:$0xff] %vm2480_vm2, %v3208_v17  ;;  %v1404_v33 = vpop.f32.mrf.mxu0 }
 0x174   : > { %3209 = vtanh.f32 %v1810_v36  ;;  %v1494_v35 = vadd.f32 %v4086_v4, %v1404_v33 }
 0x176   : > { %v1658_v23 = vadd.f32 %v1657_v43, %v1494_v35  ;;  %1443 = vmatmul.bf16.gmra.mxu0 %v4310_v32  ;;  %1701 = vmatmul.bf16.gmra.mxu2 %v4310_v32 }
 0x178   : > { %v1747_v47 = vadd.f32 %v4055_v16, %v1658_v23  ;;  %v4808_v16 = vshll.u32 %v4013_v28, 16  ;;  %v4334_v36 = vpop.f32.mrf.mxu3 }
 0x179   : > { %v1662_v38 = vpop.f32.mrf.mxu2  ;;  %1989 = vmatmul.bf16.gmra.mxu1 %v4020_v59 }
 0x17a   : > { %v3210_v53 = vpop.eup %3209  ;;  %v1811_v4 = vadd.f32 %v4110_v62, %v1747_v47  ;;  %v964_v8 = vor.u32 %v4808_v16, %v961_v25  ;;  %v4809_v25 = vld [vmem:[#allocation11_spill] sm:$0xff] }
 0x17b   : > { %2502 = vst.msk [vmem:[%s4137_s9 + $0xa8] sm:$0xff] %vm2480_vm2, %v3210_v53  ;;  %v1406_v43 = vpop.f32.mrf.mxu0 }
 0x17c   : > { %3211 = vtanh.f32 %v1811_v4  ;;  %v1496_v20 = vadd.f32 %v4105_v12, %v1406_v43  ;;  %2950 = vmatmul.msk.bf16.gmra.mxu3 %vm1122_vm3, %v3752_v48  ;;  %v1009_v17 = vsel %vm3691_vm10, 0, %v964_v8  ;;  %v4337_v12 = vpop.f32.mrf.mxu1 }
 0x17e   : > { %v1660_v15 = vadd.f32 %v1659_v27, %v1496_v20  ;;  %v4342_v27 = vsel %vm1122_vm3, %v1009_v17, %v1119_v45 }
 0x180   : > { %v1749_v22 = vadd.f32 %v4083_v30, %v1660_v15  ;;  %v4351_v43 = vpop.f32.mrf.mxu3 }
 0x181   : > { %v1664_v33 = vpop.f32.mrf.mxu2 }
 0x182   : > { %v3212_v35 = vpop.eup %3211  ;;  %v1812_v23 = vadd.f32 %v4110_v62, %v1749_v22 }
 0x183   : > { %2505 = vst.msk [vmem:[%s4137_s9 + $0xc0] sm:$0xff] %vm2480_vm2, %v3212_v35  ;;  %v1409_v28 = vpop.f32.mrf.mxu0 }
 0x184   : > { %3213 = vtanh.f32 %v1812_v23  ;;  %v1499_v30 = vadd.f32 %v4132_v52, %v1409_v28  ;;  %v4356_v20 = vpop.f32.mrf.mxu1  ;;  %v4811_v23 = vld [vmem:[#allocation4_spill] sm:$0xff] }
 0x186   : > { %v1663_v10 = vadd.f32 %v1662_v38, %v1499_v30  ;;  %1448 = vmatmul.bf16.gmra.mxu0 %v4342_v27  ;;  %3008 = vmatmul.msk.bf16.vlgmr.msrb.gmra.mxu2 %vm1122_vm3, %v3503_v19  ;;  %v4810_v19 = vld [vmem:[#allocation5_spill] sm:$0xff] }
 0x187   : > { %v4812_v30 = vld [vmem:[#allocation13_spill] sm:$0xff] }
 0x188   : > { %v1752_v47 = vadd.f32 %v4102_v61, %v1663_v10 }
 0x189   : > { %v1667_v46 = vpop.f32.mrf.mxu2  ;;  %1994 = vmatmul.bf16.gmra.mxu1 %v4809_v25 }
 0x18a   : > { %v3214_v53 = vpop.eup %3213  ;;  %v1813_v4 = vadd.f32 %v4110_v62, %v1752_v47 }
 0x18b   : > { %2506 = vst.msk [vmem:[%s4137_s9 + $0xc8] sm:$0xff] %vm2480_vm2, %v3214_v53  ;;  %v1411_v52 = vpop.f32.mrf.mxu0  ;;  %v4813_v53 = vld [vmem:[#allocation6_spill] sm:$0xff] }
 0x18c   : > { %3215 = vtanh.f32 %v1813_v4  ;;  %v1501_v38 = vadd.f32 %v4159_v39, %v1411_v52  ;;  %2951 = vmatmul.msk.bf16.gmra.mxu3 %vm1122_vm3, %v4810_v19  ;;  %v4365_v39 = vpop.f32.mrf.mxu3 }
 0x18e   : > { %v1665_v61 = vadd.f32 %v1664_v33, %v1501_v38 }
 0x190   : > { %v1754_v16 = vadd.f32 %v4128_v49, %v1665_v61  ;;  %v4370_v49 = vpop.f32.mrf.mxu1 }
 0x191   : > { %v1669_v8 = vpop.f32.mrf.mxu2 }
 0x192   : > { %v3216_v15 = vpop.eup %3215  ;;  %v1814_v22 = vadd.f32 %v4110_v62, %v1754_v16 }
 0x193   : > { %2509 = vst.msk [vmem:[%s4137_s9 + $0xe0] sm:$0xff] %vm2480_vm2, %v3216_v15  ;;  %v1414_v45 = vpop.f32.mrf.mxu0 }
 0x194   : > { %3217 = vtanh.f32 %v1814_v22  ;;  %v1504_v17 = vadd.f32 %v4178_v63, %v1414_v45  ;;  %v4380_v4 = vpop.f32.mrf.mxu3 }
 0x196   : > { %v1668_v35 = vadd.f32 %v1667_v46, %v1504_v17  ;;  %2214 = vmatmul.bf16.vlgmr.msrb.gmra.mxu0 %v4811_v23  ;;  %3009 = vmatmul.msk.bf16.gmra.mxu2 %vm1122_vm3, %v3526_v40  ;;  %v4814_v17 = vld [vmem:[#allocation15_spill] sm:$0xff] }
 0x198   : > { %v1757_v33 = vadd.f32 %v4154_v26, %v1668_v35  ;;  %v4383_v52 = vpop.f32.mrf.mxu1 }
 0x199   : > { %v1672_v28 = vpop.f32.mrf.mxu2  ;;  %1999 = vmatmul.bf16.gmra.mxu1 %v4812_v30 }
 0x19a   : > { %v3218_v10 = vpop.eup %3217  ;;  %v1815_v47 = vadd.f32 %v4110_v62, %v1757_v33 }
 0x19b   : > { %2510 = vst.msk [vmem:[%s4137_s9 + $0xe8] sm:$0xff] %vm2480_vm2, %v3218_v10  ;;  %v1416_v63 = vpop.f32.mrf.mxu0 }
 0x19c   : > { %3219 = vtanh.f32 %v1815_v47  ;;  %v1506_v46 = vadd.f32 %v4201_v14, %v1416_v63  ;;  %2952 = vmatmul.msk.bf16.gmra.mxu3 %vm1122_vm3, %v4813_v53 }
 0x19e   : > { %v1670_v40 = vadd.f32 %v1669_v8, %v1506_v46  ;;  %v4393_v8 = vpop.f32.mrf.mxu3 }
 0x1a0   : > { %v1759_v26 = vadd.f32 %v4173_v34, %v1670_v40  ;;  %v4397_v33 = vpop.f32.mrf.mxu1 }
 0x1a1   : > { %v1674_v38 = vpop.f32.mrf.mxu2 }
 0x1a2   : > { %v3220_v61 = vpop.eup %3219  ;;  %v1816_v16 = vadd.f32 %v4110_v62, %v1759_v26 }
 0x1a3   : > { %2513 = vst.msk [vmem:[%s4137_s9 + $0x100] sm:$0xff] %vm2480_vm2, %v3220_v61  ;;  %v1419_v15 = vpop.f32.mrf.mxu0 }
 0x1a4   : > { %3221 = vtanh.f32 %v1816_v16  ;;  %v1509_v14 = vadd.f32 %v4222_v44, %v1419_v15 }
 0x1a6   : > { %v1673_v22 = vadd.f32 %v1672_v28, %v1509_v14  ;;  %2219 = vmatmul.bf16.gmra.mxu0 %v3783_v1  ;;  %3010 = vmatmul.msk.bf16.gmra.mxu2 %vm1122_vm3, %v3552_v2  ;;  %v4815_v2 = vld [vmem:[#allocation7_spill] sm:$0xff]  ;;  %v4406_v46 = vpop.f32.mrf.mxu3 }
 0x1a8   : > { %v1762_v34 = vadd.f32 %v4193_v56, %v1673_v22 }
 0x1a9   : > { %v1677_v45 = vpop.f32.mrf.mxu2  ;;  %2004 = vmatmul.bf16.gmra.mxu1 %v4814_v17 }
 0x1aa   : > { %v3222_v35 = vpop.eup %3221  ;;  %v1817_v23 = vadd.f32 %v4110_v62, %v1762_v34 }
 0x1ab   : > { %2514 = vst.msk [vmem:[%s4137_s9 + $0x108] sm:$0xff] %vm2480_vm2, %v3222_v35  ;;  %v1421_v44 = vpop.f32.mrf.mxu0 }
 0x1ac   : > { %3223 = vtanh.f32 %v1817_v23  ;;  %v1511_v1 = vadd.f32 %v4241_v7, %v1421_v44  ;;  %2953 = vmatmul.msk.bf16.gmra.mxu3 %vm1122_vm3, %v4815_v2  ;;  %v4411_v7 = vpop.f32.mrf.mxu1 }
 0x1ae   : > { %v1675_v56 = vadd.f32 %v1674_v38, %v1511_v1  ;;  %v4422_v22 = vpop.f32.mrf.mxu3 }
 0x1b0   : > { %v1764_v28 = vadd.f32 %v4218_v42, %v1675_v56 }
 0x1b1   : > { %v1679_v10 = vpop.f32.mrf.mxu2 }
 0x1b2   : > { %v3224_v47 = vpop.eup %3223  ;;  %v1818_v63 = vadd.f32 %v4110_v62, %v1764_v28 }
 0x1b3   : > { %2517 = vst.msk [vmem:[%s4137_s9 + $0x120] sm:$0xff] %vm2480_vm2, %v3224_v47  ;;  %v1424_v40 = vpop.f32.mrf.mxu0 }
 0x1b4   : > { %3225 = vtanh.f32 %v1818_v63  ;;  %v1514_v26 = vadd.f32 %v4259_v18, %v1424_v40 }
 0x1b6   : > { %v1678_v61 = vadd.f32 %v1677_v45, %v1514_v26  ;;  %2224 = vmatmul.bf16.gmra.mxu0 %v3834_v57  ;;  %3011 = vmatmul.msk.bf16.gmra.mxu2 %vm1122_vm3, %v3590_v41  ;;  %v4816_v57 = vld [vmem:[#allocation8_spill] sm:$0xff]  ;;  %v4436_v56 = vpop.f32.mrf.mxu3 }
 0x1b8   : > { %v1767_v42 = vadd.f32 %v4236_v58, %v1678_v61  ;;  %v4426_v58 = vpop.f32.mrf.mxu1 }
 0x1b9   : > { %v1682_v38 = vpop.f32.mrf.mxu2  ;;  %2009 = vmatmul.bf16.gmra.mxu1 %v4181_v0 }
 0x1ba   : > { %v3226_v16 = vpop.eup %3225  ;;  %v1819_v15 = vadd.f32 %v4110_v62, %v1767_v42 }
 0x1bb   : > { %2518 = vst.msk [vmem:[%s4137_s9 + $0x128] sm:$0xff] %vm2480_vm2, %v3226_v16  ;;  %v1426_v18 = vpop.f32.mrf.mxu0 }
 0x1bc   : > { %3227 = vtanh.f32 %v1819_v15  ;;  %v1516_v14 = vadd.f32 %v4283_v5, %v1426_v18  ;;  %2954 = vmatmul.msk.bf16.gmra.mxu3 %vm1122_vm3, %v4816_v57 }
 0x1be   : > { %v1680_v41 = vadd.f32 %v1679_v10, %v1516_v14  ;;  %v4449_v26 = vpop.f32.mrf.mxu3 }
 0x1c0   : > { %v1769_v34 = vadd.f32 %v4255_v29, %v1680_v41  ;;  %v4439_v28 = vpop.f32.mrf.mxu1 }
 0x1c1   : > { %v1684_v45 = vpop.f32.mrf.mxu2 }
 0x1c2   : > { %v3228_v35 = vpop.eup %3227  ;;  %v1820_v23 = vadd.f32 %v4110_v62, %v1769_v34 }
 0x1c3   : > { %2521 = vst.msk [vmem:[%s4137_s9 + $0x140] sm:$0xff] %vm2480_vm2, %v3228_v35  ;;  %v1429_v44 = vpop.f32.mrf.mxu0 }
 0x1c4   : > { %3229 = vtanh.f32 %v1820_v23  ;;  %v1519_v5 = vadd.f32 %v4301_v51, %v1429_v44 }
 0x1c6   : > { %v1683_v1 = vadd.f32 %v1682_v38, %v1519_v5  ;;  %2229 = vmatmul.bf16.gmra.mxu0 %v3879_v60  ;;  %3012 = vmatmul.msk.bf16.gmra.mxu2 %vm1122_vm3, %v3634_v21  ;;  %v4817_v21 = vld [vmem:[#allocation9_spill] sm:$0xff] }
 0x1c8   : > { %v1772_v29 = vadd.f32 %v4274_v31, %v1683_v1  ;;  %v4452_v16 = vpop.f32.mrf.mxu1 }
 0x1c9   : > { %v1687_v10 = vpop.f32.mrf.mxu2  ;;  %2014 = vmatmul.bf16.gmra.mxu1 %v4212_v11 }
 0x1ca   : > { %v3230_v47 = vpop.eup %3229  ;;  %v1821_v63 = vadd.f32 %v4110_v62, %v1772_v29 }
 0x1cb   : > { %2522 = vst.msk [vmem:[%s4137_s9 + $0x148] sm:$0xff] %vm2480_vm2, %v3230_v47  ;;  %v1431_v51 = vpop.f32.mrf.mxu0 }
 0x1cc   : > { %3231 = vtanh.f32 %v1821_v63  ;;  %v1521_v60 = vadd.f32 %v4320_v6, %v1431_v51  ;;  %2955 = vmatmul.msk.bf16.gmra.mxu3 %vm1122_vm3, %v4817_v21 }
 0x1ce   : > { %v1685_v40 = vadd.f32 %v1684_v45, %v1521_v60  ;;  %v4463_v45 = vpop.f32.mrf.mxu3 }
 0x1d0   : > { %v1774_v31 = vadd.f32 %v4297_v24, %v1685_v40  ;;  %v4468_v35 = vpop.f32.mrf.mxu1 }
 0x1d1   : > { %v1689_v61 = vpop.f32.mrf.mxu2 }
 0x1d2   : > { %v3232_v42 = vpop.eup %3231  ;;  %v1822_v38 = vadd.f32 %v4110_v62, %v1774_v31  ;;  %v4819_v31 = vld [vmem:[#allocation12_spill] sm:$0xff] }
 0x1d3   : > { %2525 = vst.msk [vmem:[%s4137_s9 + $0x160] sm:$0xff] %vm2480_vm2, %v3232_v42  ;;  %v1434_v15 = vpop.f32.mrf.mxu0 }
 0x1d4   : > { %3233 = vtanh.f32 %v1822_v38  ;;  %v1524_v6 = vadd.f32 %v4337_v12, %v1434_v15 }
 0x1d6   : > { %v1688_v18 = vadd.f32 %v1687_v10, %v1524_v6  ;;  %2234 = vmatmul.bf16.gmra.mxu0 %v3924_v50  ;;  %3013 = vmatmul.msk.bf16.gmra.mxu2 %vm1122_vm3, %v3675_v3  ;;  %v4818_v3 = vld [vmem:[#allocation10_spill] sm:$0xff] }
 0x1d8   : > { %v1777_v24 = vadd.f32 %v4315_v55, %v1688_v18 }
 0x1d9   : > { %v1692_v14 = vpop.f32.mrf.mxu2  ;;  %2019 = vmatmul.bf16.gmra.mxu1 %v4247_v9 }
 0x1da   : > { %v3234_v41 = vpop.eup %3233  ;;  %v1823_v34 = vadd.f32 %v4110_v62, %v1777_v24 }
 0x1db   : > { %2526 = vst.msk [vmem:[%s4137_s9 + $0x168] sm:$0xff] %vm2480_vm2, %v3234_v41  ;;  %v1436_v12 = vpop.f32.mrf.mxu0 }
 0x1dc   : > { %3235 = vtanh.f32 %v1823_v34  ;;  %v1526_v50 = vadd.f32 %v4356_v20, %v1436_v12  ;;  %2956 = vmatmul.msk.bf16.gmra.mxu3 %vm1122_vm3, %v4818_v3  ;;  %v4477_v20 = vpop.f32.mrf.mxu3 }
 0x1de   : > { %v1690_v55 = vadd.f32 %v1689_v61, %v1526_v50 }
 0x1e0   : > { %v1779_v23 = vadd.f32 %v4334_v36, %v1690_v55  ;;  %v4482_v36 = vpop.f32.mrf.mxu1 }
 0x1e1   : > { %v1694_v44 = vpop.f32.mrf.mxu2 }
 0x1e2   : > { %v3236_v5 = vpop.eup %3235  ;;  %v1824_v1 = vadd.f32 %v4110_v62, %v1779_v23 }
 0x1e3   : > { %2529 = vst.msk [vmem:[%s4137_s9 + $0x180] sm:$0xff] %vm2480_vm2, %v3236_v5  ;;  %v1439_v29 = vpop.f32.mrf.mxu0 }
 0x1e4   : > { %3237 = vtanh.f32 %v1824_v1  ;;  %v1529_v10 = vadd.f32 %v4370_v49, %v1439_v29  ;;  %v4492_v61 = vpop.f32.mrf.mxu3 }
 0x1e6   : > { %v1693_v47 = vadd.f32 %v1692_v14, %v1529_v10  ;;  %2239 = vmatmul.bf16.gmra.mxu0 %v3971_v37  ;;  %3014 = vmatmul.msk.bf16.gmra.mxu2 %vm1122_vm3, %v3715_v54 }
 0x1e8   : > { %v1782_v63 = vadd.f32 %v4351_v43, %v1693_v47  ;;  %v4495_v42 = vpop.f32.mrf.mxu1 }
 0x1e9   : > { %v1697_v51 = vpop.f32.mrf.mxu2  ;;  %2024 = vmatmul.bf16.gmra.mxu1 %v4277_v13 }
 0x1ea   : > { %v3238_v60 = vpop.eup %3237  ;;  %v1825_v40 = vadd.f32 %v4110_v62, %v1782_v63 }
 0x1eb   : > { %2530 = vst.msk [vmem:[%s4137_s9 + $0x188] sm:$0xff] %vm2480_vm2, %v3238_v60  ;;  %v1441_v49 = vpop.f32.mrf.mxu0 }
 0x1ec   : > { %3239 = vtanh.f32 %v1825_v40  ;;  %v1531_v37 = vadd.f32 %v4383_v52, %v1441_v49  ;;  %2957 = vmatmul.msk.bf16.gmra.mxu3 %vm1122_vm3, %v4819_v31  ;;  %v4505_v14 = vpop.f32.mrf.mxu3 }
 0x1ee   : > { %v1695_v54 = vadd.f32 %v1694_v44, %v1531_v37 }
 0x1f0   : > { %v1784_v43 = vadd.f32 %v4365_v39, %v1695_v54  ;;  %v4509_v50 = vpop.f32.mrf.mxu1 }
 0x1f1   : > { %v1699_v38 = vpop.f32.mrf.mxu2 }
 0x1f2   : > { %v3240_v15 = vpop.eup %3239  ;;  %v1826_v6 = vadd.f32 %v4110_v62, %v1784_v43 }
 0x1f3   : > { %2533 = vst.msk [vmem:[%s4137_s9 + $0x1a0] sm:$0xff] %vm2480_vm2, %v3240_v15  ;;  %v1444_v18 = vpop.f32.mrf.mxu0 }
 0x1f4   : > { %3241 = vtanh.f32 %v1826_v6  ;;  %v1534_v52 = vadd.f32 %v4397_v33, %v1444_v18  ;;  %v4518_v1 = vpop.f32.mrf.mxu3 }
 0x1f6   : > { %v1698_v24 = vadd.f32 %v1697_v51, %v1534_v52  ;;  %2244 = vmatmul.bf16.gmra.mxu0 %v4020_v59  ;;  %3015 = vmatmul.msk.bf16.gmra.mxu2 %vm1122_vm3, %v3752_v48  ;;  %v4820_v48 = vld [vmem:[#allocation14_spill] sm:$0xff] }
 0x1f8   : > { %v1787_v39 = vadd.f32 %v4380_v4, %v1698_v24 }
 0x1f9   : > { %v1702_v41 = vpop.f32.mrf.mxu2  ;;  %2029 = vmatmul.bf16.gmra.mxu1 %v4310_v32 }
 0x1fa   : > { %v3242_v34 = vpop.eup %3241  ;;  %v1827_v12 = vadd.f32 %v4110_v62, %v1787_v39 }
 0x1fb   : > { %2534 = vst.msk [vmem:[%s4137_s9 + $0x1a8] sm:$0xff] %vm2480_vm2, %v3242_v34  ;;  %v1446_v33 = vpop.f32.mrf.mxu0 }
 0x1fc   : > { %3243 = vtanh.f32 %v1827_v12  ;;  %v1536_v59 = vadd.f32 %v4411_v7, %v1446_v33  ;;  %2958 = vmatmul.msk.bf16.gmra.mxu3 %vm1122_vm3, %v4820_v48  ;;  %v4523_v7 = vpop.f32.mrf.mxu1  ;;  %v4534_v49 = vpop.f32.mrf.mxu3  ;;  %v2060_v33 = vadd.f32 %v4463_v45, %v4482_v36  ;;  %v2062_v36 = vadd.f32 %v4477_v20, %v4495_v42 }
 0x1fe   : > { %v1700_v4 = vadd.f32 %v1699_v38, %v1536_v59  ;;  %v2055_v38 = vadd.f32 %v4436_v56, %v4452_v16  ;;  %v2057_v16 = vadd.f32 %v4449_v26, %v4468_v35 }
 0x200   : > { %v1789_v55 = vadd.f32 %v4393_v8, %v1700_v4 }
 0x201   : > { %v1704_v23 = vpop.f32.mrf.mxu2 }
 0x202   : > { %v3244_v44 = vpop.eup %3243  ;;  %v1828_v5 = vadd.f32 %v4110_v62, %v1789_v55 }
 0x203   : > { %2537 = vst.msk [vmem:[%s4137_s9 + $0x1c0] sm:$0xff] %vm2480_vm2, %v3244_v44  ;;  %v1449_v29 = vpop.f32.mrf.mxu0 }
 0x204   : > { %3245 = vtanh.f32 %v1828_v5  ;;  %v1539_v10 = vadd.f32 %v4426_v58, %v1449_v29  ;;  %v4561_v59 = vpop.f32.mrf.mxu3 }
 0x206   : > { %v1703_v47 = vadd.f32 %v1702_v41, %v1539_v10  ;;  %2249 = vmatmul.bf16.gmra.mxu0 %v4809_v25  ;;  %3016 = vmatmul.msk.bf16.gmra.mxu2 %vm1122_vm3, %v4810_v19  ;;  %v4821_v25 = vld [vmem:[#allocation2_spill] sm:$0xff] }
 0x208   : > { %v1792_v8 = vadd.f32 %v4406_v46, %v1703_v47  ;;  %v4538_v46 = vpop.f32.mrf.mxu1 }
 0x209   : > { %2034 = vmatmul.bf16.gmra.mxu1 %v4342_v27  ;;  %v2304_v63 = vpop.f32.mrf.mxu2 }
 0x20a   : > { %v3246_v51 = vpop.eup %3245  ;;  %v1829_v60 = vadd.f32 %v4110_v62, %v1792_v8 }
 0x20b   : > { %2538 = vst.msk [vmem:[%s4137_s9 + $0x1c8] sm:$0xff] %vm2480_vm2, %v3246_v51  ;;  %v1451_v58 = vpop.f32.mrf.mxu0  ;;  %v2065_v51 = vadd.f32 %v4492_v61, %v4509_v50  ;;  %v2067_v50 = vadd.f32 %v4505_v14, %v4523_v7 }
 0x20c   : > { %3247 = vtanh.f32 %v1829_v60  ;;  %v1541_v40 = vadd.f32 %v4439_v28, %v1451_v58  ;;  %2959 = vmatmul.msk.bf16.gmra.mxu3 %vm1122_vm3, %v4821_v25  ;;  %v4573_v29 = vpop.f32.mrf.mxu3 }
 0x20e   : > { %v1705_v19 = vadd.f32 %v1704_v23, %v1541_v40 }
 0x210   : > { %v1794_v37 = vadd.f32 %v4422_v22, %v1705_v19  ;;  %v4550_v52 = vpop.f32.mrf.mxu1 }
 0x211   : > { %v2306_v54 = vpop.f32.mrf.mxu2 }
 0x212   : > { %v3248_v43 = vpop.eup %3247  ;;  %v1830_v15 = vadd.f32 %v4110_v62, %v1794_v37 }
 0x213   : > { %2541 = vst.msk [vmem:[%s4137_s9 + $0x1e0] sm:$0xff] %vm2480_vm2, %v3248_v43  ;;  %v2215_v28 = vpop.f32.mrf.mxu0 }
 0x214   : > { %3249 = vtanh.f32 %v1830_v15  ;;  %v2216_v6 = vadd.f32 %v2215_v28, %v2055_v38  ;;  %v4582_v60 = vpop.f32.mrf.mxu3 }
 0x216   : > { %v2305_v18 = vadd.f32 %v2304_v63, %v2216_v6  ;;  %2254 = vmatmul.bf16.gmra.mxu0 %v4812_v30  ;;  %3017 = vmatmul.msk.bf16.gmra.mxu2 %vm1122_vm3, %v4813_v53  ;;  %v2070_v6 = vadd.f32 %v4518_v1, %v4538_v46  ;;  %v2072_v46 = vadd.f32 %v4534_v49, %v4550_v52 }
 0x218   : > { %v2384_v22 = vadd.f32 %v4110_v62, %v2305_v18  ;;  %v4563_v26 = vpop.f32.mrf.mxu1 }
 0x219   : > { %v2309_v24 = vpop.f32.mrf.mxu2 }
 0x21a   : > { %v3250_v56 = vpop.eup %3249  ;;  %3251 = vtanh.f32 %v2384_v22 }
 0x21b   : > { %2542 = vst.msk [vmem:[%s4137_s9 + $0x1e8] sm:$0xff] %vm2480_vm2, %v3250_v56  ;;  %v2217_v39 = vpop.f32.mrf.mxu0 }
 0x21c   : > { %v2218_v41 = vadd.f32 %v2217_v39, %v2057_v16  ;;  %v4594_v38 = vpop.f32.mrf.mxu3 }
 0x21e   : > { %v2307_v34 = vadd.f32 %v2306_v54, %v2218_v41 }
 0x220   : > { %v3252_v30 = vpop.eup %3251  ;;  %v2385_v12 = vadd.f32 %v4110_v62, %v2307_v34  ;;  %v4575_v47 = vpop.f32.mrf.mxu1 }
 0x221   : > { %2483 = vst.msk [vmem:[%s4137_s9 + $0x10] sm:$0xff] %vm2480_vm2, %v3252_v30  ;;  %v2311_v53 = vpop.f32.mrf.mxu2 }
 0x222   : > { %3253 = vtanh.f32 %v2385_v12  ;;  %v2075_v12 = vadd.f32 %v4561_v59, %v4563_v26  ;;  %v2077_v59 = vadd.f32 %v4573_v29, %v4575_v47  ;;  %v1121_v26 = vpop.permute.xlu2 %1120 }
 0x223   : > { %v2220_v35 = vpop.f32.mrf.mxu0 }
 0x224   : > { %v2221_v4 = vadd.f32 %v2220_v35, %v2060_v33  ;;  %v2084_v56 = vpop.f32.mrf.mxu3 }
 0x226   : > { %v2310_v55 = vadd.f32 %v2309_v24, %v2221_v4  ;;  %2259 = vmatmul.bf16.gmra.mxu0 %v4814_v17  ;;  %3018 = vmatmul.msk.bf16.gmra.mxu2 %vm1122_vm3, %v4815_v2 }
 0x228   : > { %v3254_v23 = vpop.eup %3253  ;;  %v2386_v44 = vadd.f32 %v4110_v62, %v2310_v55  ;;  %v4587_v40 = vpop.f32.mrf.mxu1 }
 0x229   : > { %2484 = vst.msk [vmem:[%s4137_s9 + $0x18] sm:$0xff] %vm2480_vm2, %v3254_v23  ;;  %v2314_v45 = vpop.f32.mrf.mxu2  ;;  %v2080_v29 = vadd.f32 %v4582_v60, %v4587_v40 }
 0x22a   : > { %3255 = vtanh.f32 %v2386_v44 }
 0x22b   : > { %v2222_v5 = vpop.f32.mrf.mxu0 }
 0x22c   : > { %v2223_v10 = vadd.f32 %v2222_v5, %v2062_v36  ;;  %v2086_v33 = vpop.f32.mrf.mxu3 }
 0x22e   : > { %v2312_v17 = vadd.f32 %v2311_v53, %v2223_v10 }
 0x230   : > { %v3256_v8 = vpop.eup %3255  ;;  %v2387_v2 = vadd.f32 %v4110_v62, %v2312_v17  ;;  %v4597_v15 = vpop.f32.mrf.mxu1 }
 0x231   : > { %2487 = vst.msk [vmem:[%s4137_s9 + $0x30] sm:$0xff] %vm2480_vm2, %v3256_v8  ;;  %v2316_v63 = vpop.f32.mrf.mxu2  ;;  %v2082_v60 = vadd.f32 %v4594_v38, %v4597_v15 }
 0x232   : > { %3257 = vtanh.f32 %v2387_v2 }
 0x233   : > { %v2225_v20 = vpop.f32.mrf.mxu0 }
 0x234   : > { %v2226_v42 = vadd.f32 %v2225_v20, %v2065_v51  ;;  %v2089_v5 = vpop.f32.mrf.mxu3 }
 0x236   : > { %v2315_v58 = vadd.f32 %v2314_v45, %v2226_v42  ;;  %2264 = vmatmul.bf16.gmra.mxu0 %v4181_v0  ;;  %3019 = vmatmul.msk.bf16.gmra.mxu2 %vm1122_vm3, %v4816_v57  ;;  %v4822_v45 = vld [vmem:[#allocation3_spill] sm:$0xff] }
 0x237   : > { %v1193_v36 = vsel %vm1122_vm3, %v4822_v45, %v1121_v26 }
 0x238   : > { %v3258_v25 = vpop.eup %3257  ;;  %v2388_v19 = vadd.f32 %v4110_v62, %v2315_v58  ;;  %2039 = vmatmul.bf16.gmra.mxu1 %v1193_v36 }
 0x239   : > { %2488 = vst.msk [vmem:[%s4137_s9 + $0x38] sm:$0xff] %vm2480_vm2, %v3258_v25  ;;  %v2319_v61 = vpop.f32.mrf.mxu2 }
 0x23a   : > { %3259 = vtanh.f32 %v2388_v19 }
 0x23b   : > { %v2227_v37 = vpop.f32.mrf.mxu0 }
 0x23c   : > { %v2228_v54 = vadd.f32 %v2227_v37, %v2067_v50  ;;  %v2091_v42 = vpop.f32.mrf.mxu3 }
 0x23e   : > { %v2317_v43 = vadd.f32 %v2316_v63, %v2228_v54 }
 0x240   : > { %v3260_v0 = vpop.eup %3259  ;;  %v2389_v57 = vadd.f32 %v4110_v62, %v2317_v43  ;;  %v4609_v62 = vld [vmem:[%s4728_s6] ss:$0 sm:$0xff] }
 0x241   : > { %2491 = vst.msk [vmem:[%s4137_s9 + $0x50] sm:$0xff] %vm2480_vm2, %v3260_v0  ;;  %v2321_v28 = vpop.f32.mrf.mxu2 }
 0x242   : > { %3261 = vtanh.f32 %v2389_v57 }
 0x243   : > { %v2230_v14 = vpop.f32.mrf.mxu0 }
 0x244   : > { %v2231_v7 = vadd.f32 %v2230_v14, %v2070_v6  ;;  %v2094_v43 = vpop.f32.mrf.mxu3 }
 0x246   : > { %v2320_v18 = vadd.f32 %v2319_v61, %v2231_v7  ;;  %2269 = vmatmul.bf16.gmra.mxu0 %v4212_v11  ;;  %3020 = vmatmul.msk.bf16.gmra.mxu2 %vm1122_vm3, %v4817_v21  ;;  %v1995_v11 = vpop.f32.mrf.mxu1 }
 0x247   : > { %v2085_v54 = vadd.f32 %v2084_v56, %v1995_v11 }
 0x248   : > { %v3262_v22 = vpop.eup %3261  ;;  %v2390_v24 = vadd.f32 %v4609_v62, %v2320_v18 }
 0x249   : > { %2492 = vst.msk [vmem:[%s4137_s9 + $0x58] sm:$0xff] %vm2480_vm2, %v3262_v22  ;;  %v2324_v1 = vpop.f32.mrf.mxu2 }
 0x24a   : > { %3263 = vtanh.f32 %v2390_v24 }
 0x24b   : > { %v2232_v16 = vpop.f32.mrf.mxu0 }
 0x24c   : > { %v2233_v39 = vadd.f32 %v2232_v16, %v2072_v46  ;;  %v2096_v22 = vpop.f32.mrf.mxu3 }
 0x24e   : > { %v2322_v21 = vadd.f32 %v2321_v28, %v2233_v39  ;;  %v1997_v52 = vpop.f32.mrf.mxu1 }
 0x24f   : > { %v2087_v7 = vadd.f32 %v2086_v33, %v1997_v52 }
 0x250   : > { %v3264_v41 = vpop.eup %3263  ;;  %v2391_v34 = vadd.f32 %v4609_v62, %v2322_v21 }
 0x251   : > { %2495 = vst.msk [vmem:[%s4137_s9 + $0x70] sm:$0xff] %vm2480_vm2, %v3264_v41  ;;  %v2326_v30 = vpop.f32.mrf.mxu2 }
 0x252   : > { %3265 = vtanh.f32 %v2391_v34 }
 0x253   : > { %v2235_v53 = vpop.f32.mrf.mxu0 }
 0x254   : > { %v2236_v49 = vadd.f32 %v2235_v53, %v2075_v12  ;;  %v2099_v21 = vpop.f32.mrf.mxu3 }
 0x256   : > { %v2325_v35 = vadd.f32 %v2324_v1, %v2236_v49  ;;  %2274 = vmatmul.bf16.gmra.mxu0 %v4247_v9  ;;  %3021 = vmatmul.msk.bf16.gmra.mxu2 %vm1122_vm3, %v4818_v3  ;;  %v2000_v10 = vpop.f32.mrf.mxu1 }
 0x257   : > { %v2090_v11 = vadd.f32 %v2089_v5, %v2000_v10 }
 0x258   : > { %v3266_v4 = vpop.eup %3265  ;;  %v2392_v55 = vadd.f32 %v4609_v62, %v2325_v35 }
 0x259   : > { %2496 = vst.msk [vmem:[%s4137_s9 + $0x78] sm:$0xff] %vm2480_vm2, %v3266_v4  ;;  %v2329_v23 = vpop.f32.mrf.mxu2 }
 0x25a   : > { %3267 = vtanh.f32 %v2392_v55 }
 0x25b   : > { %v2237_v44 = vpop.f32.mrf.mxu0 }
 0x25c   : > { %v2238_v9 = vadd.f32 %v2237_v44, %v2077_v59  ;;  %v2101_v55 = vpop.f32.mrf.mxu3 }
 0x25e   : > { %v2327_v3 = vadd.f32 %v2326_v30, %v2238_v9  ;;  %v2002_v25 = vpop.f32.mrf.mxu1 }
 0x25f   : > { %v2092_v33 = vadd.f32 %v2091_v42, %v2002_v25 }
 0x260   : > { %v3268_v17 = vpop.eup %3267  ;;  %v2393_v8 = vadd.f32 %v4609_v62, %v2327_v3 }
 0x261   : > { %2499 = vst.msk [vmem:[%s4137_s9 + $0x90] sm:$0xff] %vm2480_vm2, %v3268_v17  ;;  %v2331_v2 = vpop.f32.mrf.mxu2 }
 0x262   : > { %3269 = vtanh.f32 %v2393_v8 }
 0x263   : > { %v2240_v47 = vpop.f32.mrf.mxu0 }
 0x264   : > { %v2241_v63 = vadd.f32 %v2240_v47, %v2080_v29  ;;  %v2104_v17 = vpop.f32.mrf.mxu3 }
 0x266   : > { %v2330_v51 = vadd.f32 %v2329_v23, %v2241_v63  ;;  %2279 = vmatmul.bf16.gmra.mxu0 %v4277_v13  ;;  %3022 = vmatmul.msk.bf16.gmra.mxu2 %vm1122_vm3, %v4819_v31  ;;  %v2005_v0 = vpop.f32.mrf.mxu1 }
 0x267   : > { %v2095_v26 = vadd.f32 %v2094_v43, %v2005_v0 }
 0x268   : > { %v3270_v20 = vpop.eup %3269  ;;  %v2394_v58 = vadd.f32 %v4609_v62, %v2330_v51 }
 0x269   : > { %2500 = vst.msk [vmem:[%s4137_s9 + $0x98] sm:$0xff] %vm2480_vm2, %v3270_v20  ;;  %v2334_v19 = vpop.f32.mrf.mxu2 }
 0x26a   : > { %3271 = vtanh.f32 %v2394_v58 }
 0x26b   : > { %v2242_v40 = vpop.f32.mrf.mxu0 }
 0x26c   : > { %v2243_v61 = vadd.f32 %v2242_v40, %v2082_v60  ;;  %v2106_v25 = vpop.f32.mrf.mxu3 }
 0x26e   : > { %v2332_v50 = vadd.f32 %v2331_v2, %v2243_v61  ;;  %v2007_v1 = vpop.f32.mrf.mxu1 }
 0x26f   : > { %v2097_v10 = vadd.f32 %v2096_v22, %v2007_v1 }
 0x270   : > { %v3272_v13 = vpop.eup %3271  ;;  %v2395_v37 = vadd.f32 %v4609_v62, %v2332_v50 }
 0x271   : > { %2503 = vst.msk [vmem:[%s4137_s9 + $0xb0] sm:$0xff] %vm2480_vm2, %v3272_v13  ;;  %v2336_v31 = vpop.f32.mrf.mxu2 }
 0x272   : > { %3273 = vtanh.f32 %v2395_v37 }
 0x273   : > { %v2245_v57 = vpop.f32.mrf.mxu0 }
 0x274   : > { %v2246_v28 = vadd.f32 %v2245_v57, %v2085_v54  ;;  %v2109_v43 = vpop.f32.mrf.mxu3 }
 0x276   : > { %v2335_v6 = vadd.f32 %v2334_v19, %v2246_v28  ;;  %2284 = vmatmul.bf16.gmra.mxu0 %v4310_v32  ;;  %3023 = vmatmul.msk.bf16.gmra.mxu2 %vm1122_vm3, %v4820_v48  ;;  %v2010_v34 = vpop.f32.mrf.mxu1 }
 0x277   : > { %v2100_v42 = vadd.f32 %v2099_v21, %v2010_v34 }
 0x278   : > { %v3274_v38 = vpop.eup %3273  ;;  %v2396_v15 = vadd.f32 %v4609_v62, %v2335_v6 }
 0x279   : > { %2504 = vst.msk [vmem:[%s4137_s9 + $0xb8] sm:$0xff] %vm2480_vm2, %v3274_v38  ;;  %v2339_v14 = vpop.f32.mrf.mxu2 }
 0x27a   : > { %3275 = vtanh.f32 %v2396_v15 }
 0x27b   : > { %v2247_v18 = vpop.f32.mrf.mxu0 }
 0x27c   : > { %v2248_v24 = vadd.f32 %v2247_v18, %v2087_v7 }
 0x27e   : > { %v2337_v46 = vadd.f32 %v2336_v31, %v2248_v24  ;;  %v2012_v59 = vpop.f32.mrf.mxu1  ;;  %v2111_v24 = vpop.f32.mrf.mxu3 }
 0x27f   : > { %v2102_v37 = vadd.f32 %v2101_v55, %v2012_v59 }
 0x280   : > { %v3276_v56 = vpop.eup %3275  ;;  %v2397_v32 = vadd.f32 %v4609_v62, %v2337_v46 }
 0x281   : > { %2507 = vst.msk [vmem:[%s4137_s9 + $0xd0] sm:$0xff] %vm2480_vm2, %v3276_v56  ;;  %v2341_v48 = vpop.f32.mrf.mxu2 }
 0x282   : > { %3277 = vtanh.f32 %v2397_v32 }
 0x283   : > { %v2250_v16 = vpop.f32.mrf.mxu0 }
 0x284   : > { %v2251_v39 = vadd.f32 %v2250_v16, %v2090_v11 }
 0x286   : > { %v2340_v41 = vadd.f32 %v2339_v14, %v2251_v39  ;;  %2289 = vmatmul.bf16.gmra.mxu0 %v4342_v27  ;;  %v2015_v8 = vpop.f32.mrf.mxu1 }
 0x287   : > { %v2105_v15 = vadd.f32 %v2104_v17, %v2015_v8 }
 0x288   : > { %v3278_v30 = vpop.eup %3277  ;;  %v2398_v12 = vadd.f32 %v4609_v62, %v2340_v41 }
 0x289   : > { %2508 = vst.msk [vmem:[%s4137_s9 + $0xd8] sm:$0xff] %vm2480_vm2, %v3278_v30  ;;  %v2344_v53 = vpop.f32.mrf.mxu2  ;;  %v2114_v30 = vpop.f32.mrf.mxu3 }
 0x28a   : > { %3279 = vtanh.f32 %v2398_v12 }
 0x28b   : > { %v2252_v49 = vpop.f32.mrf.mxu0 }
 0x28c   : > { %v2253_v52 = vadd.f32 %v2252_v49, %v2092_v33 }
 0x28e   : > { %v2342_v35 = vadd.f32 %v2341_v48, %v2253_v52  ;;  %v2017_v60 = vpop.f32.mrf.mxu1 }
 0x28f   : > { %v2107_v32 = vadd.f32 %v2106_v25, %v2017_v60 }
 0x290   : > { %v3280_v4 = vpop.eup %3279  ;;  %v2399_v23 = vadd.f32 %v4609_v62, %v2342_v35 }
 0x291   : > { %2511 = vst.msk [vmem:[%s4137_s9 + $0xf0] sm:$0xff] %vm2480_vm2, %v3280_v4  ;;  %v2346_v27 = vpop.f32.mrf.mxu2  ;;  %v2116_v59 = vpop.f32.mrf.mxu3 }
 0x292   : > { %3281 = vtanh.f32 %v2399_v23 }
 0x293   : > { %v2255_v44 = vpop.f32.mrf.mxu0 }
 0x294   : > { %v2256_v45 = vadd.f32 %v2255_v44, %v2095_v26 }
 0x296   : > { %v2345_v36 = vadd.f32 %v2344_v53, %v2256_v45  ;;  %v2020_v57 = vpop.f32.mrf.mxu1 }
 0x297   : > { %v2110_v34 = vadd.f32 %v2109_v43, %v2020_v57 }
 0x298   : > { %v3282_v9 = vpop.eup %3281  ;;  %v2400_v5 = vadd.f32 %v4609_v62, %v2345_v36 }
 0x299   : > { %2512 = vst.msk [vmem:[%s4137_s9 + $0xf8] sm:$0xff] %vm2480_vm2, %v3282_v9  ;;  %v2349_v3 = vpop.f32.mrf.mxu2  ;;  %v2119_v17 = vpop.f32.mrf.mxu3 }
 0x29a   : > { %3283 = vtanh.f32 %v2400_v5 }
 0x29b   : > { %v2257_v2 = vpop.f32.mrf.mxu0 }
 0x29c   : > { %v2258_v29 = vadd.f32 %v2257_v2, %v2097_v10 }
 0x29e   : > { %v2347_v47 = vadd.f32 %v2346_v27, %v2258_v29  ;;  %v2022_v46 = vpop.f32.mrf.mxu1 }
 0x29f   : > { %v2112_v55 = vadd.f32 %v2111_v24, %v2022_v46 }
 0x2a0   : > { %v3284_v63 = vpop.eup %3283  ;;  %v2401_v51 = vadd.f32 %v4609_v62, %v2347_v47 }
 0x2a1   : > { %2515 = vst.msk [vmem:[%s4137_s9 + $0x110] sm:$0xff] %vm2480_vm2, %v3284_v63  ;;  %v2351_v20 = vpop.f32.mrf.mxu2 }
 0x2a2   : > { %3285 = vtanh.f32 %v2401_v51 }
 0x2a3   : > { %v2260_v58 = vpop.f32.mrf.mxu0 }
 0x2a4   : > { %v2261_v19 = vadd.f32 %v2260_v58, %v2100_v42 }
 0x2a6   : > { %v2350_v40 = vadd.f32 %v2349_v3, %v2261_v19  ;;  %v2025_v12 = vpop.f32.mrf.mxu1  ;;  %v2121_v19 = vpop.f32.mrf.mxu3 }
 0x2a7   : > { %v2115_v5 = vadd.f32 %v2114_v30, %v2025_v12 }
 0x2a8   : > { %v3286_v61 = vpop.eup %3285  ;;  %v2402_v50 = vadd.f32 %v4609_v62, %v2350_v40 }
 0x2a9   : > { %2516 = vst.msk [vmem:[%s4137_s9 + $0x118] sm:$0xff] %vm2480_vm2, %v3286_v61  ;;  %v2354_v13 = vpop.f32.mrf.mxu2 }
 0x2aa   : > { %3287 = vtanh.f32 %v2402_v50 }
 0x2ab   : > { %v2262_v31 = vpop.f32.mrf.mxu0 }
 0x2ac   : > { %v2263_v54 = vadd.f32 %v2262_v31, %v2102_v37 }
 0x2ae   : > { %v2352_v0 = vadd.f32 %v2351_v20, %v2263_v54  ;;  %v2027_v26 = vpop.f32.mrf.mxu1  ;;  %v2124_v57 = vpop.f32.mrf.mxu3 }
 0x2af   : > { %v2117_v63 = vadd.f32 %v2116_v59, %v2027_v26 }
 0x2b0   : > { %v3288_v28 = vpop.eup %3287  ;;  %v2403_v6 = vadd.f32 %v4609_v62, %v2352_v0 }
 0x2b1   : > { %2519 = vst.msk [vmem:[%s4137_s9 + $0x130] sm:$0xff] %vm2480_vm2, %v3288_v28  ;;  %v2356_v38 = vpop.f32.mrf.mxu2 }
 0x2b2   : > { %3289 = vtanh.f32 %v2403_v6 }
 0x2b3   : > { %v2265_v14 = vpop.f32.mrf.mxu0 }
 0x2b4   : > { %v2266_v7 = vadd.f32 %v2265_v14, %v2105_v15 }
 0x2b6   : > { %v2355_v18 = vadd.f32 %v2354_v13, %v2266_v7  ;;  %v2030_v2 = vpop.f32.mrf.mxu1 }
 0x2b7   : > { %v2120_v61 = vadd.f32 %v2119_v17, %v2030_v2 }
 0x2b8   : > { %v3290_v22 = vpop.eup %3289  ;;  %v2404_v1 = vadd.f32 %v4609_v62, %v2355_v18 }
 0x2b9   : > { %2520 = vst.msk [vmem:[%s4137_s9 + $0x138] sm:$0xff] %vm2480_vm2, %v3290_v22  ;;  %v2359_v56 = vpop.f32.mrf.mxu2 }
 0x2ba   : > { %3291 = vtanh.f32 %v2404_v1 }
 0x2bb   : > { %v2267_v48 = vpop.f32.mrf.mxu0 }
 0x2bc   : > { %v2268_v11 = vadd.f32 %v2267_v48, %v2107_v32 }
 0x2be   : > { %v2357_v16 = vadd.f32 %v2356_v38, %v2268_v11  ;;  %v2032_v40 = vpop.f32.mrf.mxu1 }
 0x2bf   : > { %v2122_v0 = vadd.f32 %v2121_v19, %v2032_v40 }
 0x2c0   : > { %v3292_v39 = vpop.eup %3291  ;;  %v2405_v21 = vadd.f32 %v4609_v62, %v2357_v16 }
 0x2c1   : > { %2523 = vst.msk [vmem:[%s4137_s9 + $0x150] sm:$0xff] %vm2480_vm2, %v3292_v39  ;;  %v2361_v41 = vpop.f32.mrf.mxu2 }
 0x2c2   : > { %3293 = vtanh.f32 %v2405_v21 }
 0x2c3   : > { %v2270_v53 = vpop.f32.mrf.mxu0 }
 0x2c4   : > { %v2271_v33 = vadd.f32 %v2270_v53, %v2110_v34 }
 0x2c6   : > { %v2360_v49 = vadd.f32 %v2359_v56, %v2271_v33  ;;  %v2035_v28 = vpop.f32.mrf.mxu1  ;;  %v2126_v56 = vpop.f32.mrf.mxu3 }
 0x2c7   : > { %v2125_v22 = vadd.f32 %v2124_v57, %v2035_v28 }
 0x2c8   : > { %v3294_v52 = vpop.eup %3293  ;;  %v2406_v35 = vadd.f32 %v4609_v62, %v2360_v49 }
 0x2c9   : > { %2524 = vst.msk [vmem:[%s4137_s9 + $0x158] sm:$0xff] %vm2480_vm2, %v3294_v52  ;;  %v2364_v4 = vpop.f32.mrf.mxu2 }
 0x2ca   : > { %3295 = vtanh.f32 %v2406_v35 }
 0x2cb   : > { %v2272_v23 = vpop.f32.mrf.mxu0 }
 0x2cc   : > { %v2273_v27 = vadd.f32 %v2272_v23, %v2112_v55 }
 0x2ce   : > { %v2362_v44 = vadd.f32 %v2361_v41, %v2273_v27  ;;  %v2037_v46 = vpop.f32.mrf.mxu1  ;;  %v2129_v30 = vpop.f32.mrf.mxu3 }
 0x2cf   : > { %v2127_v39 = vadd.f32 %v2126_v56, %v2037_v46 }
 0x2d0   : > { %v3296_v45 = vpop.eup %3295  ;;  %v2407_v36 = vadd.f32 %v4609_v62, %v2362_v44 }
 0x2d1   : > { %2527 = vst.msk [vmem:[%s4137_s9 + $0x170] sm:$0xff] %vm2480_vm2, %v3296_v45  ;;  %v2366_v9 = vpop.f32.mrf.mxu2 }
 0x2d2   : > { %3297 = vtanh.f32 %v2407_v36 }
 0x2d3   : > { %v2275_v3 = vpop.f32.mrf.mxu0 }
 0x2d4   : > { %v2276_v10 = vadd.f32 %v2275_v3, %v2115_v5 }
 0x2d6   : > { %v2365_v8 = vadd.f32 %v2364_v4, %v2276_v10  ;;  %v2040_v34 = vpop.f32.mrf.mxu1  ;;  %v2131_v59 = vpop.f32.mrf.mxu3 }
 0x2d7   : > { %v2130_v33 = vadd.f32 %v2129_v30, %v2040_v34 }
 0x2d8   : > { %v3298_v29 = vpop.eup %3297  ;;  %v2408_v47 = vadd.f32 %v4609_v62, %v2365_v8 }
 0x2d9   : > { %2528 = vst.msk [vmem:[%s4137_s9 + $0x178] sm:$0xff] %vm2480_vm2, %v3298_v29  ;;  %v2369_v20 = vpop.f32.mrf.mxu2 }
 0x2da   : > { %3299 = vtanh.f32 %v2408_v47 }
 0x2db   : > { %v2277_v51 = vpop.f32.mrf.mxu0 }
 0x2dc   : > { %v2278_v42 = vadd.f32 %v2277_v51, %v2117_v63 }
 0x2de   : > { %v2367_v58 = vadd.f32 %v2366_v9, %v2278_v42  ;;  %v2042_v23 = vpop.f32.mrf.mxu1 }
 0x2df   : > { %v2132_v44 = vadd.f32 %v2131_v59, %v2042_v23 }
 0x2e0   : > { %v3300_v25 = vpop.eup %3299  ;;  %v2409_v60 = vadd.f32 %v4609_v62, %v2367_v58 }
 0x2e1   : > { %2531 = vst.msk [vmem:[%s4137_s9 + $0x190] sm:$0xff] %vm2480_vm2, %v3300_v25  ;;  %v2371_v37 = vpop.f32.mrf.mxu2 }
 0x2e2   : > { %3301 = vtanh.f32 %v2409_v60 }
 0x2e3   : > { %v2280_v50 = vpop.f32.mrf.mxu0 }
 0x2e4   : > { %v2281_v13 = vadd.f32 %v2280_v50, %v2120_v61 }
 0x2e6   : > { %v2370_v31 = vadd.f32 %v2369_v20, %v2281_v13 }
 0x2e8   : > { %v3302_v54 = vpop.eup %3301  ;;  %v2410_v43 = vadd.f32 %v4609_v62, %v2370_v31 }
 0x2e9   : > { %2532 = vst.msk [vmem:[%s4137_s9 + $0x198] sm:$0xff] %vm2480_vm2, %v3302_v54  ;;  %v2374_v14 = vpop.f32.mrf.mxu2 }
 0x2ea   : > { %3303 = vtanh.f32 %v2410_v43 }
 0x2eb   : > { %v2282_v6 = vpop.f32.mrf.mxu0 }
 0x2ec   : > { %v2283_v38 = vadd.f32 %v2282_v6, %v2122_v0 }
 0x2ee   : > { %v2372_v15 = vadd.f32 %v2371_v37, %v2283_v38 }
 0x2f0   : > { %v3304_v7 = vpop.eup %3303  ;;  %v2411_v18 = vadd.f32 %v4609_v62, %v2372_v15 }
 0x2f1   : > { %2535 = vst.msk [vmem:[%s4137_s9 + $0x1b0] sm:$0xff] %vm2480_vm2, %v3304_v7  ;;  %v2376_v16 = vpop.f32.mrf.mxu2 }
 0x2f2   : > { %3305 = vtanh.f32 %v2411_v18 }
 0x2f3   : > { %v2285_v24 = vpop.f32.mrf.mxu0 }
 0x2f4   : > { %v2286_v1 = vadd.f32 %v2285_v24, %v2125_v22 }
 0x2f6   : > { %v2375_v32 = vadd.f32 %v2374_v14, %v2286_v1 }
 0x2f8   : > { %v3306_v48 = vpop.eup %3305  ;;  %v2412_v11 = vadd.f32 %v4609_v62, %v2375_v32 }
 0x2f9   : > { %2536 = vst.msk [vmem:[%s4137_s9 + $0x1b8] sm:$0xff] %vm2480_vm2, %v3306_v48  ;;  %v2379_v52 = vpop.f32.mrf.mxu2 }
 0x2fa   : > { %3307 = vtanh.f32 %v2412_v11 }
 0x2fb   : > { %v2287_v21 = vpop.f32.mrf.mxu0 }
 0x2fc   : > { %v2288_v41 = vadd.f32 %v2287_v21, %v2127_v39 }
 0x2fe   : > { %v2377_v12 = vadd.f32 %v2376_v16, %v2288_v41 }
 0x300   : > { %v3308_v53 = vpop.eup %3307  ;;  %v2413_v49 = vadd.f32 %v4609_v62, %v2377_v12 }
 0x301   : > { %2539 = vst.msk [vmem:[%s4137_s9 + $0x1d0] sm:$0xff] %vm2480_vm2, %v3308_v53  ;;  %v2381_v9 = vpop.f32.mrf.mxu2 }
 0x302   : > { %3309 = vtanh.f32 %v2413_v49 }
 0x303   : > { %v2290_v35 = vpop.f32.mrf.mxu0 }
 0x304   : > { %v2291_v4 = vadd.f32 %v2290_v35, %v2130_v33 }
 0x306   : > { %v2380_v55 = vadd.f32 %v2379_v52, %v2291_v4 }
 0x308   : > { %v3310_v27 = vpop.eup %3309  ;;  %v2414_v26 = vadd.f32 %v4609_v62, %v2380_v55 }
 0x309   : > { %2540 = vst.msk [vmem:[%s4137_s9 + $0x1d8] sm:$0xff] %vm2480_vm2, %v3310_v27 }
 0x30a   : > { %3311 = vtanh.f32 %v2414_v26 }
 0x30b   : > { %v2292_v45 = vpop.f32.mrf.mxu0 }
 0x30c   : > { %v2293_v36 = vadd.f32 %v2292_v45, %v2132_v44 }
 0x30e   : > { %v2382_v5 = vadd.f32 %v2381_v9, %v2293_v36 }
 0x310   : > { %v3312_v3 = vpop.eup %3311  ;;  %v2415_v10 = vadd.f32 %v4609_v62, %v2382_v5 }
 0x311   : > { %2543 = vst.msk [vmem:[%s4137_s9 + $0x1f0] sm:$0xff] %vm2480_vm2, %v3312_v3 }
 0x312   : > { %3313 = vtanh.f32 %v2415_v10 }
 0x318   : > { %v3314_v17 = vpop.eup %3313 }
 0x319   : > { %2544 = vst.msk [vmem:[%s4137_s9 + $0x1f8] sm:$0xff] %vm2480_vm2, %v3314_v17 }
 0x31a PF: > { %s17_s2 = sadd.s32 1, %s3340_s2   ;;  %s4823_s24 = smov %s3336_s1 }
 0x31b   : > { %p14_p5 = scmp.ge.s32.totalorder %s17_s2, 4   ;;  %s4824_s1 = smov %s4826_s25 }
 0x31d   :  { %16 = sbr.rel (!%p14_p5) target bundleno = 2 (0x2), region = 87 }

</bundles_post_ra>
